<compile_context>
chip_gen: v5e
topology: v5e:2x2
jax: 0.10.0
libtpu: 0.0.40
codegen_flags: <defaults>
</compile_context>

<pallas_src>
import functools

import jax
import jax.numpy as jnp
from jax import lax
from jax.experimental import pallas as pl
from jax.experimental.pallas import tpu as pltpu


def _cdiv(a, b):
    return -(-a // b)


def _round_up(x, m):
    return _cdiv(x, m) * m


def _tpu_budget():
    """Generation-aware (vmem_limit_bytes, max tile lanes)."""
    vmem = None
    try:
        vmem = getattr(pltpu.get_tpu_info(), "vmem_capacity_bytes", None)
    except Exception:
        vmem = None
    if vmem is None:
        vmem = 64 * 1024 * 1024
    if vmem >= 96 * 1024 * 1024:          # 128 MiB parts (v5e / v6e): bigger tiles
        return 64 * 1024 * 1024, 4096
    return 32 * 1024 * 1024, 2048         # 64 MiB parts (v7x-class)


_VMEM_LIMIT, _TM_MAX = _tpu_budget()


# ---------------------------------------------------------------------------
# Kernels
# ---------------------------------------------------------------------------
def _gemm_kernel(w_ref, a_ref, o_ref):
    o_ref[...] = jnp.dot(w_ref[...], a_ref[...],
                         preferred_element_type=jnp.float32).astype(o_ref.dtype)


def _bottleneck_kernel(w_ref, a_ref, b_ref, m_ref, r_ref, o_ref):
    # (1x1 skip half of the bottleneck) + combined bias, masked to the interior,
    # plus the folded ConvTranspose contribution as a fused residual.
    acc = jnp.dot(w_ref[...], a_ref[...], preferred_element_type=jnp.float32)
    o_ref[...] = ((acc + b_ref[...]) * m_ref[...] + r_ref[...]).astype(o_ref.dtype)


def _conv_taps(x_ref, w_ref, i, tm, taps):
    """Accumulate K*K shifted-GEMM taps for interior output tile i."""
    base = pl.multiple_of((i - 1) * tm, 128)
    win = x_ref[:, pl.ds(base, 3 * tm)].astype(jnp.bfloat16)   # tile + both halos
    acc = None
    for t, shift in enumerate(taps):                           # static unroll
        xt = win[:, tm + shift:2 * tm + shift]
        d = jnp.dot(w_ref[t], xt, preferred_element_type=jnp.float32)
        acc = d if acc is None else acc + d
    return acc


def _conv_relu_kernel(x_ref, w_ref, b_ref, m_ref, o_ref, *, taps, tm, mt):
    i = pl.program_id(0)

    @pl.when(jnp.logical_or(i == 0, i == mt - 1))     # pure-padding tiles
    def _():
        o_ref[...] = jnp.zeros_like(o_ref)

    @pl.when(jnp.logical_and(i > 0, i < mt - 1))
    def _():
        acc = _conv_taps(x_ref, w_ref, i, tm, taps)
        o_ref[...] = (jnp.maximum(acc + b_ref[...], 0.0) * m_ref[...]).astype(o_ref.dtype)


def _conv_res_kernel(x_ref, w_ref, b_ref, m_ref, r_ref, o_ref, *, taps, tm, mt):
    i = pl.program_id(0)

    @pl.when(jnp.logical_or(i == 0, i == mt - 1))
    def _():
        o_ref[...] = r_ref[...].astype(o_ref.dtype)

    @pl.when(jnp.logical_and(i > 0, i < mt - 1))
    def _():
        acc = _conv_taps(x_ref, w_ref, i, tm, taps)
        o_ref[...] = ((acc + b_ref[...]) * m_ref[...] + r_ref[...]).astype(o_ref.dtype)


def _cab_kernel(x_ref, wc_ref, bc_ref, w1_ref, b1_ref, w2_ref, b2_ref, m_ref,
                y_ref, pooled_ref, *, taps, tm, mt, n_batch, hpwp, core_off, inv_hw):
    """One fused CAB: phase 0 = conv+ReLU and pooled-sum accumulation,
    phase 1 = conv recompute + attention + (out*attn + x)."""
    ph = pl.program_id(0)
    i = pl.program_id(1)
    ch = wc_ref.shape[1]

    @pl.when(jnp.logical_and(ph == 0, i == 0))
    def _():
        pooled_ref[...] = jnp.zeros_like(pooled_ref)

    @pl.when(jnp.logical_and(i > 0, i < mt - 1))
    def _():
        base = i * tm
        acc = _conv_taps(x_ref, wc_ref, i, tm, taps)
        out = jnp.maximum(acc + bc_ref[...], 0.0) * m_ref[...]        # (C, tm)

        @pl.when(ph == 0)
        def _():
            # per-sample pooled sums via an iota-built membership indicator
            colv = lax.broadcasted_iota(jnp.int32, (tm, n_batch), 0) + base
            nv = lax.broadcasted_iota(jnp.int32, (tm, n_batch), 1)
            lo = core_off + nv * hpwp
            ind = jnp.logical_and(colv >= lo, colv < lo + hpwp).astype(jnp.bfloat16)
            pooled_ref[...] += jnp.dot(out.astype(jnp.bfloat16), ind,
                                       preferred_element_type=jnp.float32)

        @pl.when(ph == 1)
        def _():
            pooled = pooled_ref[...] * inv_hw                          # (C, N)
            a1 = jnp.dot(w1_ref[...], pooled,
                         preferred_element_type=jnp.float32) + b1_ref[...]
            a1 = jnp.where(a1 >= 0.0, a1, 0.2 * a1)                    # LeakyReLU(0.2)
            a2 = jnp.dot(w2_ref[...], a1,
                         preferred_element_type=jnp.float32) + b2_ref[...]
            attn = 1.0 / (1.0 + jnp.exp(-a2))                          # exact sigmoid
            col = lax.broadcasted_iota(jnp.int32, (1, tm), 1) + base
            scale = jnp.zeros((ch, tm), jnp.float32)
            for n in range(n_batch):                                   # small static N
                lo = core_off + n * hpwp
                sel = jnp.logical_and(col >= lo, col < lo + hpwp).astype(jnp.float32)
                scale = scale + attn[:, n:n + 1] * sel
            y_ref[...] = out * scale + x_ref[:, pl.ds(base, tm)]

    @pl.when(jnp.logical_and(jnp.logical_or(i == 0, i == mt - 1), ph == 1))
    def _():
        y_ref[...] = jnp.zeros_like(y_ref)


# ---------------------------------------------------------------------------
# pallas_call wrappers
# ---------------------------------------------------------------------------
def _up_gemm(w_bf, a_bf):
    """out = w @ a (bf16 in / bf16 out), >=2 'parallel' tiles when possible."""
    r, k = w_bf.shape
    m = a_bf.shape[1]
    m128 = _round_up(m, 128)
    tm = min(_TM_MAX, max(128, _round_up(_cdiv(m128, 2), 128)))
    mp = _round_up(m128, tm)
    if mp != m:
        a_bf = jnp.pad(a_bf, ((0, 0), (0, mp - m)))
    out = pl.pallas_call(
        _gemm_kernel,
        out_shape=jax.ShapeDtypeStruct((r, mp), jnp.bfloat16),
        grid=(mp // tm,),
        in_specs=[pl.BlockSpec((r, k), lambda i: (0, 0)),
                  pl.BlockSpec((k, tm), lambda i: (0, i))],
        out_specs=pl.BlockSpec((r, tm), lambda i: (0, i)),
        compiler_params=pltpu.CompilerParams(
            dimension_semantics=("parallel",), vmem_limit_bytes=_VMEM_LIMIT),
    )(w_bf, a_bf)
    return out[:, :m] if mp != m else out


def _bottleneck(w_bf, skip_flat, bias, mask, r_flat, tm, mt):
    cout, cs = w_bf.shape
    mtot = skip_flat.shape[1]
    return pl.pallas_call(
        _bottleneck_kernel,
        out_shape=jax.ShapeDtypeStruct((cout, mtot), jnp.bfloat16),
        grid=(mt,),
        in_specs=[pl.BlockSpec((cout, cs), lambda i: (0, 0)),
                  pl.BlockSpec((cs, tm), lambda i: (0, i)),
                  pl.BlockSpec((cout, 1), lambda i: (0, 0)),
                  pl.BlockSpec((1, tm), lambda i: (0, i)),
                  pl.BlockSpec((cout, tm), lambda i: (0, i))],
        out_specs=pl.BlockSpec((cout, tm), lambda i: (0, i)),
        compiler_params=pltpu.CompilerParams(
            dimension_semantics=("parallel",), vmem_limit_bytes=_VMEM_LIMIT),
    )(w_bf, skip_flat, bias, mask, r_flat)


def _conv_stage(x_flat, w, b, mask, taps, tm, mt, *, relu, residual=None,
                out_dtype=jnp.float32):
    """stride-1 'same' conv on the padded lane layout; input stays VMEM-resident."""
    # TODO(synk): for very large N*H*W stream the input with halo blocks
    # (emit_pipeline) instead of keeping it fully resident in VMEM.
    cin, mtot = x_flat.shape
    cout = w.shape[0]
    kk = w.shape[2] * w.shape[3]
    w_kk = w.transpose(2, 3, 0, 1).reshape(kk, cout, cin).astype(jnp.bfloat16)
    b2 = b.reshape(cout, 1).astype(jnp.float32)
    in_specs = [pl.BlockSpec((cin, mtot), lambda i: (0, 0)),
                pl.BlockSpec((kk, cout, cin), lambda i: (0, 0, 0)),
                pl.BlockSpec((cout, 1), lambda i: (0, 0)),
                pl.BlockSpec((1, tm), lambda i: (0, i))]
    args = [x_flat, w_kk, b2, mask]
    if residual is None:
        assert relu
        kern = functools.partial(_conv_relu_kernel, taps=tuple(taps), tm=tm, mt=mt)
    else:
        assert not relu
        kern = functools.partial(_conv_res_kernel, taps=tuple(taps), tm=tm, mt=mt)
        in_specs.append(pl.BlockSpec((cout, tm), lambda i: (0, i)))
        args.append(residual)
    return pl.pallas_call(
        kern,
        out_shape=jax.ShapeDtypeStruct((cout, mtot), out_dtype),
        grid=(mt,),
        in_specs=in_specs,
        out_specs=pl.BlockSpec((cout, tm), lambda i: (0, i)),
        compiler_params=pltpu.CompilerParams(
            dimension_semantics=("parallel",), vmem_limit_bytes=_VMEM_LIMIT),
    )(*args)


def _cab_stage(x_flat, cp, mask, taps, tm, mt, n_batch, hpwp, inv_hw):
    ch, mtot = x_flat.shape
    kk = len(taps)
    cmid = cp["att1_w"].shape[0]
    w_kk = cp["conv_w"].transpose(2, 3, 0, 1).reshape(kk, ch, ch).astype(jnp.bfloat16)
    kern = functools.partial(_cab_kernel, taps=tuple(taps), tm=tm, mt=mt,
                             n_batch=n_batch, hpwp=hpwp, core_off=tm, inv_hw=inv_hw)

    def _full(shape):
        return pl.BlockSpec(shape, lambda ph, i: (0,) * len(shape))

    return pl.pallas_call(
        kern,
        out_shape=jax.ShapeDtypeStruct((ch, mtot), jnp.float32),
        grid=(2, mt),                                   # (phase, m-tile)
        in_specs=[pl.BlockSpec((ch, mtot), lambda ph, i: (0, 0)),
                  _full((kk, ch, ch)),
                  _full((ch, 1)),
                  _full((cmid, ch)),
                  _full((cmid, 1)),
                  _full((ch, cmid)),
                  _full((ch, 1)),
                  pl.BlockSpec((1, tm), lambda ph, i: (0, i))],
        # phase 0 parks the (never-written) output block at index 0 so no
        # garbage write-back happens; phase 1 writes every tile exactly once.
        out_specs=pl.BlockSpec((ch, tm), lambda ph, i: (0, ph * i)),
        scratch_shapes=[pltpu.VMEM((ch, n_batch), jnp.float32)],
        compiler_params=pltpu.CompilerParams(
            dimension_semantics=("arbitrary", "arbitrary"),
            vmem_limit_bytes=_VMEM_LIMIT),
    )(x_flat, w_kk, cp["conv_b"].reshape(ch, 1).astype(jnp.float32),
      cp["att1_w"].reshape(cmid, ch).astype(jnp.float32),
      cp["att1_b"].reshape(cmid, 1).astype(jnp.float32),
      cp["att2_w"].reshape(ch, cmid).astype(jnp.float32),
      cp["att2_b"].reshape(ch, 1).astype(jnp.float32),
      mask)


# ---------------------------------------------------------------------------
# Layout helpers (XLA glue)
# ---------------------------------------------------------------------------
def _to_padded_flat(img, p, tm, mtot):
    """(C, N, H, W) -> zero-bordered samples flattened into the (C, Mtot) layout."""
    c = img.shape[0]
    core = jnp.pad(img, ((0, 0), (0, 0), (p, p), (p, p))).reshape(c, -1)
    return jnp.pad(core, ((0, 0), (tm, mtot - tm - core.shape[1])))


def _interior_mask(n, h, w, p, tm, mtot):
    m2d = jnp.zeros((h + 2 * p, w + 2 * p), jnp.float32).at[p:p + h, p:p + w].set(1.0)
    flat = jnp.tile(m2d.reshape(-1), (n,))
    flat = jnp.pad(flat, (tm, mtot - tm - flat.shape[0]))
    return flat.reshape(1, mtot)


# ---------------------------------------------------------------------------
# _upsample_.forward
# ---------------------------------------------------------------------------
def upsample_forward(params, x, skip, dilation=1):
    n, cin, h, w = x.shape
    cs = skip.shape[1]
    cout = params["up_w"].shape[1]
    k = params["cb_w"].shape[-1]
    h2, w2 = 2 * h, 2 * w
    p = dilation * (k - 1) // 2
    hp, wp = h2 + 2 * p, w2 + 2 * p
    hpwp = hp * wp
    mcore = n * hpwp

    tm = min(_TM_MAX, max(256, _round_up(_cdiv(mcore, 2), 128)))
    mt = 2 + _cdiv(mcore, tm)
    mtot = tm * mt
    taps = [(kh * dilation - p) * wp + (kw * dilation - p)
            for kh in range(k) for kw in range(k)]
    assert max(abs(t) for t in taps) <= tm, "tile too small for the conv halo"

    # ---- stage 1: ConvTranspose2d(2,2,s2) folded into the 'up' half of the ----
    # ---- 1x1 bottleneck -> one GEMM at HxW (no `up` tensor, no concat)     ----
    x_cm = x.transpose(1, 0, 2, 3).reshape(cin, n * h * w).astype(jnp.bfloat16)
    up_w, up_b = params["up_w"], params["up_b"]           # (Cin, Cout, 2, 2), (Cout,)
    cup = up_w.shape[1]
    wbn = params["bn_w"].reshape(cout, cup + cs)
    wbn_up, wbn_skip = wbn[:, :cup], wbn[:, cup:]
    w_comb = jnp.einsum("ou,cuab->oabc", wbn_up, up_w).reshape(cout * 4, cin)
    bias_comb = (wbn_up @ up_b + params["bn_b"]).reshape(cout, 1)

    up4 = _up_gemm(w_comb.astype(jnp.bfloat16), x_cm)     # (4*Cout, N*H*W) bf16

    # de-interleave the 4 sub-pixel phases + embed in the padded lane layout.
    # TODO(synk): emit this as strided in-kernel writes from the up GEMM instead
    # of an XLA transpose+pad pass.
    r_img = (up4.reshape(cout, 2, 2, n, h, w)
             .transpose(0, 3, 4, 1, 5, 2).reshape(cout, n, h2, w2))
    r_flat = _to_padded_flat(r_img, p, tm, mtot)                        # bf16
    skip_flat = _to_padded_flat(skip.astype(jnp.bfloat16).transpose(1, 0, 2, 3),
                                p, tm, mtot)
    mask = _interior_mask(n, h2, w2, p, tm, mtot)

    # ---- stage 2: bottleneck skip half + fused up residual + bias (bf16) ----
    bn = _bottleneck(wbn_skip.astype(jnp.bfloat16), skip_flat, bias_comb,
                     mask, r_flat, tm, mt)

    # ---- stage 3: conv block (3x3 + ReLU); f32 (residual-carrying) ----
    cb = _conv_stage(bn, params["cb_w"], params["cb_b"], mask, taps, tm, mt,
                     relu=True)

    # ---- stage 4: residual group = 3 fused CABs + final conv + group skip ----
    rg = params["rg"]
    out = cb
    for name in ("cab1", "cab2", "cab3"):
        out = _cab_stage(out, rg[name], mask, taps, tm, mt, n, hpwp,
                         1.0 / (h2 * w2))
    out = _conv_stage(out, rg["conv_w"], rg["conv_b"], mask, taps, tm, mt,
                      relu=False, residual=cb)

    # ---- extract interior, back to NCHW ----
    out = out[:, tm:tm + mcore].reshape(cout, n, hp, wp)[:, :, p:p + h2, p:p + w2]
    return out.transpose(1, 0, 2, 3)


# ---------------------------------------------------------------------------
# Deterministic parameter init (xavier-uniform-like weights, small biases)
# ---------------------------------------------------------------------------
def _xavier(key, shape, fan_in, fan_out):
    bound = (6.0 / (fan_in + fan_out)) ** 0.5
    return jax.random.uniform(key, shape, jnp.float32, -bound, bound)


def make_params(key, in_channels, out_channels, kernel_size):
    cin, cout, k = in_channels, out_channels, kernel_size
    cmid = cout // 4 if cout >= 4 else 1
    keys = iter(jax.random.split(key, 64))

    def conv_w(co, ci, kk):
        return _xavier(next(keys), (co, ci, kk, kk), ci * kk * kk, co * kk * kk)

    def bias(c):
        return jax.random.uniform(next(keys), (c,), jnp.float32, -0.05, 0.05)

    def cab_params():
        return dict(conv_w=conv_w(cout, cout, k), conv_b=bias(cout),
                    att1_w=conv_w(cmid, cout, 1), att1_b=bias(cmid),
                    att2_w=conv_w(cout, cmid, 1), att2_b=bias(cout))

    return dict(
        up_w=_xavier(next(keys), (cin, cout, 2, 2), cin * 4, cout * 4),
        up_b=bias(cout),
        bn_w=conv_w(cout, cin, 1), bn_b=bias(cout),
        cb_w=conv_w(cout, cout, k), cb_b=bias(cout),
        rg=dict(cab1=cab_params(), cab2=cab_params(), cab3=cab_params(),
                conv_w=conv_w(cout, cout, k), conv_b=bias(cout)),
    )


# ---------------------------------------------------------------------------
if __name__ == "__main__":
    # _upsample_(in_channels=8, out_channels=4, kernel_size=3, stride=1,
    #            dilation=1, bias=True); skip has in_channels - out_channels chans.
    in_channels, out_channels, kernel_size = 8, 4, 3
    N, H, W = 2, 16, 16

    key = jax.random.PRNGKey(0)
    kx, kskip, kp = jax.random.split(key, 3)
    x = jax.random.normal(kx, (N, in_channels, H, W), jnp.float32)
    skip = jax.random.normal(kskip, (N, in_channels - out_channels, 2 * H, 2 * W),
                             jnp.float32)
    params = make_params(kp, in_channels, out_channels, kernel_size)

    fwd = jax.jit(upsample_forward)
    out = jax.block_until_ready(fwd(params, x, skip))
    assert out.shape == (N, out_channels, 2 * H, 2 * W), out.shape
    assert out.dtype == jnp.float32
    assert bool(jnp.all(jnp.isfinite(out)))
    print("KERNEL_OK")
</pallas_src>

<mosaic_0001>
module attributes {stable_mosaic.version = 11 : i64} {
  func.func @_gemm_kernel(%arg0: i32, %arg1: memref<16x8xbf16, #tpu.memory_space<vmem>>, %arg2: memref<8x256xbf16, #tpu.memory_space<vmem>>, %arg3: memref<16x256xbf16, #tpu.memory_space<vmem>>) attributes {dimension_semantics = [#tpu.dimension_semantics<parallel>], iteration_bounds = array<i64: 2>, scalar_prefetch = 0 : i64, scratch_operands = 0 : i64, tpu.core_type = #tpu.core_type<tc>, window_params = [{pipeline_mode = #tpu.pipeline_mode<synchronous>, transform_indices = @transform_0, window_bounds = array<i64: 16, 8>}, {transform_indices = @transform_1, window_bounds = array<i64: 8, 256>}, {transform_indices = @transform_2, window_bounds = array<i64: 16, 256>}]} {
    %c0 = arith.constant 0 : index
    %c0_0 = arith.constant 0 : index
    %0 = vector.load %arg1[%c0, %c0_0] : memref<16x8xbf16, #tpu.memory_space<vmem>>, vector<16x8xbf16>
    %c0_1 = arith.constant 0 : index
    %c0_2 = arith.constant 0 : index
    %1 = vector.load %arg2[%c0_1, %c0_2] : memref<8x256xbf16, #tpu.memory_space<vmem>>, vector<8x256xbf16>
    %cst = arith.constant dense<0.000000e+00> : vector<16x256xf32>
    %2 = tpu.matmul %0, %1, %cst {dimension_numbers = #tpu.dot_dimension_numbers<[1], [0], [0], [1], [0, 0, 1, 1], [], []>} : vector<16x8xbf16>, vector<8x256xbf16>, vector<16x256xf32> -> vector<16x256xf32>
    %3 = arith.truncf %2 : vector<16x256xf32> to vector<16x256xbf16>
    %c0_3 = arith.constant 0 : index
    %c0_4 = arith.constant 0 : index
    %4 = vector.load %arg3[%c0_3, %c0_4] : memref<16x256xbf16, #tpu.memory_space<vmem>>, vector<16x256xbf16>
    tpu.vector_store %arg3[%c0_3, %c0_4], %3 {strides = array<i32>} : memref<16x256xbf16, #tpu.memory_space<vmem>>, vector<16x256xbf16>,
    return
  }
  func.func @transform_0(%arg0: i32) -> (i32, i32) {
    %c0_i32 = arith.constant 0 : i32
    %c0_i32_0 = arith.constant 0 : i32
    %c0_i32_1 = arith.constant 0 : i32
    return %c0_i32, %c0_i32_0 : i32, i32
  }
  func.func @transform_1(%arg0: i32) -> (i32, i32) {
    %c0_i32 = arith.constant 0 : i32
    %c0_i32_0 = arith.constant 0 : i32
    return %c0_i32, %arg0 : i32, i32
  }
  func.func @transform_2(%arg0: i32) -> (i32, i32) {
    %c0_i32 = arith.constant 0 : i32
    %c0_i32_0 = arith.constant 0 : i32
    return %c0_i32, %arg0 : i32, i32
  }
}

module attributes {stable_mosaic.version = 11 : i64} {
  func.func @_conv_relu_kernel(%arg0: i32, %arg1: memref<4x5120xbf16, #tpu.memory_space<vmem>>, %arg2: memref<9x4x4xbf16, #tpu.memory_space<vmem>>, %arg3: memref<4x1xf32, #tpu.memory_space<vmem>>, %arg4: memref<1x1280xf32, #tpu.memory_space<vmem>>, %arg5: memref<4x1280xf32, #tpu.memory_space<vmem>>) attributes {dimension_semantics = [#tpu.dimension_semantics<parallel>], iteration_bounds = array<i64: 4>, scalar_prefetch = 0 : i64, scratch_operands = 0 : i64, tpu.core_type = #tpu.core_type<tc>, window_params = [{pipeline_mode = #tpu.pipeline_mode<synchronous>, transform_indices = @transform_0, window_bounds = array<i64: 4, 5120>}, {pipeline_mode = #tpu.pipeline_mode<synchronous>, transform_indices = @transform_1, window_bounds = array<i64: 9, 4, 4>}, {pipeline_mode = #tpu.pipeline_mode<synchronous>, transform_indices = @transform_2, window_bounds = array<i64: 4, 1>}, {transform_indices = @transform_3, window_bounds = array<i64: 1, 1280>}, {transform_indices = @transform_4, window_bounds = array<i64: 4, 1280>}]} {
    %c0_i32 = arith.constant 0 : i32
    %0 = arith.cmpi eq, %arg0, %c0_i32 : i32
    %c3_i32 = arith.constant 3 : i32
    %1 = arith.cmpi eq, %arg0, %c3_i32 : i32
    %2 = arith.ori %0, %1 : i1
    %3 = arith.extui %2 : i1 to i32
    %c0_i32_0 = arith.constant 0 : i32
    %4 = arith.cmpi ne, %3, %c0_i32_0 : i32
    scf.if %4 {
      %cst = arith.constant 0.000000e+00 : f32
      %10 = vector.broadcast %cst : f32 to vector<4x1280xf32>
      %c0 = arith.constant 0 : index
      %c0_4 = arith.constant 0 : index
      %11 = vector.load %arg5[%c0, %c0_4] : memref<4x1280xf32, #tpu.memory_space<vmem>>, vector<4x1280xf32>
      tpu.vector_store %arg5[%c0, %c0_4], %10 {strides = array<i32>} : memref<4x1280xf32, #tpu.memory_space<vmem>>, vector<4x1280xf32>,
    } else {
    }
    %c0_i32_1 = arith.constant 0 : i32
    %5 = arith.cmpi sgt, %arg0, %c0_i32_1 : i32
    %c3_i32_2 = arith.constant 3 : i32
    %6 = arith.cmpi slt, %arg0, %c3_i32_2 : i32
    %7 = arith.andi %5, %6 : i1
    %8 = arith.extui %7 : i1 to i32
    %c0_i32_3 = arith.constant 0 : i32
    %9 = arith.cmpi ne, %8, %c0_i32_3 : i32
    scf.if %9 {
      %c1_i32 = arith.constant 1 : i32
      %10 = arith.subi %arg0, %c1_i32 : i32
      %c1280_i32 = arith.constant 1280 : i32
      %11 = arith.muli %10, %c1280_i32 : i32
      %12 = tpu.assume_multiple %11, 128 : i32
      %c0 = arith.constant 0 : index
      %13 = arith.index_cast %12 : i32 to index
      %14 = vector.load %arg1[%c0, %13] : memref<4x5120xbf16, #tpu.memory_space<vmem>>, vector<4x3840xbf16>
      %15 = vector.extract_strided_slice %14 {offsets = [0, 1245], sizes = [4, 1280], strides = [1, 1]} : vector<4x3840xbf16> to vector<4x1280xbf16>
      %c0_4 = arith.constant 0 : index
      %c0_5 = arith.constant 0 : index
      %c0_6 = arith.constant 0 : index
      %16 = vector.load %arg2[%c0_4, %c0_5, %c0_6] : memref<9x4x4xbf16, #tpu.memory_space<vmem>>, vector<1x4x4xbf16>
      %17 = vector.shape_cast %16 : vector<1x4x4xbf16> to vector<4x4xbf16>
      %cst = arith.constant dense<0.000000e+00> : vector<4x1280xf32>
      %18 = tpu.matmul %17, %15, %cst {dimension_numbers = #tpu.dot_dimension_numbers<[1], [0], [0], [1], [0, 0, 1, 1], [], []>} : vector<4x4xbf16>, vector<4x1280xbf16>, vector<4x1280xf32> -> vector<4x1280xf32>
      %19 = vector.extract_strided_slice %14 {offsets = [0, 1246], sizes = [4, 1280], strides = [1, 1]} : vector<4x3840xbf16> to vector<4x1280xbf16>
      %c1 = arith.constant 1 : index
      %c0_7 = arith.constant 0 : index
      %c0_8 = arith.constant 0 : index
      %20 = vector.load %arg2[%c1, %c0_7, %c0_8] : memref<9x4x4xbf16, #tpu.memory_space<vmem>>, vector<1x4x4xbf16>
      %21 = vector.shape_cast %20 : vector<1x4x4xbf16> to vector<4x4xbf16>
      %cst_9 = arith.constant dense<0.000000e+00> : vector<4x1280xf32>
      %22 = tpu.matmul %21, %19, %cst_9 {dimension_numbers = #tpu.dot_dimension_numbers<[1], [0], [0], [1], [0, 0, 1, 1], [], []>} : vector<4x4xbf16>, vector<4x1280xbf16>, vector<4x1280xf32> -> vector<4x1280xf32>
      %23 = arith.addf %18, %22 : vector<4x1280xf32>
      %24 = vector.extract_strided_slice %14 {offsets = [0, 1247], sizes = [4, 1280], strides = [1, 1]} : vector<4x3840xbf16> to vector<4x1280xbf16>
      %c2 = arith.constant 2 : index
      %c0_10 = arith.constant 0 : index
      %c0_11 = arith.constant 0 : index
      %25 = vector.load %arg2[%c2, %c0_10, %c0_11] : memref<9x4x4xbf16, #tpu.memory_space<vmem>>, vector<1x4x4xbf16>
      %26 = vector.shape_cast %25 : vector<1x4x4xbf16> to vector<4x4xbf16>
      %cst_12 = arith.constant dense<0.000000e+00> : vector<4x1280xf32>
      %27 = tpu.matmul %26, %24, %cst_12 {dimension_numbers = #tpu.dot_dimension_numbers<[1], [0], [0], [1], [0, 0, 1, 1], [], []>} : vector<4x4xbf16>, vector<4x1280xbf16>, vector<4x1280xf32> -> vector<4x1280xf32>
      %28 = arith.addf %23, %27 : vector<4x1280xf32>
      %29 = vector.extract_strided_slice %14 {offsets = [0, 1279], sizes = [4, 1280], strides = [1, 1]} : vector<4x3840xbf16> to vector<4x1280xbf16>
      %c3 = arith.constant 3 : index
      %c0_13 = arith.constant 0 : index
      %c0_14 = arith.constant 0 : index
      %30 = vector.load %arg2[%c3, %c0_13, %c0_14] : memref<9x4x4xbf16, #tpu.memory_space<vmem>>, vector<1x4x4xbf16>
      %31 = vector.shape_cast %30 : vector<1x4x4xbf16> to vector<4x4xbf16>
      %cst_15 = arith.constant dense<0.000000e+00> : vector<4x1280xf32>
      %32 = tpu.matmul %31, %29, %cst_15 {dimension_numbers = #tpu.dot_dimension_numbers<[1], [0], [0], [1], [0, 0, 1, 1], [], []>} : vector<4x4xbf16>, vector<4x1280xbf16>, vector<4x1280xf32> -> vector<4x1280xf32>
      %33 = arith.addf %28, %32 : vector<4x1280xf32>
      %34 = vector.extract_strided_slice %14 {offsets = [0, 1280], sizes = [4, 1280], strides = [1, 1]} : vector<4x3840xbf16> to vector<4x1280xbf16>
      %c4 = arith.constant 4 : index
      %c0_16 = arith.constant 0 : index
      %c0_17 = arith.constant 0 : index
      %35 = vector.load %arg2[%c4, %c0_16, %c0_17] : memref<9x4x4xbf16, #tpu.memory_space<vmem>>, vector<1x4x4xbf16>
      %36 = vector.shape_cast %35 : vector<1x4x4xbf16> to vector<4x4xbf16>
      %cst_18 = arith.constant dense<0.000000e+00> : vector<4x1280xf32>
      %37 = tpu.matmul %36, %34, %cst_18 {dimension_numbers = #tpu.dot_dimension_numbers<[1], [0], [0], [1], [0, 0, 1, 1], [], []>} : vector<4x4xbf16>, vector<4x1280xbf16>, vector<4x1280xf32> -> vector<4x1280xf32>
      %38 = arith.addf %33, %37 : vector<4x1280xf32>
      %39 = vector.extract_strided_slice %14 {offsets = [0, 1281], sizes = [4, 1280], strides = [1, 1]} : vector<4x3840xbf16> to vector<4x1280xbf16>
      %c5 = arith.constant 5 : index
      %c0_19 = arith.constant 0 : index
      %c0_20 = arith.constant 0 : index
      %40 = vector.load %arg2[%c5, %c0_19, %c0_20] : memref<9x4x4xbf16, #tpu.memory_space<vmem>>, vector<1x4x4xbf16>
      %41 = vector.shape_cast %40 : vector<1x4x4xbf16> to vector<4x4xbf16>
      %cst_21 = arith.constant dense<0.000000e+00> : vector<4x1280xf32>
      %42 = tpu.matmul %41, %39, %cst_21 {dimension_numbers = #tpu.dot_dimension_numbers<[1], [0], [0], [1], [0, 0, 1, 1], [], []>} : vector<4x4xbf16>, vector<4x1280xbf16>, vector<4x1280xf32> -> vector<4x1280xf32>
      %43 = arith.addf %38, %42 : vector<4x1280xf32>
      %44 = vector.extract_strided_slice %14 {offsets = [0, 1313], sizes = [4, 1280], strides = [1, 1]} : vector<4x3840xbf16> to vector<4x1280xbf16>
      %c6 = arith.constant 6 : index
      %c0_22 = arith.constant 0 : index
      %c0_23 = arith.constant 0 : index
      %45 = vector.load %arg2[%c6, %c0_22, %c0_23] : memref<9x4x4xbf16, #tpu.memory_space<vmem>>, vector<1x4x4xbf16>
      %46 = vector.shape_cast %45 : vector<1x4x4xbf16> to vector<4x4xbf16>
      %cst_24 = arith.constant dense<0.000000e+00> : vector<4x1280xf32>
      %47 = tpu.matmul %46, %44, %cst_24 {dimension_numbers = #tpu.dot_dimension_numbers<[1], [0], [0], [1], [0, 0, 1, 1], [], []>} : vector<4x4xbf16>, vector<4x1280xbf16>, vector<4x1280xf32> -> vector<4x1280xf32>
      %48 = arith.addf %43, %47 : vector<4x1280xf32>
      %49 = vector.extract_strided_slice %14 {offsets = [0, 1314], sizes = [4, 1280], strides = [1, 1]} : vector<4x3840xbf16> to vector<4x1280xbf16>
      %c7 = arith.constant 7 : index
      %c0_25 = arith.constant 0 : index
      %c0_26 = arith.constant 0 : index
      %50 = vector.load %arg2[%c7, %c0_25, %c0_26] : memref<9x4x4xbf16, #tpu.memory_space<vmem>>, vector<1x4x4xbf16>
      %51 = vector.shape_cast %50 : vector<1x4x4xbf16> to vector<4x4xbf16>
      %cst_27 = arith.constant dense<0.000000e+00> : vector<4x1280xf32>
      %52 = tpu.matmul %51, %49, %cst_27 {dimension_numbers = #tpu.dot_dimension_numbers<[1], [0], [0], [1], [0, 0, 1, 1], [], []>} : vector<4x4xbf16>, vector<4x1280xbf16>, vector<4x1280xf32> -> vector<4x1280xf32>
      %53 = arith.addf %48, %52 : vector<4x1280xf32>
      %54 = vector.extract_strided_slice %14 {offsets = [0, 1315], sizes = [4, 1280], strides = [1, 1]} : vector<4x3840xbf16> to vector<4x1280xbf16>
      %c8 = arith.constant 8 : index
      %c0_28 = arith.constant 0 : index
      %c0_29 = arith.constant 0 : index
      %55 = vector.load %arg2[%c8, %c0_28, %c0_29] : memref<9x4x4xbf16, #tpu.memory_space<vmem>>, vector<1x4x4xbf16>
      %56 = vector.shape_cast %55 : vector<1x4x4xbf16> to vector<4x4xbf16>
      %cst_30 = arith.constant dense<0.000000e+00> : vector<4x1280xf32>
      %57 = tpu.matmul %56, %54, %cst_30 {dimension_numbers = #tpu.dot_dimension_numbers<[1], [0], [0], [1], [0, 0, 1, 1], [], []>} : vector<4x4xbf16>, vector<4x1280xbf16>, vector<4x1280xf32> -> vector<4x1280xf32>
      %58 = arith.addf %53, %57 : vector<4x1280xf32>
      %c0_31 = arith.constant 0 : index
      %c0_32 = arith.constant 0 : index
      %59 = vector.load %arg3[%c0_31, %c0_32] : memref<4x1xf32, #tpu.memory_space<vmem>>, vector<4x1xf32>
      %60 = vector.broadcast %59 : vector<4x1xf32> to vector<4x1280xf32>
      %61 = arith.addf %58, %60 : vector<4x1280xf32>
      %cst_33 = arith.constant 0.000000e+00 : f32
      %62 = vector.broadcast %cst_33 : f32 to vector<4x1280xf32>
      %63 = arith.maximumf %61, %62 : vector<4x1280xf32>
      %c0_34 = arith.constant 0 : index
      %c0_35 = arith.constant 0 : index
      %64 = vector.load %arg4[%c0_34, %c0_35] : memref<1x1280xf32, #tpu.memory_space<vmem>>, vector<1x1280xf32>
      %65 = vector.broadcast %64 : vector<1x1280xf32> to vector<4x1280xf32>
      %66 = arith.mulf %63, %65 : vector<4x1280xf32>
      %c0_36 = arith.constant 0 : index
      %c0_37 = arith.constant 0 : index
      %67 = vector.load %arg5[%c0_36, %c0_37] : memref<4x1280xf32, #tpu.memory_space<vmem>>, vector<4x1280xf32>
      tpu.vector_store %arg5[%c0_36, %c0_37], %66 {strides = array<i32>} : memref<4x1280xf32, #tpu.memory_space<vmem>>, vector<4x1280xf32>,
    } else {
    }
    return
  }
  func.func @transform_0(%arg0: i32) -> (i32, i32) {
    %c0_i32 = arith.constant 0 : i32
    %c0_i32_0 = arith.constant 0 : i32
    %c0_i32_1 = arith.constant 0 : i32
    return %c0_i32, %c0_i32_0 : i32, i32
  }
  func.func @transform_1(%arg0: i32) -> (i32, i32, i32) {
    %c0_i32 = arith.constant 0 : i32
    %c0_i32_0 = arith.constant 0 : i32
    %c0_i32_1 = arith.constant 0 : i32
    %c0_i32_2 = arith.constant 0 : i32
    return %c0_i32, %c0_i32_0, %c0_i32_1 : i32, i32, i32
  }
  func.func @transform_2(%arg0: i32) -> (i32, i32) {
    %c0_i32 = arith.constant 0 : i32
    %c0_i32_0 = arith.constant 0 : i32
    %c0_i32_1 = arith.constant 0 : i32
    return %c0_i32, %c0_i32_0 : i32, i32
  }
  func.func @transform_3(%arg0: i32) -> (i32, i32) {
    %c0_i32 = arith.constant 0 : i32
    %c0_i32_0 = arith.constant 0 : i32
    return %c0_i32, %arg0 : i32, i32
  }
  func.func @transform_4(%arg0: i32) -> (i32, i32) {
    %c0_i32 = arith.constant 0 : i32
    %c0_i32_0 = arith.constant 0 : i32
    return %c0_i32, %arg0 : i32, i32
  }
}

module attributes {stable_mosaic.version = 11 : i64} {
  func.func @_bottleneck_kernel(%arg0: i32, %arg1: memref<4x4xbf16, #tpu.memory_space<vmem>>, %arg2: memref<4x1280xbf16, #tpu.memory_space<vmem>>, %arg3: memref<4x1xf32, #tpu.memory_space<vmem>>, %arg4: memref<1x1280xf32, #tpu.memory_space<vmem>>, %arg5: memref<4x1280xbf16, #tpu.memory_space<vmem>>, %arg6: memref<4x1280xbf16, #tpu.memory_space<vmem>>) attributes {dimension_semantics = [#tpu.dimension_semantics<parallel>], iteration_bounds = array<i64: 4>, scalar_prefetch = 0 : i64, scratch_operands = 0 : i64, tpu.core_type = #tpu.core_type<tc>, window_params = [{pipeline_mode = #tpu.pipeline_mode<synchronous>, transform_indices = @transform_0, window_bounds = array<i64: 4, 4>}, {transform_indices = @transform_1, window_bounds = array<i64: 4, 1280>}, {pipeline_mode = #tpu.pipeline_mode<synchronous>, transform_indices = @transform_2, window_bounds = array<i64: 4, 1>}, {transform_indices = @transform_3, window_bounds = array<i64: 1, 1280>}, {transform_indices = @transform_4, window_bounds = array<i64: 4, 1280>}, {transform_indices = @transform_5, window_bounds = array<i64: 4, 1280>}]} {
    %c0 = arith.constant 0 : index
    %c0_0 = arith.constant 0 : index
    %0 = vector.load %arg1[%c0, %c0_0] : memref<4x4xbf16, #tpu.memory_space<vmem>>, vector<4x4xbf16>
    %c0_1 = arith.constant 0 : index
    %c0_2 = arith.constant 0 : index
    %1 = vector.load %arg2[%c0_1, %c0_2] : memref<4x1280xbf16, #tpu.memory_space<vmem>>, vector<4x1280xbf16>
    %cst = arith.constant dense<0.000000e+00> : vector<4x1280xf32>
    %2 = tpu.matmul %0, %1, %cst {dimension_numbers = #tpu.dot_dimension_numbers<[1], [0], [0], [1], [0, 0, 1, 1], [], []>} : vector<4x4xbf16>, vector<4x1280xbf16>, vector<4x1280xf32> -> vector<4x1280xf32>
    %c0_3 = arith.constant 0 : index
    %c0_4 = arith.constant 0 : index
    %3 = vector.load %arg3[%c0_3, %c0_4] : memref<4x1xf32, #tpu.memory_space<vmem>>, vector<4x1xf32>
    %4 = vector.broadcast %3 : vector<4x1xf32> to vector<4x1280xf32>
    %5 = arith.addf %2, %4 : vector<4x1280xf32>
    %c0_5 = arith.constant 0 : index
    %c0_6 = arith.constant 0 : index
    %6 = vector.load %arg4[%c0_5, %c0_6] : memref<1x1280xf32, #tpu.memory_space<vmem>>, vector<1x1280xf32>
    %7 = vector.broadcast %6 : vector<1x1280xf32> to vector<4x1280xf32>
    %8 = arith.mulf %5, %7 : vector<4x1280xf32>
    %c0_7 = arith.constant 0 : index
    %c0_8 = arith.constant 0 : index
    %9 = vector.load %arg5[%c0_7, %c0_8] : memref<4x1280xbf16, #tpu.memory_space<vmem>>, vector<4x1280xbf16>
    %10 = arith.extf %9 : vector<4x1280xbf16> to vector<4x1280xf32>
    %11 = arith.addf %8, %10 : vector<4x1280xf32>
    %12 = arith.truncf %11 : vector<4x1280xf32> to vector<4x1280xbf16>
    %c0_9 = arith.constant 0 : index
    %c0_10 = arith.constant 0 : index
    %13 = vector.load %arg6[%c0_9, %c0_10] : memref<4x1280xbf16, #tpu.memory_space<vmem>>, vector<4x1280xbf16>
    tpu.vector_store %arg6[%c0_9, %c0_10], %12 {strides = array<i32>} : memref<4x1280xbf16, #tpu.memory_space<vmem>>, vector<4x1280xbf16>,
    return
  }
  func.func @transform_0(%arg0: i32) -> (i32, i32) {
    %c0_i32 = arith.constant 0 : i32
    %c0_i32_0 = arith.constant 0 : i32
    %c0_i32_1 = arith.constant 0 : i32
    return %c0_i32, %c0_i32_0 : i32, i32
  }
  func.func @transform_1(%arg0: i32) -> (i32, i32) {
    %c0_i32 = arith.constant 0 : i32
    %c0_i32_0 = arith.constant 0 : i32
    return %c0_i32, %arg0 : i32, i32
  }
  func.func @transform_2(%arg0: i32) -> (i32, i32) {
    %c0_i32 = arith.constant 0 : i32
    %c0_i32_0 = arith.constant 0 : i32
    %c0_i32_1 = arith.constant 0 : i32
    return %c0_i32, %c0_i32_0 : i32, i32
  }
  func.func @transform_3(%arg0: i32) -> (i32, i32) {
    %c0_i32 = arith.constant 0 : i32
    %c0_i32_0 = arith.constant 0 : i32
    return %c0_i32, %arg0 : i32, i32
  }
  func.func @transform_4(%arg0: i32) -> (i32, i32) {
    %c0_i32 = arith.constant 0 : i32
    %c0_i32_0 = arith.constant 0 : i32
    return %c0_i32, %arg0 : i32, i32
  }
  func.func @transform_5(%arg0: i32) -> (i32, i32) {
    %c0_i32 = arith.constant 0 : i32
    %c0_i32_0 = arith.constant 0 : i32
    return %c0_i32, %arg0 : i32, i32
  }
}

module attributes {stable_mosaic.version = 11 : i64} {
  func.func @_cab_kernel(%arg0: i32, %arg1: i32, %arg2: memref<4x5120xf32, #tpu.memory_space<vmem>>, %arg3: memref<9x4x4xbf16, #tpu.memory_space<vmem>>, %arg4: memref<4x1xf32, #tpu.memory_space<vmem>>, %arg5: memref<1x4xf32, #tpu.memory_space<vmem>>, %arg6: memref<1x1xf32, #tpu.memory_space<vmem>>, %arg7: memref<4x1xf32, #tpu.memory_space<vmem>>, %arg8: memref<4x1xf32, #tpu.memory_space<vmem>>, %arg9: memref<1x1280xf32, #tpu.memory_space<vmem>>, %arg10: memref<4x1280xf32, #tpu.memory_space<vmem>>, %arg11: memref<4x2xf32, #tpu.memory_space<vmem>>) attributes {dimension_semantics = [#tpu.dimension_semantics<arbitrary>, #tpu.dimension_semantics<arbitrary>], iteration_bounds = array<i64: 2, 4>, scalar_prefetch = 0 : i64, scratch_operands = 1 : i64, tpu.core_type = #tpu.core_type<tc>, window_params = [{pipeline_mode = #tpu.pipeline_mode<synchronous>, transform_indices = @transform_0, window_bounds = array<i64: 4, 5120>}, {pipeline_mode = #tpu.pipeline_mode<synchronous>, transform_indices = @transform_1, window_bounds = array<i64: 9, 4, 4>}, {pipeline_mode = #tpu.pipeline_mode<synchronous>, transform_indices = @transform_2, window_bounds = array<i64: 4, 1>}, {pipeline_mode = #tpu.pipeline_mode<synchronous>, transform_indices = @transform_3, window_bounds = array<i64: 1, 4>}, {pipeline_mode = #tpu.pipeline_mode<synchronous>, transform_indices = @transform_4, window_bounds = array<i64: 1, 1>}, {pipeline_mode = #tpu.pipeline_mode<synchronous>, transform_indices = @transform_5, window_bounds = array<i64: 4, 1>}, {pipeline_mode = #tpu.pipeline_mode<synchronous>, transform_indices = @transform_6, window_bounds = array<i64: 4, 1>}, {transform_indices = @transform_7, window_bounds = array<i64: 1, 1280>}, {transform_indices = @transform_8, window_bounds = array<i64: 4, 1280>}]} {
    %c0_i32 = arith.constant 0 : i32
    %0 = arith.cmpi eq, %arg0, %c0_i32 : i32
    %c0_i32_0 = arith.constant 0 : i32
    %1 = arith.cmpi eq, %arg1, %c0_i32_0 : i32
    %2 = arith.andi %0, %1 : i1
    %3 = arith.extui %2 : i1 to i32
    %c0_i32_1 = arith.constant 0 : i32
    %4 = arith.cmpi ne, %3, %c0_i32_1 : i32
    scf.if %4 {
      %cst = arith.constant 0.000000e+00 : f32
      %17 = vector.broadcast %cst : f32 to vector<4x2xf32>
      %c0 = arith.constant 0 : index
      %c0_7 = arith.constant 0 : index
      %18 = vector.load %arg11[%c0, %c0_7] : memref<4x2xf32, #tpu.memory_space<vmem>>, vector<4x2xf32>
      tpu.vector_store %arg11[%c0, %c0_7], %17 {strides = array<i32>} : memref<4x2xf32, #tpu.memory_space<vmem>>, vector<4x2xf32>,
    } else {
    }
    %c0_i32_2 = arith.constant 0 : i32
    %5 = arith.cmpi sgt, %arg1, %c0_i32_2 : i32
    %c3_i32 = arith.constant 3 : i32
    %6 = arith.cmpi slt, %arg1, %c3_i32 : i32
    %7 = arith.andi %5, %6 : i1
    %8 = arith.extui %7 : i1 to i32
    %c0_i32_3 = arith.constant 0 : i32
    %9 = arith.cmpi ne, %8, %c0_i32_3 : i32
    scf.if %9 {
      %c1280_i32 = arith.constant 1280 : i32
      %17 = arith.muli %arg1, %c1280_i32 : i32
      %c1_i32_7 = arith.constant 1 : i32
      %18 = arith.subi %arg1, %c1_i32_7 : i32
      %c1280_i32_8 = arith.constant 1280 : i32
      %19 = arith.muli %18, %c1280_i32_8 : i32
      %20 = tpu.assume_multiple %19, 128 : i32
      %c0 = arith.constant 0 : index
      %21 = arith.index_cast %20 : i32 to index
      %22 = vector.load %arg2[%c0, %21] : memref<4x5120xf32, #tpu.memory_space<vmem>>, vector<4x3840xf32>
      %23 = arith.truncf %22 : vector<4x3840xf32> to vector<4x3840xbf16>
      %24 = vector.extract_strided_slice %23 {offsets = [0, 1245], sizes = [4, 1280], strides = [1, 1]} : vector<4x3840xbf16> to vector<4x1280xbf16>
      %c0_9 = arith.constant 0 : index
      %c0_10 = arith.constant 0 : index
      %c0_11 = arith.constant 0 : index
      %25 = vector.load %arg3[%c0_9, %c0_10, %c0_11] : memref<9x4x4xbf16, #tpu.memory_space<vmem>>, vector<1x4x4xbf16>
      %26 = vector.shape_cast %25 : vector<1x4x4xbf16> to vector<4x4xbf16>
      %cst = arith.constant dense<0.000000e+00> : vector<4x1280xf32>
      %27 = tpu.matmul %26, %24, %cst {dimension_numbers = #tpu.dot_dimension_numbers<[1], [0], [0], [1], [0, 0, 1, 1], [], []>} : vector<4x4xbf16>, vector<4x1280xbf16>, vector<4x1280xf32> -> vector<4x1280xf32>
      %28 = vector.extract_strided_slice %23 {offsets = [0, 1246], sizes = [4, 1280], strides = [1, 1]} : vector<4x3840xbf16> to vector<4x1280xbf16>
      %c1 = arith.constant 1 : index
      %c0_12 = arith.constant 0 : index
      %c0_13 = arith.constant 0 : index
      %29 = vector.load %arg3[%c1, %c0_12, %c0_13] : memref<9x4x4xbf16, #tpu.memory_space<vmem>>, vector<1x4x4xbf16>
      %30 = vector.shape_cast %29 : vector<1x4x4xbf16> to vector<4x4xbf16>
      %cst_14 = arith.constant dense<0.000000e+00> : vector<4x1280xf32>
      %31 = tpu.matmul %30, %28, %cst_14 {dimension_numbers = #tpu.dot_dimension_numbers<[1], [0], [0], [1], [0, 0, 1, 1], [], []>} : vector<4x4xbf16>, vector<4x1280xbf16>, vector<4x1280xf32> -> vector<4x1280xf32>
      %32 = arith.addf %27, %31 : vector<4x1280xf32>
      %33 = vector.extract_strided_slice %23 {offsets = [0, 1247], sizes = [4, 1280], strides = [1, 1]} : vector<4x3840xbf16> to vector<4x1280xbf16>
      %c2 = arith.constant 2 : index
      %c0_15 = arith.constant 0 : index
      %c0_16 = arith.constant 0 : index
      %34 = vector.load %arg3[%c2, %c0_15, %c0_16] : memref<9x4x4xbf16, #tpu.memory_space<vmem>>, vector<1x4x4xbf16>
      %35 = vector.shape_cast %34 : vector<1x4x4xbf16> to vector<4x4xbf16>
      %cst_17 = arith.constant dense<0.000000e+00> : vector<4x1280xf32>
      %36 = tpu.matmul %35, %33, %cst_17 {dimension_numbers = #tpu.dot_dimension_numbers<[1], [0], [0], [1], [0, 0, 1, 1], [], []>} : vector<4x4xbf16>, vector<4x1280xbf16>, vector<4x1280xf32> -> vector<4x1280xf32>
      %37 = arith.addf %32, %36 : vector<4x1280xf32>
      %38 = vector.extract_strided_slice %23 {offsets = [0, 1279], sizes = [4, 1280], strides = [1, 1]} : vector<4x3840xbf16> to vector<4x1280xbf16>
      %c3 = arith.constant 3 : index
      %c0_18 = arith.constant 0 : index
      %c0_19 = arith.constant 0 : index
      %39 = vector.load %arg3[%c3, %c0_18, %c0_19] : memref<9x4x4xbf16, #tpu.memory_space<vmem>>, vector<1x4x4xbf16>
      %40 = vector.shape_cast %39 : vector<1x4x4xbf16> to vector<4x4xbf16>
      %cst_20 = arith.constant dense<0.000000e+00> : vector<4x1280xf32>
      %41 = tpu.matmul %40, %38, %cst_20 {dimension_numbers = #tpu.dot_dimension_numbers<[1], [0], [0], [1], [0, 0, 1, 1], [], []>} : vector<4x4xbf16>, vector<4x1280xbf16>, vector<4x1280xf32> -> vector<4x1280xf32>
      %42 = arith.addf %37, %41 : vector<4x1280xf32>
      %43 = vector.extract_strided_slice %23 {offsets = [0, 1280], sizes = [4, 1280], strides = [1, 1]} : vector<4x3840xbf16> to vector<4x1280xbf16>
      %c4 = arith.constant 4 : index
      %c0_21 = arith.constant 0 : index
      %c0_22 = arith.constant 0 : index
      %44 = vector.load %arg3[%c4, %c0_21, %c0_22] : memref<9x4x4xbf16, #tpu.memory_space<vmem>>, vector<1x4x4xbf16>
      %45 = vector.shape_cast %44 : vector<1x4x4xbf16> to vector<4x4xbf16>
      %cst_23 = arith.constant dense<0.000000e+00> : vector<4x1280xf32>
      %46 = tpu.matmul %45, %43, %cst_23 {dimension_numbers = #tpu.dot_dimension_numbers<[1], [0], [0], [1], [0, 0, 1, 1], [], []>} : vector<4x4xbf16>, vector<4x1280xbf16>, vector<4x1280xf32> -> vector<4x1280xf32>
      %47 = arith.addf %42, %46 : vector<4x1280xf32>
      %48 = vector.extract_strided_slice %23 {offsets = [0, 1281], sizes = [4, 1280], strides = [1, 1]} : vector<4x3840xbf16> to vector<4x1280xbf16>
      %c5 = arith.constant 5 : index
      %c0_24 = arith.constant 0 : index
      %c0_25 = arith.constant 0 : index
      %49 = vector.load %arg3[%c5, %c0_24, %c0_25] : memref<9x4x4xbf16, #tpu.memory_space<vmem>>, vector<1x4x4xbf16>
      %50 = vector.shape_cast %49 : vector<1x4x4xbf16> to vector<4x4xbf16>
      %cst_26 = arith.constant dense<0.000000e+00> : vector<4x1280xf32>
      %51 = tpu.matmul %50, %48, %cst_26 {dimension_numbers = #tpu.dot_dimension_numbers<[1], [0], [0], [1], [0, 0, 1, 1], [], []>} : vector<4x4xbf16>, vector<4x1280xbf16>, vector<4x1280xf32> -> vector<4x1280xf32>
      %52 = arith.addf %47, %51 : vector<4x1280xf32>
      %53 = vector.extract_strided_slice %23 {offsets = [0, 1313], sizes = [4, 1280], strides = [1, 1]} : vector<4x3840xbf16> to vector<4x1280xbf16>
      %c6 = arith.constant 6 : index
      %c0_27 = arith.constant 0 : index
      %c0_28 = arith.constant 0 : index
      %54 = vector.load %arg3[%c6, %c0_27, %c0_28] : memref<9x4x4xbf16, #tpu.memory_space<vmem>>, vector<1x4x4xbf16>
      %55 = vector.shape_cast %54 : vector<1x4x4xbf16> to vector<4x4xbf16>
      %cst_29 = arith.constant dense<0.000000e+00> : vector<4x1280xf32>
      %56 = tpu.matmul %55, %53, %cst_29 {dimension_numbers = #tpu.dot_dimension_numbers<[1], [0], [0], [1], [0, 0, 1, 1], [], []>} : vector<4x4xbf16>, vector<4x1280xbf16>, vector<4x1280xf32> -> vector<4x1280xf32>
      %57 = arith.addf %52, %56 : vector<4x1280xf32>
      %58 = vector.extract_strided_slice %23 {offsets = [0, 1314], sizes = [4, 1280], strides = [1, 1]} : vector<4x3840xbf16> to vector<4x1280xbf16>
      %c7 = arith.constant 7 : index
      %c0_30 = arith.constant 0 : index
      %c0_31 = arith.constant 0 : index
      %59 = vector.load %arg3[%c7, %c0_30, %c0_31] : memref<9x4x4xbf16, #tpu.memory_space<vmem>>, vector<1x4x4xbf16>
      %60 = vector.shape_cast %59 : vector<1x4x4xbf16> to vector<4x4xbf16>
      %cst_32 = arith.constant dense<0.000000e+00> : vector<4x1280xf32>
      %61 = tpu.matmul %60, %58, %cst_32 {dimension_numbers = #tpu.dot_dimension_numbers<[1], [0], [0], [1], [0, 0, 1, 1], [], []>} : vector<4x4xbf16>, vector<4x1280xbf16>, vector<4x1280xf32> -> vector<4x1280xf32>
      %62 = arith.addf %57, %61 : vector<4x1280xf32>
      %63 = vector.extract_strided_slice %23 {offsets = [0, 1315], sizes = [4, 1280], strides = [1, 1]} : vector<4x3840xbf16> to vector<4x1280xbf16>
      %c8 = arith.constant 8 : index
      %c0_33 = arith.constant 0 : index
      %c0_34 = arith.constant 0 : index
      %64 = vector.load %arg3[%c8, %c0_33, %c0_34] : memref<9x4x4xbf16, #tpu.memory_space<vmem>>, vector<1x4x4xbf16>
      %65 = vector.shape_cast %64 : vector<1x4x4xbf16> to vector<4x4xbf16>
      %cst_35 = arith.constant dense<0.000000e+00> : vector<4x1280xf32>
      %66 = tpu.matmul %65, %63, %cst_35 {dimension_numbers = #tpu.dot_dimension_numbers<[1], [0], [0], [1], [0, 0, 1, 1], [], []>} : vector<4x4xbf16>, vector<4x1280xbf16>, vector<4x1280xf32> -> vector<4x1280xf32>
      %67 = arith.addf %62, %66 : vector<4x1280xf32>
      %c0_36 = arith.constant 0 : index
      %c0_37 = arith.constant 0 : index
      %68 = vector.load %arg4[%c0_36, %c0_37] : memref<4x1xf32, #tpu.memory_space<vmem>>, vector<4x1xf32>
      %69 = vector.broadcast %68 : vector<4x1xf32> to vector<4x1280xf32>
      %70 = arith.addf %67, %69 : vector<4x1280xf32>
      %cst_38 = arith.constant 0.000000e+00 : f32
      %71 = vector.broadcast %cst_38 : f32 to vector<4x1280xf32>
      %72 = arith.maximumf %70, %71 : vector<4x1280xf32>
      %c0_39 = arith.constant 0 : index
      %c0_40 = arith.constant 0 : index
      %73 = vector.load %arg9[%c0_39, %c0_40] : memref<1x1280xf32, #tpu.memory_space<vmem>>, vector<1x1280xf32>
      %74 = vector.broadcast %73 : vector<1x1280xf32> to vector<4x1280xf32>
      %75 = arith.mulf %72, %74 : vector<4x1280xf32>
      %c0_i32_41 = arith.constant 0 : i32
      %76 = arith.cmpi eq, %arg0, %c0_i32_41 : i32
      %77 = arith.extui %76 : i1 to i32
      %c0_i32_42 = arith.constant 0 : i32
      %78 = arith.cmpi ne, %77, %c0_i32_42 : i32
      scf.if %78 {
        %82 = tpu.iota {dimensions = array<i32: 0>} : vector<1280x2xi32>
        %83 = vector.broadcast %17 : i32 to vector<1280x2xi32>
        %84 = arith.addi %82, %83 : vector<1280x2xi32>
        %85 = tpu.iota {dimensions = array<i32: 1>} : vector<1280x2xi32>
        %c1156_i32 = arith.constant 1156 : i32
        %86 = vector.broadcast %c1156_i32 : i32 to vector<1280x2xi32>
        %87 = arith.muli %85, %86 : vector<1280x2xi32>
        %c1280_i32_45 = arith.constant 1280 : i32
        %88 = vector.broadcast %c1280_i32_45 : i32 to vector<1280x2xi32>
        %89 = arith.addi %88, %87 : vector<1280x2xi32>
        %90 = arith.cmpi sge, %84, %89 : vector<1280x2xi32>
        %c1156_i32_46 = arith.constant 1156 : i32
        %91 = vector.broadcast %c1156_i32_46 : i32 to vector<1280x2xi32>
        %92 = arith.addi %89, %91 : vector<1280x2xi32>
        %93 = arith.cmpi slt, %84, %92 : vector<1280x2xi32>
        %94 = arith.andi %90, %93 : vector<1280x2xi1>
        %95 = arith.extui %94 : vector<1280x2xi1> to vector<1280x2xi32>
        %96 = arith.sitofp %95 : vector<1280x2xi32> to vector<1280x2xf32>
        %97 = arith.truncf %96 : vector<1280x2xf32> to vector<1280x2xbf16>
        %c0_47 = arith.constant 0 : index
        %c0_48 = arith.constant 0 : index
        %98 = vector.load %arg11[%c0_47, %c0_48] : memref<4x2xf32, #tpu.memory_space<vmem>>, vector<4x2xf32>
        %99 = arith.truncf %75 : vector<4x1280xf32> to vector<4x1280xbf16>
        %cst_49 = arith.constant dense<0.000000e+00> : vector<4x2xf32>
        %100 = tpu.matmul %99, %97, %cst_49 {dimension_numbers = #tpu.dot_dimension_numbers<[1], [0], [0], [1], [0, 0, 1, 1], [], []>} : vector<4x1280xbf16>, vector<1280x2xbf16>, vector<4x2xf32> -> vector<4x2xf32>
        %101 = arith.addf %98, %100 : vector<4x2xf32>
        %c0_50 = arith.constant 0 : index
        %c0_51 = arith.constant 0 : index
        %102 = vector.load %arg11[%c0_50, %c0_51] : memref<4x2xf32, #tpu.memory_space<vmem>>, vector<4x2xf32>
        tpu.vector_store %arg11[%c0_50, %c0_51], %101 {strides = array<i32>} : memref<4x2xf32, #tpu.memory_space<vmem>>, vector<4x2xf32>,
      } else {
      }
      %c1_i32_43 = arith.constant 1 : i32
      %79 = arith.cmpi eq, %arg0, %c1_i32_43 : i32
      %80 = arith.extui %79 : i1 to i32
      %c0_i32_44 = arith.constant 0 : i32
      %81 = arith.cmpi ne, %80, %c0_i32_44 : i32
      scf.if %81 {
        %c0_45 = arith.constant 0 : index
        %c0_46 = arith.constant 0 : index
        %82 = vector.load %arg11[%c0_45, %c0_46] : memref<4x2xf32, #tpu.memory_space<vmem>>, vector<4x2xf32>
        %cst_47 = arith.constant 9.765625E-4 : f32
        %83 = vector.broadcast %cst_47 : f32 to vector<4x2xf32>
        %84 = arith.mulf %82, %83 : vector<4x2xf32>
        %c0_48 = arith.constant 0 : index
        %c0_49 = arith.constant 0 : index
        %85 = vector.load %arg5[%c0_48, %c0_49] : memref<1x4xf32, #tpu.memory_space<vmem>>, vector<1x4xf32>
        %cst_50 = arith.constant dense<0.000000e+00> : vector<1x2xf32>
        %86 = tpu.matmul %85, %84, %cst_50 {dimension_numbers = #tpu.dot_dimension_numbers<[1], [0], [0], [1], [0, 0, 1, 1], [], []>} : vector<1x4xf32>, vector<4x2xf32>, vector<1x2xf32> -> vector<1x2xf32>
        %c0_51 = arith.constant 0 : index
        %c0_52 = arith.constant 0 : index
        %87 = vector.load %arg6[%c0_51, %c0_52] : memref<1x1xf32, #tpu.memory_space<vmem>>, vector<1x1xf32>
        %88 = vector.broadcast %87 : vector<1x1xf32> to vector<1x2xf32>
        %89 = arith.addf %86, %88 : vector<1x2xf32>
        %cst_53 = arith.constant 0.000000e+00 : f32
        %90 = vector.broadcast %cst_53 : f32 to vector<1x2xf32>
        %91 = arith.cmpf oge, %89, %90 : vector<1x2xf32>
        %cst_54 = arith.constant 2.000000e-01 : f32
        %92 = vector.broadcast %cst_54 : f32 to vector<1x2xf32>
        %93 = arith.mulf %92, %89 : vector<1x2xf32>
        %94 = arith.select %91, %89, %93 : vector<1x2xi1>, vector<1x2xf32>
        %c0_55 = arith.constant 0 : index
        %c0_56 = arith.constant 0 : index
        %95 = vector.load %arg7[%c0_55, %c0_56] : memref<4x1xf32, #tpu.memory_space<vmem>>, vector<4x1xf32>
        %cst_57 = arith.constant dense<0.000000e+00> : vector<4x2xf32>
        %96 = tpu.matmul %95, %94, %cst_57 {dimension_numbers = #tpu.dot_dimension_numbers<[1], [0], [0], [1], [0, 0, 1, 1], [], []>} : vector<4x1xf32>, vector<1x2xf32>, vector<4x2xf32> -> vector<4x2xf32>
        %c0_58 = arith.constant 0 : index
        %c0_59 = arith.constant 0 : index
        %97 = vector.load %arg8[%c0_58, %c0_59] : memref<4x1xf32, #tpu.memory_space<vmem>>, vector<4x1xf32>
        %98 = vector.broadcast %97 : vector<4x1xf32> to vector<4x2xf32>
        %99 = arith.addf %96, %98 : vector<4x2xf32>
        %cst_60 = arith.constant 0.000000e+00 : f32
        %100 = vector.broadcast %cst_60 : f32 to vector<4x2xf32>
        %101 = arith.subf %100, %99 : vector<4x2xf32>
        %102 = math.exp %101 : vector<4x2xf32>
        %cst_61 = arith.constant 1.000000e+00 : f32
        %103 = vector.broadcast %cst_61 : f32 to vector<4x2xf32>
        %104 = arith.addf %103, %102 : vector<4x2xf32>
        %cst_62 = arith.constant 1.000000e+00 : f32
        %105 = vector.broadcast %cst_62 : f32 to vector<4x2xf32>
        %106 = arith.divf %105, %104 : vector<4x2xf32>
        %107 = tpu.iota {dimensions = array<i32: 1>} : vector<1x1280xi32>
        %108 = vector.broadcast %17 : i32 to vector<1x1280xi32>
        %109 = arith.addi %107, %108 : vector<1x1280xi32>
        %cst_63 = arith.constant 0.000000e+00 : f32
        %110 = vector.broadcast %cst_63 : f32 to vector<4x1280xf32>
        %c1280_i32_64 = arith.constant 1280 : i32
        %111 = vector.broadcast %c1280_i32_64 : i32 to vector<1x1280xi32>
        %112 = arith.cmpi sge, %109, %111 : vector<1x1280xi32>
        %c2436_i32 = arith.constant 2436 : i32
        %113 = vector.broadcast %c2436_i32 : i32 to vector<1x1280xi32>
        %114 = arith.cmpi slt, %109, %113 : vector<1x1280xi32>
        %115 = arith.andi %112, %114 : vector<1x1280xi1>
        %116 = arith.extui %115 : vector<1x1280xi1> to vector<1x1280xi32>
        %117 = arith.sitofp %116 : vector<1x1280xi32> to vector<1x1280xf32>
        %118 = vector.extract_strided_slice %106 {offsets = [0, 0], sizes = [4, 1], strides = [1, 1]} : vector<4x2xf32> to vector<4x1xf32>
        %119 = vector.broadcast %118 : vector<4x1xf32> to vector<4x1280xf32>
        %120 = vector.broadcast %117 : vector<1x1280xf32> to vector<4x1280xf32>
        %121 = arith.mulf %119, %120 : vector<4x1280xf32>
        %122 = arith.addf %110, %121 : vector<4x1280xf32>
        %c2436_i32_65 = arith.constant 2436 : i32
        %123 = vector.broadcast %c2436_i32_65 : i32 to vector<1x1280xi32>
        %124 = arith.cmpi sge, %109, %123 : vector<1x1280xi32>
        %c3592_i32 = arith.constant 3592 : i32
        %125 = vector.broadcast %c3592_i32 : i32 to vector<1x1280xi32>
        %126 = arith.cmpi slt, %109, %125 : vector<1x1280xi32>
        %127 = arith.andi %124, %126 : vector<1x1280xi1>
        %128 = arith.extui %127 : vector<1x1280xi1> to vector<1x1280xi32>
        %129 = arith.sitofp %128 : vector<1x1280xi32> to vector<1x1280xf32>
        %130 = vector.extract_strided_slice %106 {offsets = [0, 1], sizes = [4, 1], strides = [1, 1]} : vector<4x2xf32> to vector<4x1xf32>
        %131 = vector.broadcast %130 : vector<4x1xf32> to vector<4x1280xf32>
        %132 = vector.broadcast %129 : vector<1x1280xf32> to vector<4x1280xf32>
        %133 = arith.mulf %131, %132 : vector<4x1280xf32>
        %134 = arith.addf %122, %133 : vector<4x1280xf32>
        %135 = arith.mulf %75, %134 : vector<4x1280xf32>
        %c0_66 = arith.constant 0 : index
        %136 = arith.index_cast %17 : i32 to index
        %137 = vector.load %arg2[%c0_66, %136] : memref<4x5120xf32, #tpu.memory_space<vmem>>, vector<4x1280xf32>
        %138 = arith.addf %135, %137 : vector<4x1280xf32>
        %c0_67 = arith.constant 0 : index
        %c0_68 = arith.constant 0 : index
        %139 = vector.load %arg10[%c0_67, %c0_68] : memref<4x1280xf32, #tpu.memory_space<vmem>>, vector<4x1280xf32>
        tpu.vector_store %arg10[%c0_67, %c0_68], %138 {strides = array<i32>} : memref<4x1280xf32, #tpu.memory_space<vmem>>, vector<4x1280xf32>,
      } else {
      }
    } else {
    }
    %c0_i32_4 = arith.constant 0 : i32
    %10 = arith.cmpi eq, %arg1, %c0_i32_4 : i32
    %c3_i32_5 = arith.constant 3 : i32
    %11 = arith.cmpi eq, %arg1, %c3_i32_5 : i32
    %12 = arith.ori %10, %11 : i1
    %c1_i32 = arith.constant 1 : i32
    %13 = arith.cmpi eq, %arg0, %c1_i32 : i32
    %14 = arith.andi %12, %13 : i1
    %15 = arith.extui %14 : i1 to i32
    %c0_i32_6 = arith.constant 0 : i32
    %16 = arith.cmpi ne, %15, %c0_i32_6 : i32
    scf.if %16 {
      %cst = arith.constant 0.000000e+00 : f32
      %17 = vector.broadcast %cst : f32 to vector<4x1280xf32>
      %c0 = arith.constant 0 : index
      %c0_7 = arith.constant 0 : index
      %18 = vector.load %arg10[%c0, %c0_7] : memref<4x1280xf32, #tpu.memory_space<vmem>>, vector<4x1280xf32>
      tpu.vector_store %arg10[%c0, %c0_7], %17 {strides = array<i32>} : memref<4x1280xf32, #tpu.memory_space<vmem>>, vector<4x1280xf32>,
    } else {
    }
    return
  }
  func.func @transform_0(%arg0: i32, %arg1: i32) -> (i32, i32) {
    %c0_i32 = arith.constant 0 : i32
    %c0_i32_0 = arith.constant 0 : i32
    %c0_i32_1 = arith.constant 0 : i32
    return %c0_i32, %c0_i32_0 : i32, i32
  }
  func.func @transform_1(%arg0: i32, %arg1: i32) -> (i32, i32, i32) {
    %c0_i32 = arith.constant 0 : i32
    %c0_i32_0 = arith.constant 0 : i32
    %c0_i32_1 = arith.constant 0 : i32
    %c0_i32_2 = arith.constant 0 : i32
    return %c0_i32, %c0_i32_0, %c0_i32_1 : i32, i32, i32
  }
  func.func @transform_2(%arg0: i32, %arg1: i32) -> (i32, i32) {
    %c0_i32 = arith.constant 0 : i32
    %c0_i32_0 = arith.constant 0 : i32
    %c0_i32_1 = arith.constant 0 : i32
    return %c0_i32, %c0_i32_0 : i32, i32
  }
  func.func @transform_3(%arg0: i32, %arg1: i32) -> (i32, i32) {
    %c0_i32 = arith.constant 0 : i32
    %c0_i32_0 = arith.constant 0 : i32
    %c0_i32_1 = arith.constant 0 : i32
    return %c0_i32, %c0_i32_0 : i32, i32
  }
  func.func @transform_4(%arg0: i32, %arg1: i32) -> (i32, i32) {
    %c0_i32 = arith.constant 0 : i32
    %c0_i32_0 = arith.constant 0 : i32
    %c0_i32_1 = arith.constant 0 : i32
    return %c0_i32, %c0_i32_0 : i32, i32
  }
  func.func @transform_5(%arg0: i32, %arg1: i32) -> (i32, i32) {
    %c0_i32 = arith.constant 0 : i32
    %c0_i32_0 = arith.constant 0 : i32
    %c0_i32_1 = arith.constant 0 : i32
    return %c0_i32, %c0_i32_0 : i32, i32
  }
  func.func @transform_6(%arg0: i32, %arg1: i32) -> (i32, i32) {
    %c0_i32 = arith.constant 0 : i32
    %c0_i32_0 = arith.constant 0 : i32
    %c0_i32_1 = arith.constant 0 : i32
    return %c0_i32, %c0_i32_0 : i32, i32
  }
  func.func @transform_7(%arg0: i32, %arg1: i32) -> (i32, i32) {
    %c0_i32 = arith.constant 0 : i32
    %c0_i32_0 = arith.constant 0 : i32
    return %c0_i32, %arg1 : i32, i32
  }
  func.func @transform_8(%arg0: i32, %arg1: i32) -> (i32, i32) {
    %0 = arith.muli %arg0, %arg1 : i32
    %c0_i32 = arith.constant 0 : i32
    %c0_i32_0 = arith.constant 0 : i32
    return %c0_i32, %0 : i32, i32
  }
}

module attributes {stable_mosaic.version = 11 : i64} {
  func.func @_conv_res_kernel(%arg0: i32, %arg1: memref<4x5120xf32, #tpu.memory_space<vmem>>, %arg2: memref<9x4x4xbf16, #tpu.memory_space<vmem>>, %arg3: memref<4x1xf32, #tpu.memory_space<vmem>>, %arg4: memref<1x1280xf32, #tpu.memory_space<vmem>>, %arg5: memref<4x1280xf32, #tpu.memory_space<vmem>>, %arg6: memref<4x1280xf32, #tpu.memory_space<vmem>>) attributes {dimension_semantics = [#tpu.dimension_semantics<parallel>], iteration_bounds = array<i64: 4>, scalar_prefetch = 0 : i64, scratch_operands = 0 : i64, tpu.core_type = #tpu.core_type<tc>, window_params = [{pipeline_mode = #tpu.pipeline_mode<synchronous>, transform_indices = @transform_0, window_bounds = array<i64: 4, 5120>}, {pipeline_mode = #tpu.pipeline_mode<synchronous>, transform_indices = @transform_1, window_bounds = array<i64: 9, 4, 4>}, {pipeline_mode = #tpu.pipeline_mode<synchronous>, transform_indices = @transform_2, window_bounds = array<i64: 4, 1>}, {transform_indices = @transform_3, window_bounds = array<i64: 1, 1280>}, {transform_indices = @transform_4, window_bounds = array<i64: 4, 1280>}, {transform_indices = @transform_5, window_bounds = array<i64: 4, 1280>}]} {
    %c0_i32 = arith.constant 0 : i32
    %0 = arith.cmpi eq, %arg0, %c0_i32 : i32
    %c3_i32 = arith.constant 3 : i32
    %1 = arith.cmpi eq, %arg0, %c3_i32 : i32
    %2 = arith.ori %0, %1 : i1
    %3 = arith.extui %2 : i1 to i32
    %c0_i32_0 = arith.constant 0 : i32
    %4 = arith.cmpi ne, %3, %c0_i32_0 : i32
    scf.if %4 {
      %c0 = arith.constant 0 : index
      %c0_4 = arith.constant 0 : index
      %10 = vector.load %arg5[%c0, %c0_4] : memref<4x1280xf32, #tpu.memory_space<vmem>>, vector<4x1280xf32>
      %c0_5 = arith.constant 0 : index
      %c0_6 = arith.constant 0 : index
      %11 = vector.load %arg6[%c0_5, %c0_6] : memref<4x1280xf32, #tpu.memory_space<vmem>>, vector<4x1280xf32>
      tpu.vector_store %arg6[%c0_5, %c0_6], %10 {strides = array<i32>} : memref<4x1280xf32, #tpu.memory_space<vmem>>, vector<4x1280xf32>,
    } else {
    }
    %c0_i32_1 = arith.constant 0 : i32
    %5 = arith.cmpi sgt, %arg0, %c0_i32_1 : i32
    %c3_i32_2 = arith.constant 3 : i32
    %6 = arith.cmpi slt, %arg0, %c3_i32_2 : i32
    %7 = arith.andi %5, %6 : i1
    %8 = arith.extui %7 : i1 to i32
    %c0_i32_3 = arith.constant 0 : i32
    %9 = arith.cmpi ne, %8, %c0_i32_3 : i32
    scf.if %9 {
      %c1_i32 = arith.constant 1 : i32
      %10 = arith.subi %arg0, %c1_i32 : i32
      %c1280_i32 = arith.constant 1280 : i32
      %11 = arith.muli %10, %c1280_i32 : i32
      %12 = tpu.assume_multiple %11, 128 : i32
      %c0 = arith.constant 0 : index
      %13 = arith.index_cast %12 : i32 to index
      %14 = vector.load %arg1[%c0, %13] : memref<4x5120xf32, #tpu.memory_space<vmem>>, vector<4x3840xf32>
      %15 = arith.truncf %14 : vector<4x3840xf32> to vector<4x3840xbf16>
      %16 = vector.extract_strided_slice %15 {offsets = [0, 1245], sizes = [4, 1280], strides = [1, 1]} : vector<4x3840xbf16> to vector<4x1280xbf16>
      %c0_4 = arith.constant 0 : index
      %c0_5 = arith.constant 0 : index
      %c0_6 = arith.constant 0 : index
      %17 = vector.load %arg2[%c0_4, %c0_5, %c0_6] : memref<9x4x4xbf16, #tpu.memory_space<vmem>>, vector<1x4x4xbf16>
      %18 = vector.shape_cast %17 : vector<1x4x4xbf16> to vector<4x4xbf16>
      %cst = arith.constant dense<0.000000e+00> : vector<4x1280xf32>
      %19 = tpu.matmul %18, %16, %cst {dimension_numbers = #tpu.dot_dimension_numbers<[1], [0], [0], [1], [0, 0, 1, 1], [], []>} : vector<4x4xbf16>, vector<4x1280xbf16>, vector<4x1280xf32> -> vector<4x1280xf32>
      %20 = vector.extract_strided_slice %15 {offsets = [0, 1246], sizes = [4, 1280], strides = [1, 1]} : vector<4x3840xbf16> to vector<4x1280xbf16>
      %c1 = arith.constant 1 : index
      %c0_7 = arith.constant 0 : index
      %c0_8 = arith.constant 0 : index
      %21 = vector.load %arg2[%c1, %c0_7, %c0_8] : memref<9x4x4xbf16, #tpu.memory_space<vmem>>, vector<1x4x4xbf16>
      %22 = vector.shape_cast %21 : vector<1x4x4xbf16> to vector<4x4xbf16>
      %cst_9 = arith.constant dense<0.000000e+00> : vector<4x1280xf32>
      %23 = tpu.matmul %22, %20, %cst_9 {dimension_numbers = #tpu.dot_dimension_numbers<[1], [0], [0], [1], [0, 0, 1, 1], [], []>} : vector<4x4xbf16>, vector<4x1280xbf16>, vector<4x1280xf32> -> vector<4x1280xf32>
      %24 = arith.addf %19, %23 : vector<4x1280xf32>
      %25 = vector.extract_strided_slice %15 {offsets = [0, 1247], sizes = [4, 1280], strides = [1, 1]} : vector<4x3840xbf16> to vector<4x1280xbf16>
      %c2 = arith.constant 2 : index
      %c0_10 = arith.constant 0 : index
      %c0_11 = arith.constant 0 : index
      %26 = vector.load %arg2[%c2, %c0_10, %c0_11] : memref<9x4x4xbf16, #tpu.memory_space<vmem>>, vector<1x4x4xbf16>
      %27 = vector.shape_cast %26 : vector<1x4x4xbf16> to vector<4x4xbf16>
      %cst_12 = arith.constant dense<0.000000e+00> : vector<4x1280xf32>
      %28 = tpu.matmul %27, %25, %cst_12 {dimension_numbers = #tpu.dot_dimension_numbers<[1], [0], [0], [1], [0, 0, 1, 1], [], []>} : vector<4x4xbf16>, vector<4x1280xbf16>, vector<4x1280xf32> -> vector<4x1280xf32>
      %29 = arith.addf %24, %28 : vector<4x1280xf32>
      %30 = vector.extract_strided_slice %15 {offsets = [0, 1279], sizes = [4, 1280], strides = [1, 1]} : vector<4x3840xbf16> to vector<4x1280xbf16>
      %c3 = arith.constant 3 : index
      %c0_13 = arith.constant 0 : index
      %c0_14 = arith.constant 0 : index
      %31 = vector.load %arg2[%c3, %c0_13, %c0_14] : memref<9x4x4xbf16, #tpu.memory_space<vmem>>, vector<1x4x4xbf16>
      %32 = vector.shape_cast %31 : vector<1x4x4xbf16> to vector<4x4xbf16>
      %cst_15 = arith.constant dense<0.000000e+00> : vector<4x1280xf32>
      %33 = tpu.matmul %32, %30, %cst_15 {dimension_numbers = #tpu.dot_dimension_numbers<[1], [0], [0], [1], [0, 0, 1, 1], [], []>} : vector<4x4xbf16>, vector<4x1280xbf16>, vector<4x1280xf32> -> vector<4x1280xf32>
      %34 = arith.addf %29, %33 : vector<4x1280xf32>
      %35 = vector.extract_strided_slice %15 {offsets = [0, 1280], sizes = [4, 1280], strides = [1, 1]} : vector<4x3840xbf16> to vector<4x1280xbf16>
      %c4 = arith.constant 4 : index
      %c0_16 = arith.constant 0 : index
      %c0_17 = arith.constant 0 : index
      %36 = vector.load %arg2[%c4, %c0_16, %c0_17] : memref<9x4x4xbf16, #tpu.memory_space<vmem>>, vector<1x4x4xbf16>
      %37 = vector.shape_cast %36 : vector<1x4x4xbf16> to vector<4x4xbf16>
      %cst_18 = arith.constant dense<0.000000e+00> : vector<4x1280xf32>
      %38 = tpu.matmul %37, %35, %cst_18 {dimension_numbers = #tpu.dot_dimension_numbers<[1], [0], [0], [1], [0, 0, 1, 1], [], []>} : vector<4x4xbf16>, vector<4x1280xbf16>, vector<4x1280xf32> -> vector<4x1280xf32>
      %39 = arith.addf %34, %38 : vector<4x1280xf32>
      %40 = vector.extract_strided_slice %15 {offsets = [0, 1281], sizes = [4, 1280], strides = [1, 1]} : vector<4x3840xbf16> to vector<4x1280xbf16>
      %c5 = arith.constant 5 : index
      %c0_19 = arith.constant 0 : index
      %c0_20 = arith.constant 0 : index
      %41 = vector.load %arg2[%c5, %c0_19, %c0_20] : memref<9x4x4xbf16, #tpu.memory_space<vmem>>, vector<1x4x4xbf16>
      %42 = vector.shape_cast %41 : vector<1x4x4xbf16> to vector<4x4xbf16>
      %cst_21 = arith.constant dense<0.000000e+00> : vector<4x1280xf32>
      %43 = tpu.matmul %42, %40, %cst_21 {dimension_numbers = #tpu.dot_dimension_numbers<[1], [0], [0], [1], [0, 0, 1, 1], [], []>} : vector<4x4xbf16>, vector<4x1280xbf16>, vector<4x1280xf32> -> vector<4x1280xf32>
      %44 = arith.addf %39, %43 : vector<4x1280xf32>
      %45 = vector.extract_strided_slice %15 {offsets = [0, 1313], sizes = [4, 1280], strides = [1, 1]} : vector<4x3840xbf16> to vector<4x1280xbf16>
      %c6 = arith.constant 6 : index
      %c0_22 = arith.constant 0 : index
      %c0_23 = arith.constant 0 : index
      %46 = vector.load %arg2[%c6, %c0_22, %c0_23] : memref<9x4x4xbf16, #tpu.memory_space<vmem>>, vector<1x4x4xbf16>
      %47 = vector.shape_cast %46 : vector<1x4x4xbf16> to vector<4x4xbf16>
      %cst_24 = arith.constant dense<0.000000e+00> : vector<4x1280xf32>
      %48 = tpu.matmul %47, %45, %cst_24 {dimension_numbers = #tpu.dot_dimension_numbers<[1], [0], [0], [1], [0, 0, 1, 1], [], []>} : vector<4x4xbf16>, vector<4x1280xbf16>, vector<4x1280xf32> -> vector<4x1280xf32>
      %49 = arith.addf %44, %48 : vector<4x1280xf32>
      %50 = vector.extract_strided_slice %15 {offsets = [0, 1314], sizes = [4, 1280], strides = [1, 1]} : vector<4x3840xbf16> to vector<4x1280xbf16>
      %c7 = arith.constant 7 : index
      %c0_25 = arith.constant 0 : index
      %c0_26 = arith.constant 0 : index
      %51 = vector.load %arg2[%c7, %c0_25, %c0_26] : memref<9x4x4xbf16, #tpu.memory_space<vmem>>, vector<1x4x4xbf16>
      %52 = vector.shape_cast %51 : vector<1x4x4xbf16> to vector<4x4xbf16>
      %cst_27 = arith.constant dense<0.000000e+00> : vector<4x1280xf32>
      %53 = tpu.matmul %52, %50, %cst_27 {dimension_numbers = #tpu.dot_dimension_numbers<[1], [0], [0], [1], [0, 0, 1, 1], [], []>} : vector<4x4xbf16>, vector<4x1280xbf16>, vector<4x1280xf32> -> vector<4x1280xf32>
      %54 = arith.addf %49, %53 : vector<4x1280xf32>
      %55 = vector.extract_strided_slice %15 {offsets = [0, 1315], sizes = [4, 1280], strides = [1, 1]} : vector<4x3840xbf16> to vector<4x1280xbf16>
      %c8 = arith.constant 8 : index
      %c0_28 = arith.constant 0 : index
      %c0_29 = arith.constant 0 : index
      %56 = vector.load %arg2[%c8, %c0_28, %c0_29] : memref<9x4x4xbf16, #tpu.memory_space<vmem>>, vector<1x4x4xbf16>
      %57 = vector.shape_cast %56 : vector<1x4x4xbf16> to vector<4x4xbf16>
      %cst_30 = arith.constant dense<0.000000e+00> : vector<4x1280xf32>
      %58 = tpu.matmul %57, %55, %cst_30 {dimension_numbers = #tpu.dot_dimension_numbers<[1], [0], [0], [1], [0, 0, 1, 1], [], []>} : vector<4x4xbf16>, vector<4x1280xbf16>, vector<4x1280xf32> -> vector<4x1280xf32>
      %59 = arith.addf %54, %58 : vector<4x1280xf32>
      %c0_31 = arith.constant 0 : index
      %c0_32 = arith.constant 0 : index
      %60 = vector.load %arg3[%c0_31, %c0_32] : memref<4x1xf32, #tpu.memory_space<vmem>>, vector<4x1xf32>
      %61 = vector.broadcast %60 : vector<4x1xf32> to vector<4x1280xf32>
      %62 = arith.addf %59, %61 : vector<4x1280xf32>
      %c0_33 = arith.constant 0 : index
      %c0_34 = arith.constant 0 : index
      %63 = vector.load %arg4[%c0_33, %c0_34] : memref<1x1280xf32, #tpu.memory_space<vmem>>, vector<1x1280xf32>
      %64 = vector.broadcast %63 : vector<1x1280xf32> to vector<4x1280xf32>
      %65 = arith.mulf %62, %64 : vector<4x1280xf32>
      %c0_35 = arith.constant 0 : index
      %c0_36 = arith.constant 0 : index
      %66 = vector.load %arg5[%c0_35, %c0_36] : memref<4x1280xf32, #tpu.memory_space<vmem>>, vector<4x1280xf32>
      %67 = arith.addf %65, %66 : vector<4x1280xf32>
      %c0_37 = arith.constant 0 : index
      %c0_38 = arith.constant 0 : index
      %68 = vector.load %arg6[%c0_37, %c0_38] : memref<4x1280xf32, #tpu.memory_space<vmem>>, vector<4x1280xf32>
      tpu.vector_store %arg6[%c0_37, %c0_38], %67 {strides = array<i32>} : memref<4x1280xf32, #tpu.memory_space<vmem>>, vector<4x1280xf32>,
    } else {
    }
    return
  }
  func.func @transform_0(%arg0: i32) -> (i32, i32) {
    %c0_i32 = arith.constant 0 : i32
    %c0_i32_0 = arith.constant 0 : i32
    %c0_i32_1 = arith.constant 0 : i32
    return %c0_i32, %c0_i32_0 : i32, i32
  }
  func.func @transform_1(%arg0: i32) -> (i32, i32, i32) {
    %c0_i32 = arith.constant 0 : i32
    %c0_i32_0 = arith.constant 0 : i32
    %c0_i32_1 = arith.constant 0 : i32
    %c0_i32_2 = arith.constant 0 : i32
    return %c0_i32, %c0_i32_0, %c0_i32_1 : i32, i32, i32
  }
  func.func @transform_2(%arg0: i32) -> (i32, i32) {
    %c0_i32 = arith.constant 0 : i32
    %c0_i32_0 = arith.constant 0 : i32
    %c0_i32_1 = arith.constant 0 : i32
    return %c0_i32, %c0_i32_0 : i32, i32
  }
  func.func @transform_3(%arg0: i32) -> (i32, i32) {
    %c0_i32 = arith.constant 0 : i32
    %c0_i32_0 = arith.constant 0 : i32
    return %c0_i32, %arg0 : i32, i32
  }
  func.func @transform_4(%arg0: i32) -> (i32, i32) {
    %c0_i32 = arith.constant 0 : i32
    %c0_i32_0 = arith.constant 0 : i32
    return %c0_i32, %arg0 : i32, i32
  }
  func.func @transform_5(%arg0: i32) -> (i32, i32) {
    %c0_i32 = arith.constant 0 : i32
    %c0_i32_0 = arith.constant 0 : i32
    return %c0_i32, %arg0 : i32, i32
  }
}

</mosaic_0001>

<bundles_post_ra>
// kernel: tile.6
= control target key start
LH: loop header
LB: loop body
LE: loop exit
PB: predicated region body
PF: predicated region fallthrough
CT: control target
= control target key end

     0   :  { %s132_s0 = inlined_call_operand.vmem [shape: f32[1156], index: 0, kind: input, shape index: {}]   ;;  %s133_s1 = inlined_call_operand.vmem [shape: f32[2,1156], index: 1, kind: output, shape index: {}]  }
   0x1   :  { %v4_v0 = vld [vmem:[%s132_s0] ss:$0 sm:$0xff]  ;;  %v44_v1 = vld [vmem:[%s132_s0 + $0x1] ss:$0 sm:$0xff]  ;;  %v46_v2 = vld [vmem:[%s132_s0 + $0x2] ss:$0 sm:$0xff] }
   0x2   :  { %5 = vst [vmem:[%s133_s1] sm:$0x3] %v4_v0  ;;  %v48_v3 = vld [vmem:[%s132_s0 + $0x3] ss:$0 sm:$0xff]  ;;  %v50_v4 = vld [vmem:[%s132_s0 + $0x4] ss:$0 sm:$0xff] }
   0x3   :  { %45 = vst [vmem:[%s133_s1 + $0x2] sm:$0x3] %v44_v1  ;;  %v52_v5 = vld [vmem:[%s132_s0 + $0x5] ss:$0 sm:$0xff]  ;;  %v54_v6 = vld [vmem:[%s132_s0 + $0x6] ss:$0 sm:$0xff] }
   0x4   :  { %47 = vst [vmem:[%s133_s1 + $0x4] sm:$0x3] %v46_v2  ;;  %v56_v7 = vld [vmem:[%s132_s0 + $0x7] ss:$0 sm:$0xff]  ;;  %v58_v8 = vld [vmem:[%s132_s0 + $0x8] ss:$0 sm:$0xff] }
   0x5   :  { %49 = vst [vmem:[%s133_s1 + $0x6] sm:$0x3] %v48_v3  ;;  %v60_v9 = vld [vmem:[%s132_s0 + $0x9] ss:$0 sm:$0xff] }
   0x6   :  { %51 = vst [vmem:[%s133_s1 + $0x8] sm:$0x3] %v50_v4 }
   0x7   :  { %53 = vst [vmem:[%s133_s1 + $0xa] sm:$0x3] %v52_v5 }
   0x8   :  { %55 = vst [vmem:[%s133_s1 + $0xc] sm:$0x3] %v54_v6 }
   0x9   :  { %57 = vst [vmem:[%s133_s1 + $0xe] sm:$0x3] %v56_v7 }
   0xa   :  { %59 = vst [vmem:[%s133_s1 + $0x10] sm:$0x3] %v58_v8 }
   0xb   :  { %61 = vst [vmem:[%s133_s1 + $0x12] sm:$0x3] %v60_v9 }

// kernel: tile.5
= control target key start
LH: loop header
LB: loop body
LE: loop exit
PB: predicated region body
PF: predicated region fallthrough
CT: control target
= control target key end

     0   :  { %vm37_vm0 = vcmask 80896   ;;  %vm9_vm1 = vcmask 15360   ;;  %s410_s14 = smov 118   ;;  %s411_s15 = smov 126   ;;  %vm51_vm2 = vcmask 97280   ;;  %vm23_vm3 = vcmask 31744   ;;  %s715_s0 = inlined_call_operand.vmem [shape: f32[34,34], index: 0, kind: input, shape index: {}]   ;;  %s716_s1 = inlined_call_operand.vmem [shape: f32[1156], index: 1, kind: output, shape index: {}]  }
   0x1   :  { %v304_v0 = vld [vmem:[%s715_s0 + $0xb] sm:$0x1]   ;;  %v296_v2 = vld [vmem:[%s715_s0 + $0xf] sm:$0x1]   ;;  %v308_v6 = vld [vmem:[%s715_s0 + $0x1a] sm:$0x1]  }
   0x2   :  { %v305_v1 = vld [vmem:[%s715_s0 + $0xb] sm:$0x1]   ;;  %v297_v4 = vld [vmem:[%s715_s0 + $0xf] sm:$0x1]   ;;  %v309_v7 = vld [vmem:[%s715_s0 + $0x1a] sm:$0x1]  }
   0x3   :  { %v38_v3 = vsel %vm37_vm0, %v305_v1, %v304_v0  ;;  %v10_v5 = vsel %vm9_vm1, %v297_v4, %v296_v2  ;;  %v300_v8 = vld [vmem:[%s715_s0 + $0x1e] sm:$0x1]   ;;  %v312_v10 = vld [vmem:[%s715_s0 + $0x7] sm:$0x1]   ;;  %vm65_vm4 = vcmask 146432   ;;  %v52_v13 = vsel %vm51_vm2, %v309_v7, %v308_v6  ;;  %s412_s28 = smov 110  }
   0x4   :  { %39 = vrot.lane.b32.xlu1 %v38_v3, %s410_s14  ;;  %11 = vrot.lane.b32.xlu0 %v10_v5, %s411_s15  ;;  %v301_v9 = vld [vmem:[%s715_s0 + $0x1e] sm:$0x1]   ;;  %v313_v11 = vld [vmem:[%s715_s0 + $0x7] sm:$0x1]   ;;  %vm79_vm5 = vcmask 162816   ;;  %s413_s4 = smov 116  }
   0x5   :  { %v66_v12 = vsel %vm65_vm4, %v313_v11, %v312_v10  ;;  %v24_v14 = vsel %vm23_vm3, %v301_v9, %v300_v8  ;;  %v316_v15 = vld [vmem:[%s715_s0 + $0x16] sm:$0x1]   ;;  %s414_s5 = smov 124   ;;  %v323_v17 = vld [vmem:[%s715_s0 + $0x12] sm:$0x1]   ;;  %vm106_vm6 = vcmask 228352  }
   0x6   :  { %67 = vrot.lane.b32.xlu2 %v66_v12, %s412_s28  ;;  %v317_v16 = vld [vmem:[%s715_s0 + $0x16] sm:$0x1]   ;;  %v324_v18 = vld [vmem:[%s715_s0 + $0x12] sm:$0x1]   ;;  %v320_v20 = vld [vmem:[%s715_s0 + $0x3] sm:$0x1]  }
   0x7   :  { %v80_v19 = vsel %vm79_vm5, %v317_v16, %v316_v15  ;;  %v321_v21 = vld [vmem:[%s715_s0 + $0x3] sm:$0x1]   ;;  %vm93_vm7 = vcmask 211968   ;;  %v107_v22 = vsel %vm106_vm6, %v324_v18, %v323_v17  ;;  %s415_s14 = smov 108   ;;  %vm27_vm8 = vcmask 244736   ;;  %s416_s19 = smov 100  }
   0x8   :  { %v94_v23 = vsel %vm93_vm7, %v321_v21, %v320_v20  ;;  %v327_v24 = vld [vmem:[%s715_s0 + $0x21] sm:$0x1]   ;;  %s417_s20 = smov 102   ;;  %v333_v27 = vld [vmem:[%s715_s0 + $0x1d] sm:$0x1]   ;;  %s418_s23 = smov 98  }
   0x9   :  { %v328_v25 = vld [vmem:[%s715_s0 + $0x21] sm:$0x1]   ;;  %v331_v28 = vld [vmem:[%s715_s0 + $0xe] sm:$0x1]   ;;  %s419_s26 = smov 90   ;;  %s420_s27 = smov 92  }
   0xa   :  { %v121_v26 = vsel %vm27_vm8, %v328_v25, %v327_v24  ;;  %v335_v29 = vld [vmem:[%s715_s0 + $0xa] sm:$0x1]   ;;  %v339_v30 = vld [vmem:[%s715_s0 + $0x6] sm:$0x1]   ;;  %s421_s3 = smov 84   ;;  %s422_s6 = smov 76  }
   0xb   :  { %v337_v31 = vld [vmem:[%s715_s0 + $0x19] sm:$0x1]   ;;  %s423_s7 = smov 82   ;;  %v341_v32 = vld [vmem:[%s715_s0 + $0x15] sm:$0x1]   ;;  %s424_s12 = smov 74  }
   0xc   :  { %53 = vrot.lane.b32.xlu1 %v52_v13, %s413_s4  ;;  %25 = vrot.lane.b32.xlu0 %v24_v14, %s414_s5  ;;  %v344_v33 = vld [vmem:[%s715_s0 + $0x11] sm:$0x1]   ;;  %v343_v34 = vld [vmem:[%s715_s0 + $0x2] sm:$0x1]   ;;  %s425_s15 = smov 66   ;;  %s426_s16 = smov 68  }
   0xd   :  { %v346_v35 = vld [vmem:[%s715_s0 + $0x20] sm:$0x1]   ;;  %v350_v36 = vld [vmem:[%s715_s0 + $0x1c] sm:$0x1]   ;;  %s427_s21 = smov 64   ;;  %s428_s24 = smov 56  }
   0xe   :  { %81 = vrot.lane.b32.xlu2 %v80_v19, %s415_s14  ;;  %v348_v37 = vld [vmem:[%s715_s0 + $0xd] sm:$0x1]   ;;  %s429_s25 = smov 58   ;;  %v352_v38 = vld [vmem:[%s715_s0 + $0x9] sm:$0x1]   ;;  %s430_s30 = smov 50  }
   0xf   :  { %v356_v39 = vld [vmem:[%s715_s0 + $0x5] sm:$0x1]   ;;  %v354_v40 = vld [vmem:[%s715_s0 + $0x18] sm:$0x1]   ;;  %s431_s4 = smov 42   ;;  %s432_s5 = smov 48  }
  0x10   :  { %v358_v41 = vld [vmem:[%s715_s0 + $0x14] sm:$0x1]   ;;  %v361_v42 = vld [vmem:[%s715_s0 + $0x10] sm:$0x1]   ;;  %s433_s10 = smov 40   ;;  %s434_s13 = smov 32  }
  0x11   :  { %v360_v43 = vld [vmem:[%s715_s0 + $0x1] sm:$0x1]   ;;  %s435_s14 = smov 34   ;;  %v363_v44 = vld [vmem:[%s715_s0 + $0x1f] sm:$0x1]   ;;  %s437_s22 = smov 22  }
  0x12   :  { %v367_v45 = vld [vmem:[%s715_s0 + $0x1b] sm:$0x1]   ;;  %v365_v46 = vld [vmem:[%s715_s0 + $0xc] sm:$0x1]   ;;  %v369_v47 = vld [vmem:[%s715_s0 + $0x8] sm:$0x1]  }
  0x13   :  { %v373_v48 = vld [vmem:[%s715_s0 + $0x4] sm:$0x1]   ;;  %s439_s28 = smov 16   ;;  %v371_v49 = vld [vmem:[%s715_s0 + $0x17] sm:$0x1]   ;;  %s440_s2 = smov 8  }
  0x14   :  { %108 = vrot.lane.b32.xlu1 %v107_v22, %s416_s19  ;;  %95 = vrot.lane.b32.xlu0 %v94_v23, %s417_s20  ;;  %s436_s19 = smov 30   ;;  %v375_v50 = vld [vmem:[%s715_s0 + $0x13] sm:$0x1]   ;;  %vm72_vm9 = vcmask 1048432   ;;  %vm3_vm10 = vcmask 277504   ;;  %vm86_vm11 = vcmask 1048416  }
  0x15   :  { %v2_v52 = vld [vmem:[%s715_s0] sm:$0x1]   ;;  %vm44_vm12 = vcmask 1048496   ;;  %vm69_vm13 = vcmask 130048   ;;  %vm13_vm14 = vcmask 261120   ;;  %vm16_vm15 = vcmask 1048560  }
  0x16   :  { %122 = vrot.lane.b32.xlu2 %v121_v26, %s418_s23  ;;  %s438_s23 = smov 24   ;;  %4 = vst.msk [vmem:[%s716_s1] sm:$0x1] %vm3_vm10, %v2_v52   ;;  %vm41_vm0 = vcmask 195584   ;;  %vm148_vm1 = vcmask 966304   ;;  %vm58_vm2 = vcmask 1048480  }
  0x17   :  { %vm30_vm4 = vcmask 1048544   ;;  %vm55_vm5 = vcmask 179200   ;;  %vm127_vm6 = vcmask 1048336   ;;  %vm110_vm7 = vcmask 48128  }
  0x18   :  { %vm100_vm10 = vcmask 1048368  }
  0x1c   :  { %139 = vrot.lane.b32.xlu1 %v333_v27, %s419_s26  ;;  %132 = vrot.lane.b32.xlu0 %v331_v28, %s420_s27 }
  0x1e   :  { %146 = vrot.lane.b32.xlu2 %v335_v29, %s421_s3  ;;  %s441_s3 = smov 14  }
  0x24   :  { %160 = vrot.lane.b32.xlu1 %v339_v30, %s422_s6  ;;  %153 = vrot.lane.b32.xlu0 %v337_v31, %s423_s7  ;;  %s442_s6 = smov 6  }
  0x26   :  { %167 = vrot.lane.b32.xlu2 %v341_v32, %s424_s12 }
  0x2c   :  { %180 = vrot.lane.b32.xlu1 %v344_v33, %s425_s15  ;;  %174 = vrot.lane.b32.xlu0 %v343_v34, %s426_s16 }
  0x2e   :  { %187 = vrot.lane.b32.xlu2 %v346_v35, %s427_s21 }
  0x34   :  { %201 = vrot.lane.b32.xlu1 %v350_v36, %s428_s24  ;;  %194 = vrot.lane.b32.xlu0 %v348_v37, %s429_s25 }
  0x36   :  { %208 = vrot.lane.b32.xlu2 %v352_v38, %s430_s30 }
  0x3c   :  { %222 = vrot.lane.b32.xlu1 %v356_v39, %s431_s4  ;;  %215 = vrot.lane.b32.xlu0 %v354_v40, %s432_s5 }
  0x3e   :  { %229 = vrot.lane.b32.xlu2 %v358_v41, %s433_s10 }
  0x44   :  { %242 = vrot.lane.b32.xlu1 %v361_v42, %s434_s13  ;;  %236 = vrot.lane.b32.xlu0 %v360_v43, %s435_s14 }
  0x46   :  { %249 = vrot.lane.b32.xlu2 %v363_v44, %s436_s19 }
  0x4c   :  { %263 = vrot.lane.b32.xlu1 %v367_v45, %s437_s22  ;;  %256 = vrot.lane.b32.xlu0 %v365_v46, %s438_s23 }
  0x4e   :  { %270 = vrot.lane.b32.xlu2 %v369_v47, %s439_s28 }
  0x54   :  { %284 = vrot.lane.b32.xlu1 %v373_v48, %s440_s2  ;;  %277 = vrot.lane.b32.xlu0 %v371_v49, %s441_s3 }
  0x56   :  { %291 = vrot.lane.b32.xlu2 %v375_v50, %s442_s6 }
  0x60   :  { %v68_v51 = vpop.permute.xlu2 %67  }
  0x61   :  { %315 = vst.msk [vmem:[%s716_s1 + $0x1] sm:$0x1] %vm72_vm9, %v68_v51   ;;  %vm97_vm9 = vcmask 64512  }
  0x68   :  { %v82_v53 = vpop.permute.xlu2 %81  }
  0x69   :  { %319 = vst.msk [vmem:[%s716_s1 + $0x5] sm:$0x1] %vm86_vm11, %v82_v53   ;;  %vm169_vm11 = vcmask 884304  }
  0x70   :  { %v123_v54 = vpop.permute.xlu2 %122  }
  0x71   :  { %329 = vst.msk [vmem:[%s716_s1 + $0x9] sm:$0x1] %vm23_vm3, %v123_v54   ;;  %vm83_vm3 = vcmask 113664  }
  0x76   :  { %v40_v55 = vpop.permute.xlu1 %39   ;;  %v12_v56 = vpop.permute.xlu0 %11  }
  0x77   :  { %307 = vst.msk [vmem:[%s716_s1 + $0x2] sm:$0x1] %vm44_vm12, %v40_v55   ;;  %vm189_vm12 = vcmask 802304  }
  0x78   :  { %314 = vst.msk [vmem:[%s716_s1 + $0x2] sm:$0x1] %vm69_vm13, %v68_v51   ;;  %v147_v57 = vpop.permute.xlu2 %146   ;;  %vm141_vm13 = vcmask 1015504  }
  0x79   :  { %298 = vst.msk [vmem:[%s716_s1 + $0x4] sm:$0x1] %vm13_vm14, %v12_v56   ;;  %vm134_vm14 = vcmask 1031904  }
  0x7a   :  { %299 = vst.msk [vmem:[%s716_s1 + $0x3] sm:$0x1] %vm16_vm15, %v12_v56   ;;  %vm210_vm15 = vcmask 687504  }
  0x7b   :  { %306 = vst.msk [vmem:[%s716_s1 + $0x3] sm:$0x1] %vm41_vm0, %v40_v55   ;;  %vm162_vm0 = vcmask 900704  }
  0x7c   :  { %336 = vst.msk [vmem:[%s716_s1 + $0x2] sm:$0x1] %vm148_vm1, %v147_v57   ;;  %vm155_vm1 = vcmask 949904  }
  0x7e   :  { %v54_v58 = vpop.permute.xlu1 %53   ;;  %v26_v59 = vpop.permute.xlu0 %25  }
  0x7f   :  { %311 = vst.msk [vmem:[%s716_s1 + $0x6] sm:$0x1] %vm58_vm2, %v54_v58   ;;  %vm231_vm2 = vcmask 605504  }
  0x80   :  { %318 = vst.msk [vmem:[%s716_s1 + $0x6] sm:$0x1] %vm83_vm3, %v82_v53   ;;  %v168_v60 = vpop.permute.xlu2 %167   ;;  %vm182_vm3 = vcmask 818704  }
  0x81   :  { %302 = vst.msk [vmem:[%s716_s1 + $0x8] sm:$0x1] %vm27_vm8, %v26_v59   ;;  %vm113_vm8 = vcmask 1048352  }
  0x82   :  { %303 = vst.msk [vmem:[%s716_s1 + $0x7] sm:$0x1] %vm30_vm4, %v26_v59   ;;  %vm176_vm4 = vcmask 835104  }
  0x83   :  { %310 = vst.msk [vmem:[%s716_s1 + $0x7] sm:$0x1] %vm55_vm5, %v54_v58   ;;  %vm251_vm5 = vcmask 523504  }
  0x84   :  { %330 = vst.msk [vmem:[%s716_s1 + $0x8] sm:$0x1] %vm127_vm6, %v123_v54   ;;  %vm203_vm6 = vcmask 736704  }
  0x86   :  { %v109_v61 = vpop.permute.xlu1 %108   ;;  %v96_v62 = vpop.permute.xlu0 %95  }
  0x87   :  { %325 = vst.msk [vmem:[%s716_s1 + $0x5] sm:$0x1] %vm110_vm7, %v109_v61   ;;  %vm196_vm7 = vcmask 753104  }
  0x88   :  { %326 = vst.msk [vmem:[%s716_s1 + $0x4] sm:$0x1] %vm113_vm8, %v109_v61   ;;  %v188_v63 = vpop.permute.xlu2 %187   ;;  %vm272_vm8 = vcmask 408704  }
  0x89   :  { %322 = vst.msk [vmem:[%s716_s1 + $0x1] sm:$0x1] %vm97_vm9, %v96_v62   ;;  %vm224_vm9 = vcmask 621904  }
  0x8a   :  { %101 = vst.msk [vmem:[%s716_s1] sm:$0x1] %vm100_vm10, %v96_v62   ;;  %vm217_vm10 = vcmask 671104  }
  0x8b   :  { %342 = vst.msk [vmem:[%s716_s1 + $0x5] sm:$0x1] %vm169_vm11, %v168_v60   ;;  %vm293_vm11 = vcmask 326704  }
  0x8c   :  { %347 = vst.msk [vmem:[%s716_s1 + $0x8] sm:$0x1] %vm189_vm12, %v188_v63   ;;  %vm244_vm12 = vcmask 539904  }
  0x8e   :  { %v140_v0 = vpop.permute.xlu1 %139   ;;  %v133_v1 = vpop.permute.xlu0 %132  }
  0x8f   :  { %334 = vst.msk [vmem:[%s716_s1 + $0x7] sm:$0x1] %vm141_vm13, %v140_v0   ;;  %vm238_vm13 = vcmask 556304  }
  0x90   :  { %332 = vst.msk [vmem:[%s716_s1 + $0x3] sm:$0x1] %vm134_vm14, %v133_v1   ;;  %v209_v2 = vpop.permute.xlu2 %208   ;;  %vm265_vm14 = vcmask 457904  }
  0x91   :  { %353 = vst.msk [vmem:[%s716_s1 + $0x2] sm:$0x1] %vm210_vm15, %v209_v2   ;;  %vm258_vm15 = vcmask 474304  }
  0x96   :  { %v161_v3 = vpop.permute.xlu1 %160   ;;  %v154_v4 = vpop.permute.xlu0 %153  }
  0x97   :  { %340 = vst.msk [vmem:[%s716_s1 + $0x1] sm:$0x1] %vm162_vm0, %v161_v3   ;;  %vm286_vm0 = vcmask 343104  }
  0x98   :  { %338 = vst.msk [vmem:[%s716_s1 + $0x6] sm:$0x1] %vm155_vm1, %v154_v4   ;;  %v230_v5 = vpop.permute.xlu2 %229   ;;  %vm279_vm1 = vcmask 392304  }
  0x99   :  { %359 = vst.msk [vmem:[%s716_s1 + $0x5] sm:$0x1] %vm231_vm2, %v230_v5  }
  0x9e   :  { %v181_v6 = vpop.permute.xlu1 %180   ;;  %v175_v7 = vpop.permute.xlu0 %174  }
  0x9f   :  { %345 = vst.msk [vmem:[%s716_s1 + $0x4] sm:$0x1] %vm182_vm3, %v181_v6  }
  0xa0   :  { %177 = vst.msk [vmem:[%s716_s1] sm:$0x1] %vm176_vm4, %v175_v7   ;;  %v250_v8 = vpop.permute.xlu2 %249  }
  0xa1   :  { %364 = vst.msk [vmem:[%s716_s1 + $0x8] sm:$0x1] %vm251_vm5, %v250_v8  }
  0xa6   :  { %v202_v9 = vpop.permute.xlu1 %201   ;;  %v195_v10 = vpop.permute.xlu0 %194  }
  0xa7   :  { %351 = vst.msk [vmem:[%s716_s1 + $0x7] sm:$0x1] %vm203_vm6, %v202_v9  }
  0xa8   :  { %349 = vst.msk [vmem:[%s716_s1 + $0x3] sm:$0x1] %vm196_vm7, %v195_v10   ;;  %v271_v11 = vpop.permute.xlu2 %270  }
  0xa9   :  { %370 = vst.msk [vmem:[%s716_s1 + $0x2] sm:$0x1] %vm272_vm8, %v271_v11  }
  0xae   :  { %v223_v12 = vpop.permute.xlu1 %222   ;;  %v216_v13 = vpop.permute.xlu0 %215  }
  0xaf   :  { %357 = vst.msk [vmem:[%s716_s1 + $0x1] sm:$0x1] %vm224_vm9, %v223_v12  }
  0xb0   :  { %355 = vst.msk [vmem:[%s716_s1 + $0x6] sm:$0x1] %vm217_vm10, %v216_v13   ;;  %v292_v14 = vpop.permute.xlu2 %291  }
  0xb1   :  { %376 = vst.msk [vmem:[%s716_s1 + $0x5] sm:$0x1] %vm293_vm11, %v292_v14  }
  0xb6   :  { %v243_v15 = vpop.permute.xlu1 %242   ;;  %v237_v16 = vpop.permute.xlu0 %236  }
  0xb7   :  { %362 = vst.msk [vmem:[%s716_s1 + $0x4] sm:$0x1] %vm244_vm12, %v243_v15  }
  0xb8   :  { %239 = vst.msk [vmem:[%s716_s1] sm:$0x1] %vm238_vm13, %v237_v16  }
  0xbe   :  { %v264_v17 = vpop.permute.xlu1 %263   ;;  %v257_v18 = vpop.permute.xlu0 %256  }
  0xbf   :  { %368 = vst.msk [vmem:[%s716_s1 + $0x7] sm:$0x1] %vm265_vm14, %v264_v17  }
  0xc0   :  { %366 = vst.msk [vmem:[%s716_s1 + $0x3] sm:$0x1] %vm258_vm15, %v257_v18  }
  0xc6   :  { %v285_v19 = vpop.permute.xlu1 %284   ;;  %v278_v20 = vpop.permute.xlu0 %277  }
  0xc7   :  { %374 = vst.msk [vmem:[%s716_s1 + $0x1] sm:$0x1] %vm286_vm0, %v285_v19  }
  0xc8   :  { %372 = vst.msk [vmem:[%s716_s1 + $0x6] sm:$0x1] %vm279_vm1, %v278_v20  }

// kernel: tile.7
= control target key start
LH: loop header
LB: loop body
LE: loop exit
PB: predicated region body
PF: predicated region fallthrough
CT: control target
= control target key end

     0   :  { %vm49_vm0 = vcmask 1047556   ;;  %vm64_vm1 = vcmask 1014784   ;;  %s116_s27 = smov 4   ;;  %vm44_vm2 = vcmask 31744   ;;  %vm71_vm3 = vcmask 64544   ;;  %s186_s0 = inlined_call_operand.vmem [shape: f32[2,1156], index: 0, kind: input, shape index: {}]   ;;  %s187_s1 = inlined_call_operand.vmem [shape: f32[2312], index: 1, kind: output, shape index: {}]  }
   0x1   :  { %v99_v0 = vld [vmem:[%s186_s0 + $0x12] sm:$0x3]  ;;  %v101_v1 = vld [vmem:[%s186_s0 + $0xe] sm:$0x3]  ;;  %v102_v2 = vld [vmem:[%s186_s0 + $0xc] sm:$0x3] }
   0x2   :  { %7 = vst [vmem:[#allocation0 + $0x48] sm:$0x3] %v99_v0  ;;  %v103_v3 = vld [vmem:[%s186_s0 + $0xa] sm:$0x3]  ;;  %v104_v4 = vld [vmem:[%s186_s0 + $0x8] sm:$0x3] }
   0x3   :  { %15 = vst [vmem:[#allocation0 + $0x38] sm:$0x3] %v101_v1  ;;  %v105_v5 = vld [vmem:[%s186_s0 + $0x6] sm:$0x3]  ;;  %v106_v6 = vld [vmem:[%s186_s0 + $0x4] sm:$0x3] }
   0x4   :  { %19 = vst [vmem:[#allocation0 + $0x30] sm:$0x3] %v102_v2  ;;  %v107_v7 = vld [vmem:[%s186_s0 + $0x2] sm:$0x3]  ;;  %v40_v8 = vld [vmem:[%s186_s0] sm:$0x3] }
   0x5   :  { %23 = vst [vmem:[#allocation0 + $0x28] sm:$0x3] %v103_v3  ;;  %v100_v9 = vld [vmem:[%s186_s0 + $0x10] sm:$0x3]  ;;  %vm89_vm4 = vcmask 1047584  }
   0x6   :  { %27 = vst [vmem:[#allocation0 + $0x20] sm:$0x3] %v104_v4 }
   0x7   :  { %31 = vst [vmem:[#allocation0 + $0x18] sm:$0x3] %v105_v5 }
   0x8   :  { %35 = vst [vmem:[#allocation0 + $0x10] sm:$0x3] %v106_v6 }
   0x9   :  { %39 = vst [vmem:[#allocation0 + $0x8] sm:$0x3] %v107_v7  ;;  %v63_v12 = vld [vmem:[#allocation0 + $0x49] sm:$0x1]   ;;  %v43_v25 = vld [vmem:[#allocation0 + $0x48] sm:$0x1]  }
   0xa   :  { %41 = vst [vmem:[#allocation0] sm:$0x3] %v40_v8 }
   0xb   :  { %11 = vst [vmem:[#allocation0 + $0x40] sm:$0x3] %v100_v9 }
   0xc   :  { %108 = vst.msk [vmem:[%s187_s1 + $0x9] sm:$0x1] %vm44_vm2, %v43_v25  }
   0xd   :  { %v48_v10 = vld [vmem:[#allocation0] ss:$8 sm:$0xf0]   ;;  %v59_v11 = vld [vmem:[#allocation0 + $0x1] ss:$8 sm:$0xf0]  }
   0xe   :  { %v79_v21 = vld [vmem:[#allocation0 + $0x1] ss:$8 sm:$0xf0]  }
  0x11   :  { %v47_v13 = vld [vmem:[#allocation0] ss:$8 sm:$0xf]   ;;  %v57_v14 = vld [vmem:[#allocation0 + $0x1] ss:$8 sm:$0xf]  }
  0x12   :  { %v50_v15 = vsel %vm49_vm0, %v48_v10, %v47_v13  ;;  %v61_v16 = vsel %vm49_vm0, %v59_v11, %v57_v14  ;;  %v93_v17 = vld [vmem:[#allocation0 + $0x41] sm:$0x1]   ;;  %v53_v18 = vld [vmem:[#allocation0 + $0x40] sm:$0x1]  }
  0x13   :  { %51 = vst [vmem:[%s187_s1] sm:$0xff] %v50_v15   ;;  %v65_v19 = vsel %vm64_vm1, %v63_v12, %v61_v16  ;;  %94 = vrot.lane.b32.xlu1 %v93_v17, %s116_s27  ;;  %v77_v20 = vld [vmem:[#allocation0 + $0x1] ss:$8 sm:$0xf]  }
  0x14   :  { %66 = vrot.lane.b32.xlu0 %v65_v19, %s116_s27  ;;  %109 = vst [vmem:[%s187_s1 + $0x8] sm:$0x1] %v53_v18   ;;  %v75_v22 = vld [vmem:[#allocation0 + $0x41] sm:$0x1]   ;;  %v81_v23 = vsel %vm49_vm0, %v79_v21, %v77_v20 }
  0x15   :  { %v83_v24 = vsel %vm64_vm1, %v81_v23, %v75_v22 }
  0x1c   :  { %84 = vrot.lane.b32.xlu0 %v83_v24, %s116_s27 }
  0x85   :  { %v95_v26 = vpop.permute.xlu1 %94  }
  0x86   :  { %v67_v27 = vpop.permute.xlu0 %66  }
  0x87   :  { %110 = vst.msk [vmem:[%s187_s1 + $0xa] sm:$0xff] %vm44_vm2, %v67_v27  }
  0x88   :  { %111 = vst.msk [vmem:[%s187_s1 + $0x12] sm:$0x1] %vm71_vm3, %v67_v27  }
  0x89   :  { %114 = vst.msk [vmem:[%s187_s1 + $0x11] sm:$0x1] %vm89_vm4, %v95_v26  }
  0x8e   :  { %v85_v28 = vpop.permute.xlu0 %84  }
  0x8f   :  { %112 = vst.msk [vmem:[%s187_s1 + $0x12] sm:$0x1] %vm44_vm2, %v85_v28  }
  0x90   :  { %113 = vst.msk [vmem:[%s187_s1 + $0x9] sm:$0xff] %vm89_vm4, %v85_v28  }

// kernel: upsample_forward.7
= control target key start
LH: loop header
LB: loop body
LE: loop exit
PB: predicated region body
PF: predicated region fallthrough
CT: control target
= control target key end

     0   :  { %s379_s9 = smov 0   ;;  %s381_s10 = smov 0   ;;  %s432_s0 = inlined_call_operand.vmem [shape: bf16[16,8], index: 0, kind: input, shape index: {}]   ;;  %s433_s1 = inlined_call_operand.vmem [shape: bf16[8,512], index: 1, kind: input, shape index: {}]   ;;  %s434_s2 = inlined_call_operand.vmem [shape: bf16[16,512], index: 2, kind: output, shape index: {}]  }
   0x1   :  { %s383_s11 = smov 0  }
   0x2 LB: > { %s392_s12 = sadd.s32 4294967295, %s362_s11   ;;  %s394_s13 = sadd.s32 1, %s362_s11   ;;  %s362_s11 = sphi %s383_s11, %s438_s11   ;;  %s358_s10 = sphi %s381_s10, %s437_s10   ;;  %s354_s9 = sphi %s379_s9, %s436_s9  }
   0x3   : > { %s63_s14 = ssub.s32 %s362_s11, %s394_s13  ;;  %s66_s15 = sadd.s32 1, %s358_s10 }
   0x4   : > { %p64_p0 = scmp.eq.s32.totalorder %s63_s14, 0  ;;  %p76_p1 = scmp.ne.s32.totalorder %s358_s10, %s354_s9 }
   0x5   : > { %p77_p2 = scmp.eq.s32.totalorder %s392_s12, 1  ;;  %p299_p3 = scmp.ge.s32.totalorder %s362_s11, 1 }
   0x6   : > { %s402_s16 = scalar_select %p64_p0, %s358_s10, %s66_s15  }
   0x7   : > { %p404_p4 = por %p77_p2, %p76_p1  ;;  %p113_p5 = scmp.lt.s32.totalorder %s362_s11, 3 }
   0x9   : > { %p114_p6 = pnand %p299_p3, %p113_p5 }
   0xa   : > { %s301_s18 = sshll.u32 (!%p114_p6), %s392_s12, 1  ;;  %s131_s25 = sand.u32 (!%p114_p6), 1, %s354_s9  }
   0xb   : > { %117 = sbr.rel (%p114_p6) target bundleno = 173 (0xad), region = 28  ;;  %p135_p7 = scmp.lt.s32.totalorder (!%p114_p6), %s301_s18, 3 }
   0xc   : > { %s300_s26 = sshll.u32 (!%p114_p6), %s131_s25, 4 }
   0xd   : > { %s133_s27 = scalar_lea.vmem (!%p114_p6), [#allocation2], %s300_s26 }
  0x10   : > { %s440_s18 = smov (!%p135_p7, %s301_s18), 3  ;;  %vm159_vm0 = vcmask 1043456   ;;  %v314_v7 = vld [vmem:[%s432_s0] sm:$0xff]  ;;  %vm155_vm1 = vcmask 64512   ;;  %s315_s28 = sshll.u32 (%p404_p4), %s392_s12, 3 }
  0x11   : > { %s302_s19 = sshll.u32 %s440_s18, 2  ;;  %s207_s3 = scalar_lea.vmem (%p404_p4), %s434_s2, %s315_s28 }
  0x12   : > { %s138_s22 = scalar_lea.vmem %s433_s1, %s302_s19 }
  0x13   : > { %v144_v0 = vld [vmem:[%s138_s22] sm:$0xff] }
  0x14   : > { %v151_v1 = vunpack.c.l.b16 %v144_v0  ;;  %v152_v2 = vunpack.c.h.b16 %v144_v0 }
  0x16   : > { %v153_v3 = vpack.c.b16 %v151_v1, %v151_v1  ;;  %v154_v4 = vpack.c.b16 %v152_v2, %v152_v2 }
  0x18   : > { %v161_v5 = vsel %vm159_vm0, %v153_v3, 0  ;;  %v164_v6 = vsel %vm159_vm0, %v154_v4, 0 }
  0x19   : > { %173 = vmatpush.bf16.msra.mxu0 %v161_v5  ;;  %187 = vmatpush.bf16.msra.mxu1 %v164_v6 }
  0x1c   : > { %307 = vmatmul.msk.bf16.vlgmr.msra.gmra.mxu0 %vm155_vm1, %v314_v7  ;;  %308 = vmatmul.msk.bf16.vlgmr.msra.gmra.mxu1 %vm155_vm1, %v314_v7 }
  0x99   : > { %v175_v8 = vpop.f32.mrf.mxu0  ;;  %v189_v9 = vpop.f32.mrf.mxu1 }
  0x9a   : > { %v194_v10 = vpack.c.bf16 %v189_v9, %v175_v8 }
  0x9c   : > { %196 = vst [vmem:[%s133_s27] sm:$0xff] %v194_v10 }
  0xa0   : > { %204 = sbr.rel (!%p404_p4) target bundleno = 173 (0xad), region = 32 }
  0xa1   : > { %v177_v11 = vpop.f32.mrf.mxu0  ;;  %v191_v12 = vpop.f32.mrf.mxu1 }
  0xa2   : > { %v195_v13 = vpack.c.bf16 %v191_v12, %v177_v11 }
  0xa3   : > { %v238_v14 = vld [vmem:[%s133_s27] sm:$0xff] (%p404_p4) }
  0xa4   : > { %197 = vst [vmem:[%s133_s27 + $0x8] sm:$0xff] %v195_v13 }
  0xa5   : > { %239 = vst [vmem:[%s207_s3] sm:$0xff] %v238_v14 }
  0xab   : > { %v240_v15 = vld [vmem:[%s133_s27 + $0x8] sm:$0xff] }
  0xac   : > { %241 = vst [vmem:[%s207_s3 + $0x10] sm:$0xff] %v240_v15 }
  0xad PF: > { %p9_p8 = scmp.ge.s32.totalorder %s394_s13, 4   ;;  %s436_s9 = smov %s358_s10 }
  0xae   : > { %s437_s10 = smov %s402_s16  ;;  %s438_s11 = smov %s394_s13 }
  0xaf   :  { %11 = sbr.rel (!%p9_p8) target bundleno = 2 (0x2), region = 96 }

// kernel: upsample_forward.8
= control target key start
LH: loop header
LB: loop body
LE: loop exit
PB: predicated region body
PF: predicated region fallthrough
CT: control target
= control target key end

     0   :  { %s725_s18 = smov 0   ;;  %s826_s0 = inlined_call_operand.vmem [shape: bf16[4,4], index: 0, kind: input, shape index: {}]   ;;  %s827_s1 = inlined_call_operand.vmem [shape: bf16[4,5120], index: 1, kind: input, shape index: {}]   ;;  %s828_s2 = inlined_call_operand.vmem [shape: f32[4,1], index: 2, kind: input, shape index: {}]   ;;  %s829_s3 = inlined_call_operand.vmem [shape: f32[1,5120], index: 3, kind: input, shape index: {}]   ;;  %s830_s4 = inlined_call_operand.vmem [shape: bf16[4,5120], index: 4, kind: input, shape index: {}]   ;;  %s831_s5 = inlined_call_operand.vmem [shape: bf16[4,5120], index: 5, kind: output, shape index: {}]  }
   0x1 LB: > { %s656_s19 = sadd.s32 4294967295, %s692_s18   ;;  %p660_p0 = scmp.ge.s32.totalorder %s692_s18, 1  ;;  %s692_s18 = sphi %s725_s18, %s15_s18  }
   0x2   : > { %p209_p1 = scmp.lt.s32.totalorder %s692_s18, 5 }
   0x4   : > { %p210_p2 = pnand %p660_p0, %p209_p1 }
   0x5   : > { %s246_s20 = smul.u32 (!%p210_p2), 10, %s656_s19 }
   0x6   : > { %213 = sbr.rel (%p210_p2) target bundleno = 198 (0xc6), region = 40 }
   0x7   : > { %p247_p3 = scmp.lt.s32.totalorder (!%p210_p2), %s246_s20, 39 }
   0xb   : > { %v694_v0 = vmov 0   ;;  %v274_v1 = vld [vmem:[%s828_s2] sm:$0xf]  ;;  %s833_s20 = smov (!%p247_p3, %s246_s20), 39  ;;  %vm301_vm0 = vcmask 1041408   ;;  %vm297_vm1 = vcmask 31744  }
   0xc   : > { %685 = vset.pattern.permute.xlu0 %v694_v0  ;;  %s739_s23 = sshll.u32 %s833_s20, 1  ;;  %v270_v10 = vld [vmem:[%s826_s0] sm:$0x3]  ;;  %s781_s9 = scalar_lea.vmem %s829_s3, %s833_s20  ;;  %vm557_vm2 = vcmask 1045508   ;;  %vm561_vm3 = vcmask 1043456  }
   0xd   : > { %277 = vperm.xlu0 %685, %v274_v1   ;;  %s250_s26 = scalar_lea.vmem %s827_s1, %s739_s23  ;;  %s749_s29 = scalar_lea.vmem %s830_s4, %s739_s23  ;;  %v784_v36 = vld [vmem:[%s781_s9] sm:$0xff] }
   0xe   : > { %v271_v2 = vld [vmem:[%s250_s26] sm:$0xff]  ;;  %v272_v3 = vld [vmem:[%s250_s26 + $0x8] sm:$0xff]  ;;  %v273_v5 = vld [vmem:[%s250_s26 + $0x10] sm:$0xf]  ;;  %v456_v38 = vperm.slane %v784_v36, 0  ;;  %v457_v39 = vperm.slane %v784_v36, 1  ;;  %s804_s12 = scalar_lea.vmem %s831_s5, %s739_s23 }
   0xf   : > { %281 = vst [vmem:[#allocation1] ss:$4 sm:$0xff] %v271_v2  ;;  %v487_v4 = vld [vmem:[%s749_s29 + $0x8] sm:$0xff]  ;;  %v486_v6 = vld [vmem:[%s749_s29] sm:$0xff]  ;;  %v488_v32 = vld [vmem:[%s749_s29 + $0x10] sm:$0xf] }
  0x10   : > { %284 = vst [vmem:[#allocation1 + $0x20] ss:$4 sm:$0xff] %v272_v3  ;;  %v490_v9 = vunpack.c.h.bf16 %v486_v6  ;;  %v491_v14 = vunpack.c.l.bf16 %v487_v4  ;;  %v492_v19 = vunpack.c.h.bf16 %v487_v4  ;;  %v489_v26 = vunpack.c.l.bf16 %v486_v6 }
  0x11   : > { %v493_v33 = vunpack.c.l.bf16 %v488_v32  ;;  %v458_v46 = vperm.slane %v784_v36, 2  ;;  %v459_v50 = vperm.slane %v784_v36, 3  ;;  %v460_v2 = vperm.slane %v784_v36, 4 }
  0x16   : > { %v285_v7 = vld.sshfl [vmem:[#allocation1] sm:$0xff pattern:$0x73625140]  ;;  %v286_v8 = vld.sshfl [vmem:[#allocation1 + $0x8] sm:$0xff pattern:$0x73625140] }
  0x17   : > { %v302_v11 = vsel %vm301_vm0, %v285_v7, 0  ;;  %v304_v12 = vsel %vm301_vm0, %v286_v8, 0  ;;  %v287_v13 = vld.sshfl [vmem:[#allocation1 + $0x10] sm:$0xff pattern:$0x73625140] }
  0x18   : > { %329 = vmatpush.bf16.msra.mxu0 %v302_v11  ;;  %342 = vmatpush.bf16.msra.mxu1 %v304_v12  ;;  %v306_v15 = vsel %vm301_vm0, %v287_v13, 0  ;;  %v288_v16 = vld.sshfl [vmem:[#allocation1 + $0x18] sm:$0xff pattern:$0x73625140] }
  0x19   : > { %355 = vmatpush.bf16.msra.mxu2 %v306_v15  ;;  %294 = vst [vmem:[#allocation1] ss:$4 sm:$0xff] %v273_v5  ;;  %v308_v17 = vsel %vm301_vm0, %v288_v16, 0  ;;  %v289_v18 = vld.sshfl [vmem:[#allocation1 + $0x20] sm:$0xff pattern:$0x73625140] }
  0x1a   : > { %368 = vmatpush.bf16.msra.mxu3 %v308_v17  ;;  %501 = vst [vmem:[#allocation1 + $0x10] ss:$2 sm:$0xff] %v490_v9  ;;  %v310_v20 = vsel %vm301_vm0, %v289_v18, 0  ;;  %v290_v21 = vld.sshfl [vmem:[#allocation1 + $0x28] sm:$0xff pattern:$0x73625140] }
  0x1b   : > { %664 = vmatmul.msk.bf16.vlgmr.msra.gmra.mxu0 %vm297_vm1, %v270_v10  ;;  %665 = vmatmul.msk.bf16.vlgmr.msra.gmra.mxu1 %vm297_vm1, %v270_v10  ;;  %v312_v22 = vsel %vm301_vm0, %v290_v21, 0  ;;  %503 = vst [vmem:[#allocation1 + $0x20] ss:$2 sm:$0xff] %v491_v14  ;;  %v291_v23 = vld.sshfl [vmem:[#allocation1 + $0x30] sm:$0xff pattern:$0x73625140] }
  0x1c   : > { %666 = vmatmul.msk.bf16.vlgmr.msra.gmra.mxu2 %vm297_vm1, %v270_v10  ;;  %381 = vmatpush.bf16.msrb.mxu0 %v310_v20  ;;  %v314_v24 = vsel %vm301_vm0, %v291_v23, 0  ;;  %v292_v25 = vld.sshfl [vmem:[#allocation1 + $0x38] sm:$0xff pattern:$0x73625140]  ;;  %v461_v5 = vperm.slane %v784_v36, 5  ;;  %v462_v18 = vperm.slane %v784_v36, 6 }
  0x1d   : > { %667 = vmatmul.msk.bf16.vlgmr.msra.gmra.mxu3 %vm297_vm1, %v270_v10  ;;  %394 = vmatpush.bf16.msrb.mxu1 %v312_v22  ;;  %v316_v27 = vsel %vm301_vm0, %v292_v25, 0  ;;  %505 = vst [vmem:[#allocation1 + $0x30] ss:$2 sm:$0xff] %v492_v19  ;;  %v463_v22 = vperm.slane %v784_v36, 7 }
  0x1e   : > { %407 = vmatpush.bf16.msrb.mxu2 %v314_v24  ;;  %420 = vmatpush.bf16.msrb.mxu3 %v316_v27 }
  0x20   : > { %v295_v28 = vld.sshfl [vmem:[#allocation1] sm:$0xff pattern:$0x73625140]  ;;  %v296_v29 = vld.sshfl [vmem:[#allocation1 + $0x8] sm:$0xff pattern:$0x73625140] }
  0x21   : > { %v318_v30 = vsel %vm301_vm0, %v295_v28, 0  ;;  %v320_v31 = vsel %vm301_vm0, %v296_v29, 0  ;;  %499 = vst [vmem:[#allocation1] ss:$2 sm:$0xff] %v489_v26 }
  0x22   : > { %433 = vmatpush.bf16.msra.mxu0 %v318_v30  ;;  %446 = vmatpush.bf16.msra.mxu1 %v320_v31  ;;  %v508_v54 = vld.sshfl [vmem:[#allocation1 + $0x10] sm:$0xff pattern:$0x75316420]  ;;  %v509_v58 = vld.sshfl [vmem:[#allocation1 + $0x18] sm:$0xff pattern:$0x75316420] }
  0x23   : > { %v510_v15 = vld.sshfl [vmem:[#allocation1 + $0x20] sm:$0xff pattern:$0x75316420]  ;;  %v511_v17 = vld.sshfl [vmem:[#allocation1 + $0x28] sm:$0xff pattern:$0x75316420] }
  0x24   : > { %v512_v26 = vld.sshfl [vmem:[#allocation1 + $0x30] sm:$0xff pattern:$0x75316420]  ;;  %v513_v30 = vld.sshfl [vmem:[#allocation1 + $0x38] sm:$0xff pattern:$0x75316420] }
  0x28   : > { %v506_v34 = vld.sshfl [vmem:[#allocation1] sm:$0xff pattern:$0x75316420]  ;;  %v507_v35 = vld.sshfl [vmem:[#allocation1 + $0x8] sm:$0xff pattern:$0x75316420] }
  0x29   : > { %514 = vst [vmem:[#allocation1] ss:$2 sm:$0xff] %v493_v33 }
  0x2b   : > { %668 = vmatmul.msk.bf16.vlgmr.msrb.gmra.mxu0 %vm297_vm1, %v270_v10  ;;  %669 = vmatmul.msk.bf16.vlgmr.msrb.gmra.mxu1 %vm297_vm1, %v270_v10 }
  0x2c   : > { %670 = vmatmul.msk.bf16.vlgmr.msrb.gmra.mxu2 %vm297_vm1, %v270_v10 }
  0x2d   : > { %671 = vmatmul.msk.bf16.vlgmr.msrb.gmra.mxu3 %vm297_vm1, %v270_v10 }
  0x3b   : > { %672 = vmatmul.msk.bf16.vlgmr.msra.gmra.mxu0 %vm297_vm1, %v270_v10  ;;  %673 = vmatmul.msk.bf16.vlgmr.msra.gmra.mxu1 %vm297_vm1, %v270_v10 }
  0x7f   : > { %v786_v37 = vpop.permute.xlu0 %277 }
  0x98   : > { %v331_v40 = vpop.f32.mrf.mxu0  ;;  %v344_v41 = vpop.f32.mrf.mxu1 }
  0x99   : > { %v332_v42 = vadd.f32 %v331_v40, %v786_v37  ;;  %v345_v43 = vadd.f32 %v344_v41, %v786_v37 }
  0x9b   : > { %v476_v44 = vmul.f32 %v456_v38, %v332_v42  ;;  %v477_v45 = vmul.f32 %v457_v39, %v345_v43 }
  0x9d   : > { %v527_v47 = vadd.f32 %v506_v34, %v476_v44  ;;  %v528_v48 = vadd.f32 %v507_v35, %v477_v45  ;;  %v453_v34 = vld [vmem:[%s781_s9 + $0x8] sm:$0x3] }
  0x9e   : > { %v464_v41 = vperm.slane %v453_v34, 0  ;;  %v465_v43 = vperm.slane %v453_v34, 1 }
  0x9f   : > { %v357_v49 = vpop.f32.mrf.mxu2  ;;  %v537_v59 = vpack.c.bf16 %v528_v48, %v527_v47  ;;  %v515_v48 = vld.sshfl [vmem:[#allocation1] sm:$0xff pattern:$0x75316420] }
  0xa0   : > { %v358_v51 = vadd.f32 %v357_v49, %v786_v37  ;;  %v370_v52 = vpop.f32.mrf.mxu3  ;;  %v333_v53 = vpop.f32.mrf.mxu0 }
  0xa1   : > { %v371_v55 = vadd.f32 %v370_v52, %v786_v37  ;;  %v346_v56 = vpop.f32.mrf.mxu1  ;;  %v547_v63 = vrot.slane %v537_v59, 2  ;;  %v516_v53 = vld.sshfl [vmem:[#allocation1 + $0x8] sm:$0xff pattern:$0x75316420] }
  0xa2   : > { %v478_v57 = vmul.f32 %v458_v46, %v358_v51 }
  0xa3   : > { %v479_v60 = vmul.f32 %v459_v50, %v371_v55  ;;  %v556_v11 = vsel %vm301_vm0, %v537_v59, %v547_v63 }
  0xa4   : > { %v529_v61 = vadd.f32 %v508_v54, %v478_v57 }
  0xa5   : > { %v530_v62 = vadd.f32 %v509_v58, %v479_v60 }
  0xa7   : > { %v538_v0 = vpack.c.bf16 %v530_v62, %v529_v61  ;;  %v359_v1 = vpop.f32.mrf.mxu2 }
  0xa8   : > { %v372_v3 = vpop.f32.mrf.mxu3  ;;  %v383_v4 = vpop.f32.mrf.mxu0 }
  0xa9   : > { %v548_v6 = vrot.slane %v538_v0, 4  ;;  %v549_v7 = vrot.slane %v538_v0, 6  ;;  %v384_v8 = vadd.f32 %v383_v4, %v786_v37  ;;  %v396_v9 = vpop.f32.mrf.mxu1 }
  0xaa   : > { %v397_v10 = vadd.f32 %v396_v9, %v786_v37 }
  0xab   : > { %v560_v12 = vsel %vm557_vm2, %v548_v6, %v549_v7  ;;  %v480_v13 = vmul.f32 %v460_v2, %v384_v8 }
  0xac   : > { %v562_v14 = vsel %vm561_vm3, %v556_v11, %v560_v12  ;;  %v481_v16 = vmul.f32 %v461_v5, %v397_v10 }
  0xad   : > { %576 = vst [vmem:[%s804_s12] sm:$0xff] %v562_v14  ;;  %v531_v19 = vadd.f32 %v510_v15, %v480_v13 }
  0xae   : > { %v532_v20 = vadd.f32 %v511_v17, %v481_v16 }
  0xaf   : > { %v409_v21 = vpop.f32.mrf.mxu2 }
  0xb0   : > { %v410_v23 = vadd.f32 %v409_v21, %v786_v37  ;;  %v422_v24 = vpop.f32.mrf.mxu3  ;;  %v385_v25 = vpop.f32.mrf.mxu0  ;;  %v539_v31 = vpack.c.bf16 %v532_v20, %v531_v19 }
  0xb1   : > { %v423_v27 = vadd.f32 %v422_v24, %v786_v37  ;;  %v398_v28 = vpop.f32.mrf.mxu1 }
  0xb2   : > { %v482_v29 = vmul.f32 %v462_v18, %v410_v23  ;;  %v550_v38 = vrot.slane %v539_v31, 2 }
  0xb3   : > { %v483_v32 = vmul.f32 %v463_v22, %v423_v27 }
  0xb4   : > { %v533_v33 = vadd.f32 %v512_v26, %v482_v29  ;;  %v565_v50 = vsel %vm301_vm0, %v539_v31, %v550_v38 }
  0xb5   : > { %v534_v35 = vadd.f32 %v513_v30, %v483_v32 }
  0xb7   : > { %v540_v39 = vpack.c.bf16 %v534_v35, %v533_v33  ;;  %v411_v40 = vpop.f32.mrf.mxu2 }
  0xb8   : > { %v424_v36 = vpop.f32.mrf.mxu3  ;;  %v435_v42 = vpop.f32.mrf.mxu0 }
  0xb9   : > { %v551_v44 = vrot.slane %v540_v39, 4  ;;  %v552_v45 = vrot.slane %v540_v39, 6  ;;  %v436_v46 = vadd.f32 %v435_v42, %v786_v37  ;;  %v448_v47 = vpop.f32.mrf.mxu1 }
  0xba   : > { %v449_v49 = vadd.f32 %v448_v47, %v786_v37 }
  0xbb   : > { %v568_v51 = vsel %vm557_vm2, %v551_v44, %v552_v45  ;;  %v484_v52 = vmul.f32 %v464_v41, %v436_v46 }
  0xbc   : > { %v569_v54 = vsel %vm561_vm3, %v565_v50, %v568_v51  ;;  %v485_v55 = vmul.f32 %v465_v43, %v449_v49 }
  0xbd   : > { %v535_v56 = vadd.f32 %v515_v48, %v484_v52  ;;  %577 = vst [vmem:[%s804_s12 + $0x8] sm:$0xff] %v569_v54 }
  0xbe   : > { %v536_v57 = vadd.f32 %v516_v53, %v485_v55 }
  0xc0   : > { %v541_v58 = vpack.c.bf16 %v536_v57, %v535_v56  ;;  %v437_v59 = vpop.f32.mrf.mxu0 }
  0xc1   : > { %v450_v60 = vpop.f32.mrf.mxu1 }
  0xc2   : > { %v553_v61 = vrot.slane %v541_v58, 2 }
  0xc4   : > { %v572_v62 = vsel %vm301_vm0, %v541_v58, %v553_v61 }
  0xc5   : > { %578 = vst [vmem:[%s804_s12 + $0x10] sm:$0xf] %v572_v62 }
  0xc6 PF: > { %s15_s18 = sadd.s32 1, %s692_s18  }
  0xc7   : > { %p12_p4 = scmp.ge.s32.totalorder %s15_s18, 6  }
  0xc9   :  { %14 = sbr.rel (!%p12_p4) target bundleno = 1 (0x1), region = 80 }

// kernel: upsample_forward.9
= control target key start
LH: loop header
LB: loop body
LE: loop exit
PB: predicated region body
PF: predicated region fallthrough
CT: control target
= control target key end

     0   :  { %s2583_s15 = smov 0   ;;  %s3321_s0 = inlined_call_operand.vmem [shape: bf16[4,5120], index: 0, kind: input, shape index: {}]   ;;  %s3322_s1 = inlined_call_operand.vmem [shape: bf16[9,4,4], index: 1, kind: input, shape index: {}]   ;;  %s3323_s2 = inlined_call_operand.vmem [shape: f32[4,1], index: 2, kind: input, shape index: {}]   ;;  %s3324_s3 = inlined_call_operand.vmem [shape: f32[1,5120], index: 3, kind: input, shape index: {}]   ;;  %s3325_s4 = inlined_call_operand.vmem [shape: f32[4,5120], index: 4, kind: output, shape index: {}]  }
   0x1 LB: > { %s2412_s16 = sadd.s32 4294967295, %s2546_s15   ;;  %p2416_p0 = scmp.ge.s32.totalorder %s2546_s15, 1  ;;  %s2546_s15 = sphi %s2583_s15, %s14_s15  }
   0x2   : > { %p162_p1 = scmp.lt.s32.totalorder %s2546_s15, 5 }
   0x4   : > { %p163_p2 = pnand %p2416_p0, %p162_p1 }
   0x5   : > { %s187_s17 = smul.u32 (!%p163_p2), 10, %s2412_s16  ;;  %p199_p3 = scmp.eq.s32.totalorder (!%p163_p2), %s2412_s16, 0 }
   0x6   : > { %166 = sbr.rel (%p163_p2) target bundleno = 656 (0x290), region = 36  ;;  %p200_p4 = scmp.eq.s32.totalorder (!%p163_p2), %s2412_s16, 3 }
   0x7   : > { %p188_p5 = scmp.lt.s32.totalorder (!%p163_p2), %s187_s17, 39 }
   0x8   : > { %p201_p6 = por (!%p163_p2), %p200_p4, %p199_p3 }
   0xb   : > { %s3327_s17 = smov (!%p188_p5, %s187_s17), 39  ;;  %204 = sbr.rel (!%p201_p6) target bundleno = 19 (0x13), region = 40  ;;  %v2548_v0 = vmov (%p201_p6), 0.0  }
   0xc   : > { %s2594_s20 = scalar_lea.vmem %s3324_s3, %s3327_s17  ;;  %s2417_s21 = sshll.u32 %s3327_s17, 2 }
   0xd   : > { %s2599_s24 = scalar_lea.vmem %s3325_s4, %s2417_s21 }
   0xe   : > { %205 = vst [vmem:[%s2599_s24] sm:$0xff] (%p201_p6), %v2548_v0 }
   0xf   : > { %206 = vst [vmem:[%s2599_s24 + $0x8] sm:$0xff] (%p201_p6), %v2548_v0 }
  0x10   : > { %207 = vst [vmem:[%s2599_s24 + $0x10] sm:$0xff] %v2548_v0 }
  0x11   : > { %208 = vst [vmem:[%s2599_s24 + $0x18] sm:$0xff] %v2548_v0 }
  0x12   : > { %209 = vst [vmem:[%s2599_s24 + $0x20] sm:$0xff] %v2548_v0 }
  0x13 PF: > { %p210_p7 = scmp.gt.s32.totalorder %s2412_s16, 0  ;;  %p211_p8 = scmp.lt.s32.totalorder %s2412_s16, 3 }
  0x15   : > { %p212_p9 = pnand %p211_p8, %p210_p7 }
  0x16   : > { %s2418_s25 = sadd.s32 (!%p212_p9), 4294967295, %s2412_s16  ;;  %s2549_s6 = smov (!%p212_p9), 34  }
  0x17   : > { %215 = sbr.rel (%p212_p9) target bundleno = 656 (0x290), region = 44  ;;  %s2550_s7 = smov (!%p212_p9), 35  }
  0x18   : > { %s217_s26 = smul.u32 (!%p212_p9), 1280, %s2418_s25  ;;  %s2551_s8 = smov (!%p212_p9), 33  }
  0x19   : > { %s2552_s9 = smov (!%p212_p9), 1   ;;  %s2553_s14 = smov (!%p212_p9), 127  }
  0x1a   : > { %s218_s27 = sshra.s32 (!%p212_p9), %s217_s26, 7  ;;  %s2554_s18 = smov (!%p212_p9), 95  }
  0x1b   : > { %s2419_s28 = sshll.u32 (!%p212_p9), %s218_s27, 1  ;;  %s2555_s22 = smov (!%p212_p9), 94  }
  0x1c   : > { %s2609_s5 = scalar_lea.vmem %s3321_s0, %s2419_s28  ;;  %vm280_vm0 = vcmask 277504   ;;  %vm295_vm1 = vcmask 1041408   ;;  %v2647_v53 = vld [vmem:[%s3322_s1 + $0x2] sm:$0x3]  ;;  %vm291_vm2 = vcmask 31744   ;;  %vm504_vm3 = vcmask 285696  }
  0x1d   : > { %v2612_v1 = vld [vmem:[%s2609_s5 + $0x10] sm:$0xff]  ;;  %v2615_v2 = vld [vmem:[%s2609_s5 + $0x18] sm:$0xff]  ;;  %v2620_v3 = vld [vmem:[%s2609_s5 + $0x20] sm:$0xff]  ;;  %vm728_vm4 = vcmask 269312   ;;  %vm962_vm5 = vcmask 7168   ;;  %vm1377_vm6 = vcmask 1039360  }
  0x1e   : > { %230 = vst [vmem:[#allocation1] ss:$4 sm:$0xff] %v2612_v1  ;;  %s2556_s26 = smov 93   ;;  %vm1612_vm7 = vcmask 777216   ;;  %vm1847_vm8 = vcmask 769024   ;;  %vm2082_vm9 = vcmask 760832  }
  0x1f   : > { %233 = vst [vmem:[#allocation1 + $0x20] ss:$4 sm:$0xff] %v2615_v2  ;;  %vm2341_vm10 = vcmask 1043456  }
  0x25   : > { %v236_v4 = vld.sshfl [vmem:[#allocation1 + $0x10] sm:$0xff pattern:$0x73625140]  ;;  %v234_v5 = vld.sshfl [vmem:[#allocation1 + $0x8] sm:$0xff pattern:$0x73625140] }
  0x26   : > { %260 = vrot.lane.b32.xlu0 %v236_v4, %s2549_s6  ;;  %258 = vrot.lane.b32.xlu1 %v234_v5, %s2549_s6  ;;  %v238_v6 = vld.sshfl [vmem:[#allocation1 + $0x18] sm:$0xff pattern:$0x73625140]  ;;  %v240_v7 = vld.sshfl [vmem:[#allocation1 + $0x20] sm:$0xff pattern:$0x73625140] }
  0x27   : > { %v246_v8 = vld.sshfl [vmem:[#allocation1 + $0x38] sm:$0xff pattern:$0x73625140]  ;;  %249 = vst [vmem:[#allocation1] ss:$4 sm:$0xff] %v2620_v3 }
  0x28   : > { %v242_v9 = vld.sshfl [vmem:[#allocation1 + $0x28] sm:$0xff pattern:$0x73625140]  ;;  %v244_v10 = vld.sshfl [vmem:[#allocation1 + $0x30] sm:$0xff pattern:$0x73625140] }
  0x29   : > { %266 = vrot.lane.b32.xlu2 %v242_v9, %s2549_s6  ;;  %458 = vst [vmem:[#allocation1 + $0x20] ss:$4 sm:$0xff] %v2615_v2 }
  0x2e   : > { %262 = vrot.lane.b32.xlu0 %v238_v6, %s2549_s6  ;;  %264 = vrot.lane.b32.xlu1 %v240_v7, %s2549_s6  ;;  %v250_v11 = vld.sshfl [vmem:[#allocation1] sm:$0xff pattern:$0x73625140]  ;;  %v252_v12 = vld.sshfl [vmem:[#allocation1 + $0x8] sm:$0xff pattern:$0x73625140] }
  0x2f   : > { %v254_v13 = vld.sshfl [vmem:[#allocation1 + $0x10] sm:$0xff pattern:$0x73625140]  ;;  %v256_v14 = vld.sshfl [vmem:[#allocation1 + $0x18] sm:$0xff pattern:$0x73625140] }
  0x30   : > { %456 = vst [vmem:[#allocation1] ss:$4 sm:$0xff] %v2612_v1  ;;  %v467_v18 = vld.sshfl [vmem:[#allocation1 + $0x28] sm:$0xff pattern:$0x73625140] }
  0x31   : > { %268 = vrot.lane.b32.xlu2 %v244_v10, %s2549_s6  ;;  %v469_v19 = vld.sshfl [vmem:[#allocation1 + $0x30] sm:$0xff pattern:$0x73625140]  ;;  %v465_v20 = vld.sshfl [vmem:[#allocation1 + $0x20] sm:$0xff pattern:$0x73625140] }
  0x32   : > { %v471_v21 = vld.sshfl [vmem:[#allocation1 + $0x38] sm:$0xff pattern:$0x73625140] }
  0x33   : > { %682 = vst [vmem:[#allocation1 + $0x20] ss:$4 sm:$0xff] %v2615_v2 }
  0x36   : > { %270 = vrot.lane.b32.xlu0 %v246_v8, %s2549_s6  ;;  %272 = vrot.lane.b32.xlu1 %v250_v11, %s2549_s6 }
  0x37   : > { %v463_v15 = vld.sshfl [vmem:[#allocation1 + $0x18] sm:$0xff pattern:$0x73625140]  ;;  %v459_v16 = vld.sshfl [vmem:[#allocation1 + $0x8] sm:$0xff pattern:$0x73625140] }
  0x38   : > { %v461_v17 = vld.sshfl [vmem:[#allocation1 + $0x10] sm:$0xff pattern:$0x73625140] }
  0x39   : > { %274 = vrot.lane.b32.xlu2 %v252_v12, %s2549_s6  ;;  %473 = vst [vmem:[#allocation1] ss:$4 sm:$0xff] %v2620_v3 }
  0x3a   : > { %v689_v29 = vld.sshfl [vmem:[#allocation1 + $0x20] sm:$0xff pattern:$0x73625140]  ;;  %v693_v30 = vld.sshfl [vmem:[#allocation1 + $0x30] sm:$0xff pattern:$0x73625140] }
  0x3b   : > { %v695_v31 = vld.sshfl [vmem:[#allocation1 + $0x38] sm:$0xff pattern:$0x73625140]  ;;  %v691_v36 = vld.sshfl [vmem:[#allocation1 + $0x28] sm:$0xff pattern:$0x73625140] }
  0x3c   : > { %916 = vst [vmem:[#allocation1 + $0x20] ss:$4 sm:$0xff] %v2615_v2 }
  0x3e   : > { %276 = vrot.lane.b32.xlu0 %v254_v13, %s2549_s6  ;;  %278 = vrot.lane.b32.xlu1 %v256_v14, %s2549_s6 }
  0x40   : > { %v474_v22 = vld.sshfl [vmem:[#allocation1] sm:$0xff pattern:$0x73625140]  ;;  %v478_v23 = vld.sshfl [vmem:[#allocation1 + $0x10] sm:$0xff pattern:$0x73625140] }
  0x41   : > { %484 = vrot.lane.b32.xlu2 %v461_v17, %s2550_s7  ;;  %v476_v24 = vld.sshfl [vmem:[#allocation1 + $0x8] sm:$0xff pattern:$0x73625140]  ;;  %v480_v25 = vld.sshfl [vmem:[#allocation1 + $0x18] sm:$0xff pattern:$0x73625140] }
  0x42   : > { %680 = vst [vmem:[#allocation1] ss:$4 sm:$0xff] %v2612_v1 }
  0x43   : > { %v923_v40 = vld.sshfl [vmem:[#allocation1 + $0x20] sm:$0xff pattern:$0x73625140]  ;;  %v925_v41 = vld.sshfl [vmem:[#allocation1 + $0x28] sm:$0xff pattern:$0x73625140] }
  0x44   : > { %v929_v43 = vld.sshfl [vmem:[#allocation1 + $0x38] sm:$0xff pattern:$0x73625140]  ;;  %v927_v55 = vld.sshfl [vmem:[#allocation1 + $0x30] sm:$0xff pattern:$0x73625140] }
  0x45   : > { %1150 = vst [vmem:[#allocation1 + $0x20] ss:$4 sm:$0xff] %v2615_v2 }
  0x46   : > { %486 = vrot.lane.b32.xlu0 %v463_v15, %s2550_s7  ;;  %482 = vrot.lane.b32.xlu1 %v459_v16, %s2550_s7 }
  0x49   : > { %488 = vrot.lane.b32.xlu2 %v465_v20, %s2550_s7  ;;  %v685_v26 = vld.sshfl [vmem:[#allocation1 + $0x10] sm:$0xff pattern:$0x73625140]  ;;  %v683_v27 = vld.sshfl [vmem:[#allocation1 + $0x8] sm:$0xff pattern:$0x73625140] }
  0x4a   : > { %v687_v28 = vld.sshfl [vmem:[#allocation1 + $0x18] sm:$0xff pattern:$0x73625140] }
  0x4b   : > { %697 = vst [vmem:[#allocation1] ss:$4 sm:$0xff] %v2620_v3 }
  0x4c   : > { %v2664_v5 = vld.sshfl [vmem:[#allocation1 + $0x20] sm:$0xff pattern:$0x73625140]  ;;  %v2666_v6 = vld.sshfl [vmem:[#allocation1 + $0x28] sm:$0xff pattern:$0x73625140] }
  0x4d   : > { %v2670_v7 = vld.sshfl [vmem:[#allocation1 + $0x30] sm:$0xff pattern:$0x73625140]  ;;  %v2672_v8 = vld.sshfl [vmem:[#allocation1 + $0x38] sm:$0xff pattern:$0x73625140] }
  0x4e   : > { %490 = vrot.lane.b32.xlu0 %v467_v18, %s2550_s7  ;;  %492 = vrot.lane.b32.xlu1 %v469_v19, %s2550_s7  ;;  %1329 = vst [vmem:[#allocation1 + $0x20] ss:$4 sm:$0xff] %v2615_v2 }
  0x51   : > { %494 = vrot.lane.b32.xlu2 %v471_v21, %s2550_s7 }
  0x52   : > { %v700_v32 = vld.sshfl [vmem:[#allocation1 + $0x8] sm:$0xff pattern:$0x73625140]  ;;  %v704_v33 = vld.sshfl [vmem:[#allocation1 + $0x18] sm:$0xff pattern:$0x73625140] }
  0x53   : > { %v698_v34 = vld.sshfl [vmem:[#allocation1] sm:$0xff pattern:$0x73625140]  ;;  %v702_v35 = vld.sshfl [vmem:[#allocation1 + $0x10] sm:$0xff pattern:$0x73625140] }
  0x54   : > { %914 = vst [vmem:[#allocation1] ss:$4 sm:$0xff] %v2612_v1 }
  0x56   : > { %496 = vrot.lane.b32.xlu0 %v474_v22, %s2550_s7  ;;  %498 = vrot.lane.b32.xlu1 %v476_v24, %s2550_s7 }
  0x59   : > { %500 = vrot.lane.b32.xlu2 %v478_v23, %s2550_s7 }
  0x5b   : > { %v919_v37 = vld.sshfl [vmem:[#allocation1 + $0x10] sm:$0xff pattern:$0x73625140]  ;;  %v917_v38 = vld.sshfl [vmem:[#allocation1 + $0x8] sm:$0xff pattern:$0x73625140] }
  0x5c   : > { %v921_v39 = vld.sshfl [vmem:[#allocation1 + $0x18] sm:$0xff pattern:$0x73625140] }
  0x5d   : > { %931 = vst [vmem:[#allocation1] ss:$4 sm:$0xff] %v2620_v3 }
  0x5e   : > { %502 = vrot.lane.b32.xlu0 %v480_v25, %s2550_s7  ;;  %708 = vrot.lane.b32.xlu1 %v685_v26, %s2551_s8 }
  0x61   : > { %710 = vrot.lane.b32.xlu2 %v687_v28, %s2551_s8 }
  0x64   : > { %v932_v44 = vld.sshfl [vmem:[#allocation1] sm:$0xff pattern:$0x73625140]  ;;  %v936_v47 = vld.sshfl [vmem:[#allocation1 + $0x10] sm:$0xff pattern:$0x73625140] }
  0x65   : > { %v938_v56 = vld.sshfl [vmem:[#allocation1 + $0x18] sm:$0xff pattern:$0x73625140]  ;;  %v934_v17 = vld.sshfl [vmem:[#allocation1 + $0x8] sm:$0xff pattern:$0x73625140] }
  0x66   : > { %712 = vrot.lane.b32.xlu1 %v689_v29, %s2551_s8  ;;  %706 = vrot.lane.b32.xlu0 %v683_v27, %s2551_s8  ;;  %1148 = vst [vmem:[#allocation1] ss:$4 sm:$0xff] %v2612_v1 }
  0x69   : > { %714 = vrot.lane.b32.xlu2 %v691_v36, %s2551_s8 }
  0x6d   : > { %v2693_v25 = vld.sshfl [vmem:[#allocation1 + $0x10] sm:$0xff pattern:$0x73625140]  ;;  %v2695_v26 = vld.sshfl [vmem:[#allocation1 + $0x18] sm:$0xff pattern:$0x73625140] }
  0x6e   : > { %716 = vrot.lane.b32.xlu0 %v693_v30, %s2551_s8  ;;  %718 = vrot.lane.b32.xlu1 %v695_v31, %s2551_s8  ;;  %1157 = vst [vmem:[#allocation1] ss:$4 sm:$0xff] %v2620_v3 }
  0x71   : > { %720 = vrot.lane.b32.xlu2 %v698_v34, %s2551_s8 }
  0x75   : > { %v2708_v36 = vld.sshfl [vmem:[#allocation1] sm:$0xff pattern:$0x73625140] }
  0x76   : > { %722 = vrot.lane.b32.xlu0 %v700_v32, %s2551_s8  ;;  %724 = vrot.lane.b32.xlu1 %v702_v35, %s2551_s8 }
  0x79   : > { %726 = vrot.lane.b32.xlu2 %v704_v33, %s2551_s8 }
  0x7e   : > { %942 = vrot.lane.b32.xlu0 %v919_v37, %s2552_s9  ;;  %944 = vrot.lane.b32.xlu1 %v921_v39, %s2552_s9  ;;  %v2710_v37 = vld.sshfl [vmem:[#allocation1 + $0x8] sm:$0xff pattern:$0x73625140]  ;;  %v2714_v39 = vld.sshfl [vmem:[#allocation1 + $0x18] sm:$0xff pattern:$0x73625140] }
  0x81   : > { %940 = vrot.lane.b32.xlu2 %v917_v38, %s2552_s9  ;;  %v2712_v38 = vld.sshfl [vmem:[#allocation1 + $0x10] sm:$0xff pattern:$0x73625140] }
  0x82   : > { %1327 = vst [vmem:[#allocation1] ss:$4 sm:$0xff] %v2612_v1 }
  0x83   : > { %v267_v42 = vpop.permute.xlu2 %266 }
  0x86   : > { %946 = vrot.lane.b32.xlu0 %v923_v40, %s2552_s9  ;;  %948 = vrot.lane.b32.xlu1 %v925_v41, %s2552_s9 }
  0x89   : > { %950 = vrot.lane.b32.xlu2 %v927_v55, %s2552_s9 }
  0x8b   : > { %v269_v45 = vpop.permute.xlu2 %268 }
  0x8c   : > { %v285_v46 = vsel %vm280_vm0, %v267_v42, %v269_v45 }
  0x8d   : > { %v309_v51 = vsel %vm295_vm1, %v285_v46, 0 }
  0x8e   : > { %952 = vrot.lane.b32.xlu0 %v929_v43, %s2552_s9  ;;  %954 = vrot.lane.b32.xlu1 %v932_v44, %s2552_s9 }
  0x91   : > { %956 = vrot.lane.b32.xlu2 %v934_v17, %s2552_s9 }
  0x93   : > { %v275_v54 = vpop.permute.xlu2 %274 }
  0x96   : > { %958 = vrot.lane.b32.xlu0 %v936_v47, %s2552_s9  ;;  %960 = vrot.lane.b32.xlu1 %v938_v56, %s2552_s9 }
  0x98   : > { %v261_v48 = vpop.permute.xlu0 %260  ;;  %v259_v49 = vpop.permute.xlu1 %258 }
  0x99   : > { %v281_v50 = vsel %vm280_vm0, %v259_v49, %v261_v48  ;;  %v2726_v49 = vld [vmem:[%s3322_s1] sm:$0x3] }
  0x9a   : > { %v297_v52 = vsel %vm295_vm1, %v281_v50, 0 }
  0x9b   : > { %333 = vmatpush.bf16.msra.mxu0 %v297_v52  ;;  %v485_v4 = vpop.permute.xlu2 %484 }
  0x9e   : > { %2421 = vmatmul.msk.bf16.vlgmr.msra.gmra.mxu0 %vm291_vm2, %v2647_v53 }
  0x9f   : > { %385 = vmatpush.bf16.msrb.mxu0 %v309_v51 }
  0xa0   : > { %v263_v57 = vpop.permute.xlu0 %262  ;;  %v265_v58 = vpop.permute.xlu1 %264 }
  0xa1   : > { %v282_v59 = vsel %vm280_vm0, %v261_v48, %v263_v57  ;;  %v283_v60 = vsel %vm280_vm0, %v263_v57, %v265_v58  ;;  %v284_v61 = vsel %vm280_vm0, %v265_v58, %v267_v42 }
  0xa2   : > { %v300_v62 = vsel %vm295_vm1, %v282_v59, 0  ;;  %v303_v63 = vsel %vm295_vm1, %v283_v60, 0  ;;  %v306_v0 = vsel %vm295_vm1, %v284_v61, 0  ;;  %v1334_v59 = vld.sshfl [vmem:[#allocation1 + $0x20] sm:$0xff pattern:$0x73625140] }
  0xa3   : > { %346 = vmatpush.bf16.msra.mxu1 %v300_v62  ;;  %359 = vmatpush.bf16.msra.mxu2 %v303_v63  ;;  %v489_v18 = vpop.permute.xlu2 %488  ;;  %v1330_v60 = vld.sshfl [vmem:[#allocation1 + $0x10] sm:$0xff pattern:$0x73625140] }
  0xa4   : > { %372 = vmatpush.bf16.msra.mxu3 %v306_v0  ;;  %1359 = vrot.lane.b32.xlu0 %v1334_v59, %s2553_s14 }
  0xa5   : > { %1355 = vrot.lane.b32.xlu1 %v1330_v60, %s2553_s14 }
  0xa6   : > { %2422 = vmatmul.msk.bf16.vlgmr.msra.gmra.mxu1 %vm291_vm2, %v2647_v53  ;;  %2423 = vmatmul.msk.bf16.vlgmr.msra.gmra.mxu2 %vm291_vm2, %v2647_v53 }
  0xa7   : > { %2424 = vmatmul.msk.bf16.vlgmr.msra.gmra.mxu3 %vm291_vm2, %v2647_v53 }
  0xa8   : > { %v271_v9 = vpop.permute.xlu0 %270  ;;  %v273_v10 = vpop.permute.xlu1 %272 }
  0xa9   : > { %v286_v11 = vsel %vm280_vm0, %v269_v45, %v271_v9  ;;  %v287_v12 = vsel %vm280_vm0, %v271_v9, %v273_v10  ;;  %v288_v13 = vsel %vm280_vm0, %v273_v10, %v275_v54 }
  0xaa   : > { %v312_v14 = vsel %vm295_vm1, %v286_v11, 0  ;;  %v315_v15 = vsel %vm295_vm1, %v287_v12, 0  ;;  %v318_v16 = vsel %vm295_vm1, %v288_v13, 0  ;;  %v1338_v11 = vld.sshfl [vmem:[#allocation1 + $0x30] sm:$0xff pattern:$0x73625140] }
  0xab   : > { %398 = vmatpush.bf16.msrb.mxu1 %v312_v14  ;;  %411 = vmatpush.bf16.msrb.mxu2 %v315_v15  ;;  %v495_v32 = vpop.permute.xlu2 %494  ;;  %v1340_v12 = vld.sshfl [vmem:[#allocation1 + $0x38] sm:$0xff pattern:$0x73625140] }
  0xac   : > { %424 = vmatpush.bf16.msrb.mxu3 %v318_v16  ;;  %1363 = vrot.lane.b32.xlu0 %v1338_v11, %s2553_s14 }
  0xad   : > { %1365 = vrot.lane.b32.xlu1 %v1340_v12, %s2553_s14 }
  0xae   : > { %2425 = vmatmul.msk.bf16.vlgmr.msrb.gmra.mxu0 %vm291_vm2, %v2647_v53 }
  0xb0   : > { %v277_v19 = vpop.permute.xlu0 %276  ;;  %v279_v20 = vpop.permute.xlu1 %278 }
  0xb1   : > { %v289_v21 = vsel %vm280_vm0, %v275_v54, %v277_v19  ;;  %v290_v22 = vsel %vm280_vm0, %v277_v19, %v279_v20 }
  0xb2   : > { %v321_v23 = vsel %vm295_vm1, %v289_v21, 0  ;;  %v324_v24 = vsel %vm295_vm1, %v290_v22, 0  ;;  %v1332_v22 = vld.sshfl [vmem:[#allocation1 + $0x18] sm:$0xff pattern:$0x73625140] }
  0xb3   : > { %437 = vmatpush.bf16.msra.mxu0 %v321_v23  ;;  %450 = vmatpush.bf16.msra.mxu1 %v324_v24  ;;  %v501_v45 = vpop.permute.xlu2 %500  ;;  %1342 = vst [vmem:[#allocation1] ss:$4 sm:$0xff] %v2620_v3 }
  0xb4   : > { %1357 = vrot.lane.b32.xlu2 %v1332_v22, %s2553_s14 }
  0xb6   : > { %2426 = vmatmul.msk.bf16.vlgmr.msrb.gmra.mxu1 %vm291_vm2, %v2647_v53  ;;  %2427 = vmatmul.msk.bf16.vlgmr.msrb.gmra.mxu2 %vm291_vm2, %v2647_v53 }
  0xb7   : > { %2428 = vmatmul.msk.bf16.vlgmr.msrb.gmra.mxu3 %vm291_vm2, %v2647_v53 }
  0xb8   : > { %v487_v27 = vpop.permute.xlu0 %486  ;;  %v483_v28 = vpop.permute.xlu1 %482 }
  0xb9   : > { %v506_v29 = vsel %vm504_vm3, %v485_v4, %v487_v27  ;;  %v507_v30 = vsel %vm504_vm3, %v487_v27, %v489_v18  ;;  %v505_v31 = vsel %vm504_vm3, %v483_v28, %v485_v4 }
  0xba   : > { %v522_v33 = vsel %vm295_vm1, %v506_v29, 0  ;;  %v525_v34 = vsel %vm295_vm1, %v507_v30, 0  ;;  %v519_v35 = vsel %vm295_vm1, %v505_v31, 0 }
  0xbb   : > { %555 = vmatpush.bf16.msra.mxu2 %v519_v35  ;;  %568 = vmatpush.bf16.msra.mxu3 %v522_v33  ;;  %v711_v58 = vpop.permute.xlu2 %710  ;;  %v1351_v35 = vld.sshfl [vmem:[#allocation1 + $0x18] sm:$0xff pattern:$0x73625140] }
  0xbc   : > { %581 = vmatpush.bf16.msrb.mxu0 %v525_v34  ;;  %v1347_v34 = vld.sshfl [vmem:[#allocation1 + $0x8] sm:$0xff pattern:$0x73625140] }
  0xbd   : > { %1369 = vrot.lane.b32.xlu0 %v1347_v34, %s2553_s14 }
  0xbe   : > { %2429 = vmatmul.msk.bf16.vlgmr.msra.gmra.mxu0 %vm291_vm2, %v2647_v53 }
  0xc0   : > { %v491_v40 = vpop.permute.xlu0 %490  ;;  %v493_v41 = vpop.permute.xlu1 %492 }
  0xc1   : > { %v508_v42 = vsel %vm504_vm3, %v489_v18, %v491_v40  ;;  %v509_v43 = vsel %vm504_vm3, %v491_v40, %v493_v41  ;;  %v510_v44 = vsel %vm504_vm3, %v493_v41, %v495_v32  ;;  %v1345_v40 = vld.sshfl [vmem:[#allocation1] sm:$0xff pattern:$0x73625140]  ;;  %v1336_v41 = vld.sshfl [vmem:[#allocation1 + $0x28] sm:$0xff pattern:$0x73625140] }
  0xc2   : > { %v528_v46 = vsel %vm295_vm1, %v508_v42, 0  ;;  %v531_v47 = vsel %vm295_vm1, %v509_v43, 0  ;;  %v534_v48 = vsel %vm295_vm1, %v510_v44, 0  ;;  %1361 = vrot.lane.b32.xlu2 %v1336_v41, %s2553_s14 }
  0xc3   : > { %594 = vmatpush.bf16.msrb.mxu1 %v528_v46  ;;  %607 = vmatpush.bf16.msrb.mxu2 %v531_v47  ;;  %v715_v10 = vpop.permute.xlu2 %714 }
  0xc4   : > { %620 = vmatpush.bf16.msrb.mxu3 %v534_v48 }
  0xc6   : > { %2430 = vmatmul.msk.bf16.vlgmr.msra.gmra.mxu1 %vm291_vm2, %v2647_v53  ;;  %2431 = vmatmul.msk.bf16.vlgmr.msra.gmra.mxu2 %vm291_vm2, %v2726_v49 }
  0xc7   : > { %2432 = vmatmul.msk.bf16.vlgmr.msra.gmra.mxu3 %vm291_vm2, %v2726_v49 }
  0xc8   : > { %v497_v50 = vpop.permute.xlu0 %496  ;;  %v499_v51 = vpop.permute.xlu1 %498 }
  0xc9   : > { %v511_v52 = vsel %vm504_vm3, %v495_v32, %v497_v50  ;;  %v512_v54 = vsel %vm504_vm3, %v497_v50, %v499_v51  ;;  %v513_v55 = vsel %vm504_vm3, %v499_v51, %v501_v45  ;;  %v2772_v32 = vld [vmem:[%s2609_s5 + $0x28] sm:$0xff] }
  0xca   : > { %v537_v56 = vsel %vm295_vm1, %v511_v52, 0  ;;  %v540_v57 = vsel %vm295_vm1, %v512_v54, 0  ;;  %v543_v53 = vsel %vm295_vm1, %v513_v55, 0  ;;  %1344 = vst [vmem:[#allocation1 + $0x20] ss:$4 sm:$0xff] %v2772_v32  ;;  %1367 = vrot.lane.b32.xlu2 %v1345_v40, %s2553_s14 }
  0xcb   : > { %633 = vmatpush.bf16.msra.mxu0 %v537_v56  ;;  %646 = vmatpush.bf16.msra.mxu1 %v540_v57  ;;  %v721_v21 = vpop.permute.xlu2 %720 }
  0xcc   : > { %659 = vmatpush.bf16.msra.mxu2 %v543_v53 }
  0xce   : > { %2433 = vmatmul.msk.bf16.vlgmr.msrb.gmra.mxu0 %vm291_vm2, %v2726_v49 }
  0xd0   : > { %v503_v61 = vpop.permute.xlu0 %502  ;;  %v709_v62 = vpop.permute.xlu1 %708 }
  0xd1   : > { %v514_v63 = vsel %vm504_vm3, %v501_v45, %v503_v61  ;;  %v730_v0 = vsel %vm728_vm4, %v709_v62, %v711_v58  ;;  %v1349_v45 = vld.sshfl [vmem:[#allocation1 + $0x10] sm:$0xff pattern:$0x73625140]  ;;  %v1353_v51 = vld.sshfl [vmem:[#allocation1 + $0x20] sm:$0xff pattern:$0x73625140] }
  0xd2   : > { %v546_v4 = vsel %vm295_vm1, %v514_v63, 0  ;;  %v746_v9 = vsel %vm295_vm1, %v730_v0, 0  ;;  %1371 = vrot.lane.b32.xlu1 %v1349_v45, %s2553_s14  ;;  %1563 = vst [vmem:[#allocation1] ss:$4 sm:$0xff] %v2612_v1  ;;  %1375 = vrot.lane.b32.xlu0 %v1353_v51, %s2553_s14 }
  0xd3   : > { %672 = vmatpush.bf16.msra.mxu3 %v546_v4  ;;  %v727_v42 = vpop.permute.xlu2 %726  ;;  %1565 = vst [vmem:[#allocation1 + $0x20] ss:$4 sm:$0xff] %v2615_v2  ;;  %1373 = vrot.lane.b32.xlu2 %v1351_v35, %s2553_s14 }
  0xd6   : > { %2434 = vmatmul.msk.bf16.vlgmr.msrb.gmra.mxu1 %vm291_vm2, %v2726_v49  ;;  %2435 = vmatmul.msk.bf16.vlgmr.msrb.gmra.mxu2 %vm291_vm2, %v2726_v49 }
  0xd7   : > { %2436 = vmatmul.msk.bf16.vlgmr.msrb.gmra.mxu3 %vm291_vm2, %v2726_v49  ;;  %792 = vmatpush.bf16.msrb.mxu1 %v746_v9 }
  0xd8   : > { %v713_v13 = vpop.permute.xlu1 %712  ;;  %v707_v14 = vpop.permute.xlu0 %706 }
  0xd9   : > { %v731_v15 = vsel %vm728_vm4, %v711_v58, %v713_v13  ;;  %v729_v16 = vsel %vm728_vm4, %v707_v14, %v709_v62  ;;  %v732_v17 = vsel %vm728_vm4, %v713_v13, %v715_v10  ;;  %v1568_v55 = vld.sshfl [vmem:[#allocation1 + $0x18] sm:$0xff pattern:$0x73625140]  ;;  %v1566_v62 = vld.sshfl [vmem:[#allocation1 + $0x10] sm:$0xff pattern:$0x73625140] }
  0xda   : > { %v749_v18 = vsel %vm295_vm1, %v731_v15, 0  ;;  %v743_v19 = vsel %vm295_vm1, %v729_v16, 0  ;;  %v752_v20 = vsel %vm295_vm1, %v732_v17, 0  ;;  %1592 = vrot.lane.b32.xlu1 %v1568_v55, %s2554_s18  ;;  %v1572_v63 = vld.sshfl [vmem:[#allocation1 + $0x28] sm:$0xff pattern:$0x73625140]  ;;  %1590 = vrot.lane.b32.xlu0 %v1566_v62, %s2554_s18 }
  0xdb   : > { %779 = vmatpush.bf16.msrb.mxu0 %v743_v19  ;;  %805 = vmatpush.bf16.msrb.mxu2 %v749_v18  ;;  %v941_v52 = vpop.permute.xlu2 %940  ;;  %1578 = vst [vmem:[#allocation1] ss:$4 sm:$0xff] %v2620_v3  ;;  %v1576_v11 = vld.sshfl [vmem:[#allocation1 + $0x38] sm:$0xff pattern:$0x73625140] }
  0xdc   : > { %818 = vmatpush.bf16.msrb.mxu3 %v752_v20 }
  0xde   : > { %2437 = vmatmul.msk.bf16.vlgmr.msra.gmra.mxu0 %vm291_vm2, %v2726_v49 }
  0xe0   : > { %v717_v23 = vpop.permute.xlu0 %716  ;;  %v719_v24 = vpop.permute.xlu1 %718 }
  0xe1   : > { %v733_v27 = vsel %vm728_vm4, %v715_v10, %v717_v23  ;;  %v734_v28 = vsel %vm728_vm4, %v717_v23, %v719_v24  ;;  %v735_v30 = vsel %vm728_vm4, %v719_v24, %v721_v21 }
  0xe2   : > { %v755_v29 = vsel %vm295_vm1, %v733_v27, 0  ;;  %v758_v31 = vsel %vm295_vm1, %v734_v28, 0  ;;  %v761_v33 = vsel %vm295_vm1, %v735_v30, 0  ;;  %1596 = vrot.lane.b32.xlu1 %v1572_v63, %s2554_s18  ;;  %1600 = vrot.lane.b32.xlu0 %v1576_v11, %s2554_s18  ;;  %v1582_v24 = vld.sshfl [vmem:[#allocation1 + $0x8] sm:$0xff pattern:$0x73625140] }
  0xe3   : > { %831 = vmatpush.bf16.msra.mxu0 %v755_v29  ;;  %v951_v12 = vpop.permute.xlu2 %950  ;;  %v1570_v28 = vld.sshfl [vmem:[#allocation1 + $0x20] sm:$0xff pattern:$0x73625140]  ;;  %v1584_v29 = vld.sshfl [vmem:[#allocation1 + $0x10] sm:$0xff pattern:$0x73625140] }
  0xe4   : > { %1594 = vrot.lane.b32.xlu2 %v1570_v28, %s2554_s18  ;;  %v1179_v11 = vsel %vm295_vm1, %v2710_v37, 0 }
  0xe6   : > { %2438 = vmatmul.msk.bf16.vlgmr.msra.gmra.mxu1 %vm291_vm2, %v2726_v49  ;;  %2439 = vmatmul.msk.bf16.vlgmr.msra.gmra.mxu2 %vm291_vm2, %v2726_v49 }
  0xe7   : > { %2440 = vmatmul.msk.bf16.vlgmr.msra.gmra.mxu3 %vm291_vm2, %v2726_v49  ;;  %844 = vmatpush.bf16.msra.mxu1 %v758_v31  ;;  %v2792_v49 = vld [vmem:[%s3322_s1 + $0x4] sm:$0x3]  ;;  %v1586_v31 = vld.sshfl [vmem:[#allocation1 + $0x18] sm:$0xff pattern:$0x73625140] }
  0xe8   : > { %857 = vmatpush.bf16.msra.mxu2 %v761_v33  ;;  %v723_v43 = vpop.permute.xlu0 %722  ;;  %v725_v44 = vpop.permute.xlu1 %724  ;;  %v1574_v33 = vld.sshfl [vmem:[#allocation1 + $0x30] sm:$0xff pattern:$0x73625140] }
  0xe9   : > { %v736_v46 = vsel %vm728_vm4, %v721_v21, %v723_v43  ;;  %v737_v47 = vsel %vm728_vm4, %v723_v43, %v725_v44  ;;  %v738_v57 = vsel %vm728_vm4, %v725_v44, %v727_v42  ;;  %v1580_v21 = vld.sshfl [vmem:[#allocation1] sm:$0xff pattern:$0x73625140]  ;;  %1579 = vst [vmem:[#allocation1 + $0x20] ss:$4 sm:$0xff] %v2772_v32 }
  0xea   : > { %v764_v48 = vsel %vm295_vm1, %v736_v46, 0  ;;  %v767_v50 = vsel %vm295_vm1, %v737_v47, 0  ;;  %v770_v59 = vsel %vm295_vm1, %v738_v57, 0  ;;  %1602 = vrot.lane.b32.xlu1 %v1580_v21, %s2554_s18  ;;  %1606 = vrot.lane.b32.xlu0 %v1584_v29, %s2554_s18  ;;  %1798 = vst [vmem:[#allocation1] ss:$4 sm:$0xff] %v2612_v1  ;;  %v1171_v57 = vsel %vm295_vm1, %v2666_v6, 0 }
  0xeb   : > { %870 = vmatpush.bf16.msra.mxu3 %v764_v48  ;;  %v957_v27 = vpop.permute.xlu2 %956  ;;  %v2850_v42 = vld [vmem:[%s3322_s1 + $0x6] sm:$0x3] }
  0xec   : > { %1598 = vrot.lane.b32.xlu2 %v1574_v33, %s2554_s18 }
  0xee   : > { %2442 = vmatmul.msk.bf16.vlgmr.msrb.gmra.mxu0 %vm291_vm2, %v2792_v49 }
  0xef   : > { %883 = vmatpush.bf16.msrb.mxu0 %v767_v50  ;;  %v1165_v50 = vsel %vm295_vm1, %v2693_v25, 0  ;;  %v1169_v25 = vsel %vm295_vm1, %v2664_v5, 0 }
  0xf0   : > { %v943_v54 = vpop.permute.xlu0 %942  ;;  %v945_v56 = vpop.permute.xlu1 %944  ;;  %v1588_v48 = vld.sshfl [vmem:[#allocation1 + $0x20] sm:$0xff pattern:$0x73625140] }
  0xf1   : > { %v964_v53 = vsel %vm962_vm5, %v943_v54, %v945_v56  ;;  %v963_v58 = vsel %vm962_vm5, %v941_v52, %v943_v54  ;;  %v1801_v46 = vld.sshfl [vmem:[#allocation1 + $0x10] sm:$0xff pattern:$0x73625140]  ;;  %v1803_v47 = vld.sshfl [vmem:[#allocation1 + $0x18] sm:$0xff pattern:$0x73625140] }
  0xf2   : > { %v980_v60 = vsel %vm295_vm1, %v964_v53, 0  ;;  %v977_v61 = vsel %vm295_vm1, %v963_v58, 0  ;;  %1608 = vrot.lane.b32.xlu1 %v1586_v31, %s2554_s18  ;;  %1813 = vst [vmem:[#allocation1] ss:$4 sm:$0xff] %v2620_v3  ;;  %1827 = vrot.lane.b32.xlu0 %v1803_v47, %s2555_s22 }
  0xf3   : > { %1800 = vst [vmem:[#allocation1 + $0x20] ss:$4 sm:$0xff] %v2615_v2 }
  0xf4   : > { %1604 = vrot.lane.b32.xlu2 %v1582_v24, %s2554_s18 }
  0xf6   : > { %2443 = vmatmul.msk.bf16.vlgmr.msrb.gmra.mxu1 %vm291_vm2, %v2792_v49  ;;  %2444 = vmatmul.msk.bf16.vlgmr.msrb.gmra.mxu2 %vm291_vm2, %v2792_v49 }
  0xf7   : > { %2445 = vmatmul.msk.bf16.vlgmr.msrb.gmra.mxu3 %vm291_vm2, %v2792_v49  ;;  %896 = vmatpush.bf16.msrb.mxu1 %v770_v59  ;;  %v1173_v59 = vsel %vm295_vm1, %v2670_v7, 0  ;;  %v1175_v7 = vsel %vm295_vm1, %v2672_v8, 0 }
  0xf8   : > { %v947_v0 = vpop.permute.xlu0 %946  ;;  %1013 = vmatpush.bf16.msrb.mxu2 %v977_v61  ;;  %1026 = vmatpush.bf16.msrb.mxu3 %v980_v60  ;;  %v949_v10 = vpop.permute.xlu1 %948 }
  0xf9   : > { %v965_v4 = vsel %vm962_vm5, %v945_v56, %v947_v0  ;;  %v966_v13 = vsel %vm962_vm5, %v947_v0, %v949_v10  ;;  %v967_v15 = vsel %vm962_vm5, %v949_v10, %v951_v12  ;;  %v1167_v56 = vsel %vm295_vm1, %v2695_v26, 0  ;;  %v1815_v60 = vld.sshfl [vmem:[#allocation1] sm:$0xff pattern:$0x73625140] }
  0xfa   : > { %v983_v9 = vsel %vm295_vm1, %v965_v4, 0  ;;  %v986_v17 = vsel %vm295_vm1, %v966_v13, 0  ;;  %v989_v18 = vsel %vm295_vm1, %v967_v15, 0  ;;  %v1805_v51 = vld.sshfl [vmem:[#allocation1 + $0x20] sm:$0xff pattern:$0x73625140] }
  0xfb   : > { %v1807_v52 = vld.sshfl [vmem:[#allocation1 + $0x28] sm:$0xff pattern:$0x73625140]  ;;  %1829 = vrot.lane.b32.xlu1 %v1805_v51, %s2555_s22  ;;  %v1809_v53 = vld.sshfl [vmem:[#allocation1 + $0x30] sm:$0xff pattern:$0x73625140] }
  0xfc   : > { %1831 = vrot.lane.b32.xlu0 %v1807_v52, %s2555_s22  ;;  %1610 = vrot.lane.b32.xlu2 %v1588_v48, %s2554_s18  ;;  %v1817_v61 = vld.sshfl [vmem:[#allocation1 + $0x8] sm:$0xff pattern:$0x73625140]  ;;  %v1177_v10 = vsel %vm295_vm1, %v2708_v36, 0 }
  0xfd   : > { %v1821_v13 = vld.sshfl [vmem:[#allocation1 + $0x18] sm:$0xff pattern:$0x73625140] }
  0xfe   : > { %2446 = vmatmul.msk.bf16.vlgmr.msra.gmra.mxu0 %vm291_vm2, %v2792_v49 }
  0xff   : > { %1039 = vmatpush.bf16.msra.mxu0 %v983_v9  ;;  %v1819_v9 = vld.sshfl [vmem:[#allocation1 + $0x10] sm:$0xff pattern:$0x73625140] }
 0x100   : > { %v953_v14 = vpop.permute.xlu0 %952  ;;  %v955_v20 = vpop.permute.xlu1 %954  ;;  %2033 = vst [vmem:[#allocation1] ss:$4 sm:$0xff] %v2612_v1  ;;  %v1181_v1 = vsel %vm295_vm1, %v2712_v38, 0 }
 0x101   : > { %v968_v16 = vsel %vm962_vm5, %v951_v12, %v953_v14  ;;  %v969_v22 = vsel %vm962_vm5, %v953_v14, %v955_v20  ;;  %v970_v34 = vsel %vm962_vm5, %v955_v20, %v957_v27  ;;  %v1811_v12 = vld.sshfl [vmem:[#allocation1 + $0x38] sm:$0xff pattern:$0x73625140] }
 0x102   : > { %v992_v19 = vsel %vm295_vm1, %v968_v16, 0  ;;  %v995_v23 = vsel %vm295_vm1, %v969_v22, 0  ;;  %v998_v43 = vsel %vm295_vm1, %v970_v34, 0  ;;  %1814 = vst [vmem:[#allocation1 + $0x20] ss:$4 sm:$0xff] %v2772_v32 }
 0x103   : > { %1833 = vrot.lane.b32.xlu1 %v1809_v53, %s2555_s22  ;;  %v2930_v16 = vld [vmem:[%s3322_s1 + $0x8] sm:$0x3] }
 0x104   : > { %1837 = vrot.lane.b32.xlu0 %v1815_v60, %s2555_s22  ;;  %1825 = vrot.lane.b32.xlu2 %v1801_v46, %s2555_s22 }
 0x106   : > { %2447 = vmatmul.msk.bf16.vlgmr.msra.gmra.mxu1 %vm291_vm2, %v2792_v49  ;;  %2448 = vmatmul.msk.bf16.vlgmr.msra.gmra.mxu2 %vm291_vm2, %v2792_v49 }
 0x107   : > { %2449 = vmatmul.msk.bf16.vlgmr.msra.gmra.mxu3 %vm291_vm2, %v2792_v49  ;;  %1052 = vmatpush.bf16.msra.mxu1 %v986_v17  ;;  %v2036_v31 = vld.sshfl [vmem:[#allocation1 + $0x10] sm:$0xff pattern:$0x73625140] }
 0x108   : > { %1065 = vmatpush.bf16.msra.mxu2 %v989_v18  ;;  %1078 = vmatpush.bf16.msra.mxu3 %v992_v19  ;;  %v959_v30 = vpop.permute.xlu0 %958  ;;  %v961_v35 = vpop.permute.xlu1 %960 }
 0x109   : > { %v971_v40 = vsel %vm962_vm5, %v957_v27, %v959_v30  ;;  %v972_v41 = vsel %vm962_vm5, %v959_v30, %v961_v35  ;;  %v1823_v17 = vld.sshfl [vmem:[#allocation1 + $0x20] sm:$0xff pattern:$0x73625140]  ;;  %v1183_v27 = vsel %vm295_vm1, %v2714_v39, 0 }
 0x10a   : > { %v1001_v44 = vsel %vm295_vm1, %v971_v40, 0  ;;  %v1004_v45 = vsel %vm295_vm1, %v972_v41, 0  ;;  %2035 = vst [vmem:[#allocation1 + $0x20] ss:$4 sm:$0xff] %v2615_v2 }
 0x10b   : > { %1839 = vrot.lane.b32.xlu1 %v1817_v61, %s2555_s22 }
 0x10c   : > { %1843 = vrot.lane.b32.xlu0 %v1821_v13, %s2555_s22  ;;  %1835 = vrot.lane.b32.xlu2 %v1811_v12, %s2555_s22 }
 0x10e   : > { %2450 = vmatmul.msk.bf16.vlgmr.msrb.gmra.mxu0 %vm291_vm2, %v2792_v49  ;;  %v1358_v37 = vpop.permute.xlu2 %1357 }
 0x10f   : > { %1091 = vmatpush.bf16.msrb.mxu0 %v995_v23 }
 0x111   : > { %v2040_v30 = vld.sshfl [vmem:[#allocation1 + $0x20] sm:$0xff pattern:$0x73625140]  ;;  %v2044_v46 = vld.sshfl [vmem:[#allocation1 + $0x30] sm:$0xff pattern:$0x73625140] }
 0x113   : > { %1845 = vrot.lane.b32.xlu1 %v1823_v17, %s2555_s22 }
 0x114   : > { %1841 = vrot.lane.b32.xlu2 %v1819_v9, %s2555_s22  ;;  %2064 = vrot.lane.b32.xlu0 %v2040_v30, %s2556_s26 }
 0x116   : > { %2451 = vmatmul.msk.bf16.vlgmr.msrb.gmra.mxu1 %vm291_vm2, %v2792_v49  ;;  %2453 = vmatmul.msk.bf16.vlgmr.msrb.gmra.mxu2 %vm291_vm2, %v2850_v42  ;;  %v1360_v19 = vpop.permute.xlu0 %1359 }
 0x117   : > { %2454 = vmatmul.msk.bf16.vlgmr.msrb.gmra.mxu3 %vm291_vm2, %v2850_v42  ;;  %1104 = vmatpush.bf16.msrb.mxu1 %v998_v43  ;;  %v1379_v21 = vsel %vm1377_vm6, %v1358_v37, %v1360_v19  ;;  %v1356_v22 = vpop.permute.xlu1 %1355 }
 0x118   : > { %1117 = vmatpush.bf16.msrb.mxu2 %v1001_v44  ;;  %1130 = vmatpush.bf16.msrb.mxu3 %v1004_v45  ;;  %v1378_v24 = vsel %vm1377_vm6, %v1356_v22, %v1358_v37  ;;  %v1395_v28 = vsel %vm295_vm1, %v1379_v21, 0 }
 0x119   : > { %v1392_v29 = vsel %vm295_vm1, %v1378_v24, 0 }
 0x11b   : > { %v2865_v49 = vpop.f32.mrf.mxu0  ;;  %2060 = vrot.lane.b32.xlu1 %v2036_v31, %s2556_s26 }
 0x11c   : > { %v1362_v2 = vpop.permute.xlu2 %1361  ;;  %2068 = vrot.lane.b32.xlu0 %v2044_v46, %s2556_s26 }
 0x11d   : > { %v1380_v33 = vsel %vm1377_vm6, %v1360_v19, %v1362_v2 }
 0x11e   : > { %2455 = vmatmul.msk.bf16.vlgmr.msra.gmra.mxu0 %vm291_vm2, %v2850_v42  ;;  %v1398_v44 = vsel %vm295_vm1, %v1380_v33, 0  ;;  %v1364_v45 = vpop.permute.xlu0 %1363 }
 0x11f   : > { %1192 = vmatpush.bf16.msra.mxu0 %v1165_v50  ;;  %v1366_v47 = vpop.permute.xlu1 %1365  ;;  %v1381_v51 = vsel %vm1377_vm6, %v1362_v2, %v1364_v45 }
 0x120   : > { %v1401_v53 = vsel %vm295_vm1, %v1381_v51, 0 }
 0x123   : > { %v337_v54 = vpop.f32.mrf.mxu0  ;;  %v2874_v55 = vpop.f32.mrf.mxu1 }
 0x124   : > { %v1368_v48 = vpop.permute.xlu2 %1367  ;;  %v1382_v54 = vsel %vm1377_vm6, %v1364_v45, %v1366_v47 }
 0x126   : > { %2456 = vmatmul.msk.bf16.vlgmr.msra.gmra.mxu1 %vm291_vm2, %v2850_v42  ;;  %2457 = vmatmul.msk.bf16.vlgmr.msra.gmra.mxu2 %vm291_vm2, %v2850_v42 }
 0x127   : > { %2458 = vmatmul.msk.bf16.vlgmr.msra.gmra.mxu3 %vm291_vm2, %v2850_v42  ;;  %1205 = vmatpush.bf16.msra.mxu1 %v1167_v56 }
 0x128   : > { %1218 = vmatpush.bf16.msra.mxu2 %v1169_v25  ;;  %1231 = vmatpush.bf16.msra.mxu3 %v1171_v57 }
 0x129   : > { %v2888_v26 = vpop.f32.mrf.mxu2 }
 0x12a   : > { %v2892_v5 = vpop.f32.mrf.mxu3 }
 0x12b   : > { %v350_v6 = vpop.f32.mrf.mxu1  ;;  %v2894_v58 = vpop.f32.mrf.mxu0 }
 0x12d   : > { %v1374_v12 = vpop.permute.xlu2 %1373 }
 0x12e   : > { %2459 = vmatmul.msk.bf16.vlgmr.msrb.gmra.mxu0 %vm291_vm2, %v2850_v42 }
 0x12f   : > { %1244 = vmatpush.bf16.msrb.mxu0 %v1173_v59  ;;  %v2038_v59 = vld.sshfl [vmem:[#allocation1 + $0x18] sm:$0xff pattern:$0x73625140] }
 0x130   : > { %2048 = vst [vmem:[#allocation1] ss:$4 sm:$0xff] %v2620_v3  ;;  %2062 = vrot.lane.b32.xlu2 %v2038_v59, %s2556_s26 }
 0x131   : > { %v363_v62 = vpop.f32.mrf.mxu2 }
 0x132   : > { %v376_v63 = vpop.f32.mrf.mxu3  ;;  %v1370_v62 = vpop.permute.xlu0 %1369 }
 0x133   : > { %v389_v0 = vpop.f32.mrf.mxu0  ;;  %v2903_v4 = vpop.f32.mrf.mxu1  ;;  %v1384_v9 = vsel %vm1377_vm6, %v1368_v48, %v1370_v62 }
 0x134   : > { %v1410_v3 = vsel %vm295_vm1, %v1384_v9, 0 }
 0x136   : > { %2460 = vmatmul.msk.bf16.vlgmr.msrb.gmra.mxu1 %vm291_vm2, %v2850_v42  ;;  %2461 = vmatmul.msk.bf16.vlgmr.msrb.gmra.mxu2 %vm291_vm2, %v2850_v42 }
 0x137   : > { %2462 = vmatmul.msk.bf16.vlgmr.msrb.gmra.mxu3 %vm291_vm2, %v2850_v42  ;;  %1257 = vmatpush.bf16.msrb.mxu1 %v1175_v7  ;;  %v2054_v13 = vld.sshfl [vmem:[#allocation1 + $0x10] sm:$0xff pattern:$0x73625140] }
 0x138   : > { %1270 = vmatpush.bf16.msrb.mxu2 %v1177_v10  ;;  %1283 = vmatpush.bf16.msrb.mxu3 %v1179_v11 }
 0x139   : > { %v2919_v8 = vpop.f32.mrf.mxu2 }
 0x13a   : > { %v2923_v36 = vpop.f32.mrf.mxu3 }
 0x13b   : > { %v402_v14 = vpop.f32.mrf.mxu1  ;;  %v2925_v15 = vpop.f32.mrf.mxu0 }
 0x13e   : > { %2464 = vmatmul.msk.bf16.vlgmr.msra.gmra.mxu0 %vm291_vm2, %v2930_v16  ;;  %v1595_v30 = vpop.permute.xlu2 %1594 }
 0x13f   : > { %1296 = vmatpush.bf16.msra.mxu0 %v1181_v1 }
 0x141   : > { %v415_v18 = vpop.f32.mrf.mxu2 }
 0x142   : > { %v428_v20 = vpop.f32.mrf.mxu3 }
 0x143   : > { %v441_v23 = vpop.f32.mrf.mxu0  ;;  %v2940_v38 = vpop.f32.mrf.mxu1  ;;  %v3009_v20 = vld [vmem:[%s3322_s1 + $0xa] sm:$0x3] }
 0x144   : > { %v1372_v11 = vpop.permute.xlu1 %1371  ;;  %v1376_v17 = vpop.permute.xlu0 %1375 }
 0x145   : > { %v1386_v1 = vsel %vm1377_vm6, %v1372_v11, %v1374_v12 }
 0x146   : > { %2465 = vmatmul.msk.bf16.vlgmr.msra.gmra.mxu1 %vm291_vm2, %v2930_v16  ;;  %2466 = vmatmul.msk.bf16.vlgmr.msra.gmra.mxu2 %vm291_vm2, %v2930_v16  ;;  %v1416_v23 = vsel %vm295_vm1, %v1386_v1, 0  ;;  %v1599_v51 = vpop.permute.xlu2 %1598 }
 0x147   : > { %2467 = vmatmul.msk.bf16.vlgmr.msra.gmra.mxu3 %vm291_vm2, %v2930_v16  ;;  %1309 = vmatpush.bf16.msra.mxu1 %v1183_v27 }
 0x148   : > { %1428 = vmatpush.bf16.msra.mxu2 %v1392_v29  ;;  %1441 = vmatpush.bf16.msra.mxu3 %v1395_v28 }
 0x149   : > { %v557_v39 = vpop.f32.mrf.mxu2 }
 0x14a   : > { %v2957_v34 = vadd.f32 %v557_v39, %v2865_v49  ;;  %v570_v35 = vpop.f32.mrf.mxu3  ;;  %v2046_v49 = vld.sshfl [vmem:[#allocation1 + $0x38] sm:$0xff pattern:$0x73625140] }
 0x14b   : > { %v2960_v40 = vadd.f32 %v570_v35, %v2874_v55  ;;  %v454_v41 = vpop.f32.mrf.mxu1  ;;  %v583_v42 = vpop.f32.mrf.mxu0  ;;  %2070 = vrot.lane.b32.xlu1 %v2046_v49, %s2556_s26  ;;  %v1383_v55 = vsel %vm1377_vm6, %v1366_v47, %v1368_v48 }
 0x14c   : > { %v2963_v43 = vadd.f32 %v583_v42, %v2888_v26  ;;  %v1404_v26 = vsel %vm295_vm1, %v1382_v54, 0  ;;  %v1407_v6 = vsel %vm295_vm1, %v1383_v55, 0  ;;  %v1593_v27 = vpop.permute.xlu1 %1592  ;;  %v1591_v35 = vpop.permute.xlu0 %1590  ;;  %v2050_v42 = vld.sshfl [vmem:[#allocation1] sm:$0xff pattern:$0x73625140] }
 0x14d   : > { %v1613_v41 = vsel %vm1612_vm7, %v1591_v35, %v1593_v27  ;;  %v1614_v45 = vsel %vm1612_vm7, %v1593_v27, %v1595_v30 }
 0x14e   : > { %2468 = vmatmul.msk.bf16.vlgmr.msrb.gmra.mxu0 %vm291_vm2, %v2930_v16  ;;  %v1605_v9 = vpop.permute.xlu2 %1604 }
 0x14f   : > { %1454 = vmatpush.bf16.msrb.mxu0 %v1398_v44 }
 0x151   : > { %v559_v50 = vpop.f32.mrf.mxu2 }
 0x152   : > { %v572_v52 = vpop.f32.mrf.mxu3  ;;  %v1630_v50 = vsel %vm295_vm1, %v1614_v45, 0 }
 0x153   : > { %v585_v56 = vpop.f32.mrf.mxu0  ;;  %v596_v25 = vpop.f32.mrf.mxu1  ;;  %2076 = vrot.lane.b32.xlu1 %v2054_v13, %s2556_s26 }
 0x154   : > { %v2974_v57 = vadd.f32 %v596_v25, %v2892_v5  ;;  %v1597_v44 = vpop.permute.xlu1 %1596  ;;  %v1601_v56 = vpop.permute.xlu0 %1600 }
 0x155   : > { %v1616_v54 = vsel %vm1612_vm7, %v1597_v44, %v1599_v51 }
 0x156   : > { %2469 = vmatmul.msk.bf16.vlgmr.msrb.gmra.mxu1 %vm291_vm2, %v2930_v16  ;;  %2470 = vmatmul.msk.bf16.vlgmr.msrb.gmra.mxu2 %vm291_vm2, %v2930_v16  ;;  %v1636_v55 = vsel %vm295_vm1, %v1616_v54, 0 }
 0x157   : > { %2471 = vmatmul.msk.bf16.vlgmr.msrb.gmra.mxu3 %vm291_vm2, %v2930_v16  ;;  %1467 = vmatpush.bf16.msrb.mxu1 %v1401_v53  ;;  %v1617_v53 = vsel %vm1612_vm7, %v1599_v51, %v1601_v56 }
 0x158   : > { %1480 = vmatpush.bf16.msrb.mxu2 %v1404_v26  ;;  %1493 = vmatpush.bf16.msrb.mxu3 %v1407_v6 }
 0x159   : > { %v609_v5 = vpop.f32.mrf.mxu2 }
 0x15a   : > { %v2988_v60 = vadd.f32 %v609_v5, %v2894_v58  ;;  %v622_v61 = vpop.f32.mrf.mxu3  ;;  %v2052_v58 = vld.sshfl [vmem:[#allocation1 + $0x8] sm:$0xff pattern:$0x73625140] }
 0x15b   : > { %v2991_v63 = vadd.f32 %v622_v61, %v2903_v4  ;;  %v598_v0 = vpop.f32.mrf.mxu1  ;;  %v635_v7 = vpop.f32.mrf.mxu0  ;;  %2074 = vrot.lane.b32.xlu0 %v2052_v58, %s2556_s26  ;;  %v2042_v4 = vld.sshfl [vmem:[#allocation1 + $0x28] sm:$0xff pattern:$0x73625140] }
 0x15c   : > { %v2995_v10 = vadd.f32 %v635_v7, %v2919_v8  ;;  %2049 = vst [vmem:[#allocation1 + $0x20] ss:$4 sm:$0xff] %v2772_v32  ;;  %v1385_v8 = vsel %vm1377_vm6, %v1370_v62, %v1372_v11  ;;  %2066 = vrot.lane.b32.xlu2 %v2042_v4, %s2556_s26  ;;  %v1387_v32 = vsel %vm1377_vm6, %v1374_v12, %v1376_v17  ;;  %v1639_v0 = vsel %vm295_vm1, %v1617_v53, 0  ;;  %v1603_v7 = vpop.permute.xlu1 %1602  ;;  %v1607_v58 = vpop.permute.xlu0 %1606 }
 0x15d   : > { %v1413_v22 = vsel %vm295_vm1, %v1385_v8, 0  ;;  %v1419_v24 = vsel %vm295_vm1, %v1387_v32, 0  ;;  %v1611_v17 = vpop.permute.xlu2 %1610 }
 0x15e   : > { %2472 = vmatmul.msk.bf16.vlgmr.msra.gmra.mxu0 %vm291_vm2, %v2930_v16 }
 0x15f   : > { %1506 = vmatpush.bf16.msra.mxu0 %v1410_v3 }
 0x161   : > { %v611_v37 = vpop.f32.mrf.mxu2 }
 0x162   : > { %v624_v14 = vpop.f32.mrf.mxu3 }
 0x163   : > { %v637_v18 = vpop.f32.mrf.mxu0  ;;  %v648_v19 = vpop.f32.mrf.mxu1  ;;  %v2058_v28 = vld.sshfl [vmem:[#allocation1 + $0x20] sm:$0xff pattern:$0x73625140] }
 0x164   : > { %v3013_v21 = vadd.f32 %v648_v19, %v2923_v36  ;;  %2080 = vrot.lane.b32.xlu0 %v2058_v28, %s2556_s26  ;;  %2072 = vrot.lane.b32.xlu2 %v2050_v42, %s2556_s26  ;;  %v1609_v1 = vpop.permute.xlu1 %1608 }
 0x165   : > { %v1621_v18 = vsel %vm1612_vm7, %v1607_v58, %v1609_v1 }
 0x166   : > { %2473 = vmatmul.msk.bf16.vlgmr.msra.gmra.mxu1 %vm291_vm2, %v2930_v16  ;;  %2475 = vmatmul.msk.bf16.vlgmr.msra.gmra.mxu2 %vm291_vm2, %v3009_v20  ;;  %v1651_v28 = vsel %vm295_vm1, %v1621_v18, 0 }
 0x167   : > { %2476 = vmatmul.msk.bf16.vlgmr.msra.gmra.mxu3 %vm291_vm2, %v3009_v20  ;;  %1519 = vmatpush.bf16.msra.mxu1 %v1413_v22 }
 0x168   : > { %1532 = vmatpush.bf16.msra.mxu2 %v1416_v23  ;;  %1545 = vmatpush.bf16.msra.mxu3 %v1419_v24 }
 0x169   : > { %v661_v36 = vpop.f32.mrf.mxu2 }
 0x16a   : > { %v3026_v2 = vadd.f32 %v661_v36, %v2925_v15  ;;  %v674_v29 = vpop.f32.mrf.mxu3  ;;  %v1627_v15 = vsel %vm295_vm1, %v1613_v41, 0  ;;  %v1828_v36 = vpop.permute.xlu0 %1827 }
 0x16b   : > { %v3029_v16 = vadd.f32 %v674_v29, %v2940_v38  ;;  %v650_v31 = vpop.f32.mrf.mxu1  ;;  %v781_v39 = vpop.f32.mrf.mxu0  ;;  %v1622_v29 = vsel %vm1612_vm7, %v1609_v1, %v1611_v17 }
 0x16c   : > { %v3032_v33 = vadd.f32 %v781_v39, %v2957_v34  ;;  %v1615_v34 = vsel %vm1612_vm7, %v1595_v30, %v1597_v44  ;;  %v1654_v41 = vsel %vm295_vm1, %v1622_v29, 0 }
 0x16d   : > { %v1633_v52 = vsel %vm295_vm1, %v1615_v34, 0 }
 0x16e   : > { %2477 = vmatmul.msk.bf16.vlgmr.msrb.gmra.mxu0 %vm291_vm2, %v3009_v20 }
 0x16f   : > { %1663 = vmatpush.bf16.msrb.mxu0 %v1627_v15  ;;  %v1830_v15 = vpop.permute.xlu1 %1829 }
 0x170   : > { %v1849_v42 = vsel %vm1847_vm8, %v1828_v36, %v1830_v15 }
 0x171   : > { %v663_v38 = vpop.f32.mrf.mxu2 }
 0x172   : > { %v676_v46 = vpop.f32.mrf.mxu3  ;;  %v1865_v38 = vsel %vm295_vm1, %v1849_v42, 0  ;;  %v1832_v45 = vpop.permute.xlu0 %1831 }
 0x173   : > { %v783_v47 = vpop.f32.mrf.mxu0  ;;  %v794_v48 = vpop.f32.mrf.mxu1  ;;  %v1850_v46 = vsel %vm1847_vm8, %v1830_v15, %v1832_v45 }
 0x174   : > { %v3042_v49 = vadd.f32 %v794_v48, %v2960_v40  ;;  %v2056_v40 = vld.sshfl [vmem:[#allocation1 + $0x18] sm:$0xff pattern:$0x73625140]  ;;  %v1868_v54 = vsel %vm295_vm1, %v1850_v46, 0 }
 0x175   : > { %2078 = vrot.lane.b32.xlu2 %v2056_v40, %s2556_s26 }
 0x176   : > { %2478 = vmatmul.msk.bf16.vlgmr.msrb.gmra.mxu1 %vm291_vm2, %v3009_v20  ;;  %2479 = vmatmul.msk.bf16.vlgmr.msrb.gmra.mxu2 %vm291_vm2, %v3009_v20 }
 0x177   : > { %2480 = vmatmul.msk.bf16.vlgmr.msrb.gmra.mxu3 %vm291_vm2, %v3009_v20  ;;  %1676 = vmatpush.bf16.msrb.mxu1 %v1630_v50 }
 0x178   : > { %1689 = vmatpush.bf16.msrb.mxu2 %v1633_v52  ;;  %1702 = vmatpush.bf16.msrb.mxu3 %v1636_v55  ;;  %v1834_v55 = vpop.permute.xlu1 %1833 }
 0x179   : > { %v807_v25 = vpop.f32.mrf.mxu2 }
 0x17a   : > { %v3057_v26 = vadd.f32 %v807_v25, %v2963_v43  ;;  %v820_v6 = vpop.f32.mrf.mxu3  ;;  %v1618_v43 = vsel %vm1612_vm7, %v1601_v56, %v1603_v7  ;;  %v1838_v25 = vpop.permute.xlu0 %1837 }
 0x17b   : > { %v3060_v59 = vadd.f32 %v820_v6, %v2974_v57  ;;  %v796_v5 = vpop.f32.mrf.mxu1  ;;  %v833_v61 = vpop.f32.mrf.mxu0  ;;  %v1619_v57 = vsel %vm1612_vm7, %v1603_v7, %v1605_v9  ;;  %v1642_v37 = vsel %vm295_vm1, %v1618_v43, 0 }
 0x17c   : > { %v3063_v62 = vadd.f32 %v833_v61, %v2988_v60  ;;  %v1620_v60 = vsel %vm1612_vm7, %v1605_v9, %v1607_v58  ;;  %v1645_v8 = vsel %vm295_vm1, %v1619_v57, 0 }
 0x17d   : > { %v1648_v14 = vsel %vm295_vm1, %v1620_v60, 0 }
 0x17e   : > { %2481 = vmatmul.msk.bf16.vlgmr.msra.gmra.mxu0 %vm291_vm2, %v3009_v20 }
 0x17f   : > { %1715 = vmatpush.bf16.msra.mxu0 %v1639_v0 }
 0x181   : > { %v809_v3 = vpop.f32.mrf.mxu2 }
 0x182   : > { %v822_v11 = vpop.f32.mrf.mxu3  ;;  %v1840_v3 = vpop.permute.xlu1 %1839 }
 0x183   : > { %v835_v12 = vpop.f32.mrf.mxu0  ;;  %v846_v4 = vpop.f32.mrf.mxu1  ;;  %v1854_v43 = vsel %vm1847_vm8, %v1838_v25, %v1840_v3 }
 0x184   : > { %v3072_v13 = vadd.f32 %v846_v4, %v2991_v63 }
 0x186   : > { %2482 = vmatmul.msk.bf16.vlgmr.msra.gmra.mxu1 %vm291_vm2, %v3009_v20  ;;  %2483 = vmatmul.msk.bf16.vlgmr.msra.gmra.mxu2 %vm291_vm2, %v3009_v20 }
 0x187   : > { %2484 = vmatmul.msk.bf16.vlgmr.msra.gmra.mxu3 %vm291_vm2, %v3009_v20  ;;  %1728 = vmatpush.bf16.msra.mxu1 %v1642_v37  ;;  %v3093_v20 = vld [vmem:[%s3322_s1 + $0xc] sm:$0x3] }
 0x188   : > { %1741 = vmatpush.bf16.msra.mxu2 %v1645_v8  ;;  %1754 = vmatpush.bf16.msra.mxu3 %v1648_v14  ;;  %v1880_v8 = vsel %vm295_vm1, %v1854_v43, 0  ;;  %v1844_v14 = vpop.permute.xlu0 %1843 }
 0x189   : > { %v859_v63 = vpop.f32.mrf.mxu2 }
 0x18a   : > { %v3085_v19 = vadd.f32 %v859_v63, %v2995_v10  ;;  %v872_v32 = vpop.f32.mrf.mxu3  ;;  %v1826_v10 = vpop.permute.xlu2 %1825 }
 0x18b   : > { %v3088_v22 = vadd.f32 %v872_v32, %v3013_v21  ;;  %v848_v23 = vpop.f32.mrf.mxu1  ;;  %v885_v24 = vpop.f32.mrf.mxu0  ;;  %v1848_v31 = vsel %vm1847_vm8, %v1826_v10, %v1828_v36 }
 0x18c   : > { %v3096_v27 = vadd.f32 %v885_v24, %v3026_v2  ;;  %v1862_v44 = vsel %vm295_vm1, %v1848_v31, 0  ;;  %v1846_v17 = vpop.permute.xlu1 %1845 }
 0x18d   : > { %v1857_v18 = vsel %vm1847_vm8, %v1844_v14, %v1846_v17 }
 0x18e   : > { %2486 = vmatmul.msk.bf16.vlgmr.msrb.gmra.mxu0 %vm291_vm2, %v3093_v20  ;;  %v1889_v10 = vsel %vm295_vm1, %v1857_v18, 0 }
 0x18f   : > { %1767 = vmatpush.bf16.msrb.mxu0 %v1651_v28 }
 0x191   : > { %v861_v21 = vpop.f32.mrf.mxu2 }
 0x192   : > { %v874_v30 = vpop.f32.mrf.mxu3  ;;  %v1836_v56 = vpop.permute.xlu2 %1835 }
 0x193   : > { %v887_v39 = vpop.f32.mrf.mxu0  ;;  %v898_v35 = vpop.f32.mrf.mxu1  ;;  %v1853_v6 = vsel %vm1847_vm8, %v1836_v56, %v1838_v25 }
 0x194   : > { %v3104_v2 = vadd.f32 %v898_v35, %v3029_v16  ;;  %v1877_v9 = vsel %vm295_vm1, %v1853_v6, 0  ;;  %v2061_v15 = vpop.permute.xlu1 %2060 }
 0x196   : > { %2487 = vmatmul.msk.bf16.vlgmr.msrb.gmra.mxu1 %vm291_vm2, %v3093_v20  ;;  %2488 = vmatmul.msk.bf16.vlgmr.msrb.gmra.mxu2 %vm291_vm2, %v3093_v20 }
 0x197   : > { %2489 = vmatmul.msk.bf16.vlgmr.msrb.gmra.mxu3 %vm291_vm2, %v3093_v20  ;;  %1780 = vmatpush.bf16.msrb.mxu1 %v1654_v41  ;;  %v2065_v41 = vpop.permute.xlu0 %2064 }
 0x198   : > { %1898 = vmatpush.bf16.msrb.mxu2 %v1862_v44  ;;  %1911 = vmatpush.bf16.msrb.mxu3 %v1865_v38 }
 0x199   : > { %v1015_v16 = vpop.f32.mrf.mxu2 }
 0x19a   : > { %v3118_v34 = vadd.f32 %v1015_v16, %v3032_v33  ;;  %v1028_v47 = vpop.f32.mrf.mxu3  ;;  %v1851_v33 = vsel %vm1847_vm8, %v1832_v45, %v1834_v55  ;;  %v1842_v58 = vpop.permute.xlu2 %1841 }
 0x19b   : > { %v3121_v48 = vadd.f32 %v1028_v47, %v3042_v49  ;;  %v900_v50 = vpop.f32.mrf.mxu1  ;;  %v1041_v51 = vpop.f32.mrf.mxu0  ;;  %v1852_v49 = vsel %vm1847_vm8, %v1834_v55, %v1836_v56  ;;  %v1871_v0 = vsel %vm295_vm1, %v1851_v33, 0 }
 0x19c   : > { %v3124_v52 = vadd.f32 %v1041_v51, %v3057_v26  ;;  %v1874_v7 = vsel %vm295_vm1, %v1852_v49, 0 }
 0x19e   : > { %2490 = vmatmul.msk.bf16.vlgmr.msra.gmra.mxu0 %vm291_vm2, %v3093_v20 }
 0x19f   : > { %1924 = vmatpush.bf16.msra.mxu0 %v1868_v54  ;;  %v2069_v51 = vpop.permute.xlu0 %2068 }
 0x1a1   : > { %v1017_v40 = vpop.f32.mrf.mxu2 }
 0x1a2   : > { %v1030_v53 = vpop.f32.mrf.mxu3  ;;  %v2063_v21 = vpop.permute.xlu2 %2062 }
 0x1a3   : > { %v1043_v5 = vpop.f32.mrf.mxu0  ;;  %v1054_v26 = vpop.f32.mrf.mxu1  ;;  %v2083_v42 = vsel %vm2082_vm9, %v2061_v15, %v2063_v21 }
 0x1a4   : > { %v3133_v61 = vadd.f32 %v1054_v26, %v3060_v59  ;;  %v2557_v26 = vmov 0  }
 0x1a5   : > { %2538 = vset.pattern.permute.xlu1 %v2557_v26  ;;  %2539 = vset.pattern.permute.xlu0 %v2557_v26 }
 0x1a6   : > { %2491 = vmatmul.msk.bf16.vlgmr.msra.gmra.mxu1 %vm291_vm2, %v3093_v20  ;;  %2492 = vmatmul.msk.bf16.vlgmr.msra.gmra.mxu2 %vm291_vm2, %v3093_v20 }
 0x1a7   : > { %2493 = vmatmul.msk.bf16.vlgmr.msra.gmra.mxu3 %vm291_vm2, %v3093_v20  ;;  %1937 = vmatpush.bf16.msra.mxu1 %v1871_v0  ;;  %v2266_v0 = vld [vmem:[%s3323_s2] sm:$0xf] }
 0x1a8   : > { %1950 = vmatpush.bf16.msra.mxu2 %v1874_v7  ;;  %1963 = vmatpush.bf16.msra.mxu3 %v1877_v9 }
 0x1a9   : > { %v1067_v59 = vpop.f32.mrf.mxu2  ;;  %2269 = vperm.xlu1 %2538, %v2266_v0  }
 0x1aa   : > { %v3146_v11 = vadd.f32 %v1067_v59, %v3063_v62  ;;  %v1080_v57 = vpop.f32.mrf.mxu3  ;;  %v1855_v62 = vsel %vm1847_vm8, %v1840_v3, %v1842_v58 }
 0x1ab   : > { %v3149_v12 = vadd.f32 %v1080_v57, %v3072_v13  ;;  %v1056_v4 = vpop.f32.mrf.mxu1  ;;  %v1093_v60 = vpop.f32.mrf.mxu0  ;;  %v1856_v13 = vsel %vm1847_vm8, %v1842_v58, %v1844_v14  ;;  %v1883_v28 = vsel %vm295_vm1, %v1855_v62, 0 }
 0x1ac   : > { %v3152_v37 = vadd.f32 %v1093_v60, %v3085_v19  ;;  %v3163_v19 = vld [vmem:[%s3322_s1 + $0xe] sm:$0x3]  ;;  %v1886_v36 = vsel %vm295_vm1, %v1856_v13, 0 }
 0x1ae   : > { %2494 = vmatmul.msk.bf16.vlgmr.msrb.gmra.mxu0 %vm291_vm2, %v3093_v20 }
 0x1af   : > { %1976 = vmatpush.bf16.msrb.mxu0 %v1880_v8 }
 0x1b1   : > { %v1069_v1 = vpop.f32.mrf.mxu2 }
 0x1b2   : > { %v1082_v63 = vpop.f32.mrf.mxu3 }
 0x1b3   : > { %v1095_v32 = vpop.f32.mrf.mxu0  ;;  %v1106_v23 = vpop.f32.mrf.mxu1 }
 0x1b4   : > { %v3166_v24 = vadd.f32 %v1106_v23, %v3088_v22 }
 0x1b6   : > { %2495 = vmatmul.msk.bf16.vlgmr.msrb.gmra.mxu1 %vm291_vm2, %v3093_v20  ;;  %2497 = vmatmul.msk.bf16.vlgmr.msrb.gmra.mxu2 %vm291_vm2, %v3163_v19  ;;  %v2067_v44 = vpop.permute.xlu2 %2066 }
 0x1b7   : > { %2498 = vmatmul.msk.bf16.vlgmr.msrb.gmra.mxu3 %vm291_vm2, %v3163_v19  ;;  %1989 = vmatpush.bf16.msrb.mxu1 %v1883_v28  ;;  %v2085_v16 = vsel %vm2082_vm9, %v2065_v41, %v2067_v44  ;;  %v2086_v55 = vsel %vm2082_vm9, %v2067_v44, %v2069_v51 }
 0x1b8   : > { %2002 = vmatpush.bf16.msrb.mxu2 %v1886_v36  ;;  %2015 = vmatpush.bf16.msrb.mxu3 %v1889_v10  ;;  %v2103_v54 = vsel %vm295_vm1, %v2085_v16, 0  ;;  %v2106_v56 = vsel %vm295_vm1, %v2086_v55, 0  ;;  %v2507_v36 = vld [vmem:[%s3322_s1 + $0x10] sm:$0x3] }
 0x1b9   : > { %v1119_v22 = vpop.f32.mrf.mxu2 }
 0x1ba   : > { %v3178_v29 = vadd.f32 %v1119_v22, %v3096_v27  ;;  %v1132_v30 = vpop.f32.mrf.mxu3  ;;  %v2097_v27 = vsel %vm295_vm1, %v2083_v42, 0 }
 0x1bb   : > { %v3181_v31 = vadd.f32 %v1132_v30, %v3104_v2  ;;  %v1108_v39 = vpop.f32.mrf.mxu1  ;;  %v1194_v35 = vpop.f32.mrf.mxu0  ;;  %v2084_v2 = vsel %vm2082_vm9, %v2063_v21, %v2065_v41 }
 0x1bc   : > { %v3184_v20 = vadd.f32 %v1194_v35, %v3118_v34  ;;  %v2100_v50 = vsel %vm295_vm1, %v2084_v2, 0 }
 0x1bd   : > { %v2071_v40 = vpop.permute.xlu1 %2070 }
 0x1be   : > { %2499 = vmatmul.msk.bf16.vlgmr.msra.gmra.mxu0 %vm291_vm2, %v3163_v19  ;;  %v2087_v33 = vsel %vm2082_vm9, %v2069_v51, %v2071_v40 }
 0x1bf   : > { %2133 = vmatpush.bf16.msra.mxu0 %v2097_v27  ;;  %v2109_v9 = vsel %vm295_vm1, %v2087_v33, 0 }
 0x1c1   : > { %v1121_v38 = vpop.f32.mrf.mxu2 }
 0x1c2   : > { %v1134_v45 = vpop.f32.mrf.mxu3 }
 0x1c3   : > { %v1196_v46 = vpop.f32.mrf.mxu0  ;;  %v1207_v34 = vpop.f32.mrf.mxu1 }
 0x1c4   : > { %v3193_v47 = vadd.f32 %v1207_v34, %v3121_v48 }
 0x1c5   : > { %v2077_v58 = vpop.permute.xlu1 %2076 }
 0x1c6   : > { %2500 = vmatmul.msk.bf16.vlgmr.msra.gmra.mxu1 %vm291_vm2, %v3163_v19  ;;  %2501 = vmatmul.msk.bf16.vlgmr.msra.gmra.mxu2 %vm291_vm2, %v3163_v19 }
 0x1c7   : > { %2502 = vmatmul.msk.bf16.vlgmr.msra.gmra.mxu3 %vm291_vm2, %v3163_v19  ;;  %2146 = vmatpush.bf16.msra.mxu1 %v2100_v50 }
 0x1c8   : > { %2159 = vmatpush.bf16.msra.mxu2 %v2103_v54  ;;  %2172 = vmatpush.bf16.msra.mxu3 %v2106_v56 }
 0x1c9   : > { %v1220_v48 = vpop.f32.mrf.mxu2 }
 0x1ca   : > { %v3207_v25 = vadd.f32 %v1220_v48, %v3124_v52  ;;  %v1233_v53 = vpop.f32.mrf.mxu3  ;;  %v2073_v52 = vpop.permute.xlu2 %2072 }
 0x1cb   : > { %v3210_v49 = vadd.f32 %v1233_v53, %v3133_v61  ;;  %v1209_v6 = vpop.f32.mrf.mxu1  ;;  %v1246_v5 = vpop.f32.mrf.mxu0  ;;  %v2088_v59 = vsel %vm2082_vm9, %v2071_v40, %v2073_v52 }
 0x1cc   : > { %v3216_v7 = vadd.f32 %v1246_v5, %v3146_v11  ;;  %v2112_v14 = vsel %vm295_vm1, %v2088_v59, 0 }
 0x1cd   : > { %v2075_v3 = vpop.permute.xlu0 %2074 }
 0x1ce   : > { %2503 = vmatmul.msk.bf16.vlgmr.msrb.gmra.mxu0 %vm291_vm2, %v3163_v19  ;;  %v2089_v57 = vsel %vm2082_vm9, %v2073_v52, %v2075_v3  ;;  %v2090_v11 = vsel %vm2082_vm9, %v2075_v3, %v2077_v58 }
 0x1cf   : > { %2185 = vmatpush.bf16.msrb.mxu0 %v2109_v9  ;;  %v2115_v1 = vsel %vm295_vm1, %v2089_v57, 0  ;;  %v2118_v62 = vsel %vm295_vm1, %v2090_v11, 0 }
 0x1d1   : > { %v1222_v61 = vpop.f32.mrf.mxu2 }
 0x1d2   : > { %v1235_v43 = vpop.f32.mrf.mxu3  ;;  %v2079_v17 = vpop.permute.xlu2 %2078 }
 0x1d3   : > { %v1248_v4 = vpop.f32.mrf.mxu0  ;;  %v1259_v60 = vpop.f32.mrf.mxu1  ;;  %v2091_v63 = vsel %vm2082_vm9, %v2077_v58, %v2079_v17 }
 0x1d4   : > { %v1320_v8 = vadd.f32 %v1259_v60, %v3149_v12 }
 0x1d6   : > { %2504 = vmatmul.msk.bf16.vlgmr.msrb.gmra.mxu1 %vm291_vm2, %v3163_v19  ;;  %2505 = vmatmul.msk.bf16.vlgmr.msrb.gmra.mxu2 %vm291_vm2, %v3163_v19  ;;  %v2081_v21 = vpop.permute.xlu0 %2080 }
 0x1d7   : > { %2506 = vmatmul.msk.bf16.vlgmr.msrb.gmra.mxu3 %vm291_vm2, %v3163_v19  ;;  %2198 = vmatpush.bf16.msrb.mxu1 %v2112_v14  ;;  %v2121_v19 = vsel %vm295_vm1, %v2091_v63, 0 }
 0x1d8   : > { %2211 = vmatpush.bf16.msrb.mxu2 %v2115_v1  ;;  %2224 = vmatpush.bf16.msrb.mxu3 %v2118_v62 }
 0x1d9   : > { %v1272_v12 = vpop.f32.mrf.mxu2 }
 0x1da   : > { %v1321_v13 = vadd.f32 %v1272_v12, %v3152_v37  ;;  %v1285_v18 = vpop.f32.mrf.mxu3  ;;  %v2092_v37 = vsel %vm2082_vm9, %v2079_v17, %v2081_v21 }
 0x1db   : > { %v1322_v32 = vadd.f32 %v1285_v18, %v3166_v24  ;;  %v1261_v23 = vpop.f32.mrf.mxu1  ;;  %v1298_v28 = vpop.f32.mrf.mxu0  ;;  %v2124_v41 = vsel %vm295_vm1, %v2092_v37, 0 }
 0x1dc   : > { %v1323_v10 = vadd.f32 %v1298_v28, %v3178_v29 }
 0x1de   : > { %2508 = vmatmul.msk.bf16.vlgmr.msra.gmra.mxu0 %vm291_vm2, %v2507_v36 }
 0x1df   : > { %2237 = vmatpush.bf16.msra.mxu0 %v2121_v19 }
 0x1e1   : > { %v1274_v22 = vpop.f32.mrf.mxu2 }
 0x1e2   : > { %v1287_v30 = vpop.f32.mrf.mxu3 }
 0x1e3   : > { %v1300_v39 = vpop.f32.mrf.mxu0  ;;  %v1311_v24 = vpop.f32.mrf.mxu1 }
 0x1e4   : > { %v1324_v35 = vadd.f32 %v1311_v24, %v3181_v31 }
 0x1e6   : > { %2509 = vmatmul.msk.bf16.vlgmr.msra.gmra.mxu1 %vm291_vm2, %v2507_v36  ;;  %2510 = vmatmul.msk.bf16.vlgmr.msra.gmra.mxu2 %vm291_vm2, %v2507_v36 }
 0x1e7   : > { %2511 = vmatmul.msk.bf16.vlgmr.msra.gmra.mxu3 %vm291_vm2, %v2507_v36  ;;  %2250 = vmatpush.bf16.msra.mxu1 %v2124_v41 }
 0x1e9   : > { %v1430_v29 = vpop.f32.mrf.mxu2 }
 0x1ea   : > { %v1551_v15 = vadd.f32 %v1430_v29, %v3184_v20  ;;  %v1443_v42 = vpop.f32.mrf.mxu3 }
 0x1eb   : > { %v1552_v44 = vadd.f32 %v1443_v42, %v3193_v47  ;;  %v1313_v27 = vpop.f32.mrf.mxu1  ;;  %v1456_v38 = vpop.f32.mrf.mxu0 }
 0x1ec   : > { %v1553_v2 = vadd.f32 %v1456_v38, %v3207_v25 }
 0x1ee   : > { %2512 = vmatmul.msk.bf16.vlgmr.msrb.gmra.mxu0 %vm291_vm2, %v2507_v36 }
 0x1f1   : > { %v1432_v31 = vpop.f32.mrf.mxu2 }
 0x1f2   : > { %v1445_v45 = vpop.f32.mrf.mxu3 }
 0x1f3   : > { %v1458_v16 = vpop.f32.mrf.mxu0  ;;  %v1469_v46 = vpop.f32.mrf.mxu1 }
 0x1f4   : > { %v1554_v34 = vadd.f32 %v1469_v46, %v3210_v49 }
 0x1f6   : > { %2513 = vmatmul.msk.bf16.vlgmr.msrb.gmra.mxu1 %vm291_vm2, %v2507_v36  ;;  %2514 = vmatmul.msk.bf16.vlgmr.msrb.gmra.mxu2 %vm291_vm2, %v2507_v36 }
 0x1f7   : > { %2515 = vmatmul.msk.bf16.vlgmr.msrb.gmra.mxu3 %vm291_vm2, %v2507_v36 }
 0x1f9   : > { %v1482_v20 = vpop.f32.mrf.mxu2 }
 0x1fa   : > { %v1555_v47 = vadd.f32 %v1482_v20, %v3216_v7  ;;  %v1495_v50 = vpop.f32.mrf.mxu3 }
 0x1fb   : > { %v1556_v51 = vadd.f32 %v1495_v50, %v1320_v8  ;;  %v1471_v54 = vpop.f32.mrf.mxu1  ;;  %v1508_v55 = vpop.f32.mrf.mxu0 }
 0x1fc   : > { %v1557_v56 = vadd.f32 %v1508_v55, %v1321_v13 }
 0x1fe   : > { %2516 = vmatmul.msk.bf16.vlgmr.msra.gmra.mxu0 %vm291_vm2, %v2507_v36 }
 0x201   : > { %v1484_v40 = vpop.f32.mrf.mxu2 }
 0x202   : > { %v1497_v48 = vpop.f32.mrf.mxu3 }
 0x203   : > { %v1510_v33 = vpop.f32.mrf.mxu0  ;;  %v1521_v25 = vpop.f32.mrf.mxu1 }
 0x204   : > { %v1558_v53 = vadd.f32 %v1521_v25, %v1322_v32 }
 0x206   : > { %2517 = vmatmul.msk.bf16.vlgmr.msra.gmra.mxu1 %vm291_vm2, %v2507_v36 }
 0x209   : > { %v1534_v49 = vpop.f32.mrf.mxu2 }
 0x20a   : > { %v1559_v6 = vadd.f32 %v1534_v49, %v1323_v10  ;;  %v1547_v5 = vpop.f32.mrf.mxu3 }
 0x20b   : > { %v1560_v26 = vadd.f32 %v1547_v5, %v1324_v35  ;;  %v1523_v0 = vpop.f32.mrf.mxu1  ;;  %v1665_v7 = vpop.f32.mrf.mxu0  ;;  %v3280_v5 = vld [vmem:[%s2594_s20] sm:$0xff] }
 0x20c   : > { %v1786_v9 = vadd.f32 %v1665_v7, %v1551_v15  ;;  %v2297_v0 = vperm.slane %v3280_v5, 1 }
 0x211   : > { %v1536_v52 = vpop.f32.mrf.mxu2 }
 0x212   : > { %v1549_v61 = vpop.f32.mrf.mxu3 }
 0x213   : > { %v1667_v3 = vpop.f32.mrf.mxu0  ;;  %v1678_v59 = vpop.f32.mrf.mxu1  ;;  %v2296_v61 = vperm.slane %v3280_v5, 0 }
 0x214   : > { %v1787_v43 = vadd.f32 %v1678_v59, %v1552_v44 }
 0x219   : > { %v1691_v57 = vpop.f32.mrf.mxu2 }
 0x21a   : > { %v1788_v58 = vadd.f32 %v1691_v57, %v1553_v2  ;;  %v1704_v4 = vpop.f32.mrf.mxu3 }
 0x21b   : > { %v1789_v60 = vadd.f32 %v1704_v4, %v1554_v34  ;;  %v1680_v11 = vpop.f32.mrf.mxu1  ;;  %v1717_v8 = vpop.f32.mrf.mxu0 }
 0x21c   : > { %v3260_v14 = vadd.f32 %v1717_v8, %v1555_v47 }
 0x221   : > { %v1693_v1 = vpop.f32.mrf.mxu2 }
 0x222   : > { %v1706_v62 = vpop.f32.mrf.mxu3 }
 0x223   : > { %v1719_v17 = vpop.f32.mrf.mxu0  ;;  %v1730_v12 = vpop.f32.mrf.mxu1 }
 0x224   : > { %v3262_v63 = vadd.f32 %v1730_v12, %v1556_v51 }
 0x229   : > { %v1743_v13 = vpop.f32.mrf.mxu2 }
 0x22a   : > { %v3264_v18 = vadd.f32 %v1743_v13, %v1557_v56  ;;  %v1756_v32 = vpop.f32.mrf.mxu3  ;;  %v3276_v56 = vpop.permute.xlu1 %2269  ;;  %v2299_v13 = vperm.slane %v3280_v5, 3 }
 0x22b   : > { %v3266_v23 = vadd.f32 %v1756_v32, %v1558_v53  ;;  %v1732_v28 = vpop.f32.mrf.mxu1  ;;  %v1769_v36 = vpop.f32.mrf.mxu0 }
 0x22c   : > { %v3268_v10 = vadd.f32 %v1769_v36, %v1559_v6  ;;  %v2298_v36 = vperm.slane %v3280_v5, 2 }
 0x231   : > { %v1745_v19 = vpop.f32.mrf.mxu2 }
 0x232   : > { %v1758_v21 = vpop.f32.mrf.mxu3 }
 0x233   : > { %v1771_v22 = vpop.f32.mrf.mxu0  ;;  %v1782_v37 = vpop.f32.mrf.mxu1 }
 0x234   : > { %v3270_v30 = vadd.f32 %v1782_v37, %v1560_v26 }
 0x239   : > { %v1900_v39 = vpop.f32.mrf.mxu2 }
 0x23a   : > { %v1913_v24 = vpop.f32.mrf.mxu3  ;;  %v2021_v54 = vadd.f32 %v1900_v39, %v1786_v9 }
 0x23b   : > { %v1784_v35 = vpop.f32.mrf.mxu1  ;;  %v1926_v41 = vpop.f32.mrf.mxu0  ;;  %v2022_v48 = vadd.f32 %v1913_v24, %v1787_v43 }
 0x23c   : > { %v2023_v7 = vadd.f32 %v1926_v41, %v1788_v58 }
 0x241   : > { %v1902_v29 = vpop.f32.mrf.mxu2 }
 0x242   : > { %v1915_v15 = vpop.f32.mrf.mxu3 }
 0x243   : > { %v1928_v42 = vpop.f32.mrf.mxu0  ;;  %v1939_v44 = vpop.f32.mrf.mxu1 }
 0x244   : > { %v2024_v3 = vadd.f32 %v1939_v44, %v1789_v60 }
 0x249   : > { %v1952_v27 = vpop.f32.mrf.mxu2 }
 0x24a   : > { %v1965_v38 = vpop.f32.mrf.mxu3  ;;  %v2025_v32 = vadd.f32 %v1952_v27, %v3260_v14 }
 0x24b   : > { %v1941_v2 = vpop.f32.mrf.mxu1  ;;  %v1978_v31 = vpop.f32.mrf.mxu0  ;;  %v2026_v39 = vadd.f32 %v1965_v38, %v3262_v63  ;;  %v2300_v63 = vperm.slane %v3280_v5, 4 }
 0x24c   : > { %v2301_v2 = vperm.slane %v3280_v5, 5 }
 0x251   : > { %v1954_v45 = vpop.f32.mrf.mxu2 }
 0x252   : > { %v1967_v16 = vpop.f32.mrf.mxu3  ;;  %v2027_v45 = vadd.f32 %v1978_v31, %v3264_v18  ;;  %v2303_v31 = vperm.slane %v3280_v5, 7 }
 0x253   : > { %v1980_v46 = vpop.f32.mrf.mxu0  ;;  %v1991_v34 = vpop.f32.mrf.mxu1 }
 0x254   : > { %v2028_v46 = vadd.f32 %v1991_v34, %v3266_v23 }
 0x259   : > { %v3272_v20 = vpop.f32.mrf.mxu2 }
 0x25a   : > { %v3274_v47 = vpop.f32.mrf.mxu3 }
 0x25b   : > { %v1993_v50 = vpop.f32.mrf.mxu1  ;;  %v2135_v51 = vpop.f32.mrf.mxu0 }
 0x25c   : > { %v2256_v55 = vadd.f32 %v2135_v51, %v2021_v54 }
 0x25e   : > { %v2272_v6 = vadd.f32 %v3276_v56, %v2256_v55 }
 0x260   : > { %v2282_v52 = vmax.f32 %v2272_v6, 0.0  ;;  %v2029_v6 = vadd.f32 %v3272_v20, %v3268_v10 }
 0x261   : > { %v2006_v40 = vpop.f32.mrf.mxu2 }
 0x262   : > { %v2019_v33 = vpop.f32.mrf.mxu3  ;;  %v2316_v62 = vmul.f32 %v2296_v61, %v2282_v52  ;;  %v2030_v61 = vadd.f32 %v3274_v47, %v3270_v30 }
 0x263   : > { %v2137_v25 = vpop.f32.mrf.mxu0  ;;  %v2148_v53 = vpop.f32.mrf.mxu1 }
 0x264   : > { %v2257_v49 = vadd.f32 %v2148_v53, %v2022_v48 }
 0x266   : > { %v2273_v26 = vadd.f32 %v3276_v56, %v2257_v49 }
 0x268   : > { %v2283_v9 = vmax.f32 %v2273_v26, 0.0  ;;  %v2302_v26 = vperm.slane %v3280_v5, 6 }
 0x269   : > { %v2161_v59 = vpop.f32.mrf.mxu2 }
 0x26a   : > { %v2317_v43 = vmul.f32 %v2297_v0, %v2283_v9  ;;  %v2258_v57 = vadd.f32 %v2161_v59, %v2023_v7  ;;  %v2174_v4 = vpop.f32.mrf.mxu3 }
 0x26b   : > { %v2259_v11 = vadd.f32 %v2174_v4, %v2024_v3  ;;  %v2150_v8 = vpop.f32.mrf.mxu1  ;;  %v2187_v1 = vpop.f32.mrf.mxu0 }
 0x26c   : > { %v2336_v17 = vrot.slane %v2317_v43, 4  ;;  %v2274_v12 = vadd.f32 %v3276_v56, %v2258_v57  ;;  %v2260_v21 = vadd.f32 %v2187_v1, %v2025_v32  ;;  %v2293_v8 = vld [vmem:[%s2594_s20 + $0x8] sm:$0x3] }
 0x26d   : > { %v2275_v58 = vadd.f32 %v3276_v56, %v2259_v11  ;;  %v2305_v1 = vperm.slane %v2293_v8, 1 }
 0x26e   : > { %v2342_v60 = vsel %vm2341_vm10, %v2316_v62, %v2336_v17  ;;  %v2284_v28 = vmax.f32 %v2274_v12, 0.0  ;;  %v2276_v14 = vadd.f32 %v3276_v56, %v2260_v21  ;;  %v2304_v17 = vperm.slane %v2293_v8, 0 }
 0x26f   : > { %2352 = vst [vmem:[%s2599_s24] sm:$0xff] %v2342_v60  ;;  %v2285_v19 = vmax.f32 %v2275_v58, 0.0 }
 0x270   : > { %v2318_v35 = vmul.f32 %v2298_v36, %v2284_v28  ;;  %v2286_v16 = vmax.f32 %v2276_v14, 0.0 }
 0x271   : > { %v2319_v22 = vmul.f32 %v2299_v13, %v2285_v19  ;;  %v2163_v37 = vpop.f32.mrf.mxu2 }
 0x272   : > { %v2176_v24 = vpop.f32.mrf.mxu3  ;;  %v2320_v25 = vmul.f32 %v2300_v63, %v2286_v16 }
 0x273   : > { %v2337_v41 = vrot.slane %v2319_v22, 4  ;;  %v2189_v29 = vpop.f32.mrf.mxu0  ;;  %v2200_v15 = vpop.f32.mrf.mxu1 }
 0x274   : > { %v2261_v42 = vadd.f32 %v2200_v15, %v2026_v39 }
 0x275   : > { %v2343_v44 = vsel %vm2341_vm10, %v2318_v35, %v2337_v41 }
 0x276   : > { %2353 = vst [vmem:[%s2599_s24 + $0x8] sm:$0xff] %v2343_v44  ;;  %v2277_v27 = vadd.f32 %v3276_v56, %v2261_v42 }
 0x278   : > { %v2287_v38 = vmax.f32 %v2277_v27, 0.0 }
 0x279   : > { %v2213_v50 = vpop.f32.mrf.mxu2 }
 0x27a   : > { %v2321_v51 = vmul.f32 %v2301_v2, %v2287_v38  ;;  %v2262_v54 = vadd.f32 %v2213_v50, %v2027_v45  ;;  %v2226_v55 = vpop.f32.mrf.mxu3 }
 0x27b   : > { %v2263_v40 = vadd.f32 %v2226_v55, %v2028_v46  ;;  %v2202_v48 = vpop.f32.mrf.mxu1  ;;  %v2239_v33 = vpop.f32.mrf.mxu0 }
 0x27c   : > { %v2338_v53 = vrot.slane %v2321_v51, 4  ;;  %v2278_v49 = vadd.f32 %v3276_v56, %v2262_v54  ;;  %v2264_v7 = vadd.f32 %v2239_v33, %v2029_v6 }
 0x27d   : > { %v2279_v18 = vadd.f32 %v3276_v56, %v2263_v40 }
 0x27e   : > { %v2344_v23 = vsel %vm2341_vm10, %v2320_v25, %v2338_v53  ;;  %v2288_v34 = vmax.f32 %v2278_v49, 0.0  ;;  %v2280_v20 = vadd.f32 %v3276_v56, %v2264_v7 }
 0x27f   : > { %2354 = vst [vmem:[%s2599_s24 + $0x10] sm:$0xff] %v2344_v23  ;;  %v2289_v0 = vmax.f32 %v2279_v18, 0.0 }
 0x280   : > { %v2322_v59 = vmul.f32 %v2302_v26, %v2288_v34  ;;  %v2290_v62 = vmax.f32 %v2280_v20, 0.0 }
 0x281   : > { %v2323_v52 = vmul.f32 %v2303_v31, %v2289_v0  ;;  %v2215_v9 = vpop.f32.mrf.mxu2 }
 0x282   : > { %v2228_v3 = vpop.f32.mrf.mxu3  ;;  %v2324_v58 = vmul.f32 %v2304_v17, %v2290_v62 }
 0x283   : > { %v2339_v43 = vrot.slane %v2323_v52, 4  ;;  %v2252_v57 = vpop.f32.mrf.mxu1  ;;  %v2241_v10 = vpop.f32.mrf.mxu0 }
 0x284   : > { %v2265_v4 = vadd.f32 %v2252_v57, %v2030_v61 }
 0x285   : > { %v2345_v11 = vsel %vm2341_vm10, %v2322_v59, %v2339_v43 }
 0x286   : > { %2355 = vst [vmem:[%s2599_s24 + $0x18] sm:$0xff] %v2345_v11  ;;  %v2281_v5 = vadd.f32 %v3276_v56, %v2265_v4 }
 0x288   : > { %v2291_v12 = vmax.f32 %v2281_v5, 0.0 }
 0x28a   : > { %v2325_v30 = vmul.f32 %v2305_v1, %v2291_v12 }
 0x28b   : > { %v2254_v47 = vpop.f32.mrf.mxu1 }
 0x28c   : > { %v2340_v13 = vrot.slane %v2325_v30, 4 }
 0x28e   : > { %v2346_v32 = vsel %vm2341_vm10, %v2324_v58, %v2340_v13 }
 0x28f   : > { %2356 = vst [vmem:[%s2599_s24 + $0x20] sm:$0xff] %v2346_v32 }
 0x290 PF: > { %s14_s15 = sadd.s32 1, %s2546_s15  }
 0x291   : > { %p11_p10 = scmp.ge.s32.totalorder %s14_s15, 6  }
 0x293   :  { %13 = sbr.rel (!%p11_p10) target bundleno = 1 (0x1), region = 92 }

// kernel: upsample_forward.13
= control target key start
LH: loop header
LB: loop body
LE: loop exit
PB: predicated region body
PF: predicated region fallthrough
CT: control target
= control target key end

     0   :  { %s2581_s18 = smov 0   ;;  %s3403_s0 = inlined_call_operand.vmem [shape: f32[4,5120], index: 0, kind: input, shape index: {}]   ;;  %s3404_s1 = inlined_call_operand.vmem [shape: bf16[9,4,4], index: 1, kind: input, shape index: {}]   ;;  %s3405_s2 = inlined_call_operand.vmem [shape: f32[4,1], index: 2, kind: input, shape index: {}]   ;;  %s3406_s3 = inlined_call_operand.vmem [shape: f32[1,5120], index: 3, kind: input, shape index: {}]   ;;  %s3407_s4 = inlined_call_operand.vmem [shape: f32[4,5120], index: 4, kind: input, shape index: {}]   ;;  %s3408_s5 = inlined_call_operand.vmem [shape: f32[4,5120], index: 5, kind: output, shape index: {}]  }
   0x1 LB: > { %s2587_s19 = sadd.s32 4294967295, %s2540_s18   ;;  %p2410_p0 = scmp.ge.s32.totalorder %s2540_s18, 1  ;;  %s2540_s18 = sphi %s2581_s18, %s15_s18  }
   0x2   : > { %p198_p1 = scmp.lt.s32.totalorder %s2540_s18, 5 }
   0x4   : > { %p199_p2 = pnand %p2410_p0, %p198_p1 }
   0x5   : > { %s230_s20 = smul.u32 (!%p199_p2), 10, %s2587_s19  ;;  %p248_p3 = scmp.eq.s32.totalorder (!%p199_p2), %s2587_s19, 0 }
   0x6   : > { %202 = sbr.rel (%p199_p2) target bundleno = 665 (0x299), region = 40  ;;  %p249_p4 = scmp.eq.s32.totalorder (!%p199_p2), %s2587_s19, 3 }
   0x7   : > { %p231_p5 = scmp.lt.s32.totalorder (!%p199_p2), %s230_s20, 39 }
   0x8   : > { %p250_p6 = por (!%p199_p2), %p249_p4, %p248_p3 }
   0xb   : > { %s3410_s20 = smov (!%p231_p5, %s230_s20), 39  ;;  %253 = sbr.rel (!%p250_p6) target bundleno = 20 (0x14), region = 44 }
   0xc   : > { %s2597_s23 = scalar_lea.vmem %s3406_s3, %s3410_s20  ;;  %s2411_s24 = sshll.u32 %s3410_s20, 2 }
   0xd   : > { %s2602_s27 = scalar_lea.vmem %s3407_s4, %s2411_s24  ;;  %s2607_s30 = scalar_lea.vmem %s3408_s5, %s2411_s24 }
   0xe   : > { %v254_v0 = vld [vmem:[%s2602_s27] sm:$0xff] (%p250_p6)  ;;  %v255_v1 = vld [vmem:[%s2602_s27 + $0x8] sm:$0xff] (%p250_p6)  ;;  %v256_v2 = vld [vmem:[%s2602_s27 + $0x10] sm:$0xff] (%p250_p6) }
   0xf   : > { %259 = vst [vmem:[%s2607_s30] sm:$0xff] (%p250_p6), %v254_v0  ;;  %v257_v3 = vld [vmem:[%s2602_s27 + $0x18] sm:$0xff] (%p250_p6)  ;;  %v258_v4 = vld [vmem:[%s2602_s27 + $0x20] sm:$0xff] (%p250_p6) }
  0x10   : > { %260 = vst [vmem:[%s2607_s30 + $0x8] sm:$0xff] %v255_v1 }
  0x11   : > { %261 = vst [vmem:[%s2607_s30 + $0x10] sm:$0xff] %v256_v2 }
  0x12   : > { %262 = vst [vmem:[%s2607_s30 + $0x18] sm:$0xff] %v257_v3 }
  0x13   : > { %263 = vst [vmem:[%s2607_s30 + $0x20] sm:$0xff] %v258_v4 }
  0x14 PF: > { %p264_p7 = scmp.gt.s32.totalorder %s2587_s19, 0  ;;  %p265_p8 = scmp.lt.s32.totalorder %s2587_s19, 3 }
  0x16   : > { %p266_p9 = pnand %p265_p8, %p264_p7 }
  0x17   : > { %s2413_s6 = sadd.s32 (!%p266_p9), 4294967295, %s2587_s19  ;;  %s2542_s13 = smov (!%p266_p9), 34  }
  0x18   : > { %269 = sbr.rel (%p266_p9) target bundleno = 665 (0x299), region = 48  ;;  %s2543_s14 = smov (!%p266_p9), 35  }
  0x19   : > { %s271_s7 = smul.u32 (!%p266_p9), 1280, %s2413_s6  ;;  %s2544_s15 = smov (!%p266_p9), 33  }
  0x1a   : > { %s2545_s16 = smov (!%p266_p9), 1   ;;  %s2546_s17 = smov (!%p266_p9), 127  }
  0x1b   : > { %s272_s8 = sshra.s32 (!%p266_p9), %s271_s7, 7  ;;  %s2547_s21 = smov (!%p266_p9), 95  }
  0x1c   : > { %s2414_s9 = sshll.u32 (!%p266_p9), %s272_s8, 2  ;;  %s2548_s25 = smov (!%p266_p9), 94  }
  0x1d   : > { %s2625_s12 = scalar_lea.vmem %s3403_s0, %s2414_s9  ;;  %v2260_v33 = vld [vmem:[%s2602_s27] sm:$0xff]  ;;  %vm412_vm0 = vcmask 277504   ;;  %vm427_vm1 = vcmask 1041408   ;;  %vm423_vm2 = vcmask 31744   ;;  %vm610_vm3 = vcmask 285696   ;;  %s2549_s29 = smov 93  }
  0x1e   : > { %v277_v5 = vld [vmem:[%s2625_s12 + $0x8] sm:$0xff]  ;;  %v276_v7 = vld [vmem:[%s2625_s12] sm:$0xff]  ;;  %v278_v9 = vld [vmem:[%s2625_s12 + $0x10] sm:$0xff]  ;;  %vm808_vm4 = vcmask 269312   ;;  %vm1016_vm5 = vcmask 7168   ;;  %vm1402_vm6 = vcmask 1039360  }
  0x1f   : > { %v281_v6 = vld [vmem:[%s2625_s12 + $0x28] sm:$0xff]  ;;  %308 = vst [vmem:[#allocation1 + $0x10] ss:$2 sm:$0xff] %v277_v5  ;;  %v280_v8 = vld [vmem:[%s2625_s12 + $0x20] sm:$0xff]  ;;  %v282_v10 = vld [vmem:[%s2625_s12 + $0x30] sm:$0xff]  ;;  %vm1610_vm7 = vcmask 777216  }
  0x20   : > { %314 = vst [vmem:[#allocation1 + $0x10] ss:$2 sm:$0xff] %v281_v6  ;;  %v279_v11 = vld [vmem:[%s2625_s12 + $0x18] sm:$0xff]  ;;  %v285_v13 = vld [vmem:[%s2625_s12 + $0x48] sm:$0xff]  ;;  %v284_v14 = vld [vmem:[%s2625_s12 + $0x40] sm:$0xff]  ;;  %vm1818_vm8 = vcmask 769024  }
  0x21   : > { %306 = vst [vmem:[#allocation1] ss:$2 sm:$0xff] %v276_v7  ;;  %v283_v12 = vld [vmem:[%s2625_s12 + $0x38] sm:$0xff]  ;;  %v288_v32 = vld [vmem:[%s2625_s12 + $0x60] sm:$0xff]  ;;  %vm2026_vm9 = vcmask 760832   ;;  %vm2323_vm10 = vcmask 1043456  }
  0x22   : > { %313 = vst [vmem:[#allocation1] ss:$2 sm:$0xff] %v280_v8  ;;  %v2725_v1 = vld [vmem:[%s3404_s1 + $0x2] sm:$0x3] }
  0x23   : > { %310 = vst [vmem:[#allocation1 + $0x20] ss:$2 sm:$0xff] %v278_v9 }
  0x24   : > { %315 = vst [vmem:[#allocation1 + $0x20] ss:$2 sm:$0xff] %v282_v10 }
  0x25   : > { %312 = vst [vmem:[#allocation1 + $0x30] ss:$2 sm:$0xff] %v279_v11 }
  0x26   : > { %316 = vst [vmem:[#allocation1 + $0x30] ss:$2 sm:$0xff] %v283_v12 }
  0x27   : > { %v319_v15 = vld.sshfl [vmem:[#allocation1 + $0x10] sm:$0xff pattern:$0x75316420]  ;;  %v320_v16 = vld.sshfl [vmem:[#allocation1 + $0x18] sm:$0xff pattern:$0x75316420] }
  0x28   : > { %v353_v17 = vpack.c.bf16 %v320_v16, %v319_v15  ;;  %326 = vst [vmem:[#allocation1 + $0x10] ss:$2 sm:$0xff] %v285_v13 }
  0x29   : > { %v317_v18 = vld.sshfl [vmem:[#allocation1] sm:$0xff pattern:$0x75316420]  ;;  %v318_v19 = vld.sshfl [vmem:[#allocation1 + $0x8] sm:$0xff pattern:$0x75316420] }
  0x2a   : > { %v369_v20 = vunpack.c.l.b16 %v353_v17  ;;  %v352_v21 = vpack.c.bf16 %v318_v19, %v317_v18  ;;  %325 = vst [vmem:[#allocation1] ss:$2 sm:$0xff] %v284_v14  ;;  %v370_v30 = vunpack.c.h.b16 %v353_v17 }
  0x2b   : > { %v321_v22 = vld.sshfl [vmem:[#allocation1 + $0x20] sm:$0xff pattern:$0x75316420]  ;;  %v322_v23 = vld.sshfl [vmem:[#allocation1 + $0x28] sm:$0xff pattern:$0x75316420] }
  0x2c   : > { %v2637_v24 = vpack.c.b16 %v369_v20, %v369_v20  ;;  %v368_v25 = vunpack.c.h.b16 %v352_v21  ;;  %v354_v26 = vpack.c.bf16 %v322_v23, %v321_v22  ;;  %v2649_v39 = vpack.c.b16 %v370_v30, %v370_v30 }
  0x2d   : > { %v323_v27 = vld.sshfl [vmem:[#allocation1 + $0x30] sm:$0xff pattern:$0x75316420]  ;;  %v324_v28 = vld.sshfl [vmem:[#allocation1 + $0x38] sm:$0xff pattern:$0x75316420] }
  0x2e   : > { %392 = vrot.lane.b32.xlu0 %v2637_v24, %s2542_s13  ;;  %v2641_v29 = vpack.c.b16 %v368_v25, %v368_v25  ;;  %v372_v31 = vunpack.c.h.b16 %v354_v26  ;;  %v371_v34 = vunpack.c.l.b16 %v354_v26  ;;  %v355_v35 = vpack.c.bf16 %v324_v28, %v323_v27 }
  0x2f   : > { %v331_v45 = vld.sshfl [vmem:[#allocation1 + $0x10] sm:$0xff pattern:$0x75316420]  ;;  %v332_v46 = vld.sshfl [vmem:[#allocation1 + $0x18] sm:$0xff pattern:$0x75316420] }
  0x30   : > { %390 = vrot.lane.b32.xlu1 %v2641_v29, %s2542_s13  ;;  %v2647_v36 = vpack.c.b16 %v372_v31, %v372_v31  ;;  %v373_v40 = vunpack.c.l.b16 %v355_v35  ;;  %v2653_v42 = vpack.c.b16 %v371_v34, %v371_v34  ;;  %v374_v43 = vunpack.c.h.b16 %v355_v35 }
  0x31   : > { %v329_v37 = vld.sshfl [vmem:[#allocation1] sm:$0xff pattern:$0x75316420]  ;;  %v330_v38 = vld.sshfl [vmem:[#allocation1 + $0x8] sm:$0xff pattern:$0x75316420]  ;;  %v357_v50 = vpack.c.bf16 %v332_v46, %v331_v45 }
  0x32   : > { %335 = vst [vmem:[#allocation1] ss:$2 sm:$0xff] %v288_v32  ;;  %398 = vrot.lane.b32.xlu2 %v2647_v36, %s2542_s13  ;;  %v356_v41 = vpack.c.bf16 %v330_v38, %v329_v37  ;;  %v2657_v44 = vpack.c.b16 %v373_v40, %v373_v40  ;;  %v2661_v49 = vpack.c.b16 %v374_v43, %v374_v43 }
  0x33   : > { %2270 = vst [vmem:[#allocation1] ss:$2 sm:$0xff] %v2260_v33  ;;  %v377_v53 = vunpack.c.l.b16 %v357_v50  ;;  %v378_v54 = vunpack.c.h.b16 %v357_v50 }
  0x34   : > { %v375_v47 = vunpack.c.l.b16 %v356_v41  ;;  %v376_v48 = vunpack.c.h.b16 %v356_v41 }
  0x35   : > { %v2673_v55 = vpack.c.b16 %v377_v53, %v377_v53  ;;  %v2677_v56 = vpack.c.b16 %v378_v54, %v378_v54  ;;  %v2802_v53 = vld [vmem:[%s3404_s1] sm:$0x3] }
  0x36   : > { %394 = vrot.lane.b32.xlu0 %v2649_v39, %s2542_s13  ;;  %v2665_v51 = vpack.c.b16 %v375_v47, %v375_v47  ;;  %v2667_v52 = vpack.c.b16 %v376_v48, %v376_v48 }
  0x38   : > { %396 = vrot.lane.b32.xlu1 %v2653_v42, %s2542_s13 }
  0x3a   : > { %400 = vrot.lane.b32.xlu2 %v2657_v44, %s2542_s13 }
  0x3e   : > { %402 = vrot.lane.b32.xlu0 %v2661_v49, %s2542_s13 }
  0x40   : > { %404 = vrot.lane.b32.xlu1 %v2665_v51, %s2542_s13 }
  0x42   : > { %406 = vrot.lane.b32.xlu2 %v2667_v52, %s2542_s13 }
  0x46   : > { %408 = vrot.lane.b32.xlu0 %v2673_v55, %s2542_s13 }
  0x48   : > { %410 = vrot.lane.b32.xlu1 %v2677_v56, %s2542_s13 }
  0x4a   : > { %590 = vrot.lane.b32.xlu2 %v2637_v24, %s2543_s14 }
  0x4e   : > { %592 = vrot.lane.b32.xlu0 %v2649_v39, %s2543_s14 }
  0x50   : > { %588 = vrot.lane.b32.xlu1 %v2641_v29, %s2543_s14 }
  0x52   : > { %594 = vrot.lane.b32.xlu2 %v2653_v42, %s2543_s14 }
  0x56   : > { %596 = vrot.lane.b32.xlu0 %v2647_v36, %s2543_s14 }
  0x58   : > { %598 = vrot.lane.b32.xlu1 %v2657_v44, %s2543_s14 }
  0x5a   : > { %600 = vrot.lane.b32.xlu2 %v2661_v49, %s2543_s14 }
  0x5e   : > { %602 = vrot.lane.b32.xlu0 %v2665_v51, %s2543_s14 }
  0x60   : > { %604 = vrot.lane.b32.xlu1 %v2667_v52, %s2543_s14 }
  0x62   : > { %606 = vrot.lane.b32.xlu2 %v2673_v55, %s2543_s14 }
  0x66   : > { %608 = vrot.lane.b32.xlu0 %v2677_v56, %s2543_s14 }
  0x68   : > { %788 = vrot.lane.b32.xlu1 %v2637_v24, %s2544_s15 }
  0x6a   : > { %790 = vrot.lane.b32.xlu2 %v2649_v39, %s2544_s15 }
  0x6e   : > { %786 = vrot.lane.b32.xlu0 %v2641_v29, %s2544_s15 }
  0x70   : > { %792 = vrot.lane.b32.xlu1 %v2653_v42, %s2544_s15 }
  0x72   : > { %794 = vrot.lane.b32.xlu2 %v2647_v36, %s2544_s15 }
  0x76   : > { %796 = vrot.lane.b32.xlu0 %v2657_v44, %s2544_s15 }
  0x78   : > { %798 = vrot.lane.b32.xlu1 %v2661_v49, %s2544_s15 }
  0x7a   : > { %800 = vrot.lane.b32.xlu2 %v2665_v51, %s2544_s15 }
  0x7e   : > { %802 = vrot.lane.b32.xlu0 %v2667_v52, %s2544_s15 }
  0x80   : > { %804 = vrot.lane.b32.xlu1 %v2673_v55, %s2544_s15 }
  0x82   : > { %806 = vrot.lane.b32.xlu2 %v2677_v56, %s2544_s15 }
  0x86   : > { %996 = vrot.lane.b32.xlu0 %v2637_v24, %s2545_s16 }
  0x88   : > { %998 = vrot.lane.b32.xlu1 %v2649_v39, %s2545_s16 }
  0x8a   : > { %994 = vrot.lane.b32.xlu2 %v2641_v29, %s2545_s16 }
  0x8c   : > { %v399_v57 = vpop.permute.xlu2 %398 }
  0x8e   : > { %1000 = vrot.lane.b32.xlu0 %v2653_v42, %s2545_s16 }
  0x90   : > { %1002 = vrot.lane.b32.xlu1 %v2647_v36, %s2545_s16 }
  0x92   : > { %1004 = vrot.lane.b32.xlu2 %v2657_v44, %s2545_s16 }
  0x94   : > { %v401_v58 = vpop.permute.xlu2 %400 }
  0x95   : > { %v417_v60 = vsel %vm412_vm0, %v399_v57, %v401_v58 }
  0x96   : > { %1006 = vrot.lane.b32.xlu0 %v2661_v49, %s2545_s16  ;;  %v441_v63 = vsel %vm427_vm1, %v417_v60, 0 }
  0x98   : > { %1008 = vrot.lane.b32.xlu1 %v2665_v51, %s2545_s16 }
  0x9a   : > { %1010 = vrot.lane.b32.xlu2 %v2667_v52, %s2545_s16 }
  0x9c   : > { %v407_v2 = vpop.permute.xlu2 %406 }
  0x9e   : > { %1012 = vrot.lane.b32.xlu0 %v2673_v55, %s2545_s16 }
  0xa0   : > { %v393_v59 = vpop.permute.xlu0 %392  ;;  %1014 = vrot.lane.b32.xlu1 %v2677_v56, %s2545_s16 }
  0xa2   : > { %v391_v61 = vpop.permute.xlu1 %390  ;;  %1382 = vrot.lane.b32.xlu2 %v2649_v39, %s2546_s17 }
  0xa3   : > { %v413_v62 = vsel %vm412_vm0, %v391_v61, %v393_v59 }
  0xa4   : > { %v429_v0 = vsel %vm427_vm1, %v413_v62, 0  ;;  %v591_v11 = vpop.permute.xlu2 %590 }
  0xa5   : > { %465 = vmatpush.bf16.msra.mxu0 %v429_v0 }
  0xa6   : > { %1384 = vrot.lane.b32.xlu0 %v2653_v42, %s2546_s17 }
  0xa8   : > { %2416 = vmatmul.msk.bf16.vlgmr.msra.gmra.mxu0 %vm423_vm2, %v2725_v1  ;;  %v395_v3 = vpop.permute.xlu0 %394  ;;  %1380 = vrot.lane.b32.xlu1 %v2637_v24, %s2546_s17 }
  0xa9   : > { %517 = vmatpush.bf16.msrb.mxu0 %v441_v63  ;;  %v414_v4 = vsel %vm412_vm0, %v393_v59, %v395_v3 }
  0xaa   : > { %v397_v5 = vpop.permute.xlu1 %396  ;;  %v432_v6 = vsel %vm427_vm1, %v414_v4, 0  ;;  %1386 = vrot.lane.b32.xlu2 %v2647_v36, %s2546_s17 }
  0xab   : > { %478 = vmatpush.bf16.msra.mxu1 %v432_v6  ;;  %v415_v7 = vsel %vm412_vm0, %v395_v3, %v397_v5  ;;  %v416_v8 = vsel %vm412_vm0, %v397_v5, %v399_v57 }
  0xac   : > { %v435_v9 = vsel %vm427_vm1, %v415_v7, 0  ;;  %v438_v10 = vsel %vm427_vm1, %v416_v8, 0  ;;  %v595_v21 = vpop.permute.xlu2 %594 }
  0xad   : > { %491 = vmatpush.bf16.msra.mxu2 %v435_v9  ;;  %504 = vmatpush.bf16.msra.mxu3 %v438_v10 }
  0xae   : > { %2417 = vmatmul.msk.bf16.vlgmr.msra.gmra.mxu1 %vm423_vm2, %v2725_v1  ;;  %1388 = vrot.lane.b32.xlu0 %v2657_v44, %s2546_s17 }
  0xb0   : > { %2418 = vmatmul.msk.bf16.vlgmr.msra.gmra.mxu2 %vm423_vm2, %v2725_v1  ;;  %2419 = vmatmul.msk.bf16.vlgmr.msra.gmra.mxu3 %vm423_vm2, %v2725_v1  ;;  %v403_v12 = vpop.permute.xlu0 %402 }
  0xb1   : > { %v418_v13 = vsel %vm412_vm0, %v401_v58, %v403_v12  ;;  %1390 = vrot.lane.b32.xlu1 %v2661_v49, %s2546_s17 }
  0xb2   : > { %v405_v14 = vpop.permute.xlu1 %404  ;;  %v444_v15 = vsel %vm427_vm1, %v418_v13, 0  ;;  %1392 = vrot.lane.b32.xlu2 %v2665_v51, %s2546_s17 }
  0xb3   : > { %530 = vmatpush.bf16.msrb.mxu1 %v444_v15  ;;  %v419_v16 = vsel %vm412_vm0, %v403_v12, %v405_v14  ;;  %v420_v17 = vsel %vm412_vm0, %v405_v14, %v407_v2 }
  0xb4   : > { %v447_v18 = vsel %vm427_vm1, %v419_v16, 0  ;;  %v450_v19 = vsel %vm427_vm1, %v420_v17, 0  ;;  %v601_v34 = vpop.permute.xlu2 %600 }
  0xb5   : > { %543 = vmatpush.bf16.msrb.mxu2 %v447_v18  ;;  %556 = vmatpush.bf16.msrb.mxu3 %v450_v19  ;;  %v286_v19 = vld [vmem:[%s2625_s12 + $0x50] sm:$0xff] }
  0xb6   : > { %1394 = vrot.lane.b32.xlu0 %v2667_v52, %s2546_s17  ;;  %327 = vst [vmem:[#allocation1 + $0x20] ss:$2 sm:$0xff] %v286_v19 }
  0xb8   : > { %2420 = vmatmul.msk.bf16.vlgmr.msrb.gmra.mxu0 %vm423_vm2, %v2725_v1  ;;  %v409_v20 = vpop.permute.xlu0 %408 }
  0xb9   : > { %v421_v22 = vsel %vm412_vm0, %v407_v2, %v409_v20  ;;  %1396 = vrot.lane.b32.xlu1 %v2673_v55, %s2546_s17 }
  0xba   : > { %v453_v23 = vsel %vm427_vm1, %v421_v22, 0  ;;  %v411_v25 = vpop.permute.xlu1 %410  ;;  %1398 = vrot.lane.b32.xlu2 %v2677_v56, %s2546_s17 }
  0xbb   : > { %569 = vmatpush.bf16.msra.mxu0 %v453_v23  ;;  %v422_v26 = vsel %vm412_vm0, %v409_v20, %v411_v25 }
  0xbc   : > { %v456_v27 = vsel %vm427_vm1, %v422_v26, 0  ;;  %v607_v45 = vpop.permute.xlu2 %606 }
  0xbd   : > { %582 = vmatpush.bf16.msra.mxu1 %v456_v27 }
  0xbe   : > { %2421 = vmatmul.msk.bf16.vlgmr.msrb.gmra.mxu1 %vm423_vm2, %v2725_v1 }
  0xc0   : > { %2422 = vmatmul.msk.bf16.vlgmr.msrb.gmra.mxu2 %vm423_vm2, %v2725_v1  ;;  %2423 = vmatmul.msk.bf16.vlgmr.msrb.gmra.mxu3 %vm423_vm2, %v2725_v1  ;;  %v593_v28 = vpop.permute.xlu0 %592 }
  0xc1   : > { %v612_v29 = vsel %vm610_vm3, %v591_v11, %v593_v28  ;;  %v613_v30 = vsel %vm610_vm3, %v593_v28, %v595_v21  ;;  %1590 = vrot.lane.b32.xlu1 %v2649_v39, %s2547_s21 }
  0xc2   : > { %v628_v31 = vsel %vm427_vm1, %v612_v29, 0  ;;  %v631_v32 = vsel %vm427_vm1, %v613_v30, 0  ;;  %v589_v33 = vpop.permute.xlu1 %588  ;;  %1592 = vrot.lane.b32.xlu2 %v2653_v42, %s2547_s21  ;;  %v290_v29 = vld [vmem:[%s2625_s12 + $0x70] sm:$0xff] }
  0xc3   : > { %v611_v35 = vsel %vm610_vm3, %v589_v33, %v591_v11  ;;  %674 = vmatpush.bf16.msra.mxu3 %v628_v31  ;;  %687 = vmatpush.bf16.msrb.mxu0 %v631_v32  ;;  %v2262_v30 = vld [vmem:[%s2602_s27 + $0x10] sm:$0xff]  ;;  %v333_v32 = vld.sshfl [vmem:[#allocation1 + $0x20] sm:$0xff pattern:$0x75316420] }
  0xc4   : > { %v625_v37 = vsel %vm427_vm1, %v611_v35, 0  ;;  %v791_v0 = vpop.permute.xlu2 %790  ;;  %v334_v33 = vld.sshfl [vmem:[#allocation1 + $0x28] sm:$0xff pattern:$0x75316420] }
  0xc5   : > { %661 = vmatpush.bf16.msra.mxu2 %v625_v37  ;;  %337 = vst [vmem:[#allocation1 + $0x20] ss:$2 sm:$0xff] %v290_v29  ;;  %v358_v37 = vpack.c.bf16 %v334_v33, %v333_v32 }
  0xc6   : > { %2274 = vst [vmem:[#allocation1 + $0x20] ss:$2 sm:$0xff] %v2262_v30 }
  0xc8   : > { %2424 = vmatmul.msk.bf16.vlgmr.msra.gmra.mxu0 %vm423_vm2, %v2725_v1  ;;  %v597_v38 = vpop.permute.xlu0 %596 }
  0xc9   : > { %v614_v40 = vsel %vm610_vm3, %v595_v21, %v597_v38  ;;  %1594 = vrot.lane.b32.xlu1 %v2647_v36, %s2547_s21 }
  0xca   : > { %v634_v41 = vsel %vm427_vm1, %v614_v40, 0  ;;  %v599_v43 = vpop.permute.xlu1 %598  ;;  %1596 = vrot.lane.b32.xlu2 %v2657_v44, %s2547_s21  ;;  %v1378_v40 = vunpack.c.l.b16 %v358_v37  ;;  %v1224_v37 = vsel %vm427_vm1, %v2665_v51, 0 }
  0xcb   : > { %v615_v46 = vsel %vm610_vm3, %v597_v38, %v599_v43  ;;  %700 = vmatpush.bf16.msrb.mxu1 %v634_v41  ;;  %v616_v47 = vsel %vm610_vm3, %v599_v43, %v601_v34  ;;  %v2869_v41 = vld [vmem:[%s3404_s1 + $0x4] sm:$0x3] }
  0xcc   : > { %v637_v48 = vsel %vm427_vm1, %v615_v46, 0  ;;  %v640_v50 = vsel %vm427_vm1, %v616_v47, 0  ;;  %v795_v7 = vpop.permute.xlu2 %794 }
  0xcd   : > { %713 = vmatpush.bf16.msrb.mxu2 %v637_v48  ;;  %726 = vmatpush.bf16.msrb.mxu3 %v640_v50 }
  0xce   : > { %2425 = vmatmul.msk.bf16.vlgmr.msra.gmra.mxu1 %vm423_vm2, %v2725_v1 }
  0xd0   : > { %2426 = vmatmul.msk.bf16.vlgmr.msra.gmra.mxu2 %vm423_vm2, %v2802_v53  ;;  %2427 = vmatmul.msk.bf16.vlgmr.msra.gmra.mxu3 %vm423_vm2, %v2802_v53  ;;  %v603_v54 = vpop.permute.xlu0 %602 }
  0xd1   : > { %v617_v57 = vsel %vm610_vm3, %v601_v34, %v603_v54  ;;  %1600 = vrot.lane.b32.xlu1 %v2665_v51, %s2547_s21 }
  0xd2   : > { %v643_v58 = vsel %vm427_vm1, %v617_v57, 0  ;;  %v605_v59 = vpop.permute.xlu1 %604  ;;  %1602 = vrot.lane.b32.xlu2 %v2667_v52, %s2547_s21 }
  0xd3   : > { %739 = vmatpush.bf16.msra.mxu0 %v643_v58  ;;  %v618_v60 = vsel %vm610_vm3, %v603_v54, %v605_v59  ;;  %v619_v61 = vsel %vm610_vm3, %v605_v59, %v607_v45 }
  0xd4   : > { %v646_v62 = vsel %vm427_vm1, %v618_v60, 0  ;;  %v649_v63 = vsel %vm427_vm1, %v619_v61, 0  ;;  %v801_v16 = vpop.permute.xlu2 %800 }
  0xd5   : > { %752 = vmatpush.bf16.msra.mxu1 %v646_v62  ;;  %765 = vmatpush.bf16.msra.mxu2 %v649_v63 }
  0xd8   : > { %2428 = vmatmul.msk.bf16.vlgmr.msrb.gmra.mxu0 %vm423_vm2, %v2802_v53  ;;  %v609_v1 = vpop.permute.xlu0 %608 }
  0xd9   : > { %v620_v2 = vsel %vm610_vm3, %v607_v45, %v609_v1  ;;  %1606 = vrot.lane.b32.xlu1 %v2677_v56, %s2547_s21  ;;  %v2872_v45 = vpack.c.b16 %v1378_v40, %v1378_v40 }
  0xda   : > { %v652_v3 = vsel %vm427_vm1, %v620_v2, 0  ;;  %v789_v4 = vpop.permute.xlu1 %788 }
  0xdb   : > { %778 = vmatpush.bf16.msra.mxu3 %v652_v3  ;;  %v810_v5 = vsel %vm808_vm4, %v789_v4, %v791_v0  ;;  %1400 = vrot.lane.b32.xlu0 %v2872_v45, %s2546_s17 }
  0xdc   : > { %v826_v6 = vsel %vm427_vm1, %v810_v5, 0  ;;  %v807_v28 = vpop.permute.xlu2 %806  ;;  %1608 = vrot.lane.b32.xlu2 %v2872_v45, %s2547_s21 }
  0xde   : > { %2429 = vmatmul.msk.bf16.vlgmr.msrb.gmra.mxu1 %vm423_vm2, %v2802_v53 }
  0xdf   : > { %872 = vmatpush.bf16.msrb.mxu1 %v826_v6 }
  0xe0   : > { %2430 = vmatmul.msk.bf16.vlgmr.msrb.gmra.mxu2 %vm423_vm2, %v2802_v53  ;;  %2431 = vmatmul.msk.bf16.vlgmr.msrb.gmra.mxu3 %vm423_vm2, %v2802_v53  ;;  %v787_v8 = vpop.permute.xlu0 %786 }
  0xe1   : > { %v809_v9 = vsel %vm808_vm4, %v787_v8, %v789_v4  ;;  %1800 = vrot.lane.b32.xlu1 %v2653_v42, %s2548_s25 }
  0xe2   : > { %v823_v10 = vsel %vm427_vm1, %v809_v9, 0  ;;  %v793_v11 = vpop.permute.xlu1 %792 }
  0xe3   : > { %v811_v12 = vsel %vm808_vm4, %v791_v0, %v793_v11  ;;  %859 = vmatpush.bf16.msrb.mxu0 %v823_v10  ;;  %v812_v13 = vsel %vm808_vm4, %v793_v11, %v795_v7  ;;  %1588 = vrot.lane.b32.xlu0 %v2637_v24, %s2547_s21 }
  0xe4   : > { %v829_v14 = vsel %vm427_vm1, %v811_v12, 0  ;;  %v832_v15 = vsel %vm427_vm1, %v812_v13, 0  ;;  %v995_v47 = vpop.permute.xlu2 %994  ;;  %1796 = vrot.lane.b32.xlu2 %v2637_v24, %s2548_s25 }
  0xe5   : > { %885 = vmatpush.bf16.msrb.mxu2 %v829_v14  ;;  %898 = vmatpush.bf16.msrb.mxu3 %v832_v15 }
  0xe8   : > { %2432 = vmatmul.msk.bf16.vlgmr.msra.gmra.mxu0 %vm423_vm2, %v2802_v53  ;;  %v797_v17 = vpop.permute.xlu0 %796 }
  0xe9   : > { %v813_v18 = vsel %vm808_vm4, %v795_v7, %v797_v17  ;;  %1804 = vrot.lane.b32.xlu1 %v2657_v44, %s2548_s25 }
  0xea   : > { %v835_v20 = vsel %vm427_vm1, %v813_v18, 0  ;;  %v799_v21 = vpop.permute.xlu1 %798  ;;  %v2447_v18 = vld [vmem:[%s3404_s1 + $0x6] sm:$0x3] }
  0xeb   : > { %911 = vmatpush.bf16.msra.mxu0 %v835_v20  ;;  %v814_v22 = vsel %vm808_vm4, %v797_v17, %v799_v21  ;;  %v815_v23 = vsel %vm808_vm4, %v799_v21, %v801_v16  ;;  %1598 = vrot.lane.b32.xlu0 %v2661_v49, %s2547_s21 }
  0xec   : > { %v838_v25 = vsel %vm427_vm1, %v814_v22, 0  ;;  %v841_v26 = vsel %vm427_vm1, %v815_v23, 0  ;;  %v1005_v0 = vpop.permute.xlu2 %1004  ;;  %1806 = vrot.lane.b32.xlu2 %v2661_v49, %s2548_s25  ;;  %v1206_v22 = vsel %vm427_vm1, %v2637_v24, 0 }
  0xee   : > { %2433 = vmatmul.msk.bf16.vlgmr.msra.gmra.mxu1 %vm423_vm2, %v2802_v53 }
  0xef   : > { %924 = vmatpush.bf16.msra.mxu1 %v838_v25  ;;  %v1209_v25 = vsel %vm427_vm1, %v2649_v39, 0 }
  0xf0   : > { %2434 = vmatmul.msk.bf16.vlgmr.msra.gmra.mxu2 %vm423_vm2, %v2802_v53  ;;  %2435 = vmatmul.msk.bf16.vlgmr.msra.gmra.mxu3 %vm423_vm2, %v2802_v53  ;;  %v803_v27 = vpop.permute.xlu0 %802 }
  0xf1   : > { %937 = vmatpush.bf16.msra.mxu2 %v841_v26  ;;  %v816_v31 = vsel %vm808_vm4, %v801_v16, %v803_v27  ;;  %1810 = vrot.lane.b32.xlu1 %v2667_v52, %s2548_s25 }
  0xf2   : > { %v844_v34 = vsel %vm427_vm1, %v816_v31, 0  ;;  %v805_v35 = vpop.permute.xlu1 %804 }
  0xf3   : > { %v817_v38 = vsel %vm808_vm4, %v803_v27, %v805_v35  ;;  %950 = vmatpush.bf16.msra.mxu3 %v844_v34  ;;  %v818_v48 = vsel %vm808_vm4, %v805_v35, %v807_v28  ;;  %1604 = vrot.lane.b32.xlu0 %v2673_v55, %s2547_s21  ;;  %v1215_v27 = vsel %vm427_vm1, %v2647_v36, 0  ;;  %v1221_v34 = vsel %vm427_vm1, %v2661_v49, 0 }
  0xf4   : > { %v847_v43 = vsel %vm427_vm1, %v817_v38, 0  ;;  %v850_v57 = vsel %vm427_vm1, %v818_v48, 0  ;;  %1812 = vrot.lane.b32.xlu2 %v2673_v55, %s2548_s25  ;;  %v1011_v11 = vpop.permute.xlu2 %1010  ;;  %v1227_v38 = vsel %vm427_vm1, %v2667_v52, 0 }
  0xf8   : > { %2437 = vmatmul.msk.bf16.vlgmr.msrb.gmra.mxu0 %vm423_vm2, %v2869_v41  ;;  %v997_v46 = vpop.permute.xlu0 %996 }
  0xf9   : > { %963 = vmatpush.bf16.msrb.mxu0 %v847_v43  ;;  %1816 = vrot.lane.b32.xlu1 %v2872_v45, %s2548_s25  ;;  %v1017_v53 = vsel %vm1016_vm5, %v995_v47, %v997_v46  ;;  %v3008_v43 = vld [vmem:[%s3404_s1 + $0x8] sm:$0x3] }
  0xfa   : > { %v999_v50 = vpop.permute.xlu1 %998  ;;  %v1031_v58 = vsel %vm427_vm1, %v1017_v53, 0 }
  0xfb   : > { %v1018_v54 = vsel %vm1016_vm5, %v997_v46, %v999_v50  ;;  %1798 = vrot.lane.b32.xlu0 %v2649_v39, %s2548_s25  ;;  %v1230_v46 = vsel %vm427_vm1, %v2673_v55, 0 }
  0xfc   : > { %v1034_v59 = vsel %vm427_vm1, %v1018_v54, 0  ;;  %2006 = vrot.lane.b32.xlu2 %v2649_v39, %s2549_s29 }
  0xfe   : > { %2438 = vmatmul.msk.bf16.vlgmr.msrb.gmra.mxu1 %vm423_vm2, %v2869_v41 }
  0xff   : > { %976 = vmatpush.bf16.msrb.mxu1 %v850_v57 }
 0x100   : > { %2439 = vmatmul.msk.bf16.vlgmr.msrb.gmra.mxu2 %vm423_vm2, %v2869_v41  ;;  %2440 = vmatmul.msk.bf16.vlgmr.msrb.gmra.mxu3 %vm423_vm2, %v2869_v41  ;;  %v1001_v60 = vpop.permute.xlu0 %1000 }
 0x101   : > { %1067 = vmatpush.bf16.msrb.mxu2 %v1031_v58  ;;  %1080 = vmatpush.bf16.msrb.mxu3 %v1034_v59  ;;  %v1019_v61 = vsel %vm1016_vm5, %v999_v50, %v1001_v60 }
 0x102   : > { %2004 = vrot.lane.b32.xlu1 %v2637_v24, %s2549_s29  ;;  %v1003_v62 = vpop.permute.xlu1 %1002  ;;  %v1037_v63 = vsel %vm427_vm1, %v1019_v61, 0  ;;  %v1212_v24 = vsel %vm427_vm1, %v2653_v42, 0 }
 0x103   : > { %v1020_v2 = vsel %vm1016_vm5, %v1001_v60, %v1003_v62  ;;  %v1021_v3 = vsel %vm1016_vm5, %v1003_v62, %v1005_v0  ;;  %1802 = vrot.lane.b32.xlu0 %v2647_v36, %s2548_s25 }
 0x104   : > { %v1040_v5 = vsel %vm427_vm1, %v1020_v2, 0  ;;  %v1043_v6 = vsel %vm427_vm1, %v1021_v3, 0  ;;  %2010 = vrot.lane.b32.xlu2 %v2647_v36, %s2549_s29  ;;  %v1218_v36 = vsel %vm427_vm1, %v2657_v44, 0 }
 0x108   : > { %2441 = vmatmul.msk.bf16.vlgmr.msra.gmra.mxu0 %vm423_vm2, %v2869_v41  ;;  %v1007_v1 = vpop.permute.xlu0 %1006 }
 0x109   : > { %1093 = vmatpush.bf16.msra.mxu0 %v1037_v63  ;;  %v1022_v4 = vsel %vm1016_vm5, %v1005_v0, %v1007_v1 }
 0x10a   : > { %2014 = vrot.lane.b32.xlu1 %v2661_v49, %s2549_s29  ;;  %v1046_v7 = vsel %vm427_vm1, %v1022_v4, 0  ;;  %v1009_v8 = vpop.permute.xlu1 %1008 }
 0x10b   : > { %v1023_v9 = vsel %vm1016_vm5, %v1007_v1, %v1009_v8  ;;  %v1024_v14 = vsel %vm1016_vm5, %v1009_v8, %v1011_v11  ;;  %1808 = vrot.lane.b32.xlu0 %v2665_v51, %s2548_s25 }
 0x10c   : > { %v1049_v10 = vsel %vm427_vm1, %v1023_v9, 0  ;;  %v1052_v17 = vsel %vm427_vm1, %v1024_v14, 0  ;;  %2016 = vrot.lane.b32.xlu2 %v2665_v51, %s2549_s29 }
 0x10e   : > { %2442 = vmatmul.msk.bf16.vlgmr.msra.gmra.mxu1 %vm423_vm2, %v2869_v41 }
 0x10f   : > { %1106 = vmatpush.bf16.msra.mxu1 %v1040_v5 }
 0x110   : > { %2443 = vmatmul.msk.bf16.vlgmr.msra.gmra.mxu2 %vm423_vm2, %v2869_v41  ;;  %2444 = vmatmul.msk.bf16.vlgmr.msra.gmra.mxu3 %vm423_vm2, %v2869_v41  ;;  %v1013_v12 = vpop.permute.xlu0 %1012 }
 0x111   : > { %1119 = vmatpush.bf16.msra.mxu2 %v1043_v6  ;;  %1132 = vmatpush.bf16.msra.mxu3 %v1046_v7  ;;  %v1025_v15 = vsel %vm1016_vm5, %v1011_v11, %v1013_v12 }
 0x112   : > { %2020 = vrot.lane.b32.xlu1 %v2673_v55, %s2549_s29  ;;  %v1015_v13 = vpop.permute.xlu1 %1014  ;;  %v1055_v19 = vsel %vm427_vm1, %v1025_v15, 0  ;;  %v1233_v55 = vsel %vm427_vm1, %v2677_v56, 0 }
 0x113   : > { %v1026_v16 = vsel %vm1016_vm5, %v1013_v12, %v1015_v13  ;;  %1814 = vrot.lane.b32.xlu0 %v2677_v56, %s2548_s25 }
 0x114   : > { %v1058_v20 = vsel %vm427_vm1, %v1026_v16, 0  ;;  %2022 = vrot.lane.b32.xlu2 %v2677_v56, %s2549_s29 }
 0x118   : > { %2445 = vmatmul.msk.bf16.vlgmr.msrb.gmra.mxu0 %vm423_vm2, %v2869_v41 }
 0x119   : > { %1145 = vmatpush.bf16.msrb.mxu0 %v1049_v10 }
 0x11a   : > { %v1381_v47 = vpop.permute.xlu1 %1380 }
 0x11b   : > { %2008 = vrot.lane.b32.xlu0 %v2653_v42, %s2549_s29 }
 0x11e   : > { %2446 = vmatmul.msk.bf16.vlgmr.msrb.gmra.mxu1 %vm423_vm2, %v2869_v41  ;;  %v1383_v41 = vpop.permute.xlu2 %1382 }
 0x11f   : > { %1158 = vmatpush.bf16.msrb.mxu1 %v1052_v17  ;;  %v1403_v54 = vsel %vm1402_vm6, %v1381_v47, %v1383_v41 }
 0x120   : > { %2448 = vmatmul.msk.bf16.vlgmr.msrb.gmra.mxu2 %vm423_vm2, %v2447_v18  ;;  %2449 = vmatmul.msk.bf16.vlgmr.msrb.gmra.mxu3 %vm423_vm2, %v2447_v18 }
 0x121   : > { %1171 = vmatpush.bf16.msrb.mxu2 %v1055_v19  ;;  %1184 = vmatpush.bf16.msrb.mxu3 %v1058_v20 }
 0x123   : > { %2012 = vrot.lane.b32.xlu0 %v2657_v44, %s2549_s29  ;;  %v1385_v44 = vpop.permute.xlu0 %1384 }
 0x124   : > { %v1404_v53 = vsel %vm1402_vm6, %v1383_v41, %v1385_v44 }
 0x125   : > { %v2953_v21 = vpop.f32.mrf.mxu0  ;;  %v1420_v60 = vsel %vm427_vm1, %v1404_v53, 0 }
 0x126   : > { %v1387_v59 = vpop.permute.xlu2 %1386 }
 0x127   : > { %v1405_v62 = vsel %vm1402_vm6, %v1385_v44, %v1387_v59 }
 0x128   : > { %2450 = vmatmul.msk.bf16.vlgmr.msra.gmra.mxu0 %vm423_vm2, %v2447_v18  ;;  %v1423_v4 = vsel %vm427_vm1, %v1405_v62, 0 }
 0x129   : > { %1242 = vmatpush.bf16.msra.mxu0 %v1206_v22 }
 0x12b   : > { %v2962_v23 = vpop.f32.mrf.mxu1  ;;  %2018 = vrot.lane.b32.xlu0 %v2667_v52, %s2549_s29  ;;  %v1417_v52 = vsel %vm427_vm1, %v1403_v54, 0  ;;  %v1389_v5 = vpop.permute.xlu0 %1388 }
 0x12c   : > { %v1406_v7 = vsel %vm1402_vm6, %v1387_v59, %v1389_v5 }
 0x12d   : > { %v469_v26 = vpop.f32.mrf.mxu0  ;;  %v1426_v13 = vsel %vm427_vm1, %v1406_v7, 0 }
 0x12e   : > { %2451 = vmatmul.msk.bf16.vlgmr.msra.gmra.mxu1 %vm423_vm2, %v2447_v18  ;;  %v1393_v6 = vpop.permute.xlu2 %1392 }
 0x12f   : > { %1255 = vmatpush.bf16.msra.mxu1 %v1209_v25 }
 0x130   : > { %2452 = vmatmul.msk.bf16.vlgmr.msra.gmra.mxu2 %vm423_vm2, %v2447_v18  ;;  %2453 = vmatmul.msk.bf16.vlgmr.msra.gmra.mxu3 %vm423_vm2, %v2447_v18 }
 0x131   : > { %1268 = vmatpush.bf16.msra.mxu2 %v1212_v24  ;;  %1281 = vmatpush.bf16.msra.mxu3 %v1215_v27 }
 0x133   : > { %v493_v39 = vpop.f32.mrf.mxu2  ;;  %v2977_v28 = vpop.f32.mrf.mxu3  ;;  %2024 = vrot.lane.b32.xlu0 %v2872_v45, %s2549_s29 }
 0x134   : > { %v482_v29 = vpop.f32.mrf.mxu1  ;;  %v1391_v45 = vpop.permute.xlu1 %1390 }
 0x135   : > { %v2979_v30 = vpop.f32.mrf.mxu0  ;;  %v1407_v10 = vsel %vm1402_vm6, %v1389_v5, %v1391_v45  ;;  %v1408_v11 = vsel %vm1402_vm6, %v1391_v45, %v1393_v6 }
 0x136   : > { %v1429_v16 = vsel %vm427_vm1, %v1407_v10, 0  ;;  %v1432_v17 = vsel %vm427_vm1, %v1408_v11, 0 }
 0x138   : > { %2454 = vmatmul.msk.bf16.vlgmr.msrb.gmra.mxu0 %vm423_vm2, %v2447_v18 }
 0x139   : > { %1294 = vmatpush.bf16.msrb.mxu0 %v1218_v36 }
 0x13b   : > { %v495_v31 = vpop.f32.mrf.mxu2  ;;  %v508_v32 = vpop.f32.mrf.mxu3 }
 0x13c   : > { %v2986_v33 = vpop.f32.mrf.mxu1  ;;  %v1397_v26 = vpop.permute.xlu1 %1396 }
 0x13d   : > { %v521_v35 = vpop.f32.mrf.mxu0 }
 0x13e   : > { %2455 = vmatmul.msk.bf16.vlgmr.msrb.gmra.mxu1 %vm423_vm2, %v2447_v18 }
 0x13f   : > { %1307 = vmatpush.bf16.msrb.mxu1 %v1221_v34 }
 0x140   : > { %2456 = vmatmul.msk.bf16.vlgmr.msrb.gmra.mxu2 %vm423_vm2, %v2447_v18  ;;  %2457 = vmatmul.msk.bf16.vlgmr.msrb.gmra.mxu3 %vm423_vm2, %v2447_v18  ;;  %v1395_v18 = vpop.permute.xlu0 %1394 }
 0x141   : > { %1320 = vmatpush.bf16.msrb.mxu2 %v1224_v37  ;;  %1333 = vmatpush.bf16.msrb.mxu3 %v1227_v38  ;;  %v1410_v29 = vsel %vm1402_vm6, %v1395_v18, %v1397_v26 }
 0x142   : > { %v1438_v35 = vsel %vm427_vm1, %v1410_v29, 0 }
 0x143   : > { %v2999_v42 = vpop.f32.mrf.mxu2  ;;  %v3001_v49 = vpop.f32.mrf.mxu3 }
 0x144   : > { %v534_v40 = vpop.f32.mrf.mxu1 }
 0x145   : > { %v3003_v51 = vpop.f32.mrf.mxu0 }
 0x148   : > { %2459 = vmatmul.msk.bf16.vlgmr.msra.gmra.mxu0 %vm423_vm2, %v3008_v43 }
 0x149   : > { %1346 = vmatpush.bf16.msra.mxu0 %v1230_v46  ;;  %v1591_v46 = vpop.permute.xlu1 %1590 }
 0x14b   : > { %v547_v48 = vpop.f32.mrf.mxu2  ;;  %v560_v50 = vpop.f32.mrf.mxu3 }
 0x14c   : > { %v3018_v57 = vpop.f32.mrf.mxu1 }
 0x14d   : > { %v573_v58 = vpop.f32.mrf.mxu0 }
 0x14e   : > { %2460 = vmatmul.msk.bf16.vlgmr.msra.gmra.mxu1 %vm423_vm2, %v3008_v43 }
 0x14f   : > { %1359 = vmatpush.bf16.msra.mxu1 %v1233_v55 }
 0x150   : > { %2461 = vmatmul.msk.bf16.vlgmr.msra.gmra.mxu2 %vm423_vm2, %v3008_v43  ;;  %2462 = vmatmul.msk.bf16.vlgmr.msra.gmra.mxu3 %vm423_vm2, %v3008_v43 }
 0x151   : > { %1453 = vmatpush.bf16.msra.mxu2 %v1417_v52  ;;  %1466 = vmatpush.bf16.msra.mxu3 %v1420_v60  ;;  %v1595_v60 = vpop.permute.xlu1 %1594 }
 0x153   : > { %v663_v56 = vpop.f32.mrf.mxu2  ;;  %v676_v61 = vpop.f32.mrf.mxu3 }
 0x154   : > { %v3034_v63 = vadd.f32 %v663_v56, %v2953_v21  ;;  %v3037_v0 = vadd.f32 %v676_v61, %v2962_v23  ;;  %v586_v1 = vpop.f32.mrf.mxu1  ;;  %v1409_v21 = vsel %vm1402_vm6, %v1393_v6, %v1395_v18 }
 0x155   : > { %v689_v2 = vpop.f32.mrf.mxu0 }
 0x156   : > { %v3039_v3 = vadd.f32 %v689_v2, %v493_v39  ;;  %v1435_v39 = vsel %vm427_vm1, %v1409_v21, 0 }
 0x158   : > { %2463 = vmatmul.msk.bf16.vlgmr.msrb.gmra.mxu0 %vm423_vm2, %v3008_v43 }
 0x159   : > { %1479 = vmatpush.bf16.msrb.mxu0 %v1423_v4 }
 0x15b   : > { %v665_v8 = vpop.f32.mrf.mxu2  ;;  %v678_v9 = vpop.f32.mrf.mxu3 }
 0x15c   : > { %v702_v12 = vpop.f32.mrf.mxu1 }
 0x15d   : > { %v691_v14 = vpop.f32.mrf.mxu0  ;;  %v3049_v15 = vadd.f32 %v702_v12, %v2977_v28  ;;  %v1399_v28 = vpop.permute.xlu2 %1398 }
 0x15e   : > { %2464 = vmatmul.msk.bf16.vlgmr.msrb.gmra.mxu1 %vm423_vm2, %v3008_v43  ;;  %v1411_v32 = vsel %vm1402_vm6, %v1397_v26, %v1399_v28 }
 0x15f   : > { %1492 = vmatpush.bf16.msrb.mxu1 %v1426_v13  ;;  %v1441_v40 = vsel %vm427_vm1, %v1411_v32, 0  ;;  %v1601_v13 = vpop.permute.xlu1 %1600 }
 0x160   : > { %2465 = vmatmul.msk.bf16.vlgmr.msrb.gmra.mxu2 %vm423_vm2, %v3008_v43  ;;  %2466 = vmatmul.msk.bf16.vlgmr.msrb.gmra.mxu3 %vm423_vm2, %v3008_v43 }
 0x161   : > { %1505 = vmatpush.bf16.msrb.mxu2 %v1429_v16  ;;  %1518 = vmatpush.bf16.msrb.mxu3 %v1432_v17 }
 0x163   : > { %v715_v19 = vpop.f32.mrf.mxu2  ;;  %v728_v20 = vpop.f32.mrf.mxu3 }
 0x164   : > { %v3061_v22 = vadd.f32 %v715_v19, %v2979_v30  ;;  %v3064_v23 = vadd.f32 %v728_v20, %v2986_v33  ;;  %v704_v25 = vpop.f32.mrf.mxu1  ;;  %v1401_v30 = vpop.permute.xlu0 %1400 }
 0x165   : > { %v741_v24 = vpop.f32.mrf.mxu0  ;;  %v1412_v33 = vsel %vm1402_vm6, %v1399_v28, %v1401_v30 }
 0x166   : > { %v3067_v27 = vadd.f32 %v741_v24, %v2999_v42  ;;  %v3082_v42 = vld [vmem:[%s3404_s1 + $0xa] sm:$0x3]  ;;  %v1444_v41 = vsel %vm427_vm1, %v1412_v33, 0 }
 0x167   : > { %v1607_v29 = vpop.permute.xlu1 %1606 }
 0x168   : > { %2467 = vmatmul.msk.bf16.vlgmr.msra.gmra.mxu0 %vm423_vm2, %v3008_v43 }
 0x169   : > { %1531 = vmatpush.bf16.msra.mxu0 %v1435_v39 }
 0x16b   : > { %v717_v36 = vpop.f32.mrf.mxu2  ;;  %v730_v31 = vpop.f32.mrf.mxu3 }
 0x16c   : > { %v754_v34 = vpop.f32.mrf.mxu1  ;;  %v1589_v53 = vpop.permute.xlu0 %1588 }
 0x16d   : > { %v743_v37 = vpop.f32.mrf.mxu0  ;;  %v3077_v38 = vadd.f32 %v754_v34, %v3001_v49  ;;  %v1593_v49 = vpop.permute.xlu2 %1592  ;;  %v1611_v55 = vsel %vm1610_vm7, %v1589_v53, %v1591_v46 }
 0x16e   : > { %2468 = vmatmul.msk.bf16.vlgmr.msra.gmra.mxu1 %vm423_vm2, %v3008_v43  ;;  %v1625_v59 = vsel %vm427_vm1, %v1611_v55, 0  ;;  %v1613_v61 = vsel %vm1610_vm7, %v1593_v49, %v1595_v60 }
 0x16f   : > { %1544 = vmatpush.bf16.msra.mxu1 %v1438_v35  ;;  %v1631_v5 = vsel %vm427_vm1, %v1613_v61, 0 }
 0x170   : > { %2470 = vmatmul.msk.bf16.vlgmr.msra.gmra.mxu2 %vm423_vm2, %v3082_v42  ;;  %2471 = vmatmul.msk.bf16.vlgmr.msra.gmra.mxu3 %vm423_vm2, %v3082_v42 }
 0x171   : > { %1557 = vmatpush.bf16.msra.mxu2 %v1441_v40  ;;  %1570 = vmatpush.bf16.msra.mxu3 %v1444_v41 }
 0x173   : > { %v767_v44 = vpop.f32.mrf.mxu2  ;;  %v780_v47 = vpop.f32.mrf.mxu3 }
 0x174   : > { %v3093_v43 = vadd.f32 %v767_v44, %v3003_v51  ;;  %v3096_v48 = vadd.f32 %v780_v47, %v3018_v57  ;;  %v756_v50 = vpop.f32.mrf.mxu1  ;;  %v1612_v51 = vsel %vm1610_vm7, %v1591_v46, %v1593_v49  ;;  %v1599_v6 = vpop.permute.xlu0 %1598 }
 0x175   : > { %v861_v54 = vpop.f32.mrf.mxu0  ;;  %v1597_v52 = vpop.permute.xlu2 %1596 }
 0x176   : > { %v3100_v58 = vadd.f32 %v861_v54, %v3034_v63  ;;  %v1614_v62 = vsel %vm1610_vm7, %v1595_v60, %v1597_v52  ;;  %v1628_v63 = vsel %vm427_vm1, %v1612_v51, 0  ;;  %v1615_v8 = vsel %vm1610_vm7, %v1597_v52, %v1599_v6  ;;  %v1801_v46 = vpop.permute.xlu1 %1800 }
 0x177   : > { %v1634_v45 = vsel %vm427_vm1, %v1614_v62, 0  ;;  %v1637_v16 = vsel %vm427_vm1, %v1615_v8, 0 }
 0x178   : > { %2472 = vmatmul.msk.bf16.vlgmr.msrb.gmra.mxu0 %vm423_vm2, %v3082_v42 }
 0x179   : > { %1661 = vmatpush.bf16.msrb.mxu0 %v1625_v59 }
 0x17b   : > { %v769_v57 = vpop.f32.mrf.mxu2  ;;  %v782_v56 = vpop.f32.mrf.mxu3 }
 0x17c   : > { %v874_v1 = vpop.f32.mrf.mxu1  ;;  %v1605_v18 = vpop.permute.xlu0 %1604 }
 0x17d   : > { %v863_v2 = vpop.f32.mrf.mxu0  ;;  %v3110_v4 = vadd.f32 %v874_v1, %v3037_v0  ;;  %v1603_v17 = vpop.permute.xlu2 %1602  ;;  %v1619_v31 = vsel %vm1610_vm7, %v1605_v18, %v1607_v29 }
 0x17e   : > { %2473 = vmatmul.msk.bf16.vlgmr.msrb.gmra.mxu1 %vm423_vm2, %v3082_v42  ;;  %v1618_v21 = vsel %vm1610_vm7, %v1603_v17, %v1605_v18  ;;  %v1649_v41 = vsel %vm427_vm1, %v1619_v31, 0  ;;  %v1805_v1 = vpop.permute.xlu1 %1804 }
 0x17f   : > { %1674 = vmatpush.bf16.msrb.mxu1 %v1628_v63  ;;  %v1646_v28 = vsel %vm427_vm1, %v1618_v21, 0 }
 0x180   : > { %2474 = vmatmul.msk.bf16.vlgmr.msrb.gmra.mxu2 %vm423_vm2, %v3082_v42  ;;  %2475 = vmatmul.msk.bf16.vlgmr.msrb.gmra.mxu3 %vm423_vm2, %v3082_v42 }
 0x181   : > { %1687 = vmatpush.bf16.msrb.mxu2 %v1631_v5  ;;  %1700 = vmatpush.bf16.msrb.mxu3 %v1634_v45 }
 0x183   : > { %v887_v7 = vpop.f32.mrf.mxu2  ;;  %v900_v0 = vpop.f32.mrf.mxu3 }
 0x184   : > { %v3122_v9 = vadd.f32 %v887_v7, %v3039_v3  ;;  %v3125_v10 = vadd.f32 %v900_v0, %v3049_v15  ;;  %v876_v11 = vpop.f32.mrf.mxu1  ;;  %v1616_v3 = vsel %vm1610_vm7, %v1599_v6, %v1601_v13  ;;  %v1617_v15 = vsel %vm1610_vm7, %v1601_v13, %v1603_v17  ;;  %v1799_v35 = vpop.permute.xlu0 %1798 }
 0x185   : > { %v913_v12 = vpop.f32.mrf.mxu0  ;;  %v1643_v39 = vsel %vm427_vm1, %v1617_v15, 0  ;;  %v1609_v30 = vpop.permute.xlu2 %1608  ;;  %v1820_v50 = vsel %vm1818_vm8, %v1799_v35, %v1801_v46 }
 0x186   : > { %v3128_v14 = vadd.f32 %v913_v12, %v3061_v22  ;;  %v1640_v22 = vsel %vm427_vm1, %v1616_v3, 0  ;;  %v1836_v52 = vsel %vm427_vm1, %v1820_v50, 0  ;;  %v1811_v18 = vpop.permute.xlu1 %1810 }
 0x188   : > { %2476 = vmatmul.msk.bf16.vlgmr.msra.gmra.mxu0 %vm423_vm2, %v3082_v42 }
 0x189   : > { %1713 = vmatpush.bf16.msra.mxu0 %v1637_v16 }
 0x18b   : > { %v889_v19 = vpop.f32.mrf.mxu2  ;;  %v902_v20 = vpop.f32.mrf.mxu3 }
 0x18c   : > { %v926_v25 = vpop.f32.mrf.mxu1  ;;  %v1803_v60 = vpop.permute.xlu0 %1802 }
 0x18d   : > { %v915_v26 = vpop.f32.mrf.mxu0  ;;  %v3138_v24 = vadd.f32 %v926_v25, %v3064_v23  ;;  %v1821_v57 = vsel %vm1818_vm8, %v1801_v46, %v1803_v60 }
 0x18e   : > { %2477 = vmatmul.msk.bf16.vlgmr.msra.gmra.mxu1 %vm423_vm2, %v3082_v42  ;;  %v1839_v5 = vsel %vm427_vm1, %v1821_v57, 0 }
 0x18f   : > { %1726 = vmatpush.bf16.msra.mxu1 %v1640_v22 }
 0x190   : > { %2478 = vmatmul.msk.bf16.vlgmr.msra.gmra.mxu2 %vm423_vm2, %v3082_v42  ;;  %2479 = vmatmul.msk.bf16.vlgmr.msra.gmra.mxu3 %vm423_vm2, %v3082_v42  ;;  %v3158_v42 = vld [vmem:[%s3404_s1 + $0xc] sm:$0x3] }
 0x191   : > { %1739 = vmatpush.bf16.msra.mxu2 %v1643_v39  ;;  %1752 = vmatpush.bf16.msra.mxu3 %v1646_v28 }
 0x193   : > { %v939_v23 = vpop.f32.mrf.mxu2  ;;  %v952_v36 = vpop.f32.mrf.mxu3 }
 0x194   : > { %v3150_v32 = vadd.f32 %v939_v23, %v3067_v27  ;;  %v3153_v33 = vadd.f32 %v952_v36, %v3077_v38  ;;  %v928_v34 = vpop.f32.mrf.mxu1  ;;  %v1797_v27 = vpop.permute.xlu2 %1796  ;;  %v1620_v38 = vsel %vm1610_vm7, %v1607_v29, %v1609_v30 }
 0x195   : > { %v965_v37 = vpop.f32.mrf.mxu0  ;;  %v1819_v47 = vsel %vm1818_vm8, %v1797_v27, %v1799_v35  ;;  %v1809_v6 = vpop.permute.xlu0 %1808 }
 0x196   : > { %v3161_v40 = vadd.f32 %v965_v37, %v3093_v43  ;;  %v1652_v43 = vsel %vm427_vm1, %v1620_v38, 0  ;;  %v1833_v59 = vsel %vm427_vm1, %v1819_v47, 0  ;;  %v1825_v19 = vsel %vm1818_vm8, %v1809_v6, %v1811_v18  ;;  %v1817_v29 = vpop.permute.xlu1 %1816  ;;  %v3232_v37 = vld [vmem:[%s3404_s1 + $0xe] sm:$0x3] }
 0x197   : > { %v1851_v39 = vsel %vm427_vm1, %v1825_v19, 0 }
 0x198   : > { %2481 = vmatmul.msk.bf16.vlgmr.msrb.gmra.mxu0 %vm423_vm2, %v3158_v42 }
 0x199   : > { %1765 = vmatpush.bf16.msrb.mxu0 %v1649_v41 }
 0x19b   : > { %v941_v49 = vpop.f32.mrf.mxu2  ;;  %v954_v44 = vpop.f32.mrf.mxu3 }
 0x19c   : > { %v978_v53 = vpop.f32.mrf.mxu1  ;;  %v1807_v45 = vpop.permute.xlu2 %1806 }
 0x19d   : > { %v967_v54 = vpop.f32.mrf.mxu0  ;;  %v3171_v55 = vadd.f32 %v978_v53, %v3096_v48  ;;  %v1824_v8 = vsel %vm1818_vm8, %v1807_v45, %v1809_v6  ;;  %v1815_v28 = vpop.permute.xlu0 %1814 }
 0x19e   : > { %2482 = vmatmul.msk.bf16.vlgmr.msrb.gmra.mxu1 %vm423_vm2, %v3158_v42  ;;  %v1848_v17 = vsel %vm427_vm1, %v1824_v8, 0  ;;  %v1828_v36 = vsel %vm1818_vm8, %v1815_v28, %v1817_v29  ;;  %v2005_v46 = vpop.permute.xlu1 %2004 }
 0x19f   : > { %1778 = vmatpush.bf16.msrb.mxu1 %v1652_v43  ;;  %v1860_v38 = vsel %vm427_vm1, %v1828_v36, 0 }
 0x1a0   : > { %2483 = vmatmul.msk.bf16.vlgmr.msrb.gmra.mxu2 %vm423_vm2, %v3158_v42  ;;  %2484 = vmatmul.msk.bf16.vlgmr.msrb.gmra.mxu3 %vm423_vm2, %v3158_v42 }
 0x1a1   : > { %1869 = vmatpush.bf16.msrb.mxu2 %v1833_v59  ;;  %1882 = vmatpush.bf16.msrb.mxu3 %v1836_v52 }
 0x1a3   : > { %v1069_v51 = vpop.f32.mrf.mxu2  ;;  %v1082_v48 = vpop.f32.mrf.mxu3 }
 0x1a4   : > { %v3183_v56 = vadd.f32 %v1069_v51, %v3100_v58  ;;  %v3186_v61 = vadd.f32 %v1082_v48, %v3110_v4  ;;  %v980_v62 = vpop.f32.mrf.mxu1  ;;  %v1822_v58 = vsel %vm1818_vm8, %v1803_v60, %v1805_v1  ;;  %v1823_v4 = vsel %vm1818_vm8, %v1805_v1, %v1807_v45  ;;  %v1813_v25 = vpop.permute.xlu2 %1812 }
 0x1a5   : > { %v1095_v63 = vpop.f32.mrf.mxu0  ;;  %v1845_v16 = vsel %vm427_vm1, %v1823_v4, 0 }
 0x1a6   : > { %v3189_v2 = vadd.f32 %v1095_v63, %v3122_v9  ;;  %v1842_v9 = vsel %vm427_vm1, %v1822_v58, 0  ;;  %v2015_v6 = vpop.permute.xlu1 %2014 }
 0x1a8   : > { %2485 = vmatmul.msk.bf16.vlgmr.msra.gmra.mxu0 %vm423_vm2, %v3158_v42 }
 0x1a9   : > { %1895 = vmatpush.bf16.msra.mxu0 %v1839_v5 }
 0x1ab   : > { %v1071_v7 = vpop.f32.mrf.mxu2  ;;  %v1084_v0 = vpop.f32.mrf.mxu3 }
 0x1ac   : > { %v1108_v11 = vpop.f32.mrf.mxu1  ;;  %v2007_v27 = vpop.permute.xlu2 %2006 }
 0x1ad   : > { %v1097_v12 = vpop.f32.mrf.mxu0  ;;  %v3199_v13 = vadd.f32 %v1108_v11, %v3125_v10  ;;  %v2550_v11 = vmov 0  }
 0x1ae   : > { %2486 = vmatmul.msk.bf16.vlgmr.msra.gmra.mxu1 %vm423_vm2, %v3158_v42  ;;  %2532 = vset.pattern.permute.xlu1 %v2550_v11 }
 0x1af   : > { %1908 = vmatpush.bf16.msra.mxu1 %v1842_v9  ;;  %v2210_v9 = vld [vmem:[%s3405_s2] sm:$0xf]  ;;  %2533 = vset.pattern.permute.xlu0 %v2550_v11 }
 0x1b0   : > { %2487 = vmatmul.msk.bf16.vlgmr.msra.gmra.mxu2 %vm423_vm2, %v3158_v42  ;;  %2488 = vmatmul.msk.bf16.vlgmr.msra.gmra.mxu3 %vm423_vm2, %v3158_v42 }
 0x1b1   : > { %1921 = vmatpush.bf16.msra.mxu2 %v1845_v16  ;;  %1934 = vmatpush.bf16.msra.mxu3 %v1848_v17 }
 0x1b2   : > { %2213 = vperm.xlu1 %2532, %v2210_v9  }
 0x1b3   : > { %v1121_v3 = vpop.f32.mrf.mxu2  ;;  %v1134_v10 = vpop.f32.mrf.mxu3 }
 0x1b4   : > { %v3211_v20 = vadd.f32 %v1121_v3, %v3128_v14  ;;  %v3214_v15 = vadd.f32 %v1134_v10, %v3138_v24  ;;  %v1110_v21 = vpop.f32.mrf.mxu1  ;;  %v1826_v14 = vsel %vm1818_vm8, %v1811_v18, %v1813_v25  ;;  %v1827_v24 = vsel %vm1818_vm8, %v1813_v25, %v1815_v28  ;;  %v2011_v60 = vpop.permute.xlu2 %2010 }
 0x1b5   : > { %v1147_v22 = vpop.f32.mrf.mxu0  ;;  %v1857_v41 = vsel %vm427_vm1, %v1827_v24, 0  ;;  %v2021_v18 = vpop.permute.xlu1 %2020 }
 0x1b6   : > { %v3217_v26 = vadd.f32 %v1147_v22, %v3150_v32  ;;  %v1854_v32 = vsel %vm427_vm1, %v1826_v14, 0 }
 0x1b8   : > { %2489 = vmatmul.msk.bf16.vlgmr.msrb.gmra.mxu0 %vm423_vm2, %v3158_v42 }
 0x1b9   : > { %1947 = vmatpush.bf16.msrb.mxu0 %v1851_v39 }
 0x1bb   : > { %v1123_v30 = vpop.f32.mrf.mxu2  ;;  %v1136_v23 = vpop.f32.mrf.mxu3 }
 0x1bc   : > { %v1160_v31 = vpop.f32.mrf.mxu1 }
 0x1bd   : > { %v1149_v34 = vpop.f32.mrf.mxu0  ;;  %v3227_v35 = vadd.f32 %v1160_v31, %v3153_v33  ;;  %v2009_v33 = vpop.permute.xlu0 %2008 }
 0x1be   : > { %2490 = vmatmul.msk.bf16.vlgmr.msrb.gmra.mxu1 %vm423_vm2, %v3158_v42  ;;  %v2027_v42 = vsel %vm2026_vm9, %v2005_v46, %v2007_v27  ;;  %v2028_v51 = vsel %vm2026_vm9, %v2007_v27, %v2009_v33 }
 0x1bf   : > { %1960 = vmatpush.bf16.msrb.mxu1 %v1854_v32  ;;  %v2041_v59 = vsel %vm427_vm1, %v2027_v42, 0 }
 0x1c0   : > { %2492 = vmatmul.msk.bf16.vlgmr.msrb.gmra.mxu2 %vm423_vm2, %v3232_v37  ;;  %2493 = vmatmul.msk.bf16.vlgmr.msrb.gmra.mxu3 %vm423_vm2, %v3232_v37 }
 0x1c1   : > { %1973 = vmatpush.bf16.msrb.mxu2 %v1857_v41  ;;  %1986 = vmatpush.bf16.msrb.mxu3 %v1860_v38  ;;  %v2502_v41 = vld [vmem:[%s3404_s1 + $0x10] sm:$0x3] }
 0x1c3   : > { %v1173_v49 = vpop.f32.mrf.mxu2  ;;  %v1186_v44 = vpop.f32.mrf.mxu3 }
 0x1c4   : > { %v3244_v47 = vadd.f32 %v1173_v49, %v3161_v40  ;;  %v3247_v50 = vadd.f32 %v1186_v44, %v3171_v55  ;;  %v1162_v53 = vpop.f32.mrf.mxu1  ;;  %v2029_v55 = vsel %vm2026_vm9, %v2009_v33, %v2011_v60 }
 0x1c5   : > { %v1244_v43 = vpop.f32.mrf.mxu0  ;;  %v2013_v52 = vpop.permute.xlu0 %2012  ;;  %v2047_v5 = vsel %vm427_vm1, %v2029_v55, 0 }
 0x1c6   : > { %v3250_v54 = vadd.f32 %v1244_v43, %v3183_v56  ;;  %v2030_v57 = vsel %vm2026_vm9, %v2011_v60, %v2013_v52  ;;  %v2044_v56 = vsel %vm427_vm1, %v2028_v51, 0  ;;  %v2031_v7 = vsel %vm2026_vm9, %v2013_v52, %v2015_v6 }
 0x1c7   : > { %v2050_v45 = vsel %vm427_vm1, %v2030_v57, 0  ;;  %v2053_v17 = vsel %vm427_vm1, %v2031_v7, 0 }
 0x1c8   : > { %2494 = vmatmul.msk.bf16.vlgmr.msra.gmra.mxu0 %vm423_vm2, %v3232_v37 }
 0x1c9   : > { %2077 = vmatpush.bf16.msra.mxu0 %v2041_v59 }
 0x1cb   : > { %v1175_v40 = vpop.f32.mrf.mxu2  ;;  %v1188_v48 = vpop.f32.mrf.mxu3 }
 0x1cc   : > { %v1257_v62 = vpop.f32.mrf.mxu1 }
 0x1cd   : > { %v1246_v1 = vpop.f32.mrf.mxu0  ;;  %v3260_v63 = vadd.f32 %v1257_v62, %v3186_v61 }
 0x1ce   : > { %2495 = vmatmul.msk.bf16.vlgmr.msra.gmra.mxu1 %vm423_vm2, %v3232_v37 }
 0x1cf   : > { %2090 = vmatpush.bf16.msra.mxu1 %v2044_v56 }
 0x1d0   : > { %2496 = vmatmul.msk.bf16.vlgmr.msra.gmra.mxu2 %vm423_vm2, %v3232_v37  ;;  %2497 = vmatmul.msk.bf16.vlgmr.msra.gmra.mxu3 %vm423_vm2, %v3232_v37 }
 0x1d1   : > { %2103 = vmatpush.bf16.msra.mxu2 %v2047_v5  ;;  %2116 = vmatpush.bf16.msra.mxu3 %v2050_v45 }
 0x1d3   : > { %v1270_v58 = vpop.f32.mrf.mxu2  ;;  %v1283_v61 = vpop.f32.mrf.mxu3 }
 0x1d4   : > { %v3272_v0 = vadd.f32 %v1270_v58, %v3189_v2  ;;  %v3275_v4 = vadd.f32 %v1283_v61, %v3199_v13  ;;  %v1259_v8 = vpop.f32.mrf.mxu1  ;;  %v2017_v2 = vpop.permute.xlu2 %2016 }
 0x1d5   : > { %v1296_v12 = vpop.f32.mrf.mxu0  ;;  %v2019_v13 = vpop.permute.xlu0 %2018  ;;  %v2032_v3 = vsel %vm2026_vm9, %v2015_v6, %v2017_v2 }
 0x1d6   : > { %v3281_v16 = vadd.f32 %v1296_v12, %v3211_v20  ;;  %v2033_v21 = vsel %vm2026_vm9, %v2017_v2, %v2019_v13  ;;  %v2034_v25 = vsel %vm2026_vm9, %v2019_v13, %v2021_v18  ;;  %v2056_v20 = vsel %vm427_vm1, %v2032_v3, 0 }
 0x1d7   : > { %v2059_v29 = vsel %vm427_vm1, %v2033_v21, 0  ;;  %v2062_v14 = vsel %vm427_vm1, %v2034_v25, 0 }
 0x1d8   : > { %2498 = vmatmul.msk.bf16.vlgmr.msrb.gmra.mxu0 %vm423_vm2, %v3232_v37 }
 0x1d9   : > { %2129 = vmatpush.bf16.msrb.mxu0 %v2053_v17 }
 0x1db   : > { %v1272_v10 = vpop.f32.mrf.mxu2  ;;  %v1285_v19 = vpop.f32.mrf.mxu3 }
 0x1dc   : > { %v1309_v22 = vpop.f32.mrf.mxu1  ;;  %v2023_v30 = vpop.permute.xlu2 %2022 }
 0x1dd   : > { %v1298_v39 = vpop.f32.mrf.mxu0  ;;  %v1370_v28 = vadd.f32 %v1309_v22, %v3214_v15  ;;  %v2035_v15 = vsel %vm2026_vm9, %v2021_v18, %v2023_v30  ;;  %v2025_v38 = vpop.permute.xlu0 %2024 }
 0x1de   : > { %2499 = vmatmul.msk.bf16.vlgmr.msrb.gmra.mxu1 %vm423_vm2, %v3232_v37  ;;  %v2036_v33 = vsel %vm2026_vm9, %v2023_v30, %v2025_v38 }
 0x1df   : > { %2142 = vmatpush.bf16.msrb.mxu1 %v2056_v20 }
 0x1e0   : > { %2500 = vmatmul.msk.bf16.vlgmr.msrb.gmra.mxu2 %vm423_vm2, %v3232_v37  ;;  %2501 = vmatmul.msk.bf16.vlgmr.msrb.gmra.mxu3 %vm423_vm2, %v3232_v37  ;;  %v2065_v37 = vsel %vm427_vm1, %v2035_v15, 0 }
 0x1e1   : > { %2155 = vmatpush.bf16.msrb.mxu2 %v2059_v29  ;;  %2168 = vmatpush.bf16.msrb.mxu3 %v2062_v14 }
 0x1e3   : > { %v1322_v23 = vpop.f32.mrf.mxu2  ;;  %v1335_v24 = vpop.f32.mrf.mxu3 }
 0x1e4   : > { %v1371_v36 = vadd.f32 %v1322_v23, %v3217_v26  ;;  %v1372_v31 = vadd.f32 %v1335_v24, %v3227_v35  ;;  %v1311_v32 = vpop.f32.mrf.mxu1  ;;  %v2068_v35 = vsel %vm427_vm1, %v2036_v33, 0 }
 0x1e5   : > { %v1348_v34 = vpop.f32.mrf.mxu0 }
 0x1e6   : > { %v1373_v27 = vadd.f32 %v1348_v34, %v3244_v47 }
 0x1e8   : > { %2503 = vmatmul.msk.bf16.vlgmr.msra.gmra.mxu0 %vm423_vm2, %v2502_v41 }
 0x1e9   : > { %2181 = vmatpush.bf16.msra.mxu0 %v2065_v37 }
 0x1eb   : > { %v1324_v46 = vpop.f32.mrf.mxu2  ;;  %v1337_v26 = vpop.f32.mrf.mxu3 }
 0x1ec   : > { %v1361_v49 = vpop.f32.mrf.mxu1 }
 0x1ed   : > { %v1350_v44 = vpop.f32.mrf.mxu0  ;;  %v1374_v42 = vadd.f32 %v1361_v49, %v3247_v50 }
 0x1ee   : > { %2504 = vmatmul.msk.bf16.vlgmr.msra.gmra.mxu1 %vm423_vm2, %v2502_v41 }
 0x1ef   : > { %2194 = vmatpush.bf16.msra.mxu1 %v2068_v35 }
 0x1f0   : > { %2505 = vmatmul.msk.bf16.vlgmr.msra.gmra.mxu2 %vm423_vm2, %v2502_v41  ;;  %2506 = vmatmul.msk.bf16.vlgmr.msra.gmra.mxu3 %vm423_vm2, %v2502_v41 }
 0x1f3   : > { %v1455_v47 = vpop.f32.mrf.mxu2  ;;  %v1468_v53 = vpop.f32.mrf.mxu3 }
 0x1f4   : > { %v1576_v43 = vadd.f32 %v1455_v47, %v3250_v54  ;;  %v1577_v59 = vadd.f32 %v1468_v53, %v3260_v63  ;;  %v1363_v60 = vpop.f32.mrf.mxu1 }
 0x1f5   : > { %v1481_v52 = vpop.f32.mrf.mxu0  ;;  %v2277_v60 = vld.sshfl [vmem:[#allocation1] sm:$0xff pattern:$0x75316420] }
 0x1f6   : > { %v1578_v51 = vadd.f32 %v1481_v52, %v3272_v0  ;;  %v289_v52 = vld [vmem:[%s2625_s12 + $0x68] sm:$0xff] }
 0x1f7   : > { %336 = vst [vmem:[#allocation1 + $0x10] ss:$2 sm:$0xff] %v289_v52 }
 0x1f8   : > { %2507 = vmatmul.msk.bf16.vlgmr.msrb.gmra.mxu0 %vm423_vm2, %v2502_v41 }
 0x1fb   : > { %v1457_v50 = vpop.f32.mrf.mxu2  ;;  %v1470_v40 = vpop.f32.mrf.mxu3 }
 0x1fc   : > { %v1494_v48 = vpop.f32.mrf.mxu1  ;;  %v2278_v50 = vld.sshfl [vmem:[#allocation1 + $0x8] sm:$0xff pattern:$0x75316420] }
 0x1fd   : > { %v1483_v55 = vpop.f32.mrf.mxu0  ;;  %v1579_v57 = vadd.f32 %v1494_v48, %v3275_v4  ;;  %v2261_v40 = vld [vmem:[%s2602_s27 + $0x8] sm:$0xff] }
 0x1fe   : > { %2508 = vmatmul.msk.bf16.vlgmr.msrb.gmra.mxu1 %vm423_vm2, %v2502_v41  ;;  %2272 = vst [vmem:[#allocation1 + $0x10] ss:$2 sm:$0xff] %v2261_v40 }
 0x200   : > { %2509 = vmatmul.msk.bf16.vlgmr.msrb.gmra.mxu2 %vm423_vm2, %v2502_v41  ;;  %2510 = vmatmul.msk.bf16.vlgmr.msrb.gmra.mxu3 %vm423_vm2, %v2502_v41 }
 0x203   : > { %v1507_v54 = vpop.f32.mrf.mxu2  ;;  %v1520_v62 = vpop.f32.mrf.mxu3 }
 0x204   : > { %v1580_v56 = vadd.f32 %v1507_v54, %v3281_v16  ;;  %v1581_v1 = vadd.f32 %v1520_v62, %v1370_v28  ;;  %v1496_v63 = vpop.f32.mrf.mxu1 }
 0x205   : > { %v1533_v5 = vpop.f32.mrf.mxu0 }
 0x206   : > { %v1582_v45 = vadd.f32 %v1533_v5, %v1371_v36  ;;  %v287_v5 = vld [vmem:[%s2625_s12 + $0x58] sm:$0xff] }
 0x207   : > { %328 = vst [vmem:[#allocation1 + $0x30] ss:$2 sm:$0xff] %v287_v5 }
 0x208   : > { %2511 = vmatmul.msk.bf16.vlgmr.msra.gmra.mxu0 %vm423_vm2, %v2502_v41 }
 0x20b   : > { %v1509_v6 = vpop.f32.mrf.mxu2  ;;  %v1522_v58 = vpop.f32.mrf.mxu3 }
 0x20c   : > { %v1546_v61 = vpop.f32.mrf.mxu1 }
 0x20d   : > { %v1535_v7 = vpop.f32.mrf.mxu0  ;;  %v1583_v0 = vadd.f32 %v1546_v61, %v1372_v31 }
 0x20e   : > { %2512 = vmatmul.msk.bf16.vlgmr.msra.gmra.mxu1 %vm423_vm2, %v2502_v41 }
 0x213   : > { %v1559_v4 = vpop.f32.mrf.mxu2  ;;  %v1572_v8 = vpop.f32.mrf.mxu3 }
 0x214   : > { %v1584_v11 = vadd.f32 %v1559_v4, %v1373_v27  ;;  %v1585_v9 = vadd.f32 %v1572_v8, %v1374_v42  ;;  %v1548_v12 = vpop.f32.mrf.mxu1 }
 0x215   : > { %v1663_v17 = vpop.f32.mrf.mxu0 }
 0x216   : > { %v1784_v16 = vadd.f32 %v1663_v17, %v1576_v43 }
 0x21b   : > { %v1561_v2 = vpop.f32.mrf.mxu2  ;;  %v1574_v13 = vpop.f32.mrf.mxu3 }
 0x21c   : > { %v1676_v18 = vpop.f32.mrf.mxu1 }
 0x21d   : > { %v1665_v3 = vpop.f32.mrf.mxu0  ;;  %v1785_v10 = vadd.f32 %v1676_v18, %v1577_v59 }
 0x223   : > { %v1689_v19 = vpop.f32.mrf.mxu2  ;;  %v1702_v21 = vpop.f32.mrf.mxu3 }
 0x224   : > { %v3325_v25 = vadd.f32 %v1689_v19, %v1578_v51  ;;  %v3327_v22 = vadd.f32 %v1702_v21, %v1579_v57  ;;  %v1678_v20 = vpop.f32.mrf.mxu1  ;;  %v2264_v51 = vld [vmem:[%s2602_s27 + $0x20] sm:$0xff]  ;;  %v3354_v8 = vpop.permute.xlu1 %2213 }
 0x225   : > { %v1715_v39 = vpop.f32.mrf.mxu0  ;;  %2285 = vst [vmem:[#allocation1] ss:$2 sm:$0xff] %v2264_v51 }
 0x226   : > { %v3329_v28 = vadd.f32 %v1715_v39, %v1580_v56 }
 0x22b   : > { %v1691_v29 = vpop.f32.mrf.mxu2  ;;  %v1704_v14 = vpop.f32.mrf.mxu3 }
 0x22c   : > { %v1728_v30 = vpop.f32.mrf.mxu1 }
 0x22d   : > { %v1717_v23 = vpop.f32.mrf.mxu0  ;;  %v3331_v24 = vadd.f32 %v1728_v30, %v1581_v1 }
 0x233   : > { %v1741_v15 = vpop.f32.mrf.mxu2  ;;  %v1754_v36 = vpop.f32.mrf.mxu3 }
 0x234   : > { %v3333_v31 = vadd.f32 %v1741_v15, %v1582_v45  ;;  %v3335_v32 = vadd.f32 %v1754_v36, %v1583_v0  ;;  %v1730_v34 = vpop.f32.mrf.mxu1  ;;  %v2263_v45 = vld [vmem:[%s2602_s27 + $0x18] sm:$0xff] }
 0x235   : > { %v1767_v41 = vpop.f32.mrf.mxu0  ;;  %2276 = vst [vmem:[#allocation1 + $0x30] ss:$2 sm:$0xff] %v2263_v45 }
 0x236   : > { %v3337_v27 = vadd.f32 %v1767_v41, %v1584_v11  ;;  %v3357_v11 = vld [vmem:[%s2597_s23] sm:$0xff] }
 0x237   : > { %v2230_v19 = vperm.slane %v3357_v11, 0  ;;  %v2231_v21 = vperm.slane %v3357_v11, 1  ;;  %v2232_v36 = vperm.slane %v3357_v11, 2  ;;  %v2233_v41 = vperm.slane %v3357_v11, 3 }
 0x23b   : > { %v1743_v37 = vpop.f32.mrf.mxu2  ;;  %v1756_v38 = vpop.f32.mrf.mxu3 }
 0x23c   : > { %v1780_v33 = vpop.f32.mrf.mxu1 }
 0x23d   : > { %v1769_v46 = vpop.f32.mrf.mxu0  ;;  %v3339_v26 = vadd.f32 %v1780_v33, %v1585_v9 }
 0x243   : > { %v1871_v49 = vpop.f32.mrf.mxu2  ;;  %v1884_v35 = vpop.f32.mrf.mxu3 }
 0x244   : > { %v1782_v44 = vpop.f32.mrf.mxu1  ;;  %v1992_v0 = vadd.f32 %v1871_v49, %v1784_v16  ;;  %v1993_v9 = vadd.f32 %v1884_v35, %v1785_v10 }
 0x245   : > { %v1897_v42 = vpop.f32.mrf.mxu0  ;;  %v2280_v44 = vld.sshfl [vmem:[#allocation1 + $0x18] sm:$0xff pattern:$0x75316420] }
 0x246   : > { %v1994_v29 = vadd.f32 %v1897_v42, %v3325_v25 }
 0x24b   : > { %v1873_v47 = vpop.f32.mrf.mxu2  ;;  %v1886_v53 = vpop.f32.mrf.mxu3 }
 0x24c   : > { %v1910_v43 = vpop.f32.mrf.mxu1  ;;  %v2279_v53 = vld.sshfl [vmem:[#allocation1 + $0x10] sm:$0xff pattern:$0x75316420] }
 0x24d   : > { %v1899_v59 = vpop.f32.mrf.mxu0  ;;  %v1995_v14 = vadd.f32 %v1910_v43, %v3327_v22 }
 0x253   : > { %v1923_v48 = vpop.f32.mrf.mxu2  ;;  %v1936_v55 = vpop.f32.mrf.mxu3 }
 0x254   : > { %v1912_v57 = vpop.f32.mrf.mxu1  ;;  %v1996_v22 = vadd.f32 %v1923_v48, %v3329_v28  ;;  %v2234_v28 = vperm.slane %v3357_v11, 4 }
 0x255   : > { %v3344_v54 = vpop.f32.mrf.mxu0 }
 0x25b   : > { %v1925_v62 = vpop.f32.mrf.mxu2  ;;  %v1938_v56 = vpop.f32.mrf.mxu3 }
 0x25c   : > { %v3346_v1 = vpop.f32.mrf.mxu1 }
 0x25d   : > { %v1951_v63 = vpop.f32.mrf.mxu0 }
 0x25e   : > { %v2235_v63 = vperm.slane %v3357_v11, 5 }
 0x263   : > { %v3350_v6 = vpop.f32.mrf.mxu2  ;;  %v3352_v58 = vpop.f32.mrf.mxu3 }
 0x264   : > { %v1964_v61 = vpop.f32.mrf.mxu1 }
 0x265   : > { %v2079_v7 = vpop.f32.mrf.mxu0  ;;  %v2282_v61 = vld.sshfl [vmem:[#allocation1 + $0x28] sm:$0xff pattern:$0x75316420] }
 0x266   : > { %v2200_v4 = vadd.f32 %v2079_v7, %v1992_v0  ;;  %v1998_v7 = vadd.f32 %v3344_v54, %v3333_v31  ;;  %v1999_v0 = vadd.f32 %v3346_v1, %v3335_v32  ;;  %v2000_v54 = vadd.f32 %v3350_v6, %v3337_v27 }
 0x268   : > { %v2216_v3 = vadd.f32 %v3354_v8, %v2200_v4  ;;  %v2281_v4 = vld.sshfl [vmem:[#allocation1 + $0x20] sm:$0xff pattern:$0x75316420] }
 0x26a   : > { %v2250_v16 = vmul.f32 %v2230_v19, %v2216_v3  ;;  %v2237_v3 = vperm.slane %v3357_v11, 7 }
 0x26b   : > { %v1977_v12 = vpop.f32.mrf.mxu2  ;;  %v1990_v17 = vpop.f32.mrf.mxu3 }
 0x26c   : > { %v2092_v2 = vpop.f32.mrf.mxu1  ;;  %v2298_v38 = vadd.f32 %v2277_v60, %v2250_v16  ;;  %v1997_v60 = vadd.f32 %v1936_v55, %v3331_v24 }
 0x26d   : > { %v2081_v13 = vpop.f32.mrf.mxu0  ;;  %v2201_v18 = vadd.f32 %v2092_v2, %v1993_v9 }
 0x26e   : > { %v2236_v13 = vperm.slane %v3357_v11, 6 }
 0x26f   : > { %v2217_v20 = vadd.f32 %v3354_v8, %v2201_v18 }
 0x271   : > { %v2251_v39 = vmul.f32 %v2231_v21, %v2217_v20 }
 0x273   : > { %v2299_v10 = vadd.f32 %v2278_v50, %v2251_v39  ;;  %v2105_v30 = vpop.f32.mrf.mxu2  ;;  %v2118_v23 = vpop.f32.mrf.mxu3  ;;  %v2284_v39 = vld.sshfl [vmem:[#allocation1 + $0x38] sm:$0xff pattern:$0x75316420] }
 0x274   : > { %v2202_v15 = vadd.f32 %v2105_v30, %v1994_v29  ;;  %v2203_v34 = vadd.f32 %v2118_v23, %v1995_v14  ;;  %v2094_v37 = vpop.f32.mrf.mxu1  ;;  %v2227_v23 = vld [vmem:[%s2597_s23 + $0x8] sm:$0x3] }
 0x275   : > { %v2318_v33 = vrot.slane %v2299_v10, 4  ;;  %v2131_v46 = vpop.f32.mrf.mxu0  ;;  %v2283_v10 = vld.sshfl [vmem:[#allocation1 + $0x30] sm:$0xff pattern:$0x75316420]  ;;  %v2238_v6 = vperm.slane %v2227_v23, 0 }
 0x276   : > { %v2218_v49 = vadd.f32 %v3354_v8, %v2202_v15  ;;  %v2219_v25 = vadd.f32 %v3354_v8, %v2203_v34  ;;  %v2204_v43 = vadd.f32 %v2131_v46, %v1996_v22  ;;  %v2001_v15 = vadd.f32 %v3352_v58, %v3339_v26  ;;  %v2286_v58 = vld.sshfl [vmem:[#allocation1] sm:$0xff pattern:$0x75316420] }
 0x277   : > { %v2324_v35 = vsel %vm2323_vm10, %v2298_v38, %v2318_v33  ;;  %v2239_v46 = vperm.slane %v2227_v23, 1 }
 0x278   : > { %2334 = vst [vmem:[%s2607_s30] sm:$0xff] %v2324_v35  ;;  %v2252_v42 = vmul.f32 %v2232_v36, %v2218_v49  ;;  %v2253_v47 = vmul.f32 %v2233_v41, %v2219_v25  ;;  %v2220_v62 = vadd.f32 %v3354_v8, %v2204_v43  ;;  %v2287_v35 = vld.sshfl [vmem:[#allocation1 + $0x8] sm:$0xff pattern:$0x75316420] }
 0x27a   : > { %v2301_v59 = vadd.f32 %v2280_v44, %v2253_v47  ;;  %v2300_v50 = vadd.f32 %v2279_v53, %v2252_v42  ;;  %v2254_v24 = vmul.f32 %v2234_v28, %v2220_v62 }
 0x27b   : > { %v2107_v52 = vpop.f32.mrf.mxu2  ;;  %v2120_v51 = vpop.f32.mrf.mxu3 }
 0x27c   : > { %v2319_v40 = vrot.slane %v2301_v59, 4  ;;  %v2144_v57 = vpop.f32.mrf.mxu1  ;;  %v2302_v21 = vadd.f32 %v2281_v4, %v2254_v24 }
 0x27d   : > { %v2133_v48 = vpop.f32.mrf.mxu0  ;;  %v2205_v56 = vadd.f32 %v2144_v57, %v1997_v60 }
 0x27e   : > { %v2325_v5 = vsel %vm2323_vm10, %v2300_v50, %v2319_v40 }
 0x27f   : > { %2335 = vst [vmem:[%s2607_s30 + $0x8] sm:$0xff] %v2325_v5  ;;  %v2221_v45 = vadd.f32 %v3354_v8, %v2205_v56 }
 0x281   : > { %v2255_v55 = vmul.f32 %v2235_v63, %v2221_v45 }
 0x283   : > { %v2303_v9 = vadd.f32 %v2282_v61, %v2255_v55  ;;  %v2157_v12 = vpop.f32.mrf.mxu2  ;;  %v2170_v17 = vpop.f32.mrf.mxu3 }
 0x284   : > { %v2206_v2 = vadd.f32 %v2157_v12, %v1998_v7  ;;  %v2207_v18 = vadd.f32 %v2170_v17, %v1999_v0  ;;  %v2146_v19 = vpop.f32.mrf.mxu1 }
 0x285   : > { %v2320_v20 = vrot.slane %v2303_v9, 4  ;;  %v2183_v16 = vpop.f32.mrf.mxu0 }
 0x286   : > { %v2222_v31 = vadd.f32 %v3354_v8, %v2206_v2  ;;  %v2223_v32 = vadd.f32 %v3354_v8, %v2207_v18  ;;  %v2208_v11 = vadd.f32 %v2183_v16, %v2000_v54 }
 0x287   : > { %v2326_v1 = vsel %vm2323_vm10, %v2302_v21, %v2320_v20 }
 0x288   : > { %2336 = vst [vmem:[%s2607_s30 + $0x10] sm:$0xff] %v2326_v1  ;;  %v2256_v29 = vmul.f32 %v2236_v13, %v2222_v31  ;;  %v2257_v14 = vmul.f32 %v2237_v3, %v2223_v32  ;;  %v2224_v27 = vadd.f32 %v3354_v8, %v2208_v11 }
 0x28a   : > { %v2305_v30 = vadd.f32 %v2284_v39, %v2257_v14  ;;  %v2304_v41 = vadd.f32 %v2283_v10, %v2256_v29  ;;  %v2258_v44 = vmul.f32 %v2238_v6, %v2224_v27 }
 0x28b   : > { %v2172_v36 = vpop.f32.mrf.mxu3  ;;  %v2159_v34 = vpop.f32.mrf.mxu2 }
 0x28c   : > { %v2321_v37 = vrot.slane %v2305_v30, 4  ;;  %v2196_v38 = vpop.f32.mrf.mxu1  ;;  %v2306_v53 = vadd.f32 %v2286_v58, %v2258_v44 }
 0x28d   : > { %v2209_v33 = vadd.f32 %v2196_v38, %v2001_v15  ;;  %v2185_v49 = vpop.f32.mrf.mxu0 }
 0x28e   : > { %v2327_v25 = vsel %vm2323_vm10, %v2304_v41, %v2321_v37 }
 0x28f   : > { %2337 = vst [vmem:[%s2607_s30 + $0x18] sm:$0xff] %v2327_v25  ;;  %v2225_v22 = vadd.f32 %v3354_v8, %v2209_v33 }
 0x291   : > { %v2259_v26 = vmul.f32 %v2239_v46, %v2225_v22 }
 0x293   : > { %v2307_v42 = vadd.f32 %v2287_v35, %v2259_v26 }
 0x294   : > { %v2198_v47 = vpop.f32.mrf.mxu1 }
 0x295   : > { %v2322_v43 = vrot.slane %v2307_v42, 4 }
 0x297   : > { %v2328_v59 = vsel %vm2323_vm10, %v2306_v53, %v2322_v43 }
 0x298   : > { %2338 = vst [vmem:[%s2607_s30 + $0x20] sm:$0xff] %v2328_v59 }
 0x299 PF: > { %s15_s18 = sadd.s32 1, %s2540_s18  }
 0x29a   : > { %p12_p10 = scmp.ge.s32.totalorder %s15_s18, 6  }
 0x29c   :  { %14 = sbr.rel (!%p12_p10) target bundleno = 1 (0x1), region = 96 }

// kernel: upsample_forward.10
= control target key start
LH: loop header
LB: loop body
LE: loop exit
PB: predicated region body
PF: predicated region fallthrough
CT: control target
= control target key end

     0   :  { %s4763_s29 = smov 0   ;;  %s4765_s30 = smov 0   ;;  %s6553_s0 = inlined_call_operand.vmem [shape: f32[4,5120], index: 0, kind: input, shape index: {}]   ;;  %s6554_s1 = inlined_call_operand.vmem [shape: bf16[9,4,4], index: 1, kind: input, shape index: {}]   ;;  %s6555_s2 = inlined_call_operand.vmem [shape: f32[4,1], index: 2, kind: input, shape index: {}]   ;;  %s6556_s3 = inlined_call_operand.vmem [shape: f32[1,4], index: 3, kind: input, shape index: {}]   ;;  %s6557_s4 = inlined_call_operand.<no memory space> [shape: f32[1,1], index: 4, kind: input, shape index: {}]   ;;  %s6558_s5 = inlined_call_operand.vmem [shape: f32[4,1], index: 5, kind: input, shape index: {}]   ;;  %s6559_s6 = inlined_call_operand.vmem [shape: f32[4,1], index: 6, kind: input, shape index: {}]   ;;  %s6560_s7 = inlined_call_operand.vmem [shape: f32[1,5120], index: 7, kind: input, shape index: {}]   ;;  %s6561_s8 = inlined_call_operand.vmem [shape: f32[4,5120], index: 8, kind: output, shape index: {}]  }
   0x1   :  { %v13_v0 = vstv %s6557_s4  ;;  %s4767_s9 = smov 0   ;;  %s4769_s10 = smov 0  }
   0x2   :  { %14 = vst [vmem:[#allocation3] sm:$0x1] %v13_v0  ;;  %s4771_s11 = smov 0  }
   0x3 LB: > { %s29_s4 = sadd.s32 1, %s4690_s9  ;;  %s32_s12 = sadd.s32 1, %s4694_s10  ;;  %s4698_s11 = sphi %s4771_s11, %s20_s11   ;;  %s4694_s10 = sphi %s4769_s10, %s6637_s10   ;;  %s4690_s9 = sphi %s4767_s9, %s6636_s9   ;;  %s4686_s30 = sphi %s4765_s30, %s6635_s30   ;;  %s4682_s29 = sphi %s4763_s29, %s6634_s29  }
   0x4   : > { %p30_p0 = scmp.ge.s32.totalorder %s29_s4, 4  ;;  %p4144_p1 = scmp.ge.s32.totalorder %s4698_s11, 1 }
   0x5   : > { %p278_p2 = scmp.lt.s32.totalorder %s4698_s11, 9 }
   0x6   : > { %s6639_s4 = smov (%p30_p0, %s29_s4), 0  ;;  %s6641_s12 = smov (!%p30_p0, %s32_s12), %s4694_s10 }
   0x7   : > { %p279_p3 = pnand %p4144_p1, %p278_p2  ;;  %p34_p4 = scmp.ge.s32.totalorder %s6641_s12, 2 }
   0x8   : > { %s312_s13 = smul.u32 (!%p279_p3), 10, %s4682_s29  ;;  %p326_p5 = scmp.eq.s32.totalorder (!%p279_p3), %s4686_s30, 0 }
   0x9   : > { %s6643_s12 = smov (%p34_p4, %s6641_s12), 0  ;;  %282 = sbr.rel (%p279_p3) target bundleno = 1511 (0x5e7), region = 52 }
   0xa   : > { %s317_s14 = smul.u32 (!%p279_p3), %s4682_s29, %s4686_s30  ;;  %p327_p6 = scmp.eq.s32.totalorder (!%p279_p3), %s4682_s29, 0 }
   0xb   : > { %p313_p7 = scmp.lt.s32.totalorder (!%p279_p3), %s312_s13, 39 }
   0xc   : > { %s318_s15 = smul.u32 (!%p279_p3), 10, %s317_s14  ;;  %p328_p8 = pnand (!%p279_p3), %p327_p6, %p326_p5 }
   0xe   : > { %s6645_s13 = smov (!%p313_p7, %s312_s13), 39  ;;  %p319_p9 = scmp.lt.s32.totalorder %s318_s15, 39 }
   0xf   : > { %s4807_s18 = scalar_lea.vmem %s6560_s7, %s6645_s13  ;;  %331 = sbr.rel (%p328_p8) target bundleno = 22 (0x16), region = 56 }
  0x10   : > { %s6647_s15 = smov (!%p319_p9, %s318_s15), 39 }
  0x11   : > { %s4145_s19 = sshll.u32 %s6647_s15, 2 }
  0x12   : > { %s4812_s22 = scalar_lea.vmem %s6561_s8, %s4145_s19 }
  0x14   : > { %vm332_vm0 = vcmask 11264   ;;  %v4700_v1 = vmov 0.0  }
  0x15   : > { %333 = vst.msk [vmem:[#allocation2] sm:$0xf] %vm332_vm0, %v4700_v1 }
  0x16 PF: > { %p334_p10 = scmp.gt.s32.totalorder %s4682_s29, 0  ;;  %p335_p11 = scmp.lt.s32.totalorder %s4682_s29, 3 }
  0x18   : > { %p336_p12 = pnand %p335_p11, %p334_p10 }
  0x19   : > { %s4146_s23 = sadd.s32 (!%p336_p12), 4294967295, %s4682_s29  ;;  %s4834_s14 = smul.u32 (!%p336_p12), 1280, %s4682_s29 }
  0x1a   : > { %339 = sbr.rel (%p336_p12) target bundleno = 1494 (0x5d6), region = 60  ;;  %s4701_s15 = smov (!%p336_p12), 34  }
  0x1b   : > { %s342_s24 = smul.u32 (!%p336_p12), 1280, %s4146_s23  ;;  %s4702_s16 = smov (!%p336_p12), 35  }
  0x1c   : > { %s4703_s17 = smov (!%p336_p12), 33   ;;  %s4704_s19 = smov (!%p336_p12), 1  }
  0x1d   : > { %s343_s25 = sshra.s32 (!%p336_p12), %s342_s24, 7  ;;  %s4705_s20 = smov (!%p336_p12), 127  }
  0x1e   : > { %s4147_s26 = sshll.u32 (!%p336_p12), %s343_s25, 2  ;;  %s4706_s24 = smov (!%p336_p12), 95  }
  0x1f   : > { %s4820_s13 = scalar_lea.vmem %s6553_s0, %s4147_s26  ;;  %vm483_vm1 = vcmask 277504   ;;  %vm498_vm2 = vcmask 1041408   ;;  %vm6563_vm3 = vcmask 31744   ;;  %vm681_vm4 = vcmask 285696   ;;  %s4707_s27 = smov 94  }
  0x20   : > { %v348_v2 = vld [vmem:[%s4820_s13 + $0x8] sm:$0xff]  ;;  %v347_v4 = vld [vmem:[%s4820_s13] sm:$0xff]  ;;  %v349_v6 = vld [vmem:[%s4820_s13 + $0x10] sm:$0xff]  ;;  %vm879_vm5 = vcmask 269312   ;;  %vm6562_vm6 = vcmask 7168   ;;  %vm1473_vm7 = vcmask 1039360  }
  0x21   : > { %v352_v3 = vld [vmem:[%s4820_s13 + $0x28] sm:$0xff]  ;;  %379 = vst [vmem:[#allocation1 + $0x10] ss:$2 sm:$0xff] %v348_v2  ;;  %v351_v5 = vld [vmem:[%s4820_s13 + $0x20] sm:$0xff]  ;;  %v353_v7 = vld [vmem:[%s4820_s13 + $0x30] sm:$0xff]  ;;  %vm1681_vm8 = vcmask 777216  }
  0x22   : > { %385 = vst [vmem:[#allocation1 + $0x10] ss:$2 sm:$0xff] %v352_v3  ;;  %v350_v8 = vld [vmem:[%s4820_s13 + $0x18] sm:$0xff]  ;;  %v356_v10 = vld [vmem:[%s4820_s13 + $0x48] sm:$0xff]  ;;  %v355_v11 = vld [vmem:[%s4820_s13 + $0x40] sm:$0xff]  ;;  %vm1889_vm9 = vcmask 769024  }
  0x23   : > { %377 = vst [vmem:[#allocation1] ss:$2 sm:$0xff] %v347_v4  ;;  %v354_v9 = vld [vmem:[%s4820_s13 + $0x38] sm:$0xff]  ;;  %v360_v25 = vld [vmem:[%s4820_s13 + $0x68] sm:$0xff]  ;;  %v359_v28 = vld [vmem:[%s4820_s13 + $0x60] sm:$0xff]  ;;  %vm2097_vm10 = vcmask 760832  }
  0x24   : > { %384 = vst [vmem:[#allocation1] ss:$2 sm:$0xff] %v351_v5  ;;  %v358_v19 = vld [vmem:[%s4820_s13 + $0x58] sm:$0xff]  ;;  %p4246_p13 = scmp.ne.s32.totalorder %s4686_s30, 0 }
  0x25   : > { %381 = vst [vmem:[#allocation1 + $0x20] ss:$2 sm:$0xff] %v349_v6  ;;  %v4934_v6 = vld [vmem:[%s6554_s1 + $0x2] sm:$0x3] }
  0x26   : > { %386 = vst [vmem:[#allocation1 + $0x20] ss:$2 sm:$0xff] %v353_v7 }
  0x27   : > { %383 = vst [vmem:[#allocation1 + $0x30] ss:$2 sm:$0xff] %v350_v8 }
  0x28   : > { %387 = vst [vmem:[#allocation1 + $0x30] ss:$2 sm:$0xff] %v354_v9 }
  0x29   : > { %v390_v12 = vld.sshfl [vmem:[#allocation1 + $0x10] sm:$0xff pattern:$0x75316420]  ;;  %v391_v13 = vld.sshfl [vmem:[#allocation1 + $0x18] sm:$0xff pattern:$0x75316420] }
  0x2a   : > { %v424_v14 = vpack.c.bf16 %v391_v13, %v390_v12  ;;  %397 = vst [vmem:[#allocation1 + $0x10] ss:$2 sm:$0xff] %v356_v10 }
  0x2b   : > { %v388_v15 = vld.sshfl [vmem:[#allocation1] sm:$0xff pattern:$0x75316420]  ;;  %v389_v16 = vld.sshfl [vmem:[#allocation1 + $0x8] sm:$0xff pattern:$0x75316420] }
  0x2c   : > { %v441_v17 = vunpack.c.h.b16 %v424_v14  ;;  %v423_v18 = vpack.c.bf16 %v389_v16, %v388_v15  ;;  %396 = vst [vmem:[#allocation1] ss:$2 sm:$0xff] %v355_v11  ;;  %v440_v34 = vunpack.c.l.b16 %v424_v14 }
  0x2d   : > { %v392_v20 = vld.sshfl [vmem:[#allocation1 + $0x20] sm:$0xff pattern:$0x75316420]  ;;  %v393_v21 = vld.sshfl [vmem:[#allocation1 + $0x28] sm:$0xff pattern:$0x75316420] }
  0x2e   : > { %v4836_v22 = vpack.c.b16 %v441_v17, %v441_v17  ;;  %v439_v23 = vunpack.c.h.b16 %v423_v18  ;;  %v425_v24 = vpack.c.bf16 %v393_v21, %v392_v20  ;;  %v4852_v42 = vpack.c.b16 %v440_v34, %v440_v34 }
  0x2f   : > { %v394_v26 = vld.sshfl [vmem:[#allocation1 + $0x30] sm:$0xff pattern:$0x75316420]  ;;  %v395_v27 = vld.sshfl [vmem:[#allocation1 + $0x38] sm:$0xff pattern:$0x75316420] }
  0x30   : > { %465 = vrot.lane.b32.xlu1 %v4836_v22, %s4701_s15  ;;  %v4842_v29 = vpack.c.b16 %v439_v23, %v439_v23  ;;  %v442_v30 = vunpack.c.l.b16 %v425_v24  ;;  %399 = vst [vmem:[#allocation1 + $0x30] ss:$2 sm:$0xff] %v358_v19  ;;  %v443_v31 = vunpack.c.h.b16 %v425_v24  ;;  %v426_v35 = vpack.c.bf16 %v395_v27, %v394_v26 }
  0x31   : > { %v402_v32 = vld.sshfl [vmem:[#allocation1 + $0x10] sm:$0xff pattern:$0x75316420]  ;;  %v403_v33 = vld.sshfl [vmem:[#allocation1 + $0x18] sm:$0xff pattern:$0x75316420] }
  0x32   : > { %461 = vrot.lane.b32.xlu0 %v4842_v29, %s4701_s15  ;;  %v4846_v36 = vpack.c.b16 %v443_v31, %v443_v31  ;;  %407 = vst [vmem:[#allocation1 + $0x10] ss:$2 sm:$0xff] %v360_v25  ;;  %v4848_v40 = vpack.c.b16 %v442_v30, %v442_v30  ;;  %v444_v41 = vunpack.c.l.b16 %v426_v35  ;;  %v445_v45 = vunpack.c.h.b16 %v426_v35 }
  0x33   : > { %v400_v37 = vld.sshfl [vmem:[#allocation1] sm:$0xff pattern:$0x75316420]  ;;  %v401_v38 = vld.sshfl [vmem:[#allocation1 + $0x8] sm:$0xff pattern:$0x75316420]  ;;  %v428_v48 = vpack.c.bf16 %v403_v33, %v402_v32 }
  0x34   : > { %406 = vst [vmem:[#allocation1] ss:$2 sm:$0xff] %v359_v28  ;;  %v427_v39 = vpack.c.bf16 %v401_v38, %v400_v37  ;;  %469 = vrot.lane.b32.xlu2 %v4846_v36, %s4701_s15  ;;  %v4856_v44 = vpack.c.b16 %v444_v41, %v444_v41  ;;  %v4864_v49 = vpack.c.b16 %v445_v45, %v445_v45 }
  0x35   : > { %v449_v51 = vunpack.c.h.b16 %v428_v48  ;;  %v448_v52 = vunpack.c.l.b16 %v428_v48 }
  0x36   : > { %v446_v43 = vunpack.c.l.b16 %v427_v39  ;;  %v447_v46 = vunpack.c.h.b16 %v427_v39 }
  0x37   : > { %v4872_v53 = vpack.c.b16 %v449_v51, %v449_v51  ;;  %v4876_v54 = vpack.c.b16 %v448_v52, %v448_v52 }
  0x38   : > { %467 = vrot.lane.b32.xlu1 %v4848_v40, %s4701_s15  ;;  %v4860_v47 = vpack.c.b16 %v446_v43, %v446_v43  ;;  %v4866_v50 = vpack.c.b16 %v447_v46, %v447_v46  ;;  %v4995_v43 = vld [vmem:[%s6554_s1] sm:$0x3] }
  0x3a   : > { %463 = vrot.lane.b32.xlu0 %v4852_v42, %s4701_s15 }
  0x3c   : > { %471 = vrot.lane.b32.xlu2 %v4856_v44, %s4701_s15 }
  0x40   : > { %475 = vrot.lane.b32.xlu1 %v4860_v47, %s4701_s15 }
  0x42   : > { %473 = vrot.lane.b32.xlu0 %v4864_v49, %s4701_s15 }
  0x44   : > { %477 = vrot.lane.b32.xlu2 %v4866_v50, %s4701_s15 }
  0x48   : > { %481 = vrot.lane.b32.xlu1 %v4872_v53, %s4701_s15 }
  0x4a   : > { %479 = vrot.lane.b32.xlu0 %v4876_v54, %s4701_s15  ;;  %s4708_s15 = smov 93  }
  0x4c   : > { %659 = vrot.lane.b32.xlu2 %v4842_v29, %s4702_s16 }
  0x50   : > { %663 = vrot.lane.b32.xlu1 %v4836_v22, %s4702_s16 }
  0x52   : > { %661 = vrot.lane.b32.xlu0 %v4852_v42, %s4702_s16 }
  0x54   : > { %665 = vrot.lane.b32.xlu2 %v4848_v40, %s4702_s16 }
  0x58   : > { %669 = vrot.lane.b32.xlu1 %v4856_v44, %s4702_s16 }
  0x5a   : > { %667 = vrot.lane.b32.xlu0 %v4846_v36, %s4702_s16 }
  0x5c   : > { %671 = vrot.lane.b32.xlu2 %v4864_v49, %s4702_s16 }
  0x60   : > { %675 = vrot.lane.b32.xlu1 %v4866_v50, %s4702_s16 }
  0x62   : > { %673 = vrot.lane.b32.xlu0 %v4860_v47, %s4702_s16 }
  0x64   : > { %677 = vrot.lane.b32.xlu2 %v4876_v54, %s4702_s16 }
  0x68   : > { %857 = vrot.lane.b32.xlu1 %v4842_v29, %s4703_s17 }
  0x6a   : > { %679 = vrot.lane.b32.xlu0 %v4872_v53, %s4702_s16 }
  0x6c   : > { %859 = vrot.lane.b32.xlu2 %v4852_v42, %s4703_s17 }
  0x70   : > { %863 = vrot.lane.b32.xlu1 %v4848_v40, %s4703_s17 }
  0x72   : > { %861 = vrot.lane.b32.xlu0 %v4836_v22, %s4703_s17 }
  0x74   : > { %865 = vrot.lane.b32.xlu2 %v4846_v36, %s4703_s17 }
  0x78   : > { %869 = vrot.lane.b32.xlu1 %v4864_v49, %s4703_s17 }
  0x7a   : > { %867 = vrot.lane.b32.xlu0 %v4856_v44, %s4703_s17 }
  0x7c   : > { %871 = vrot.lane.b32.xlu2 %v4860_v47, %s4703_s17 }
  0x80   : > { %875 = vrot.lane.b32.xlu1 %v4876_v54, %s4703_s17 }
  0x82   : > { %873 = vrot.lane.b32.xlu0 %v4866_v50, %s4703_s17 }
  0x84   : > { %877 = vrot.lane.b32.xlu2 %v4872_v53, %s4703_s17 }
  0x88   : > { %1067 = vrot.lane.b32.xlu1 %v4852_v42, %s4704_s19 }
  0x8a   : > { %1065 = vrot.lane.b32.xlu0 %v4842_v29, %s4704_s19 }
  0x8c   : > { %1069 = vrot.lane.b32.xlu2 %v4836_v22, %s4704_s19 }
  0x8e   : > { %v470_v55 = vpop.permute.xlu2 %469 }
  0x90   : > { %1073 = vrot.lane.b32.xlu1 %v4846_v36, %s4704_s19 }
  0x92   : > { %1071 = vrot.lane.b32.xlu0 %v4848_v40, %s4704_s19 }
  0x94   : > { %1075 = vrot.lane.b32.xlu2 %v4856_v44, %s4704_s19 }
  0x96   : > { %v472_v56 = vpop.permute.xlu2 %471 }
  0x97   : > { %v488_v61 = vsel %vm483_vm1, %v470_v55, %v472_v56 }
  0x98   : > { %1079 = vrot.lane.b32.xlu1 %v4860_v47, %s4704_s19  ;;  %v512_v5 = vsel %vm498_vm2, %v488_v61, 0 }
  0x9a   : > { %1077 = vrot.lane.b32.xlu0 %v4864_v49, %s4704_s19 }
  0x9c   : > { %1081 = vrot.lane.b32.xlu2 %v4866_v50, %s4704_s19 }
  0x9e   : > { %v478_v59 = vpop.permute.xlu2 %477 }
  0xa0   : > { %1085 = vrot.lane.b32.xlu1 %v4872_v53, %s4704_s19 }
  0xa2   : > { %v466_v57 = vpop.permute.xlu1 %465  ;;  %1083 = vrot.lane.b32.xlu0 %v4876_v54, %s4704_s19 }
  0xa4   : > { %v462_v58 = vpop.permute.xlu0 %461  ;;  %1451 = vrot.lane.b32.xlu2 %v4852_v42, %s4705_s20 }
  0xa6   : > { %v660_v9 = vpop.permute.xlu2 %659 }
  0xa8   : > { %1455 = vrot.lane.b32.xlu1 %v4848_v40, %s4705_s20 }
  0xaa   : > { %v468_v60 = vpop.permute.xlu1 %467  ;;  %1453 = vrot.lane.b32.xlu0 %v4836_v22, %s4705_s20 }
  0xab   : > { %v486_v62 = vsel %vm483_vm1, %v466_v57, %v468_v60  ;;  %v487_v63 = vsel %vm483_vm1, %v468_v60, %v470_v55 }
  0xac   : > { %v464_v0 = vpop.permute.xlu0 %463  ;;  %v506_v1 = vsel %vm498_vm2, %v486_v62, 0  ;;  %v509_v2 = vsel %vm498_vm2, %v487_v63, 0  ;;  %1457 = vrot.lane.b32.xlu2 %v4846_v36, %s4705_s20 }
  0xad   : > { %v484_v3 = vsel %vm483_vm1, %v462_v58, %v464_v0  ;;  %v485_v4 = vsel %vm483_vm1, %v464_v0, %v466_v57  ;;  %562 = vmatpush.bf16.msra.mxu2 %v506_v1  ;;  %575 = vmatpush.bf16.msra.mxu3 %v509_v2 }
  0xae   : > { %v500_v7 = vsel %vm498_vm2, %v484_v3, 0  ;;  %v503_v8 = vsel %vm498_vm2, %v485_v4, 0  ;;  %v666_v19 = vpop.permute.xlu2 %665 }
  0xaf   : > { %536 = vmatpush.bf16.msra.mxu0 %v500_v7  ;;  %549 = vmatpush.bf16.msra.mxu1 %v503_v8 }
  0xb0   : > { %4151 = vmatmul.msk.bf16.vlgmr.msra.gmra.mxu2 %vm6563_vm3, %v4934_v6  ;;  %4152 = vmatmul.msk.bf16.vlgmr.msra.gmra.mxu3 %vm6563_vm3, %v4934_v6 }
  0xb1   : > { %1461 = vrot.lane.b32.xlu1 %v4864_v49, %s4705_s20 }
  0xb2   : > { %4149 = vmatmul.msk.bf16.vlgmr.msra.gmra.mxu0 %vm6563_vm3, %v4934_v6  ;;  %4150 = vmatmul.msk.bf16.vlgmr.msra.gmra.mxu1 %vm6563_vm3, %v4934_v6  ;;  %v476_v10 = vpop.permute.xlu1 %475 }
  0xb3   : > { %588 = vmatpush.bf16.msrb.mxu0 %v512_v5  ;;  %v491_v11 = vsel %vm483_vm1, %v476_v10, %v478_v59  ;;  %1459 = vrot.lane.b32.xlu0 %v4856_v44, %s4705_s20 }
  0xb4   : > { %v474_v12 = vpop.permute.xlu0 %473  ;;  %v521_v13 = vsel %vm498_vm2, %v491_v11, 0  ;;  %1463 = vrot.lane.b32.xlu2 %v4860_v47, %s4705_s20 }
  0xb5   : > { %v489_v14 = vsel %vm483_vm1, %v472_v56, %v474_v12  ;;  %v490_v15 = vsel %vm483_vm1, %v474_v12, %v476_v10  ;;  %627 = vmatpush.bf16.msrb.mxu3 %v521_v13 }
  0xb6   : > { %v515_v16 = vsel %vm498_vm2, %v489_v14, 0  ;;  %v518_v17 = vsel %vm498_vm2, %v490_v15, 0  ;;  %v672_v30 = vpop.permute.xlu2 %671 }
  0xb7   : > { %601 = vmatpush.bf16.msrb.mxu1 %v515_v16  ;;  %614 = vmatpush.bf16.msrb.mxu2 %v518_v17  ;;  %v357_v17 = vld [vmem:[%s4820_s13 + $0x50] sm:$0xff] }
  0xb8   : > { %398 = vst [vmem:[#allocation1 + $0x20] ss:$2 sm:$0xff] %v357_v17 }
  0xb9   : > { %1467 = vrot.lane.b32.xlu1 %v4876_v54, %s4705_s20 }
  0xba   : > { %v482_v18 = vpop.permute.xlu1 %481 }
  0xbb   : > { %1465 = vrot.lane.b32.xlu0 %v4866_v50, %s4705_s20 }
  0xbc   : > { %v480_v20 = vpop.permute.xlu0 %479  ;;  %1469 = vrot.lane.b32.xlu2 %v4872_v53, %s4705_s20 }
  0xbd   : > { %v492_v21 = vsel %vm483_vm1, %v478_v59, %v480_v20  ;;  %v493_v23 = vsel %vm483_vm1, %v480_v20, %v482_v18 }
  0xbe   : > { %v524_v24 = vsel %vm498_vm2, %v492_v21, 0  ;;  %v527_v25 = vsel %vm498_vm2, %v493_v23, 0  ;;  %v678_v41 = vpop.permute.xlu2 %677 }
  0xbf   : > { %640 = vmatpush.bf16.msra.mxu0 %v524_v24  ;;  %653 = vmatpush.bf16.msra.mxu1 %v527_v25 }
  0xc0   : > { %4155 = vmatmul.msk.bf16.vlgmr.msrb.gmra.mxu2 %vm6563_vm3, %v4934_v6  ;;  %4156 = vmatmul.msk.bf16.vlgmr.msrb.gmra.mxu3 %vm6563_vm3, %v4934_v6 }
  0xc1   : > { %1659 = vrot.lane.b32.xlu1 %v4852_v42, %s4706_s24 }
  0xc2   : > { %4153 = vmatmul.msk.bf16.vlgmr.msrb.gmra.mxu0 %vm6563_vm3, %v4934_v6  ;;  %4154 = vmatmul.msk.bf16.vlgmr.msrb.gmra.mxu1 %vm6563_vm3, %v4934_v6  ;;  %v664_v26 = vpop.permute.xlu1 %663 }
  0xc3   : > { %v684_v27 = vsel %vm681_vm4, %v664_v26, %v666_v19 }
  0xc4   : > { %v662_v28 = vpop.permute.xlu0 %661  ;;  %v702_v29 = vsel %vm498_vm2, %v684_v27, 0  ;;  %1661 = vrot.lane.b32.xlu2 %v4836_v22, %s4706_s24  ;;  %v361_v27 = vld [vmem:[%s4820_s13 + $0x70] sm:$0xff] }
  0xc5   : > { %v682_v31 = vsel %vm681_vm4, %v660_v9, %v662_v28  ;;  %v683_v32 = vsel %vm681_vm4, %v662_v28, %v664_v26  ;;  %758 = vmatpush.bf16.msrb.mxu0 %v702_v29  ;;  %v404_v28 = vld.sshfl [vmem:[#allocation1 + $0x20] sm:$0xff pattern:$0x75316420]  ;;  %v405_v29 = vld.sshfl [vmem:[#allocation1 + $0x28] sm:$0xff pattern:$0x75316420] }
  0xc6   : > { %v696_v33 = vsel %vm498_vm2, %v682_v31, 0  ;;  %v699_v34 = vsel %vm498_vm2, %v683_v32, 0  ;;  %v860_v62 = vpop.permute.xlu2 %859  ;;  %408 = vst [vmem:[#allocation1 + $0x20] ss:$2 sm:$0xff] %v361_v27  ;;  %v429_v31 = vpack.c.bf16 %v405_v29, %v404_v28  ;;  %v1295_v28 = vsel %vm498_vm2, %v4860_v47, 0 }
  0xc7   : > { %732 = vmatpush.bf16.msra.mxu2 %v696_v33  ;;  %745 = vmatpush.bf16.msra.mxu3 %v699_v34 }
  0xc8   : > { %v1449_v34 = vunpack.c.l.b16 %v429_v31  ;;  %v1289_v31 = vsel %vm498_vm2, %v4856_v44, 0 }
  0xc9   : > { %1665 = vrot.lane.b32.xlu1 %v4846_v36, %s4706_s24 }
  0xca   : > { %v670_v35 = vpop.permute.xlu1 %669 }
  0xcb   : > { %v687_v37 = vsel %vm681_vm4, %v670_v35, %v672_v30 }
  0xcc   : > { %v668_v38 = vpop.permute.xlu0 %667  ;;  %v711_v39 = vsel %vm498_vm2, %v687_v37, 0  ;;  %1667 = vrot.lane.b32.xlu2 %v4856_v44, %s4706_s24 }
  0xcd   : > { %v685_v45 = vsel %vm681_vm4, %v666_v19, %v668_v38  ;;  %v686_v46 = vsel %vm681_vm4, %v668_v38, %v670_v35  ;;  %797 = vmatpush.bf16.msrb.mxu3 %v711_v39  ;;  %v5063_v35 = vpack.c.b16 %v1449_v34, %v1449_v34 }
  0xce   : > { %v705_v48 = vsel %vm498_vm2, %v685_v45, 0  ;;  %v708_v51 = vsel %vm498_vm2, %v686_v46, 0  ;;  %v866_v5 = vpop.permute.xlu2 %865 }
  0xcf   : > { %771 = vmatpush.bf16.msrb.mxu1 %v705_v48  ;;  %784 = vmatpush.bf16.msrb.mxu2 %v708_v51 }
  0xd0   : > { %4159 = vmatmul.msk.bf16.vlgmr.msra.gmra.mxu2 %vm6563_vm3, %v4995_v43  ;;  %4160 = vmatmul.msk.bf16.vlgmr.msra.gmra.mxu3 %vm6563_vm3, %v4995_v43 }
  0xd1   : > { %1671 = vrot.lane.b32.xlu1 %v4860_v47, %s4706_s24  ;;  %1471 = vrot.lane.b32.xlu0 %v5063_v35, %s4705_s20 }
  0xd2   : > { %4157 = vmatmul.msk.bf16.vlgmr.msra.gmra.mxu0 %vm6563_vm3, %v4934_v6  ;;  %4158 = vmatmul.msk.bf16.vlgmr.msra.gmra.mxu1 %vm6563_vm3, %v4934_v6  ;;  %v676_v52 = vpop.permute.xlu1 %675 }
  0xd3   : > { %v690_v55 = vsel %vm681_vm4, %v676_v52, %v678_v41 }
  0xd4   : > { %v674_v56 = vpop.permute.xlu0 %673  ;;  %v720_v57 = vsel %vm498_vm2, %v690_v55, 0  ;;  %1673 = vrot.lane.b32.xlu2 %v4866_v50, %s4706_s24 }
  0xd5   : > { %v688_v58 = vsel %vm681_vm4, %v672_v30, %v674_v56  ;;  %v689_v59 = vsel %vm681_vm4, %v674_v56, %v676_v52  ;;  %836 = vmatpush.bf16.msra.mxu2 %v720_v57 }
  0xd6   : > { %v714_v60 = vsel %vm498_vm2, %v688_v58, 0  ;;  %v717_v61 = vsel %vm498_vm2, %v689_v59, 0  ;;  %v872_v14 = vpop.permute.xlu2 %871 }
  0xd7   : > { %810 = vmatpush.bf16.msra.mxu0 %v714_v60  ;;  %823 = vmatpush.bf16.msra.mxu1 %v717_v61 }
  0xd9   : > { %1677 = vrot.lane.b32.xlu1 %v4872_v53, %s4706_s24  ;;  %1663 = vrot.lane.b32.xlu0 %v4848_v40, %s4706_s24 }
  0xda   : > { %v858_v63 = vpop.permute.xlu1 %857 }
  0xdb   : > { %v880_v2 = vsel %vm879_vm5, %v858_v63, %v860_v62 }
  0xdc   : > { %v680_v0 = vpop.permute.xlu0 %679  ;;  %v894_v4 = vsel %vm498_vm2, %v880_v2, 0  ;;  %1679 = vrot.lane.b32.xlu2 %v5063_v35, %s4706_s24 }
  0xdd   : > { %v691_v1 = vsel %vm681_vm4, %v678_v41, %v680_v0  ;;  %v5074_v41 = vld [vmem:[%s6554_s1 + $0x4] sm:$0x3] }
  0xde   : > { %v723_v3 = vsel %vm498_vm2, %v691_v1, 0  ;;  %v878_v26 = vpop.permute.xlu2 %877 }
  0xdf   : > { %849 = vmatpush.bf16.msra.mxu3 %v723_v3 }
  0xe0   : > { %4163 = vmatmul.msk.bf16.vlgmr.msrb.gmra.mxu2 %vm6563_vm3, %v4995_v43  ;;  %4164 = vmatmul.msk.bf16.vlgmr.msrb.gmra.mxu3 %vm6563_vm3, %v4995_v43 }
  0xe1   : > { %1869 = vrot.lane.b32.xlu1 %v4836_v22, %s4707_s27  ;;  %1669 = vrot.lane.b32.xlu0 %v4864_v49, %s4706_s24 }
  0xe2   : > { %4161 = vmatmul.msk.bf16.vlgmr.msrb.gmra.mxu0 %vm6563_vm3, %v4995_v43  ;;  %4162 = vmatmul.msk.bf16.vlgmr.msrb.gmra.mxu1 %vm6563_vm3, %v4995_v43  ;;  %v864_v6 = vpop.permute.xlu1 %863 }
  0xe3   : > { %930 = vmatpush.bf16.msrb.mxu0 %v894_v4  ;;  %v883_v7 = vsel %vm879_vm5, %v864_v6, %v866_v5 }
  0xe4   : > { %v862_v8 = vpop.permute.xlu0 %861  ;;  %v903_v9 = vsel %vm498_vm2, %v883_v7, 0  ;;  %1871 = vrot.lane.b32.xlu2 %v4848_v40, %s4707_s27 }
  0xe5   : > { %v881_v10 = vsel %vm879_vm5, %v860_v62, %v862_v8  ;;  %v882_v11 = vsel %vm879_vm5, %v862_v8, %v864_v6  ;;  %969 = vmatpush.bf16.msrb.mxu3 %v903_v9 }
  0xe6   : > { %v897_v12 = vsel %vm498_vm2, %v881_v10, 0  ;;  %v900_v13 = vsel %vm498_vm2, %v882_v11, 0  ;;  %v1070_v38 = vpop.permute.xlu2 %1069  ;;  %v4180_v10 = vld [vmem:[%s6554_s1 + $0x6] sm:$0x3] }
  0xe7   : > { %943 = vmatpush.bf16.msrb.mxu1 %v897_v12  ;;  %956 = vmatpush.bf16.msrb.mxu2 %v900_v13 }
  0xe9   : > { %1875 = vrot.lane.b32.xlu1 %v4856_v44, %s4707_s27  ;;  %1675 = vrot.lane.b32.xlu0 %v4876_v54, %s4706_s24 }
  0xea   : > { %v870_v15 = vpop.permute.xlu1 %869 }
  0xeb   : > { %v886_v16 = vsel %vm879_vm5, %v870_v15, %v872_v14 }
  0xec   : > { %v868_v18 = vpop.permute.xlu0 %867  ;;  %v912_v21 = vsel %vm498_vm2, %v886_v16, 0  ;;  %1877 = vrot.lane.b32.xlu2 %v4864_v49, %s4707_s27 }
  0xed   : > { %v884_v19 = vsel %vm879_vm5, %v866_v5, %v868_v18  ;;  %v885_v20 = vsel %vm879_vm5, %v868_v18, %v870_v15  ;;  %v1283_v18 = vsel %vm498_vm2, %v4848_v40, 0 }
  0xee   : > { %v906_v23 = vsel %vm498_vm2, %v884_v19, 0  ;;  %v909_v24 = vsel %vm498_vm2, %v885_v20, 0  ;;  %v1076_v59 = vpop.permute.xlu2 %1075 }
  0xf0   : > { %4167 = vmatmul.msk.bf16.vlgmr.msra.gmra.mxu2 %vm6563_vm3, %v4995_v43  ;;  %4168 = vmatmul.msk.bf16.vlgmr.msra.gmra.mxu3 %vm6563_vm3, %v4995_v43 }
  0xf1   : > { %1008 = vmatpush.bf16.msra.mxu2 %v912_v21  ;;  %1881 = vrot.lane.b32.xlu1 %v4866_v50, %s4707_s27  ;;  %v1277_v21 = vsel %vm498_vm2, %v4852_v42, 0 }
  0xf2   : > { %4165 = vmatmul.msk.bf16.vlgmr.msra.gmra.mxu0 %vm6563_vm3, %v4995_v43  ;;  %4166 = vmatmul.msk.bf16.vlgmr.msra.gmra.mxu1 %vm6563_vm3, %v4995_v43  ;;  %v876_v25 = vpop.permute.xlu1 %875 }
  0xf3   : > { %982 = vmatpush.bf16.msra.mxu0 %v906_v23  ;;  %995 = vmatpush.bf16.msra.mxu1 %v909_v24  ;;  %v889_v45 = vsel %vm879_vm5, %v876_v25, %v878_v26  ;;  %v1280_v23 = vsel %vm498_vm2, %v4836_v22, 0  ;;  %v1286_v24 = vsel %vm498_vm2, %v4846_v36, 0 }
  0xf4   : > { %v874_v30 = vpop.permute.xlu0 %873  ;;  %v921_v55 = vsel %vm498_vm2, %v889_v45, 0  ;;  %1883 = vrot.lane.b32.xlu2 %v4876_v54, %s4707_s27  ;;  %1867 = vrot.lane.b32.xlu0 %v4852_v42, %s4707_s27 }
  0xf5   : > { %v887_v32 = vsel %vm879_vm5, %v872_v14, %v874_v30  ;;  %v888_v43 = vsel %vm879_vm5, %v874_v30, %v876_v25 }
  0xf6   : > { %v915_v33 = vsel %vm498_vm2, %v887_v32, 0  ;;  %v918_v52 = vsel %vm498_vm2, %v888_v43, 0  ;;  %v1082_v6 = vpop.permute.xlu2 %1081  ;;  %v1292_v32 = vsel %vm498_vm2, %v4864_v49, 0 }
  0xf7   : > { %1021 = vmatpush.bf16.msra.mxu3 %v915_v33 }
  0xf9   : > { %1887 = vrot.lane.b32.xlu1 %v5063_v35, %s4707_s27 }
  0xfa   : > { %v1068_v37 = vpop.permute.xlu1 %1067 }
  0xfb   : > { %v1089_v48 = vsel %vm6562_vm6, %v1068_v37, %v1070_v38 }
  0xfc   : > { %v1066_v39 = vpop.permute.xlu0 %1065  ;;  %v1105_v56 = vsel %vm498_vm2, %v1089_v48, 0  ;;  %2075 = vrot.lane.b32.xlu2 %v4852_v42, %s4708_s15  ;;  %1873 = vrot.lane.b32.xlu0 %v4846_v36, %s4707_s27 }
  0xfd   : > { %v1088_v46 = vsel %vm6562_vm6, %v1066_v39, %v1068_v37 }
  0xfe   : > { %v1102_v51 = vsel %vm498_vm2, %v1088_v46, 0  ;;  %v5209_v46 = vld [vmem:[%s6554_s1 + $0x8] sm:$0x3] }
 0x100   : > { %4172 = vmatmul.msk.bf16.vlgmr.msrb.gmra.mxu2 %vm6563_vm3, %v5074_v41  ;;  %4173 = vmatmul.msk.bf16.vlgmr.msrb.gmra.mxu3 %vm6563_vm3, %v5074_v41 }
 0x101   : > { %1138 = vmatpush.bf16.msrb.mxu2 %v1102_v51  ;;  %1151 = vmatpush.bf16.msrb.mxu3 %v1105_v56 }
 0x102   : > { %4170 = vmatmul.msk.bf16.vlgmr.msrb.gmra.mxu0 %vm6563_vm3, %v5074_v41  ;;  %4171 = vmatmul.msk.bf16.vlgmr.msrb.gmra.mxu1 %vm6563_vm3, %v5074_v41  ;;  %v1074_v58 = vpop.permute.xlu1 %1073 }
 0x103   : > { %1034 = vmatpush.bf16.msrb.mxu0 %v918_v52  ;;  %1047 = vmatpush.bf16.msrb.mxu1 %v921_v55  ;;  %v1092_v60 = vsel %vm6562_vm6, %v1074_v58, %v1076_v59  ;;  %v1301_v55 = vsel %vm498_vm2, %v4876_v54, 0 }
 0x104   : > { %v1072_v57 = vpop.permute.xlu0 %1071  ;;  %2079 = vrot.lane.b32.xlu1 %v4848_v40, %s4708_s15  ;;  %v1114_v0 = vsel %vm498_vm2, %v1092_v60, 0  ;;  %2081 = vrot.lane.b32.xlu2 %v4846_v36, %s4708_s15 }
 0x105   : > { %v1090_v62 = vsel %vm6562_vm6, %v1070_v38, %v1072_v57  ;;  %v1091_v63 = vsel %vm6562_vm6, %v1072_v57, %v1074_v58  ;;  %1879 = vrot.lane.b32.xlu0 %v4860_v47, %s4707_s27 }
 0x106   : > { %v1108_v2 = vsel %vm498_vm2, %v1090_v62, 0  ;;  %v1111_v3 = vsel %vm498_vm2, %v1091_v63, 0 }
 0x10a   : > { %v1080_v5 = vpop.permute.xlu1 %1079 }
 0x10b   : > { %v1095_v12 = vsel %vm6562_vm6, %v1080_v5, %v1082_v6 }
 0x10c   : > { %v1078_v61 = vpop.permute.xlu0 %1077  ;;  %2085 = vrot.lane.b32.xlu1 %v4864_v49, %s4708_s15  ;;  %v1123_v16 = vsel %vm498_vm2, %v1095_v12, 0  ;;  %2087 = vrot.lane.b32.xlu2 %v4860_v47, %s4708_s15  ;;  %v1452_v49 = vpop.permute.xlu2 %1451 }
 0x10d   : > { %v1093_v1 = vsel %vm6562_vm6, %v1076_v59, %v1078_v61  ;;  %v1094_v11 = vsel %vm6562_vm6, %v1078_v61, %v1080_v5  ;;  %1885 = vrot.lane.b32.xlu0 %v4872_v53, %s4707_s27 }
 0x10e   : > { %v1117_v4 = vsel %vm498_vm2, %v1093_v1, 0  ;;  %v1120_v15 = vsel %vm498_vm2, %v1094_v11, 0 }
 0x110   : > { %4176 = vmatmul.msk.bf16.vlgmr.msra.gmra.mxu2 %vm6563_vm3, %v5074_v41  ;;  %4177 = vmatmul.msk.bf16.vlgmr.msra.gmra.mxu3 %vm6563_vm3, %v5074_v41 }
 0x111   : > { %1190 = vmatpush.bf16.msra.mxu2 %v1114_v0  ;;  %1203 = vmatpush.bf16.msra.mxu3 %v1117_v4 }
 0x112   : > { %4174 = vmatmul.msk.bf16.vlgmr.msra.gmra.mxu0 %vm6563_vm3, %v5074_v41  ;;  %4175 = vmatmul.msk.bf16.vlgmr.msra.gmra.mxu1 %vm6563_vm3, %v5074_v41  ;;  %v1086_v9 = vpop.permute.xlu1 %1085 }
 0x113   : > { %1164 = vmatpush.bf16.msra.mxu0 %v1108_v2  ;;  %1177 = vmatpush.bf16.msra.mxu1 %v1111_v3 }
 0x114   : > { %2091 = vrot.lane.b32.xlu1 %v4876_v54, %s4708_s15  ;;  %v1084_v7 = vpop.permute.xlu0 %1083  ;;  %2093 = vrot.lane.b32.xlu2 %v4872_v53, %s4708_s15  ;;  %v1458_v57 = vpop.permute.xlu2 %1457 }
 0x115   : > { %v1096_v8 = vsel %vm6562_vm6, %v1082_v6, %v1084_v7  ;;  %v1097_v14 = vsel %vm6562_vm6, %v1084_v7, %v1086_v9  ;;  %2077 = vrot.lane.b32.xlu0 %v4836_v22, %s4708_s15  ;;  %v1298_v22 = vsel %vm498_vm2, %v4866_v50, 0 }
 0x116   : > { %v1126_v13 = vsel %vm498_vm2, %v1096_v8, 0  ;;  %v1129_v17 = vsel %vm498_vm2, %v1097_v14, 0 }
 0x11a   : > { %v1456_v43 = vpop.permute.xlu1 %1455 }
 0x11b   : > { %v1476_v4 = vsel %vm1473_vm7, %v1456_v43, %v1458_v57 }
 0x11c   : > { %v1454_v38 = vpop.permute.xlu0 %1453  ;;  %v1464_v2 = vpop.permute.xlu2 %1463  ;;  %v1494_v11 = vsel %vm498_vm2, %v1476_v4, 0 }
 0x11d   : > { %2083 = vrot.lane.b32.xlu0 %v4856_v44, %s4708_s15  ;;  %v1475_v48 = vsel %vm1473_vm7, %v1454_v38, %v1456_v43 }
 0x11e   : > { %v1491_v56 = vsel %vm498_vm2, %v1475_v48, 0 }
 0x120   : > { %4181 = vmatmul.msk.bf16.vlgmr.msrb.gmra.mxu2 %vm6563_vm3, %v4180_v10  ;;  %4182 = vmatmul.msk.bf16.vlgmr.msrb.gmra.mxu3 %vm6563_vm3, %v4180_v10 }
 0x121   : > { %1242 = vmatpush.bf16.msrb.mxu2 %v1126_v13  ;;  %1255 = vmatpush.bf16.msrb.mxu3 %v1129_v17 }
 0x122   : > { %4178 = vmatmul.msk.bf16.vlgmr.msrb.gmra.mxu0 %vm6563_vm3, %v5074_v41  ;;  %4179 = vmatmul.msk.bf16.vlgmr.msrb.gmra.mxu1 %vm6563_vm3, %v5074_v41  ;;  %v1474_v41 = vsel %vm1473_vm7, %v1452_v49, %v1454_v38 }
 0x123   : > { %1216 = vmatpush.bf16.msrb.mxu0 %v1120_v15  ;;  %1229 = vmatpush.bf16.msrb.mxu1 %v1123_v16  ;;  %v1488_v44 = vsel %vm498_vm2, %v1474_v41, 0  ;;  %v1462_v63 = vpop.permute.xlu1 %1461 }
 0x125   : > { %2089 = vrot.lane.b32.xlu0 %v4866_v50, %s4708_s15  ;;  %v1304_v50 = vsel %vm498_vm2, %v4872_v53, 0  ;;  %v1460_v62 = vpop.permute.xlu0 %1459 }
 0x126   : > { %v1478_v1 = vsel %vm1473_vm7, %v1460_v62, %v1462_v63  ;;  %v1477_v5 = vsel %vm1473_vm7, %v1458_v57, %v1460_v62 }
 0x127   : > { %v1500_v6 = vsel %vm498_vm2, %v1478_v1, 0  ;;  %v1497_v12 = vsel %vm498_vm2, %v1477_v5, 0 }
 0x12d   : > { %2095 = vrot.lane.b32.xlu0 %v5063_v35, %s4708_s15  ;;  %v1479_v35 = vsel %vm1473_vm7, %v1462_v63, %v1464_v2  ;;  %v1466_v14 = vpop.permute.xlu0 %1465 }
 0x12e   : > { %v1503_v13 = vsel %vm498_vm2, %v1479_v35, 0 }
 0x12f   : > { %v5157_v19 = vpop.f32.mrf.mxu0  ;;  %v5159_v20 = vpop.f32.mrf.mxu1 }
 0x130   : > { %4185 = vmatmul.msk.bf16.vlgmr.msra.gmra.mxu2 %vm6563_vm3, %v4180_v10  ;;  %4186 = vmatmul.msk.bf16.vlgmr.msra.gmra.mxu3 %vm6563_vm3, %v4180_v10 }
 0x131   : > { %1339 = vmatpush.bf16.msra.mxu2 %v1283_v18  ;;  %1352 = vmatpush.bf16.msra.mxu3 %v1286_v24  ;;  %v1468_v18 = vpop.permute.xlu1 %1467 }
 0x132   : > { %4183 = vmatmul.msk.bf16.vlgmr.msra.gmra.mxu0 %vm6563_vm3, %v4180_v10  ;;  %4184 = vmatmul.msk.bf16.vlgmr.msra.gmra.mxu1 %vm6563_vm3, %v4180_v10 }
 0x133   : > { %v5171_v40 = vpop.f32.mrf.mxu2  ;;  %1313 = vmatpush.bf16.msra.mxu0 %v1277_v21  ;;  %1326 = vmatpush.bf16.msra.mxu1 %v1280_v23  ;;  %v5173_v25 = vpop.f32.mrf.mxu3 }
 0x134   : > { %v1470_v23 = vpop.permute.xlu2 %1469 }
 0x137   : > { %v540_v42 = vpop.f32.mrf.mxu0  ;;  %v553_v26 = vpop.f32.mrf.mxu1 }
 0x138   : > { %v5270_v26 = vld [vmem:[%s6554_s1 + $0xa] sm:$0x3] }
 0x13b   : > { %v566_v36 = vpop.f32.mrf.mxu2  ;;  %v579_v27 = vpop.f32.mrf.mxu3 }
 0x13c   : > { %v1480_v36 = vsel %vm1473_vm7, %v1464_v2, %v1466_v14  ;;  %v1481_v27 = vsel %vm1473_vm7, %v1466_v14, %v1468_v18 }
 0x13f   : > { %v5183_v29 = vpop.f32.mrf.mxu0  ;;  %v5185_v30 = vpop.f32.mrf.mxu1 }
 0x140   : > { %4189 = vmatmul.msk.bf16.vlgmr.msrb.gmra.mxu2 %vm6563_vm3, %v4180_v10  ;;  %4190 = vmatmul.msk.bf16.vlgmr.msrb.gmra.mxu3 %vm6563_vm3, %v4180_v10 }
 0x141   : > { %1391 = vmatpush.bf16.msrb.mxu2 %v1295_v28  ;;  %1404 = vmatpush.bf16.msrb.mxu3 %v1298_v22 }
 0x142   : > { %4187 = vmatmul.msk.bf16.vlgmr.msrb.gmra.mxu0 %vm6563_vm3, %v4180_v10  ;;  %4188 = vmatmul.msk.bf16.vlgmr.msrb.gmra.mxu1 %vm6563_vm3, %v4180_v10 }
 0x143   : > { %v5197_v47 = vpop.f32.mrf.mxu2  ;;  %1365 = vmatpush.bf16.msrb.mxu0 %v1289_v31  ;;  %1378 = vmatpush.bf16.msrb.mxu1 %v1292_v32  ;;  %v5199_v33 = vpop.f32.mrf.mxu3 }
 0x144   : > { %v1472_v42 = vpop.permute.xlu0 %1471 }
 0x147   : > { %v592_v34 = vpop.f32.mrf.mxu0  ;;  %v605_v37 = vpop.f32.mrf.mxu1 }
 0x148   : > { %v1506_v34 = vsel %vm498_vm2, %v1480_v36, 0  ;;  %v1509_v37 = vsel %vm498_vm2, %v1481_v27, 0 }
 0x14b   : > { %v618_v39 = vpop.f32.mrf.mxu2  ;;  %v631_v45 = vpop.f32.mrf.mxu3 }
 0x14c   : > { %v1664_v45 = vpop.permute.xlu0 %1663 }
 0x14f   : > { %v5213_v51 = vpop.f32.mrf.mxu0  ;;  %v5215_v52 = vpop.f32.mrf.mxu1 }
 0x150   : > { %4194 = vmatmul.msk.bf16.vlgmr.msra.gmra.mxu2 %vm6563_vm3, %v5209_v46  ;;  %4195 = vmatmul.msk.bf16.vlgmr.msra.gmra.mxu3 %vm6563_vm3, %v5209_v46 }
 0x151   : > { %1524 = vmatpush.bf16.msra.mxu2 %v1488_v44  ;;  %1537 = vmatpush.bf16.msra.mxu3 %v1491_v56 }
 0x152   : > { %4192 = vmatmul.msk.bf16.vlgmr.msra.gmra.mxu0 %vm6563_vm3, %v5209_v46  ;;  %4193 = vmatmul.msk.bf16.vlgmr.msra.gmra.mxu1 %vm6563_vm3, %v5209_v46 }
 0x153   : > { %v734_v58 = vpop.f32.mrf.mxu2  ;;  %1417 = vmatpush.bf16.msra.mxu0 %v1301_v55  ;;  %1430 = vmatpush.bf16.msra.mxu1 %v1304_v50  ;;  %v747_v53 = vpop.f32.mrf.mxu3 }
 0x154   : > { %v5231_v54 = vadd.f32 %v734_v58, %v5157_v19  ;;  %v5236_v59 = vadd.f32 %v747_v53, %v5159_v20 }
 0x157   : > { %v644_v60 = vpop.f32.mrf.mxu0  ;;  %v657_v61 = vpop.f32.mrf.mxu1 }
 0x15b   : > { %v736_v0 = vpop.f32.mrf.mxu2  ;;  %v749_v3 = vpop.f32.mrf.mxu3 }
 0x15c   : > { %v1670_v3 = vpop.permute.xlu0 %1669 }
 0x15f   : > { %v760_v7 = vpop.f32.mrf.mxu0  ;;  %v773_v8 = vpop.f32.mrf.mxu1 }
 0x160   : > { %v5244_v9 = vadd.f32 %v760_v7, %v5171_v40  ;;  %v5247_v10 = vadd.f32 %v773_v8, %v5173_v25  ;;  %4198 = vmatmul.msk.bf16.vlgmr.msrb.gmra.mxu2 %vm6563_vm3, %v5209_v46  ;;  %4199 = vmatmul.msk.bf16.vlgmr.msrb.gmra.mxu3 %vm6563_vm3, %v5209_v46  ;;  %v1482_v40 = vsel %vm1473_vm7, %v1468_v18, %v1470_v23 }
 0x161   : > { %1576 = vmatpush.bf16.msrb.mxu2 %v1500_v6  ;;  %1589 = vmatpush.bf16.msrb.mxu3 %v1503_v13  ;;  %v1512_v28 = vsel %vm498_vm2, %v1482_v40, 0 }
 0x162   : > { %4196 = vmatmul.msk.bf16.vlgmr.msrb.gmra.mxu0 %vm6563_vm3, %v5209_v46  ;;  %4197 = vmatmul.msk.bf16.vlgmr.msrb.gmra.mxu1 %vm6563_vm3, %v5209_v46 }
 0x163   : > { %v786_v15 = vpop.f32.mrf.mxu2  ;;  %1550 = vmatpush.bf16.msrb.mxu0 %v1494_v11  ;;  %1563 = vmatpush.bf16.msrb.mxu1 %v1497_v12  ;;  %v799_v17 = vpop.f32.mrf.mxu3 }
 0x164   : > { %v5261_v16 = vadd.f32 %v786_v15, %v5183_v29  ;;  %v5264_v19 = vadd.f32 %v799_v17, %v5185_v30  ;;  %v1483_v29 = vsel %vm1473_vm7, %v1470_v23, %v1472_v42  ;;  %v1660_v30 = vpop.permute.xlu1 %1659  ;;  %v1676_v13 = vpop.permute.xlu0 %1675 }
 0x165   : > { %v1515_v38 = vsel %vm498_vm2, %v1483_v29, 0 }
 0x167   : > { %v762_v20 = vpop.f32.mrf.mxu0  ;;  %v775_v21 = vpop.f32.mrf.mxu1 }
 0x16b   : > { %v788_v24 = vpop.f32.mrf.mxu2  ;;  %v801_v25 = vpop.f32.mrf.mxu3 }
 0x16c   : > { %v1666_v55 = vpop.permute.xlu1 %1665  ;;  %v1868_v29 = vpop.permute.xlu0 %1867 }
 0x16f   : > { %v812_v31 = vpop.f32.mrf.mxu0  ;;  %v825_v32 = vpop.f32.mrf.mxu1 }
 0x170   : > { %v5277_v22 = vadd.f32 %v812_v31, %v5197_v47  ;;  %v5280_v49 = vadd.f32 %v825_v32, %v5199_v33  ;;  %4203 = vmatmul.msk.bf16.vlgmr.msra.gmra.mxu2 %vm6563_vm3, %v5270_v26  ;;  %4204 = vmatmul.msk.bf16.vlgmr.msra.gmra.mxu3 %vm6563_vm3, %v5270_v26  ;;  %v1662_v47 = vpop.permute.xlu2 %1661 }
 0x171   : > { %1628 = vmatpush.bf16.msra.mxu2 %v1512_v28  ;;  %1641 = vmatpush.bf16.msra.mxu3 %v1515_v38  ;;  %v1682_v58 = vsel %vm1681_vm8, %v1660_v30, %v1662_v47 }
 0x172   : > { %4200 = vmatmul.msk.bf16.vlgmr.msra.gmra.mxu0 %vm6563_vm3, %v5209_v46  ;;  %4201 = vmatmul.msk.bf16.vlgmr.msra.gmra.mxu1 %vm6563_vm3, %v5209_v46  ;;  %v1684_v46 = vsel %vm1681_vm8, %v1664_v45, %v1666_v55  ;;  %v1696_v0 = vsel %vm498_vm2, %v1682_v58, 0 }
 0x173   : > { %v838_v33 = vpop.f32.mrf.mxu2  ;;  %1602 = vmatpush.bf16.msra.mxu0 %v1506_v34  ;;  %1615 = vmatpush.bf16.msra.mxu1 %v1509_v37  ;;  %v851_v41 = vpop.f32.mrf.mxu3  ;;  %v1702_v53 = vsel %vm498_vm2, %v1684_v46, 0 }
 0x174   : > { %v5294_v39 = vadd.f32 %v838_v33, %v5213_v51  ;;  %v5297_v43 = vadd.f32 %v851_v41, %v5215_v52  ;;  %v1683_v51 = vsel %vm1681_vm8, %v1662_v47, %v1664_v45  ;;  %v1672_v5 = vpop.permute.xlu1 %1671 }
 0x175   : > { %v1699_v1 = vsel %vm498_vm2, %v1683_v51, 0  ;;  %v1687_v17 = vsel %vm1681_vm8, %v1670_v3, %v1672_v5 }
 0x176   : > { %v1711_v25 = vsel %vm498_vm2, %v1687_v17, 0 }
 0x177   : > { %v814_v44 = vpop.f32.mrf.mxu0  ;;  %v827_v48 = vpop.f32.mrf.mxu1 }
 0x178   : > { %v1668_v56 = vpop.permute.xlu2 %1667 }
 0x179   : > { %v1685_v60 = vsel %vm1681_vm8, %v1666_v55, %v1668_v56  ;;  %v1686_v15 = vsel %vm1681_vm8, %v1668_v56, %v1670_v3 }
 0x17a   : > { %v1705_v2 = vsel %vm498_vm2, %v1685_v60, 0  ;;  %v1708_v40 = vsel %vm498_vm2, %v1686_v15, 0 }
 0x17b   : > { %v840_v50 = vpop.f32.mrf.mxu2  ;;  %v853_v57 = vpop.f32.mrf.mxu3 }
 0x17c   : > { %v1678_v20 = vpop.permute.xlu1 %1677  ;;  %v1874_v57 = vpop.permute.xlu0 %1873 }
 0x17d   : > { %v1690_v47 = vsel %vm1681_vm8, %v1676_v13, %v1678_v20 }
 0x17e   : > { %v1720_v50 = vsel %vm498_vm2, %v1690_v47, 0 }
 0x17f   : > { %v932_v52 = vpop.f32.mrf.mxu0  ;;  %v945_v61 = vpop.f32.mrf.mxu1 }
 0x180   : > { %v5305_v62 = vadd.f32 %v932_v52, %v5231_v54  ;;  %v5308_v63 = vadd.f32 %v945_v61, %v5236_v59  ;;  %4207 = vmatmul.msk.bf16.vlgmr.msrb.gmra.mxu2 %vm6563_vm3, %v5270_v26  ;;  %4208 = vmatmul.msk.bf16.vlgmr.msrb.gmra.mxu3 %vm6563_vm3, %v5270_v26  ;;  %v1674_v8 = vpop.permute.xlu2 %1673 }
 0x181   : > { %1758 = vmatpush.bf16.msrb.mxu2 %v1702_v53  ;;  %1771 = vmatpush.bf16.msrb.mxu3 %v1705_v2  ;;  %v1688_v12 = vsel %vm1681_vm8, %v1672_v5, %v1674_v8  ;;  %v1689_v18 = vsel %vm1681_vm8, %v1674_v8, %v1676_v13 }
 0x182   : > { %4205 = vmatmul.msk.bf16.vlgmr.msrb.gmra.mxu0 %vm6563_vm3, %v5270_v26  ;;  %4206 = vmatmul.msk.bf16.vlgmr.msrb.gmra.mxu1 %vm6563_vm3, %v5270_v26  ;;  %v1717_v42 = vsel %vm498_vm2, %v1689_v18, 0 }
 0x183   : > { %v958_v54 = vpop.f32.mrf.mxu2  ;;  %1732 = vmatpush.bf16.msrb.mxu0 %v1696_v0  ;;  %1745 = vmatpush.bf16.msrb.mxu1 %v1699_v1  ;;  %v971_v4 = vpop.f32.mrf.mxu3 }
 0x184   : > { %v5322_v59 = vadd.f32 %v958_v54, %v5244_v9  ;;  %v5325_v6 = vadd.f32 %v971_v4, %v5247_v10  ;;  %v1714_v9 = vsel %vm498_vm2, %v1688_v12, 0  ;;  %v1870_v32 = vpop.permute.xlu1 %1869  ;;  %v1880_v2 = vpop.permute.xlu0 %1879 }
 0x187   : > { %v934_v35 = vpop.f32.mrf.mxu0  ;;  %v947_v7 = vpop.f32.mrf.mxu1 }
 0x18b   : > { %v960_v11 = vpop.f32.mrf.mxu2  ;;  %v973_v14 = vpop.f32.mrf.mxu3 }
 0x18c   : > { %v1876_v53 = vpop.permute.xlu1 %1875 }
 0x18d   : > { %v1893_v4 = vsel %vm1889_vm9, %v1874_v57, %v1876_v53 }
 0x18e   : > { %v1913_v12 = vsel %vm498_vm2, %v1893_v4, 0 }
 0x18f   : > { %v984_v21 = vpop.f32.mrf.mxu0  ;;  %v997_v10 = vpop.f32.mrf.mxu1 }
 0x190   : > { %v5333_v23 = vadd.f32 %v984_v21, %v5261_v16  ;;  %v5336_v24 = vadd.f32 %v997_v10, %v5264_v19  ;;  %4211 = vmatmul.msk.bf16.vlgmr.msra.gmra.mxu2 %vm6563_vm3, %v5270_v26  ;;  %4212 = vmatmul.msk.bf16.vlgmr.msra.gmra.mxu3 %vm6563_vm3, %v5270_v26  ;;  %v1680_v16 = vpop.permute.xlu2 %1679  ;;  %v1886_v21 = vpop.permute.xlu0 %1885 }
 0x191   : > { %1810 = vmatpush.bf16.msra.mxu2 %v1714_v9  ;;  %1823 = vmatpush.bf16.msra.mxu3 %v1717_v42 }
 0x192   : > { %4209 = vmatmul.msk.bf16.vlgmr.msra.gmra.mxu0 %vm6563_vm3, %v5270_v26  ;;  %4210 = vmatmul.msk.bf16.vlgmr.msra.gmra.mxu1 %vm6563_vm3, %v5270_v26  ;;  %v1890_v26 = vsel %vm1889_vm9, %v1868_v29, %v1870_v32 }
 0x193   : > { %v1010_v19 = vpop.f32.mrf.mxu2  ;;  %1784 = vmatpush.bf16.msra.mxu0 %v1708_v40  ;;  %1797 = vmatpush.bf16.msra.mxu1 %v1711_v25  ;;  %v1023_v27 = vpop.f32.mrf.mxu3  ;;  %v1904_v41 = vsel %vm498_vm2, %v1890_v26, 0 }
 0x194   : > { %v5350_v36 = vadd.f32 %v1010_v19, %v5277_v22  ;;  %v5353_v28 = vadd.f32 %v1023_v27, %v5280_v49  ;;  %v5359_v22 = vld [vmem:[%s6554_s1 + $0xc] sm:$0x3]  ;;  %v1691_v49 = vsel %vm1681_vm8, %v1678_v20, %v1680_v16  ;;  %v1882_v14 = vpop.permute.xlu1 %1881  ;;  %v5420_v16 = vld [vmem:[%s6554_s1 + $0xe] sm:$0x3] }
 0x195   : > { %v1723_v46 = vsel %vm498_vm2, %v1691_v49, 0 }
 0x197   : > { %v986_v30 = vpop.f32.mrf.mxu0  ;;  %v999_v31 = vpop.f32.mrf.mxu1 }
 0x198   : > { %v1872_v37 = vpop.permute.xlu2 %1871 }
 0x199   : > { %v1891_v33 = vsel %vm1889_vm9, %v1870_v32, %v1872_v37  ;;  %v1892_v54 = vsel %vm1889_vm9, %v1872_v37, %v1874_v57 }
 0x19a   : > { %v1907_v56 = vsel %vm498_vm2, %v1891_v33, 0  ;;  %v1910_v11 = vsel %vm498_vm2, %v1892_v54, 0 }
 0x19b   : > { %v1012_v34 = vpop.f32.mrf.mxu2  ;;  %v1025_v38 = vpop.f32.mrf.mxu3 }
 0x19c   : > { %v1888_v25 = vpop.permute.xlu1 %1887 }
 0x19d   : > { %v1899_v29 = vsel %vm1889_vm9, %v1886_v21, %v1888_v25 }
 0x19e   : > { %v1931_v38 = vsel %vm498_vm2, %v1899_v29, 0 }
 0x19f   : > { %v1036_v45 = vpop.f32.mrf.mxu0  ;;  %v1049_v44 = vpop.f32.mrf.mxu1 }
 0x1a0   : > { %v5366_v48 = vadd.f32 %v1036_v45, %v5294_v39  ;;  %v5369_v55 = vadd.f32 %v1049_v44, %v5297_v43  ;;  %4216 = vmatmul.msk.bf16.vlgmr.msrb.gmra.mxu2 %vm6563_vm3, %v5359_v22  ;;  %4217 = vmatmul.msk.bf16.vlgmr.msrb.gmra.mxu3 %vm6563_vm3, %v5359_v22  ;;  %v1878_v61 = vpop.permute.xlu2 %1877 }
 0x1a1   : > { %1940 = vmatpush.bf16.msrb.mxu2 %v1904_v41  ;;  %1953 = vmatpush.bf16.msrb.mxu3 %v1907_v56  ;;  %v1894_v1 = vsel %vm1889_vm9, %v1876_v53, %v1878_v61  ;;  %v1895_v5 = vsel %vm1889_vm9, %v1878_v61, %v1880_v2 }
 0x1a2   : > { %4214 = vmatmul.msk.bf16.vlgmr.msrb.gmra.mxu0 %vm6563_vm3, %v5359_v22  ;;  %4215 = vmatmul.msk.bf16.vlgmr.msrb.gmra.mxu1 %vm6563_vm3, %v5359_v22  ;;  %v1919_v13 = vsel %vm498_vm2, %v1895_v5, 0 }
 0x1a3   : > { %v1140_v39 = vpop.f32.mrf.mxu2  ;;  %1836 = vmatpush.bf16.msrb.mxu0 %v1720_v50  ;;  %1849 = vmatpush.bf16.msrb.mxu1 %v1723_v46  ;;  %v1153_v58 = vpop.f32.mrf.mxu3 }
 0x1a4   : > { %v5383_v43 = vadd.f32 %v1140_v39, %v5305_v62  ;;  %v5386_v51 = vadd.f32 %v1153_v58, %v5308_v63  ;;  %v1916_v62 = vsel %vm498_vm2, %v1894_v1, 0  ;;  %v2080_v41 = vpop.permute.xlu1 %2079 }
 0x1a7   : > { %v1038_v60 = vpop.f32.mrf.mxu0  ;;  %v1051_v52 = vpop.f32.mrf.mxu1 }
 0x1a8   : > { %v1884_v17 = vpop.permute.xlu2 %1883 }
 0x1a9   : > { %v1898_v40 = vsel %vm1889_vm9, %v1884_v17, %v1886_v21  ;;  %v1897_v19 = vsel %vm1889_vm9, %v1882_v14, %v1884_v17  ;;  %v4709_v17 = vmov 0  }
 0x1aa   : > { %v1925_v26 = vsel %vm498_vm2, %v1897_v19, 0  ;;  %4650 = vset.pattern.permute.xlu1 %v4709_v17  ;;  %4651 = vset.pattern.permute.xlu0 %v4709_v17 }
 0x1ab   : > { %v1142_v0 = vpop.f32.mrf.mxu2  ;;  %v1155_v3 = vpop.f32.mrf.mxu3 }
 0x1ac   : > { %v2086_v3 = vpop.permute.xlu1 %2085 }
 0x1af   : > { %v1166_v35 = vpop.f32.mrf.mxu0  ;;  %v1179_v63 = vpop.f32.mrf.mxu1 }
 0x1b0   : > { %v5394_v7 = vadd.f32 %v1166_v35, %v5322_v59  ;;  %v5397_v8 = vadd.f32 %v1179_v63, %v5325_v6  ;;  %4220 = vmatmul.msk.bf16.vlgmr.msra.gmra.mxu2 %vm6563_vm3, %v5359_v22  ;;  %4221 = vmatmul.msk.bf16.vlgmr.msra.gmra.mxu3 %vm6563_vm3, %v5359_v22  ;;  %v2076_v27 = vpop.permute.xlu2 %2075 }
 0x1b1   : > { %1992 = vmatpush.bf16.msra.mxu2 %v1916_v62  ;;  %2005 = vmatpush.bf16.msra.mxu3 %v1919_v13 }
 0x1b2   : > { %4218 = vmatmul.msk.bf16.vlgmr.msra.gmra.mxu0 %vm6563_vm3, %v5359_v22  ;;  %4219 = vmatmul.msk.bf16.vlgmr.msra.gmra.mxu1 %vm6563_vm3, %v5359_v22 }
 0x1b3   : > { %v1192_v59 = vpop.f32.mrf.mxu2  ;;  %1966 = vmatpush.bf16.msra.mxu0 %v1910_v11  ;;  %1979 = vmatpush.bf16.msra.mxu1 %v1913_v12  ;;  %v1205_v15 = vpop.f32.mrf.mxu3 }
 0x1b4   : > { %v5411_v6 = vadd.f32 %v1192_v59, %v5333_v23  ;;  %v5414_v9 = vadd.f32 %v1205_v15, %v5336_v24  ;;  %v1896_v23 = vsel %vm1889_vm9, %v1880_v2, %v1882_v14  ;;  %v1928_v24 = vsel %vm498_vm2, %v1898_v40, 0  ;;  %v2092_v13 = vpop.permute.xlu1 %2091  ;;  %v2281_v59 = vld [vmem:[%s6555_s2] sm:$0xf] }
 0x1b5   : > { %v1922_v37 = vsel %vm498_vm2, %v1896_v23, 0  ;;  %2284 = vperm.xlu1 %4650, %v2281_v59  }
 0x1b7   : > { %v1168_v18 = vpop.f32.mrf.mxu0  ;;  %v1181_v20 = vpop.f32.mrf.mxu1 }
 0x1b8   : > { %v2082_v50 = vpop.permute.xlu2 %2081 }
 0x1bb   : > { %v1194_v10 = vpop.f32.mrf.mxu2  ;;  %v1207_v42 = vpop.f32.mrf.mxu3 }
 0x1bf   : > { %v1218_v30 = vpop.f32.mrf.mxu0  ;;  %v1231_v31 = vpop.f32.mrf.mxu1 }
 0x1c0   : > { %v5427_v32 = vadd.f32 %v1218_v30, %v5350_v36  ;;  %v5430_v34 = vadd.f32 %v1231_v31, %v5353_v28  ;;  %4225 = vmatmul.msk.bf16.vlgmr.msrb.gmra.mxu2 %vm6563_vm3, %v5420_v16  ;;  %4226 = vmatmul.msk.bf16.vlgmr.msrb.gmra.mxu3 %vm6563_vm3, %v5420_v16  ;;  %v2078_v36 = vpop.permute.xlu0 %2077  ;;  %v2088_v35 = vpop.permute.xlu2 %2087 }
 0x1c1   : > { %2044 = vmatpush.bf16.msrb.mxu2 %v1928_v24  ;;  %2057 = vmatpush.bf16.msrb.mxu3 %v1931_v38  ;;  %v2098_v39 = vsel %vm2097_vm10, %v2076_v27, %v2078_v36  ;;  %v2103_v15 = vsel %vm2097_vm10, %v2086_v3, %v2088_v35  ;;  %v4235_v38 = vld [vmem:[%s6554_s1 + $0x10] sm:$0x3] }
 0x1c2   : > { %4222 = vmatmul.msk.bf16.vlgmr.msrb.gmra.mxu0 %vm6563_vm3, %v5359_v22  ;;  %4223 = vmatmul.msk.bf16.vlgmr.msrb.gmra.mxu1 %vm6563_vm3, %v5359_v22  ;;  %v2100_v22 = vsel %vm2097_vm10, %v2080_v41, %v2082_v50  ;;  %v2112_v0 = vsel %vm498_vm2, %v2098_v39, 0  ;;  %v2127_v42 = vsel %vm498_vm2, %v2103_v15, 0 }
 0x1c3   : > { %v1244_v28 = vpop.f32.mrf.mxu2  ;;  %2018 = vmatpush.bf16.msrb.mxu0 %v1922_v37  ;;  %2031 = vmatpush.bf16.msrb.mxu1 %v1925_v26  ;;  %v1257_v49 = vpop.f32.mrf.mxu3  ;;  %v2118_v58 = vsel %vm498_vm2, %v2100_v22, 0 }
 0x1c4   : > { %v5444_v47 = vadd.f32 %v1244_v28, %v5366_v48  ;;  %v5447_v33 = vadd.f32 %v1257_v49, %v5369_v55  ;;  %v2099_v48 = vsel %vm2097_vm10, %v2078_v36, %v2080_v41 }
 0x1c5   : > { %v2115_v1 = vsel %vm498_vm2, %v2099_v48, 0 }
 0x1c7   : > { %v1220_v45 = vpop.f32.mrf.mxu0  ;;  %v1233_v44 = vpop.f32.mrf.mxu1 }
 0x1c8   : > { %v2084_v56 = vpop.permute.xlu0 %2083  ;;  %v2094_v30 = vpop.permute.xlu2 %2093 }
 0x1c9   : > { %v2101_v53 = vsel %vm2097_vm10, %v2082_v50, %v2084_v56 }
 0x1ca   : > { %v2121_v2 = vsel %vm498_vm2, %v2101_v53, 0 }
 0x1cb   : > { %v1246_v46 = vpop.f32.mrf.mxu2  ;;  %v1259_v57 = vpop.f32.mrf.mxu3 }
 0x1cf   : > { %v1315_v55 = vpop.f32.mrf.mxu0  ;;  %v1328_v60 = vpop.f32.mrf.mxu1 }
 0x1d0   : > { %v5455_v52 = vadd.f32 %v1315_v55, %v5383_v43  ;;  %v5458_v61 = vadd.f32 %v1328_v60, %v5386_v51  ;;  %4229 = vmatmul.msk.bf16.vlgmr.msra.gmra.mxu2 %vm6563_vm3, %v5420_v16  ;;  %4230 = vmatmul.msk.bf16.vlgmr.msra.gmra.mxu3 %vm6563_vm3, %v5420_v16  ;;  %v2090_v63 = vpop.permute.xlu0 %2089 }
 0x1d1   : > { %2174 = vmatpush.bf16.msra.mxu2 %v2118_v58  ;;  %2187 = vmatpush.bf16.msra.mxu3 %v2121_v2  ;;  %v2104_v12 = vsel %vm2097_vm10, %v2088_v35, %v2090_v63  ;;  %v2105_v18 = vsel %vm2097_vm10, %v2090_v63, %v2092_v13 }
 0x1d2   : > { %4227 = vmatmul.msk.bf16.vlgmr.msra.gmra.mxu0 %vm6563_vm3, %v5420_v16  ;;  %4228 = vmatmul.msk.bf16.vlgmr.msra.gmra.mxu1 %vm6563_vm3, %v5420_v16  ;;  %v2133_v23 = vsel %vm498_vm2, %v2105_v18, 0 }
 0x1d3   : > { %v1341_v43 = vpop.f32.mrf.mxu2  ;;  %2148 = vmatpush.bf16.msra.mxu0 %v2112_v0  ;;  %2161 = vmatpush.bf16.msra.mxu1 %v2115_v1  ;;  %v1354_v54 = vpop.f32.mrf.mxu3 }
 0x1d4   : > { %v5472_v51 = vadd.f32 %v1341_v43, %v5394_v7  ;;  %v5475_v4 = vadd.f32 %v1354_v54, %v5397_v8  ;;  %v2102_v7 = vsel %vm2097_vm10, %v2084_v56, %v2086_v3  ;;  %v2130_v8 = vsel %vm498_vm2, %v2104_v12, 0 }
 0x1d5   : > { %v2124_v25 = vsel %vm498_vm2, %v2102_v7, 0 }
 0x1d7   : > { %v1317_v62 = vpop.f32.mrf.mxu0  ;;  %v1330_v5 = vpop.f32.mrf.mxu1 }
 0x1d8   : > { %v2096_v31 = vpop.permute.xlu0 %2095 }
 0x1d9   : > { %v2107_v36 = vsel %vm2097_vm10, %v2094_v30, %v2096_v31 }
 0x1da   : > { %v2139_v45 = vsel %vm498_vm2, %v2107_v36, 0 }
 0x1db   : > { %v1343_v11 = vpop.f32.mrf.mxu2  ;;  %v1356_v14 = vpop.f32.mrf.mxu3 }
 0x1df   : > { %v1367_v20 = vpop.f32.mrf.mxu0  ;;  %v1380_v21 = vpop.f32.mrf.mxu1 }
 0x1e0   : > { %v1440_v10 = vadd.f32 %v1367_v20, %v5411_v6  ;;  %v1441_v40 = vadd.f32 %v1380_v21, %v5414_v9  ;;  %4233 = vmatmul.msk.bf16.vlgmr.msrb.gmra.mxu2 %vm6563_vm3, %v5420_v16  ;;  %4234 = vmatmul.msk.bf16.vlgmr.msrb.gmra.mxu3 %vm6563_vm3, %v5420_v16 }
 0x1e1   : > { %2226 = vmatpush.bf16.msrb.mxu2 %v2130_v8  ;;  %2239 = vmatpush.bf16.msrb.mxu3 %v2133_v23 }
 0x1e2   : > { %4231 = vmatmul.msk.bf16.vlgmr.msrb.gmra.mxu0 %vm6563_vm3, %v5420_v16  ;;  %4232 = vmatmul.msk.bf16.vlgmr.msrb.gmra.mxu1 %vm6563_vm3, %v5420_v16  ;;  %v2106_v16 = vsel %vm2097_vm10, %v2092_v13, %v2094_v30 }
 0x1e3   : > { %v1393_v6 = vpop.f32.mrf.mxu2  ;;  %2200 = vmatpush.bf16.msrb.mxu0 %v2124_v25  ;;  %2213 = vmatpush.bf16.msrb.mxu1 %v2127_v42  ;;  %v1406_v19 = vpop.f32.mrf.mxu3  ;;  %v2136_v41 = vsel %vm498_vm2, %v2106_v16, 0 }
 0x1e4   : > { %v1442_v9 = vadd.f32 %v1393_v6, %v5427_v32  ;;  %v1443_v24 = vadd.f32 %v1406_v19, %v5430_v34 }
 0x1e7   : > { %v1369_v27 = vpop.f32.mrf.mxu0  ;;  %v1382_v29 = vpop.f32.mrf.mxu1 }
 0x1eb   : > { %v1395_v37 = vpop.f32.mrf.mxu2  ;;  %v1408_v26 = vpop.f32.mrf.mxu3 }
 0x1ef   : > { %v1419_v28 = vpop.f32.mrf.mxu0  ;;  %v1432_v32 = vpop.f32.mrf.mxu1 }
 0x1f0   : > { %v1444_v49 = vadd.f32 %v1419_v28, %v5444_v47  ;;  %v1445_v34 = vadd.f32 %v1432_v32, %v5447_v33  ;;  %4238 = vmatmul.msk.bf16.vlgmr.msra.gmra.mxu2 %vm6563_vm3, %v4235_v38  ;;  %4239 = vmatmul.msk.bf16.vlgmr.msra.gmra.mxu3 %vm6563_vm3, %v4235_v38 }
 0x1f2   : > { %4236 = vmatmul.msk.bf16.vlgmr.msra.gmra.mxu0 %vm6563_vm3, %v4235_v38  ;;  %4237 = vmatmul.msk.bf16.vlgmr.msra.gmra.mxu1 %vm6563_vm3, %v4235_v38 }
 0x1f3   : > { %v1526_v44 = vpop.f32.mrf.mxu2  ;;  %2252 = vmatpush.bf16.msra.mxu0 %v2136_v41  ;;  %2265 = vmatpush.bf16.msra.mxu1 %v2139_v45  ;;  %v1539_v47 = vpop.f32.mrf.mxu3 }
 0x1f4   : > { %v1647_v50 = vadd.f32 %v1526_v44, %v5455_v52  ;;  %v1648_v33 = vadd.f32 %v1539_v47, %v5458_v61 }
 0x1f7   : > { %v1421_v46 = vpop.f32.mrf.mxu0  ;;  %v1434_v22 = vpop.f32.mrf.mxu1 }
 0x1fb   : > { %v1528_v56 = vpop.f32.mrf.mxu2  ;;  %v1541_v57 = vpop.f32.mrf.mxu3 }
 0x1ff   : > { %v1552_v39 = vpop.f32.mrf.mxu0  ;;  %v1565_v48 = vpop.f32.mrf.mxu1 }
 0x200   : > { %v1649_v58 = vadd.f32 %v1552_v39, %v5472_v51  ;;  %v1650_v53 = vadd.f32 %v1565_v48, %v5475_v4  ;;  %4242 = vmatmul.msk.bf16.vlgmr.msrb.gmra.mxu2 %vm6563_vm3, %v4235_v38  ;;  %4243 = vmatmul.msk.bf16.vlgmr.msrb.gmra.mxu3 %vm6563_vm3, %v4235_v38 }
 0x202   : > { %4240 = vmatmul.msk.bf16.vlgmr.msrb.gmra.mxu0 %vm6563_vm3, %v4235_v38  ;;  %4241 = vmatmul.msk.bf16.vlgmr.msrb.gmra.mxu1 %vm6563_vm3, %v4235_v38 }
 0x203   : > { %v1578_v55 = vpop.f32.mrf.mxu2  ;;  %v1591_v52 = vpop.f32.mrf.mxu3 }
 0x204   : > { %v1651_v60 = vadd.f32 %v1578_v55, %v1440_v10  ;;  %v1652_v61 = vadd.f32 %v1591_v52, %v1441_v40 }
 0x207   : > { %v1554_v0 = vpop.f32.mrf.mxu0  ;;  %v1567_v1 = vpop.f32.mrf.mxu1 }
 0x20b   : > { %v1580_v2 = vpop.f32.mrf.mxu2  ;;  %v1593_v3 = vpop.f32.mrf.mxu3 }
 0x20f   : > { %v1604_v43 = vpop.f32.mrf.mxu0  ;;  %v1617_v51 = vpop.f32.mrf.mxu1 }
 0x210   : > { %v1653_v54 = vadd.f32 %v1604_v43, %v1442_v9  ;;  %v1654_v4 = vadd.f32 %v1617_v51, %v1443_v24 }
 0x212   : > { %4244 = vmatmul.msk.bf16.vlgmr.msra.gmra.mxu0 %vm6563_vm3, %v4235_v38  ;;  %4245 = vmatmul.msk.bf16.vlgmr.msra.gmra.mxu1 %vm6563_vm3, %v4235_v38 }
 0x213   : > { %v1630_v62 = vpop.f32.mrf.mxu2  ;;  %v1643_v35 = vpop.f32.mrf.mxu3 }
 0x214   : > { %v1655_v5 = vadd.f32 %v1630_v62, %v1444_v49  ;;  %v1656_v63 = vadd.f32 %v1643_v35, %v1445_v34 }
 0x217   : > { %v1606_v11 = vpop.f32.mrf.mxu0  ;;  %v1619_v12 = vpop.f32.mrf.mxu1 }
 0x21b   : > { %v1632_v13 = vpop.f32.mrf.mxu2  ;;  %v1645_v14 = vpop.f32.mrf.mxu3 }
 0x21f   : > { %v1734_v59 = vpop.f32.mrf.mxu0  ;;  %v1747_v7 = vpop.f32.mrf.mxu1 }
 0x220   : > { %v1855_v15 = vadd.f32 %v1734_v59, %v1647_v50  ;;  %v1856_v17 = vadd.f32 %v1747_v7, %v1648_v33 }
 0x223   : > { %v1760_v8 = vpop.f32.mrf.mxu2  ;;  %v1773_v20 = vpop.f32.mrf.mxu3 }
 0x224   : > { %v1857_v18 = vadd.f32 %v1760_v8, %v1649_v58  ;;  %v1858_v21 = vadd.f32 %v1773_v20, %v1650_v53 }
 0x227   : > { %v1736_v10 = vpop.f32.mrf.mxu0  ;;  %v1749_v40 = vpop.f32.mrf.mxu1 }
 0x228   : > { %v5539_v43 = vpop.permute.xlu1 %2284 }
 0x22b   : > { %v1762_v25 = vpop.f32.mrf.mxu2  ;;  %v1775_v42 = vpop.f32.mrf.mxu3 }
 0x22f   : > { %v1786_v23 = vpop.f32.mrf.mxu0  ;;  %v1799_v6 = vpop.f32.mrf.mxu1 }
 0x230   : > { %v5523_v9 = vadd.f32 %v1786_v23, %v1651_v60  ;;  %v5525_v19 = vadd.f32 %v1799_v6, %v1652_v61 }
 0x233   : > { %v1812_v24 = vpop.f32.mrf.mxu2  ;;  %v1825_v29 = vpop.f32.mrf.mxu3 }
 0x234   : > { %v5527_v27 = vadd.f32 %v1812_v24, %v1653_v54  ;;  %v5529_v30 = vadd.f32 %v1825_v29, %v1654_v4  ;;  %v2307_v4 = vld [vmem:[%s4807_s18] sm:$0xff] }
 0x235   : > { %v2311_v12 = vperm.slane %v2307_v4, 0  ;;  %v2312_v13 = vperm.slane %v2307_v4, 1  ;;  %v2313_v40 = vperm.slane %v2307_v4, 2  ;;  %v2314_v23 = vperm.slane %v2307_v4, 3 }
 0x237   : > { %v1788_v31 = vpop.f32.mrf.mxu0  ;;  %v1801_v37 = vpop.f32.mrf.mxu1 }
 0x23b   : > { %v1814_v26 = vpop.f32.mrf.mxu2  ;;  %v1827_v38 = vpop.f32.mrf.mxu3 }
 0x23f   : > { %v1838_v16 = vpop.f32.mrf.mxu0  ;;  %v1851_v36 = vpop.f32.mrf.mxu1 }
 0x240   : > { %v5531_v28 = vadd.f32 %v1838_v16, %v1655_v5  ;;  %v5533_v32 = vadd.f32 %v1851_v36, %v1656_v63 }
 0x243   : > { %v1942_v49 = vpop.f32.mrf.mxu2  ;;  %v1955_v41 = vpop.f32.mrf.mxu3 }
 0x244   : > { %v2063_v34 = vadd.f32 %v1942_v49, %v1855_v15  ;;  %v2064_v45 = vadd.f32 %v1955_v41, %v1856_v17 }
 0x247   : > { %v1840_v44 = vpop.f32.mrf.mxu0  ;;  %v1853_v50 = vpop.f32.mrf.mxu1 }
 0x24b   : > { %v1944_v47 = vpop.f32.mrf.mxu2  ;;  %v1957_v33 = vpop.f32.mrf.mxu3 }
 0x24c   : > { %v2315_v47 = vperm.slane %v2307_v4, 4 }
 0x24f   : > { %v1968_v46 = vpop.f32.mrf.mxu0  ;;  %v1981_v22 = vpop.f32.mrf.mxu1 }
 0x250   : > { %v2065_v35 = vadd.f32 %v1968_v46, %v1857_v18  ;;  %v2066_v14 = vadd.f32 %v1981_v22, %v1858_v21  ;;  %v2316_v46 = vperm.slane %v2307_v4, 5 }
 0x253   : > { %v1994_v56 = vpop.f32.mrf.mxu2  ;;  %v2007_v57 = vpop.f32.mrf.mxu3 }
 0x254   : > { %v2067_v16 = vadd.f32 %v1994_v56, %v5523_v9  ;;  %v2068_v36 = vadd.f32 %v2007_v57, %v5525_v19 }
 0x257   : > { %v1970_v39 = vpop.f32.mrf.mxu0  ;;  %v1983_v48 = vpop.f32.mrf.mxu1 }
 0x25b   : > { %v1996_v58 = vpop.f32.mrf.mxu2  ;;  %v2009_v53 = vpop.f32.mrf.mxu3 }
 0x25f   : > { %v2020_v55 = vpop.f32.mrf.mxu0  ;;  %v2033_v60 = vpop.f32.mrf.mxu1 }
 0x260   : > { %v2069_v44 = vadd.f32 %v2020_v55, %v5527_v27  ;;  %v2070_v22 = vadd.f32 %v2033_v60, %v5529_v30  ;;  %v2317_v55 = vperm.slane %v2307_v4, 6 }
 0x263   : > { %v5535_v52 = vpop.f32.mrf.mxu2  ;;  %v5537_v61 = vpop.f32.mrf.mxu3 }
 0x267   : > { %v2022_v0 = vpop.f32.mrf.mxu0  ;;  %v2035_v1 = vpop.f32.mrf.mxu1 }
 0x268   : > { %v2318_v1 = vperm.slane %v2307_v4, 7 }
 0x26b   : > { %v2048_v2 = vpop.f32.mrf.mxu2  ;;  %v2061_v3 = vpop.f32.mrf.mxu3 }
 0x26f   : > { %v2150_v51 = vpop.f32.mrf.mxu0  ;;  %v2163_v54 = vpop.f32.mrf.mxu1 }
 0x270   : > { %v2271_v62 = vadd.f32 %v2150_v51, %v2063_v34  ;;  %v2272_v5 = vadd.f32 %v2163_v54, %v2064_v45 }
 0x272   : > { %v2287_v63 = vadd.f32 %v5539_v43, %v2271_v62  ;;  %v2288_v11 = vadd.f32 %v5539_v43, %v2272_v5 }
 0x273   : > { %v2176_v59 = vpop.f32.mrf.mxu2  ;;  %v2189_v8 = vpop.f32.mrf.mxu3 }
 0x274   : > { %v2297_v7 = vmax.f32 %v2287_v63, 0.0  ;;  %v2298_v15 = vmax.f32 %v2288_v11, 0.0  ;;  %v2273_v17 = vadd.f32 %v2176_v59, %v2065_v35  ;;  %v2274_v20 = vadd.f32 %v2189_v8, %v2066_v14 }
 0x275   : > { %v2071_v35 = vadd.f32 %v5535_v52, %v5531_v28  ;;  %v2072_v63 = vadd.f32 %v5537_v61, %v5533_v32 }
 0x276   : > { %v2289_v10 = vadd.f32 %v5539_v43, %v2273_v17  ;;  %v5545_v25 = vmul.f32 %v2311_v12, %v2297_v7  ;;  %v5547_v42 = vmul.f32 %v2312_v13, %v2298_v15  ;;  %v2290_v18 = vadd.f32 %v5539_v43, %v2274_v20  ;;  %v2308_v12 = vld [vmem:[%s4807_s18 + $0x8] sm:$0x3] }
 0x277   : > { %v2152_v6 = vpop.f32.mrf.mxu0  ;;  %v2165_v24 = vpop.f32.mrf.mxu1  ;;  %v2319_v7 = vperm.slane %v2308_v12, 0  ;;  %v2320_v17 = vperm.slane %v2308_v12, 1 }
 0x278   : > { %v2299_v29 = vmax.f32 %v2289_v10, 0.0  ;;  %v2300_v21 = vmax.f32 %v2290_v18, 0.0 }
 0x27a   : > { %v5550_v31 = vmul.f32 %v2313_v40, %v2299_v29  ;;  %v5552_v37 = vmul.f32 %v2314_v23, %v2300_v21 }
 0x27b   : > { %v2178_v26 = vpop.f32.mrf.mxu2  ;;  %v2191_v38 = vpop.f32.mrf.mxu3 }
 0x27f   : > { %v2202_v49 = vpop.f32.mrf.mxu0  ;;  %v2215_v34 = vpop.f32.mrf.mxu1 }
 0x280   : > { %v2275_v41 = vadd.f32 %v2202_v49, %v2067_v16  ;;  %v2276_v45 = vadd.f32 %v2215_v34, %v2068_v36 }
 0x282   : > { %v2291_v50 = vadd.f32 %v5539_v43, %v2275_v41  ;;  %v2292_v33 = vadd.f32 %v5539_v43, %v2276_v45 }
 0x283   : > { %v2228_v39 = vpop.f32.mrf.mxu2  ;;  %v2241_v56 = vpop.f32.mrf.mxu3 }
 0x284   : > { %v2301_v48 = vmax.f32 %v2291_v50, 0.0  ;;  %v2302_v58 = vmax.f32 %v2292_v33, 0.0  ;;  %v2277_v9 = vadd.f32 %v2228_v39, %v2069_v44  ;;  %v2278_v19 = vadd.f32 %v2241_v56, %v2070_v22 }
 0x286   : > { %v5560_v57 = vmul.f32 %v2315_v47, %v2301_v48  ;;  %v5562_v53 = vmul.f32 %v2316_v46, %v2302_v58  ;;  %v2293_v27 = vadd.f32 %v5539_v43, %v2277_v9  ;;  %v2294_v0 = vadd.f32 %v5539_v43, %v2278_v19 }
 0x287   : > { %v2204_v2 = vpop.f32.mrf.mxu0  ;;  %v2217_v3 = vpop.f32.mrf.mxu1 }
 0x288   : > { %v2303_v30 = vmax.f32 %v2293_v27, 0.0  ;;  %v2304_v60 = vmax.f32 %v2294_v0, 0.0 }
 0x28a   : > { %v5566_v51 = vmul.f32 %v2317_v55, %v2303_v30  ;;  %v5568_v54 = vmul.f32 %v2318_v1, %v2304_v60 }
 0x28b   : > { %v2230_v62 = vpop.f32.mrf.mxu2  ;;  %v2243_v5 = vpop.f32.mrf.mxu3 }
 0x28f   : > { %v2254_v11 = vpop.f32.mrf.mxu0  ;;  %v2267_v13 = vpop.f32.mrf.mxu1 }
 0x290   : > { %v2279_v4 = vadd.f32 %v2254_v11, %v2071_v35  ;;  %v2280_v14 = vadd.f32 %v2267_v13, %v2072_v63 }
 0x292   : > { %v2295_v59 = vadd.f32 %v5539_v43, %v2279_v4  ;;  %v2296_v15 = vadd.f32 %v5539_v43, %v2280_v14 }
 0x293   : > { %2343 = sbr.rel (%p4246_p13) target bundleno = 1052 (0x41c), region = 64 }
 0x294   : > { %v2305_v8 = vmax.f32 %v2295_v59, 0.0  ;;  %v2306_v20 = vmax.f32 %v2296_v15, 0.0 }
 0x296   : > { %v5577_v10 = vmul.f32 %v2319_v7, %v2305_v8  ;;  %v5579_v40 = vmul.f32 %v2320_v17, %v2306_v20 }
 0x297   : > { %v2256_v28 = vpop.f32.mrf.mxu0  ;;  %v2269_v52 = vpop.f32.mrf.mxu1 }
 0x298   : > { %v2344_v32 = vlaneseq  ;;  %v5585_v23 = vstv %s4834_s14  ;;  %v4710_v48 = vmov 1.0|1.0  }
 0x29a   : > { %v5582_v61 = vshrl.u32 %v2344_v32, 7  ;;  %v2667_v18 = vand.u32 127, %v2344_v32 }
 0x29c   : > { %v2359_v43 = vadd.s32 112, %v5582_v61  ;;  %v2360_v6 = vadd.s32 120, %v5582_v61  ;;  %v2668_v24 = vmul.u32 1156, %v2667_v18  ;;  %v2375_v29 = vadd.s32 240, %v5582_v61 }
 0x29d   : > { %v2376_v21 = vadd.s32 248, %v5582_v61  ;;  %v2391_v36 = vadd.s32 368, %v5582_v61  ;;  %v2392_v34 = vadd.s32 376, %v5582_v61  ;;  %v2407_v44 = vadd.s32 496, %v5582_v61 }
 0x29e   : > { %v2520_v26 = vadd.s32 %v5585_v23, %v2359_v43  ;;  %v2521_v38 = vadd.s32 %v5585_v23, %v2360_v6  ;;  %v5593_v16 = vadd.s32 1280, %v2668_v24  ;;  %v2536_v49 = vadd.s32 %v5585_v23, %v2375_v29 }
 0x29f   : > { %v2537_v45 = vadd.s32 %v5585_v23, %v2376_v21  ;;  %v2552_v50 = vadd.s32 %v5585_v23, %v2391_v36  ;;  %v2408_v47 = vadd.s32 504, %v5582_v61  ;;  %v2553_v33 = vadd.s32 %v5585_v23, %v2392_v34 }
 0x2a0   : > { %vm2684_vm11 = vcmp.ge.s32.totalorder %v2520_v26, %v5593_v16  ;;  %v5600_v41 = vadd.s32 1156, %v5593_v16  ;;  %vm2685_vm12 = vcmp.ge.s32.totalorder %v2521_v38, %v5593_v16  ;;  %vm2700_vm0 = vcmp.ge.s32.totalorder %v2536_v49, %v5593_v16 }
 0x2a1   : > { %vm2701_vm4 = vcmp.ge.s32.totalorder %v2537_v45, %v5593_v16  ;;  %v2357_v46 = vadd.s32 96, %v5582_v61  ;;  %v2568_v22 = vadd.s32 %v5585_v23, %v2407_v44  ;;  %v2358_v39 = vadd.s32 104, %v5582_v61 }
 0x2a2   : > { %vm2845_vm13 = vcmp.lt.s32.totalorder %v2520_v26, %v5600_v41  ;;  %vm2846_vm14 = vcmp.lt.s32.totalorder %v2521_v38, %v5600_v41  ;;  %vm2861_vm1 = vcmp.lt.s32.totalorder %v2536_v49, %v5600_v41  ;;  %vm2862_vm5 = vcmp.lt.s32.totalorder %v2537_v45, %v5600_v41 }
 0x2a3   : > { %vm3005_vm15 = vmand %vm2684_vm11, %vm2845_vm13  ;;  %vm2716_vm9 = vcmp.ge.s32.totalorder %v2552_v50, %v5593_v16  ;;  %vm2877_vm10 = vcmp.lt.s32.totalorder %v2552_v50, %v5600_v41  ;;  %v2569_v58 = vadd.s32 %v5585_v23, %v2408_v47  ;;  %vm2878_vm13 = vcmp.lt.s32.totalorder %v2553_v33, %v5600_v41 }
 0x2a4   : > { %vm3006_vm2 = vmand %vm2685_vm12, %vm2846_vm14  ;;  %vm2717_vm12 = vcmp.ge.s32.totalorder %v2553_v33, %v5593_v16  ;;  %v2373_v9 = vadd.s32 224, %v5582_v61  ;;  %v2518_v56 = vadd.s32 %v5585_v23, %v2357_v46  ;;  %v2374_v19 = vadd.s32 232, %v5582_v61 }
 0x2a5   : > { %vm4407_vm7 = vmpackc.low %vm3006_vm2, %vm3005_vm15  ;;  %v2519_v27 = vadd.s32 %v5585_v23, %v2358_v39  ;;  %v2389_v55 = vadd.s32 352, %v5582_v61  ;;  %v2390_v1 = vadd.s32 360, %v5582_v61  ;;  %v2405_v3 = vadd.s32 480, %v5582_v61 }
 0x2a6   : > { %4408 = vmatpush.bf16.msk.msra.mxu0 %vm4407_vm7, %v4710_v48  ;;  %vm3021_vm8 = vmand %vm2700_vm0, %vm2861_vm1  ;;  %vm2732_vm0 = vcmp.ge.s32.totalorder %v2568_v22, %v5593_v16  ;;  %vm2893_vm1 = vcmp.lt.s32.totalorder %v2568_v22, %v5600_v41  ;;  %v2534_v0 = vadd.s32 %v5585_v23, %v2373_v9  ;;  %v2535_v2 = vadd.s32 %v5585_v23, %v2374_v19 }
 0x2a7   : > { %vm3022_vm11 = vmand %vm2701_vm4, %vm2862_vm5  ;;  %vm2733_vm4 = vcmp.ge.s32.totalorder %v2569_v58, %v5593_v16  ;;  %vm2894_vm5 = vcmp.lt.s32.totalorder %v2569_v58, %v5600_v41  ;;  %v2550_v30 = vadd.s32 %v5585_v23, %v2389_v55  ;;  %v2406_v60 = vadd.s32 488, %v5582_v61 }
 0x2a8   : > { %vm4423_vm14 = vmpackc.low %vm3022_vm11, %vm3021_vm8  ;;  %v2551_v62 = vadd.s32 %v5585_v23, %v2390_v1  ;;  %v2355_v5 = vadd.s32 80, %v5582_v61  ;;  %v2566_v35 = vadd.s32 %v5585_v23, %v2405_v3  ;;  %v2356_v63 = vadd.s32 88, %v5582_v61 }
 0x2a9   : > { %4424 = vmatpush.bf16.msk.msra.mxu1 %vm4423_vm14, %v4710_v48  ;;  %vm3037_vm15 = vmand %vm2716_vm9, %vm2877_vm10  ;;  %vm2682_vm9 = vcmp.ge.s32.totalorder %v2518_v56, %v5593_v16  ;;  %vm2843_vm10 = vcmp.lt.s32.totalorder %v2518_v56, %v5600_v41  ;;  %v2567_v11 = vadd.s32 %v5585_v23, %v2406_v60  ;;  %v2371_v12 = vadd.s32 208, %v5582_v61 }
 0x2aa   : > { %vm3038_vm2 = vmand %vm2717_vm12, %vm2878_vm13  ;;  %vm2683_vm12 = vcmp.ge.s32.totalorder %v2519_v27, %v5593_v16  ;;  %vm2844_vm13 = vcmp.lt.s32.totalorder %v2519_v27, %v5600_v41  ;;  %v2516_v13 = vadd.s32 %v5585_v23, %v2355_v5  ;;  %v2372_v4 = vadd.s32 216, %v5582_v61 }
 0x2ab   : > { %vm4439_vm7 = vmpackc.low %vm3038_vm2, %vm3037_vm15  ;;  %v2517_v14 = vadd.s32 %v5585_v23, %v2356_v63  ;;  %v2387_v59 = vadd.s32 336, %v5582_v61  ;;  %v2532_v7 = vadd.s32 %v5585_v23, %v2371_v12  ;;  %v2388_v15 = vadd.s32 344, %v5582_v61 }
 0x2ac   : > { %4440 = vmatpush.bf16.msk.msra.mxu2 %vm4439_vm7, %v4710_v48  ;;  %vm3053_vm8 = vmand %vm2732_vm0, %vm2893_vm1  ;;  %vm2698_vm0 = vcmp.ge.s32.totalorder %v2534_v0, %v5593_v16  ;;  %vm2859_vm1 = vcmp.lt.s32.totalorder %v2534_v0, %v5600_v41  ;;  %v2533_v17 = vadd.s32 %v5585_v23, %v2372_v4  ;;  %v2403_v8 = vadd.s32 464, %v5582_v61 }
 0x2ad   : > { %vm3054_vm11 = vmand %vm2733_vm4, %vm2894_vm5  ;;  %vm2699_vm4 = vcmp.ge.s32.totalorder %v2535_v2, %v5593_v16  ;;  %vm2860_vm5 = vcmp.lt.s32.totalorder %v2535_v2, %v5600_v41  ;;  %v2548_v20 = vadd.s32 %v5585_v23, %v2387_v59  ;;  %v2404_v28 = vadd.s32 472, %v5582_v61 }
 0x2ae   : > { %vm4455_vm14 = vmpackc.low %vm3054_vm11, %vm3053_vm8  ;;  %v2549_v52 = vadd.s32 %v5585_v23, %v2388_v15  ;;  %v2353_v32 = vadd.s32 64, %v5582_v61  ;;  %v2564_v18 = vadd.s32 %v5585_v23, %v2403_v8  ;;  %v2354_v43 = vadd.s32 72, %v5582_v61 }
 0x2af   : > { %4456 = vmatpush.bf16.msk.msra.mxu3 %vm4455_vm14, %v4710_v48  ;;  %vm3003_vm15 = vmand %vm2682_vm9, %vm2843_vm10  ;;  %vm2714_vm9 = vcmp.ge.s32.totalorder %v2550_v30, %v5593_v16  ;;  %vm2875_vm10 = vcmp.lt.s32.totalorder %v2550_v30, %v5600_v41  ;;  %v2565_v6 = vadd.s32 %v5585_v23, %v2404_v28  ;;  %v2369_v24 = vadd.s32 192, %v5582_v61 }
 0x2b0   : > { %vm3004_vm2 = vmand %vm2683_vm12, %vm2844_vm13  ;;  %vm2715_vm12 = vcmp.ge.s32.totalorder %v2551_v62, %v5593_v16  ;;  %vm2876_vm13 = vcmp.lt.s32.totalorder %v2551_v62, %v5600_v41  ;;  %v2514_v29 = vadd.s32 %v5585_v23, %v2353_v32  ;;  %v2370_v21 = vadd.s32 200, %v5582_v61 }
 0x2b1   : > { %vm4409_vm7 = vmpackc.low %vm3004_vm2, %vm3003_vm15  ;;  %v2515_v26 = vadd.s32 %v5585_v23, %v2354_v43  ;;  %v2385_v38 = vadd.s32 320, %v5582_v61  ;;  %v2530_v36 = vadd.s32 %v5585_v23, %v2369_v24  ;;  %v2386_v49 = vadd.s32 328, %v5582_v61 }
 0x2b2   : > { %4410 = vmatpush.bf16.msk.msra.mxu0 %vm4409_vm7, %v4710_v48  ;;  %vm3019_vm8 = vmand %vm2698_vm0, %vm2859_vm1  ;;  %vm2730_vm0 = vcmp.ge.s32.totalorder %v2566_v35, %v5593_v16  ;;  %vm2891_vm1 = vcmp.lt.s32.totalorder %v2566_v35, %v5600_v41  ;;  %v2531_v34 = vadd.s32 %v5585_v23, %v2370_v21  ;;  %v2401_v45 = vadd.s32 448, %v5582_v61 }
 0x2b3   : > { %vm3020_vm11 = vmand %vm2699_vm4, %vm2860_vm5  ;;  %vm2731_vm4 = vcmp.ge.s32.totalorder %v2567_v11, %v5593_v16  ;;  %vm2892_vm5 = vcmp.lt.s32.totalorder %v2567_v11, %v5600_v41  ;;  %v2546_v44 = vadd.s32 %v5585_v23, %v2385_v38  ;;  %v2402_v50 = vadd.s32 456, %v5582_v61 }
 0x2b4   : > { %vm4425_vm14 = vmpackc.low %vm3020_vm11, %vm3019_vm8  ;;  %v2547_v47 = vadd.s32 %v5585_v23, %v2386_v49  ;;  %v2351_v33 = vadd.s32 48, %v5582_v61  ;;  %v2562_v46 = vadd.s32 %v5585_v23, %v2401_v45  ;;  %v2352_v22 = vadd.s32 56, %v5582_v61 }
 0x2b5   : > { %4426 = vmatpush.bf16.msk.msra.mxu1 %vm4425_vm14, %v4710_v48  ;;  %vm3035_vm15 = vmand %vm2714_vm9, %vm2875_vm10  ;;  %vm2680_vm9 = vcmp.ge.s32.totalorder %v2516_v13, %v5593_v16  ;;  %vm2841_vm10 = vcmp.lt.s32.totalorder %v2516_v13, %v5600_v41  ;;  %v2563_v39 = vadd.s32 %v5585_v23, %v2402_v50  ;;  %v2367_v58 = vadd.s32 176, %v5582_v61 }
 0x2b6   : > { %vm3036_vm2 = vmand %vm2715_vm12, %vm2876_vm13  ;;  %vm2681_vm12 = vcmp.ge.s32.totalorder %v2517_v14, %v5593_v16  ;;  %vm2842_vm13 = vcmp.lt.s32.totalorder %v2517_v14, %v5600_v41  ;;  %v2512_v9 = vadd.s32 %v5585_v23, %v2351_v33  ;;  %v2368_v56 = vadd.s32 184, %v5582_v61 }
 0x2b7   : > { %vm4441_vm7 = vmpackc.low %vm3036_vm2, %vm3035_vm15  ;;  %v2513_v19 = vadd.s32 %v5585_v23, %v2352_v22  ;;  %v2383_v27 = vadd.s32 304, %v5582_v61  ;;  %v2528_v55 = vadd.s32 %v5585_v23, %v2367_v58  ;;  %v2384_v0 = vadd.s32 312, %v5582_v61 }
 0x2b8   : > { %4442 = vmatpush.bf16.msk.msra.mxu2 %vm4441_vm7, %v4710_v48  ;;  %vm3051_vm8 = vmand %vm2730_vm0, %vm2891_vm1  ;;  %vm2696_vm0 = vcmp.ge.s32.totalorder %v2532_v7, %v5593_v16  ;;  %vm2857_vm1 = vcmp.lt.s32.totalorder %v2532_v7, %v5600_v41  ;;  %v2529_v1 = vadd.s32 %v5585_v23, %v2368_v56  ;;  %v2399_v2 = vadd.s32 432, %v5582_v61 }
 0x2b9   : > { %vm3052_vm11 = vmand %vm2731_vm4, %vm2892_vm5  ;;  %vm2697_vm4 = vcmp.ge.s32.totalorder %v2533_v17, %v5593_v16  ;;  %vm2858_vm5 = vcmp.lt.s32.totalorder %v2533_v17, %v5600_v41  ;;  %v2544_v3 = vadd.s32 %v5585_v23, %v2383_v27  ;;  %v2400_v30 = vadd.s32 440, %v5582_v61 }
 0x2ba   : > { %vm4457_vm14 = vmpackc.low %vm3052_vm11, %vm3051_vm8  ;;  %v2545_v60 = vadd.s32 %v5585_v23, %v2384_v0  ;;  %v2349_v62 = vadd.s32 32, %v5582_v61  ;;  %v2560_v5 = vadd.s32 %v5585_v23, %v2399_v2  ;;  %v2350_v35 = vadd.s32 40, %v5582_v61 }
 0x2bb   : > { %4458 = vmatpush.bf16.msk.msra.mxu3 %vm4457_vm14, %v4710_v48  ;;  %vm3001_vm15 = vmand %vm2680_vm9, %vm2841_vm10  ;;  %vm2712_vm9 = vcmp.ge.s32.totalorder %v2548_v20, %v5593_v16  ;;  %vm2873_vm10 = vcmp.lt.s32.totalorder %v2548_v20, %v5600_v41  ;;  %v2561_v63 = vadd.s32 %v5585_v23, %v2400_v30  ;;  %v2365_v11 = vadd.s32 160, %v5582_v61 }
 0x2bc   : > { %vm3002_vm2 = vmand %vm2681_vm12, %vm2842_vm13  ;;  %vm2713_vm12 = vcmp.ge.s32.totalorder %v2549_v52, %v5593_v16  ;;  %vm2874_vm13 = vcmp.lt.s32.totalorder %v2549_v52, %v5600_v41  ;;  %v2510_v12 = vadd.s32 %v5585_v23, %v2349_v62  ;;  %v2366_v13 = vadd.s32 168, %v5582_v61 }
 0x2bd   : > { %vm4411_vm7 = vmpackc.low %vm3002_vm2, %vm3001_vm15  ;;  %v2511_v4 = vadd.s32 %v5585_v23, %v2350_v35  ;;  %v2381_v14 = vadd.s32 288, %v5582_v61  ;;  %v2526_v59 = vadd.s32 %v5585_v23, %v2365_v11  ;;  %v2382_v7 = vadd.s32 296, %v5582_v61 }
 0x2be   : > { %4412 = vmatpush.bf16.msk.msra.mxu0 %vm4411_vm7, %v4710_v48  ;;  %vm3017_vm8 = vmand %vm2696_vm0, %vm2857_vm1  ;;  %vm2728_vm0 = vcmp.ge.s32.totalorder %v2564_v18, %v5593_v16  ;;  %vm2889_vm1 = vcmp.lt.s32.totalorder %v2564_v18, %v5600_v41  ;;  %v2527_v15 = vadd.s32 %v5585_v23, %v2366_v13  ;;  %v2397_v17 = vadd.s32 416, %v5582_v61 }
 0x2bf   : > { %vm3018_vm11 = vmand %vm2697_vm4, %vm2858_vm5  ;;  %vm2729_vm4 = vcmp.ge.s32.totalorder %v2565_v6, %v5593_v16  ;;  %vm2890_vm5 = vcmp.lt.s32.totalorder %v2565_v6, %v5600_v41  ;;  %v2542_v8 = vadd.s32 %v5585_v23, %v2381_v14  ;;  %v2398_v20 = vadd.s32 424, %v5582_v61 }
 0x2c0   : > { %vm4427_vm14 = vmpackc.low %vm3018_vm11, %vm3017_vm8  ;;  %v2543_v28 = vadd.s32 %v5585_v23, %v2382_v7  ;;  %v2347_v52 = vadd.s32 16, %v5582_v61  ;;  %v2558_v32 = vadd.s32 %v5585_v23, %v2397_v17  ;;  %v2348_v18 = vadd.s32 24, %v5582_v61 }
 0x2c1   : > { %4428 = vmatpush.bf16.msk.msra.mxu1 %vm4427_vm14, %v4710_v48  ;;  %vm3033_vm15 = vmand %vm2712_vm9, %vm2873_vm10  ;;  %vm2678_vm9 = vcmp.ge.s32.totalorder %v2514_v29, %v5593_v16  ;;  %vm2839_vm10 = vcmp.lt.s32.totalorder %v2514_v29, %v5600_v41  ;;  %v2559_v43 = vadd.s32 %v5585_v23, %v2398_v20  ;;  %v2363_v6 = vadd.s32 144, %v5582_v61 }
 0x2c2   : > { %vm3034_vm2 = vmand %vm2713_vm12, %vm2874_vm13  ;;  %vm2679_vm12 = vcmp.ge.s32.totalorder %v2515_v26, %v5593_v16  ;;  %vm2840_vm13 = vcmp.lt.s32.totalorder %v2515_v26, %v5600_v41  ;;  %v2508_v24 = vadd.s32 %v5585_v23, %v2347_v52  ;;  %v2364_v29 = vadd.s32 152, %v5582_v61 }
 0x2c3   : > { %vm4443_vm7 = vmpackc.low %vm3034_vm2, %vm3033_vm15  ;;  %v2509_v21 = vadd.s32 %v5585_v23, %v2348_v18  ;;  %v2379_v26 = vadd.s32 272, %v5582_v61  ;;  %v2524_v38 = vadd.s32 %v5585_v23, %v2363_v6  ;;  %v2346_v33 = vadd.s32 8, %v5582_v61 }
 0x2c4   : > { %4444 = vmatpush.bf16.msk.msra.mxu2 %vm4443_vm7, %v4710_v48  ;;  %vm3049_vm8 = vmand %vm2728_vm0, %vm2889_vm1  ;;  %vm2694_vm0 = vcmp.ge.s32.totalorder %v2530_v36, %v5593_v16  ;;  %vm2855_vm1 = vcmp.lt.s32.totalorder %v2530_v36, %v5600_v41  ;;  %v2380_v36 = vadd.s32 280, %v5582_v61  ;;  %v2525_v49 = vadd.s32 %v5585_v23, %v2364_v29 }
 0x2c5   : > { %vm3050_vm11 = vmand %vm2729_vm4, %vm2890_vm5  ;;  %vm2695_vm4 = vcmp.ge.s32.totalorder %v2531_v34, %v5593_v16  ;;  %vm2856_vm5 = vcmp.lt.s32.totalorder %v2531_v34, %v5600_v41  ;;  %v2395_v34 = vadd.s32 400, %v5582_v61  ;;  %v2540_v45 = vadd.s32 %v5585_v23, %v2379_v26 }
 0x2c6   : > { %vm4459_vm14 = vmpackc.low %vm3050_vm11, %vm3049_vm8  ;;  %v2541_v50 = vadd.s32 %v5585_v23, %v2380_v36  ;;  %v2361_v22 = vadd.s32 128, %v5582_v61  ;;  %v2362_v58 = vadd.s32 136, %v5582_v61  ;;  %v2377_v56 = vadd.s32 256, %v5582_v61 }
 0x2c7   : > { %4460 = vmatpush.bf16.msk.msra.mxu3 %vm4459_vm14, %v4710_v48  ;;  %vm2999_vm15 = vmand %vm2678_vm9, %vm2839_vm10  ;;  %vm2710_vm9 = vcmp.ge.s32.totalorder %v2546_v44, %v5593_v16  ;;  %vm2871_vm10 = vcmp.lt.s32.totalorder %v2546_v44, %v5600_v41  ;;  %v2396_v44 = vadd.s32 408, %v5582_v61  ;;  %v2378_v27 = vadd.s32 264, %v5582_v61 }
 0x2c8   : > { %vm3000_vm2 = vmand %vm2679_vm12, %vm2840_vm13  ;;  %vm2711_vm12 = vcmp.ge.s32.totalorder %v2547_v47, %v5593_v16  ;;  %vm2872_vm13 = vcmp.lt.s32.totalorder %v2547_v47, %v5600_v41  ;;  %v2556_v47 = vadd.s32 %v5585_v23, %v2395_v34  ;;  %v2423_v0 = vadd.s32 624, %v5582_v61 }
 0x2c9   : > { %vm4413_vm7 = vmpackc.low %vm3000_vm2, %vm2999_vm15  ;;  %v2424_v2 = vadd.s32 632, %v5582_v61  ;;  %v2439_v30 = vadd.s32 752, %v5582_v61  ;;  %v2440_v62 = vadd.s32 760, %v5582_v61  ;;  %v2455_v35 = vadd.s32 880, %v5582_v61 }
 0x2ca   : > { %4414 = vmatpush.bf16.msk.msra.mxu0 %vm4413_vm7, %v4710_v48  ;;  %vm3015_vm8 = vmand %vm2694_vm0, %vm2855_vm1  ;;  %vm2726_vm0 = vcmp.ge.s32.totalorder %v2562_v46, %v5593_v16  ;;  %vm2887_vm1 = vcmp.lt.s32.totalorder %v2562_v46, %v5600_v41  ;;  %v2557_v46 = vadd.s32 %v5585_v23, %v2396_v44  ;;  %v2456_v11 = vadd.s32 888, %v5582_v61 }
 0x2cb   : > { %vm3016_vm11 = vmand %vm2695_vm4, %vm2856_vm5  ;;  %vm2727_vm4 = vcmp.ge.s32.totalorder %v2563_v39, %v5593_v16  ;;  %vm2888_vm5 = vcmp.lt.s32.totalorder %v2563_v39, %v5600_v41  ;;  %v2506_v39 = vadd.s32 %v5585_v23, %v5582_v61  ;;  %v2393_v13 = vadd.s32 384, %v5582_v61 }
 0x2cc   : > { %vm4429_vm14 = vmpackc.low %vm3016_vm11, %vm3015_vm8  ;;  %v2394_v14 = vadd.s32 392, %v5582_v61  ;;  %v2471_v7 = vadd.s32 1008, %v5582_v61  ;;  %v2472_v17 = vadd.s32 1016, %v5582_v61  ;;  %v2421_v20 = vadd.s32 608, %v5582_v61 }
 0x2cd   : > { %4430 = vmatpush.bf16.msk.msra.mxu1 %vm4429_vm14, %v4710_v48  ;;  %vm3031_vm15 = vmand %vm2710_vm9, %vm2871_vm10  ;;  %vm2676_vm9 = vcmp.ge.s32.totalorder %v2512_v9, %v5593_v16  ;;  %vm2837_vm10 = vcmp.lt.s32.totalorder %v2512_v9, %v5600_v41  ;;  %v2507_v9 = vadd.s32 %v5585_v23, %v2346_v33  ;;  %v2422_v52 = vadd.s32 616, %v5582_v61 }
 0x2ce   : > { %vm3032_vm2 = vmand %vm2711_vm12, %vm2872_vm13  ;;  %vm2677_vm12 = vcmp.ge.s32.totalorder %v2513_v19, %v5593_v16  ;;  %vm2838_vm13 = vcmp.lt.s32.totalorder %v2513_v19, %v5600_v41  ;;  %v2522_v19 = vadd.s32 %v5585_v23, %v2361_v22  ;;  %v2437_v18 = vadd.s32 736, %v5582_v61 }
 0x2cf   : > { %vm4445_vm7 = vmpackc.low %vm3032_vm2, %vm3031_vm15  ;;  %v2438_v6 = vadd.s32 744, %v5582_v61  ;;  %v2453_v29 = vadd.s32 864, %v5582_v61  ;;  %v2454_v26 = vadd.s32 872, %v5582_v61  ;;  %v2470_v34 = vadd.s32 1000, %v5582_v61 }
 0x2d0   : > { %4446 = vmatpush.bf16.msk.msra.mxu2 %vm4445_vm7, %v4710_v48  ;;  %vm3047_vm8 = vmand %vm2726_vm0, %vm2887_vm1  ;;  %vm2692_vm0 = vcmp.ge.s32.totalorder %v2528_v55, %v5593_v16  ;;  %vm2853_vm1 = vcmp.lt.s32.totalorder %v2528_v55, %v5600_v41  ;;  %v2523_v55 = vadd.s32 %v5585_v23, %v2362_v58  ;;  %v2419_v44 = vadd.s32 592, %v5582_v61 }
 0x2d1   : > { %vm3048_vm11 = vmand %vm2727_vm4, %vm2888_vm5  ;;  %vm2693_vm4 = vcmp.ge.s32.totalorder %v2529_v1, %v5593_v16  ;;  %vm2854_vm5 = vcmp.lt.s32.totalorder %v2529_v1, %v5600_v41  ;;  %v2538_v1 = vadd.s32 %v5585_v23, %v2377_v56  ;;  %v2614_v36 = vadd.s32 %v5585_v23, %v2453_v29 }
 0x2d2   : > { %vm4461_vm14 = vmpackc.low %vm3048_vm11, %vm3047_vm8  ;;  %v2631_v33 = vadd.s32 %v5585_v23, %v2470_v34  ;;  %v3554_v22 = vpack.c.bf16 %v5550_v31, %v5550_v31  ;;  %v2436_v58 = vadd.s32 728, %v5582_v61 }
 0x2d3   : > { %4462 = vmatpush.bf16.msk.msra.mxu3 %vm4461_vm14, %v4710_v48  ;;  %vm2997_vm15 = vmand %vm2676_vm9, %vm2837_vm10  ;;  %vm2708_vm9 = vcmp.ge.s32.totalorder %v2544_v3, %v5593_v16  ;;  %vm2869_vm10 = vcmp.lt.s32.totalorder %v2544_v3, %v5600_v41  ;;  %v2539_v3 = vadd.s32 %v5585_v23, %v2378_v27  ;;  %v2452_v27 = vadd.s32 856, %v5582_v61 }
 0x2d4   : > { %vm2998_vm2 = vmand %vm2677_vm12, %vm2838_vm13  ;;  %vm2709_vm12 = vcmp.ge.s32.totalorder %v2545_v60, %v5593_v16  ;;  %vm2870_vm13 = vcmp.lt.s32.totalorder %v2545_v60, %v5600_v41  ;;  %v2584_v60 = vadd.s32 %v5585_v23, %v2423_v0  ;;  %v2467_v0 = vadd.s32 976, %v5582_v61 }
 0x2d5   : > { %vm4415_vm7 = vmpackc.low %vm2998_vm2, %vm2997_vm15 }
 0x2d6   : > { %4416 = vmatpush.bf16.msk.msra.mxu0 %vm4415_vm7, %v4710_v48  ;;  %vm3013_vm8 = vmand %vm2692_vm0, %vm2853_vm1  ;;  %vm2724_vm0 = vcmp.ge.s32.totalorder %v2560_v5, %v5593_v16  ;;  %vm2885_vm1 = vcmp.lt.s32.totalorder %v2560_v5, %v5600_v41  ;;  %v2585_v5 = vadd.s32 %v5585_v23, %v2424_v2  ;;  %v2468_v2 = vadd.s32 984, %v5582_v61 }
 0x2d7   : > { %vm3014_vm11 = vmand %vm2693_vm4, %vm2854_vm5  ;;  %vm2725_vm4 = vcmp.ge.s32.totalorder %v2561_v63, %v5593_v16  ;;  %vm2886_vm5 = vcmp.lt.s32.totalorder %v2561_v63, %v5600_v41  ;;  %v2600_v63 = vadd.s32 %v5585_v23, %v2439_v30  ;;  %v3552_v30 = vpack.c.bf16 %v5545_v25, %v5545_v25 }
 0x2d8   : > { %vm4431_vm14 = vmpackc.low %vm3014_vm11, %vm3013_vm8 }
 0x2d9   : > { %4432 = vmatpush.bf16.msk.msra.mxu1 %vm4431_vm14, %v4710_v48  ;;  %vm3029_vm15 = vmand %vm2708_vm9, %vm2869_vm10  ;;  %vm2674_vm9 = vcmp.ge.s32.totalorder %v2510_v12, %v5593_v16  ;;  %vm2835_vm10 = vcmp.lt.s32.totalorder %v2510_v12, %v5600_v41  ;;  %v2601_v12 = vadd.s32 %v5585_v23, %v2440_v62  ;;  %v2417_v62 = vadd.s32 576, %v5582_v61 }
 0x2da   : > { %vm3030_vm2 = vmand %vm2709_vm12, %vm2870_vm13  ;;  %vm2675_vm12 = vcmp.ge.s32.totalorder %v2511_v4, %v5593_v16  ;;  %vm2836_vm13 = vcmp.lt.s32.totalorder %v2511_v4, %v5600_v41  ;;  %v2616_v4 = vadd.s32 %v5585_v23, %v2455_v35  ;;  %v2418_v35 = vadd.s32 584, %v5582_v61 }
 0x2db   : > { %vm4447_vm7 = vmpackc.low %vm3030_vm2, %vm3029_vm15 }
 0x2dc   : > { %4448 = vmatpush.bf16.msk.msra.mxu2 %vm4447_vm7, %v4710_v48  ;;  %vm3045_vm8 = vmand %vm2724_vm0, %vm2885_vm1  ;;  %vm2690_vm0 = vcmp.ge.s32.totalorder %v2526_v59, %v5593_v16  ;;  %vm2851_vm1 = vcmp.lt.s32.totalorder %v2526_v59, %v5600_v41  ;;  %v2617_v59 = vadd.s32 %v5585_v23, %v2456_v11  ;;  %v3553_v11 = vpack.c.bf16 %v5547_v42, %v5547_v42 }
 0x2dd   : > { %vm3046_vm11 = vmand %vm2725_vm4, %vm2886_vm5  ;;  %vm2691_vm4 = vcmp.ge.s32.totalorder %v2527_v15, %v5593_v16  ;;  %vm2852_vm5 = vcmp.lt.s32.totalorder %v2527_v15, %v5600_v41  ;;  %v2554_v15 = vadd.s32 %v5585_v23, %v2393_v13  ;;  %v2578_v13 = vadd.s32 %v5585_v23, %v2417_v62 }
 0x2de   : > { %vm4463_vm14 = vmpackc.low %vm3046_vm11, %vm3045_vm8  ;;  %v2411_v62 = vadd.s32 528, %v5582_v61 }
 0x2df   : > { %4464 = vmatpush.bf16.msk.msra.mxu3 %vm4463_vm14, %v4710_v48  ;;  %vm2995_vm15 = vmand %vm2674_vm9, %vm2835_vm10  ;;  %vm2706_vm9 = vcmp.ge.s32.totalorder %v2542_v8, %v5593_v16  ;;  %vm2867_vm10 = vcmp.lt.s32.totalorder %v2542_v8, %v5600_v41  ;;  %v2555_v8 = vadd.s32 %v5585_v23, %v2394_v14  ;;  %v2579_v14 = vadd.s32 %v5585_v23, %v2418_v35 }
 0x2e0   : > { %vm2996_vm2 = vmand %vm2675_vm12, %vm2836_vm13  ;;  %vm2707_vm12 = vcmp.ge.s32.totalorder %v2543_v28, %v5593_v16  ;;  %vm2868_vm13 = vcmp.lt.s32.totalorder %v2543_v28, %v5600_v41  ;;  %v2632_v28 = vadd.s32 %v5585_v23, %v2471_v7  ;;  %v2412_v35 = vadd.s32 536, %v5582_v61 }
 0x2e1   : > { %vm4417_vm7 = vmpackc.low %vm2996_vm2, %vm2995_vm15 }
 0x2e2   : > { %4418 = vmatpush.bf16.msk.msra.mxu0 %vm4417_vm7, %v4710_v48  ;;  %vm3011_vm8 = vmand %vm2690_vm0, %vm2851_vm1  ;;  %vm2722_vm0 = vcmp.ge.s32.totalorder %v2558_v32, %v5593_v16  ;;  %vm2883_vm1 = vcmp.lt.s32.totalorder %v2558_v32, %v5600_v41  ;;  %v2633_v32 = vadd.s32 %v5585_v23, %v2472_v17 }
 0x2e3   : > { %vm3012_vm11 = vmand %vm2691_vm4, %vm2852_vm5  ;;  %vm2723_vm4 = vcmp.ge.s32.totalorder %v2559_v43, %v5593_v16  ;;  %vm2884_vm5 = vcmp.lt.s32.totalorder %v2559_v43, %v5600_v41  ;;  %v2582_v43 = vadd.s32 %v5585_v23, %v2421_v20 }
 0x2e4   : > { %vm4433_vm14 = vmpackc.low %vm3012_vm11, %vm3011_vm8 }
 0x2e5   : > { %4434 = vmatpush.bf16.msk.msra.mxu1 %vm4433_vm14, %v4710_v48  ;;  %vm3027_vm15 = vmand %vm2706_vm9, %vm2867_vm10  ;;  %vm2672_vm9 = vcmp.ge.s32.totalorder %v2508_v24, %v5593_v16  ;;  %vm2833_vm10 = vcmp.lt.s32.totalorder %v2508_v24, %v5600_v41  ;;  %v2583_v24 = vadd.s32 %v5585_v23, %v2422_v52 }
 0x2e6   : > { %vm3028_vm2 = vmand %vm2707_vm12, %vm2868_vm13  ;;  %vm2673_vm12 = vcmp.ge.s32.totalorder %v2509_v21, %v5593_v16  ;;  %vm2834_vm13 = vcmp.lt.s32.totalorder %v2509_v21, %v5600_v41  ;;  %v2598_v21 = vadd.s32 %v5585_v23, %v2437_v18 }
 0x2e7   : > { %vm4449_vm7 = vmpackc.low %vm3028_vm2, %vm3027_vm15 }
 0x2e8   : > { %4450 = vmatpush.bf16.msk.msra.mxu2 %vm4449_vm7, %v4710_v48  ;;  %vm3043_vm8 = vmand %vm2722_vm0, %vm2883_vm1  ;;  %vm2688_vm0 = vcmp.ge.s32.totalorder %v2524_v38, %v5593_v16  ;;  %vm2849_vm1 = vcmp.lt.s32.totalorder %v2524_v38, %v5600_v41  ;;  %v2599_v38 = vadd.s32 %v5585_v23, %v2438_v6 }
 0x2e9   : > { %vm3044_vm11 = vmand %vm2723_vm4, %vm2884_vm5  ;;  %vm2689_vm4 = vcmp.ge.s32.totalorder %v2525_v49, %v5593_v16  ;;  %vm2850_vm5 = vcmp.lt.s32.totalorder %v2525_v49, %v5600_v41  ;;  %v2469_v49 = vadd.s32 992, %v5582_v61 }
 0x2ea   : > { %vm4465_vm14 = vmpackc.low %vm3044_vm11, %vm3043_vm8 }
 0x2eb   : > { %4466 = vmatpush.bf16.msk.msra.mxu3 %vm4465_vm14, %v4710_v48  ;;  %vm2993_vm15 = vmand %vm2672_vm9, %vm2833_vm10  ;;  %vm2704_vm9 = vcmp.ge.s32.totalorder %v2540_v45, %v5593_v16  ;;  %vm2865_vm10 = vcmp.lt.s32.totalorder %v2540_v45, %v5600_v41  ;;  %v2615_v45 = vadd.s32 %v5585_v23, %v2454_v26 }
 0x2ec   : > { %vm2994_vm2 = vmand %vm2673_vm12, %vm2834_vm13  ;;  %vm2705_vm12 = vcmp.ge.s32.totalorder %v2541_v50, %v5593_v16  ;;  %vm2866_vm13 = vcmp.lt.s32.totalorder %v2541_v50, %v5600_v41  ;;  %v2630_v50 = vadd.s32 %v5585_v23, %v2469_v49  ;;  %v2448_v49 = vadd.s32 824, %v5582_v61 }
 0x2ed   : > { %vm4419_vm7 = vmpackc.low %vm2994_vm2, %vm2993_vm15 }
 0x2ee   : > { %4420 = vmatpush.bf16.msk.msra.mxu0 %vm4419_vm7, %v4710_v48  ;;  %vm3009_vm8 = vmand %vm2688_vm0, %vm2849_vm1  ;;  %vm2720_vm0 = vcmp.ge.s32.totalorder %v2556_v47, %v5593_v16  ;;  %vm2881_vm1 = vcmp.lt.s32.totalorder %v2556_v47, %v5600_v41  ;;  %v2420_v47 = vadd.s32 600, %v5582_v61 }
 0x2ef   : > { %vm3010_vm11 = vmand %vm2689_vm4, %vm2850_vm5  ;;  %vm2721_vm4 = vcmp.ge.s32.totalorder %v2557_v46, %v5593_v16  ;;  %vm2882_vm5 = vcmp.lt.s32.totalorder %v2557_v46, %v5600_v41  ;;  %v2435_v46 = vadd.s32 720, %v5582_v61 }
 0x2f0   : > { %vm4435_vm14 = vmpackc.low %vm3010_vm11, %vm3009_vm8 }
 0x2f1   : > { %4436 = vmatpush.bf16.msk.msra.mxu1 %vm4435_vm14, %v4710_v48  ;;  %vm3025_vm15 = vmand %vm2704_vm9, %vm2865_vm10  ;;  %vm2670_vm9 = vcmp.ge.s32.totalorder %v2506_v39, %v5593_v16  ;;  %vm2831_vm10 = vcmp.lt.s32.totalorder %v2506_v39, %v5600_v41  ;;  %v2580_v39 = vadd.s32 %v5585_v23, %v2419_v44  ;;  %v2596_v56 = vadd.s32 %v5585_v23, %v2435_v46 }
 0x2f2   : > { %vm3026_vm2 = vmand %vm2705_vm12, %vm2866_vm13  ;;  %vm2671_vm12 = vcmp.ge.s32.totalorder %v2507_v9, %v5593_v16  ;;  %vm2832_vm13 = vcmp.lt.s32.totalorder %v2507_v9, %v5600_v41  ;;  %v2581_v9 = vadd.s32 %v5585_v23, %v2420_v47  ;;  %v2609_v47 = vadd.s32 %v5585_v23, %v2448_v49 }
 0x2f3   : > { %vm4451_vm7 = vmpackc.low %vm3026_vm2, %vm3025_vm15 }
 0x2f4   : > { %4452 = vmatpush.bf16.msk.msra.mxu2 %vm4451_vm7, %v4710_v48  ;;  %vm3041_vm8 = vmand %vm2720_vm0, %vm2881_vm1  ;;  %vm2686_vm0 = vcmp.ge.s32.totalorder %v2522_v19, %v5593_v16  ;;  %vm2847_vm1 = vcmp.lt.s32.totalorder %v2522_v19, %v5600_v41  ;;  %v2451_v19 = vadd.s32 848, %v5582_v61 }
 0x2f5   : > { %vm3042_vm11 = vmand %vm2721_vm4, %vm2882_vm5  ;;  %vm2687_vm4 = vcmp.ge.s32.totalorder %v2523_v55, %v5593_v16  ;;  %vm2848_vm5 = vcmp.lt.s32.totalorder %v2523_v55, %v5600_v41  ;;  %v2597_v55 = vadd.s32 %v5585_v23, %v2436_v58  ;;  %v2429_v58 = vadd.s32 672, %v5582_v61 }
 0x2f6   : > { %vm4467_vm14 = vmpackc.low %vm3042_vm11, %vm3041_vm8 }
 0x2f7   : > { %4468 = vmatpush.bf16.msk.msra.mxu3 %vm4467_vm14, %v4710_v48  ;;  %vm2991_vm15 = vmand %vm2670_vm9, %vm2831_vm10  ;;  %vm2702_vm9 = vcmp.ge.s32.totalorder %v2538_v1, %v5593_v16  ;;  %vm2863_vm10 = vcmp.lt.s32.totalorder %v2538_v1, %v5600_v41  ;;  %v2612_v1 = vadd.s32 %v5585_v23, %v2451_v19 }
 0x2f8   : > { %vm2992_vm2 = vmand %vm2671_vm12, %vm2832_vm13  ;;  %vm2703_vm12 = vcmp.ge.s32.totalorder %v2539_v3, %v5593_v16  ;;  %vm2864_vm13 = vcmp.lt.s32.totalorder %v2539_v3, %v5600_v41  ;;  %v2613_v3 = vadd.s32 %v5585_v23, %v2452_v27  ;;  %v2445_v27 = vadd.s32 800, %v5582_v61 }
 0x2f9   : > { %vm4421_vm7 = vmpackc.low %vm2992_vm2, %vm2991_vm15 }
 0x2fa   : > { %4422 = vmatpush.bf16.msk.msra.mxu0 %vm4421_vm7, %v4710_v48  ;;  %vm3007_vm8 = vmand %vm2686_vm0, %vm2847_vm1  ;;  %vm2748_vm0 = vcmp.ge.s32.totalorder %v2584_v60, %v5593_v16  ;;  %vm2909_vm1 = vcmp.lt.s32.totalorder %v2584_v60, %v5600_v41  ;;  %v3555_v60 = vpack.c.bf16 %v5552_v37, %v5552_v37 }
 0x2fb   : > { %vm3008_vm11 = vmand %vm2687_vm4, %vm2848_vm5  ;;  %vm2749_vm4 = vcmp.ge.s32.totalorder %v2585_v5, %v5593_v16  ;;  %vm2910_vm5 = vcmp.lt.s32.totalorder %v2585_v5, %v5600_v41  ;;  %v2628_v5 = vadd.s32 %v5585_v23, %v2467_v0  ;;  %v2446_v0 = vadd.s32 808, %v5582_v61 }
 0x2fc   : > { %vm4437_vm14 = vmpackc.low %vm3008_vm11, %vm3007_vm8 }
 0x2fd   : > { %4438 = vmatpush.bf16.msk.msra.mxu1 %vm4437_vm14, %v4710_v48  ;;  %vm3023_vm15 = vmand %vm2702_vm9, %vm2863_vm10  ;;  %vm2764_vm9 = vcmp.ge.s32.totalorder %v2600_v63, %v5593_v16  ;;  %vm2925_vm10 = vcmp.lt.s32.totalorder %v2600_v63, %v5600_v41  ;;  %3570 = vmatmul.bf16.vlgmr.msra.gmra.mxu0 %v3552_v30  ;;  %v2629_v63 = vadd.s32 %v5585_v23, %v2468_v2  ;;  %v2461_v2 = vadd.s32 928, %v5582_v61 }
 0x2fe   : > { %vm3024_vm2 = vmand %vm2703_vm12, %vm2864_vm13  ;;  %vm2765_vm12 = vcmp.ge.s32.totalorder %v2601_v12, %v5593_v16  ;;  %vm2926_vm13 = vcmp.lt.s32.totalorder %v2601_v12, %v5600_v41  ;;  %v2433_v12 = vadd.s32 704, %v5582_v61  ;;  %v2462_v30 = vadd.s32 936, %v5582_v61 }
 0x2ff   : > { %vm4453_vm7 = vmpackc.low %vm3024_vm2, %vm3023_vm15 }
 0x300   : > { %4454 = vmatpush.bf16.msk.msra.mxu2 %vm4453_vm7, %v4710_v48  ;;  %vm3069_vm8 = vmand %vm2748_vm0, %vm2909_vm1  ;;  %vm2780_vm0 = vcmp.ge.s32.totalorder %v2616_v4, %v5593_v16  ;;  %vm2941_vm1 = vcmp.lt.s32.totalorder %v2616_v4, %v5600_v41  ;;  %v2434_v4 = vadd.s32 712, %v5582_v61  ;;  %3583 = vmatmul.bf16.vlgmr.msra.gmra.mxu1 %v3553_v11  ;;  %v2594_v7 = vadd.s32 %v5585_v23, %v2433_v12 }
 0x301   : > { %vm3070_vm11 = vmand %vm2749_vm4, %vm2910_vm5  ;;  %vm2781_vm4 = vcmp.ge.s32.totalorder %v2617_v59, %v5593_v16  ;;  %vm2942_vm5 = vcmp.lt.s32.totalorder %v2617_v59, %v5600_v41  ;;  %v2449_v59 = vadd.s32 832, %v5582_v61  ;;  %v2427_v11 = vadd.s32 656, %v5582_v61 }
 0x302   : > { %vm4471_vm14 = vmpackc.low %vm3070_vm11, %vm3069_vm8  ;;  %v2595_v17 = vadd.s32 %v5585_v23, %v2434_v4  ;;  %v2572_v12 = vadd.s32 %v5585_v23, %v2411_v62  ;;  %v2573_v4 = vadd.s32 %v5585_v23, %v2412_v35  ;;  %v2502_v62 = vadd.s32 1256, %v5582_v61 }
 0x303   : > { %4472 = vmatpush.bf16.msk.msrb.mxu0 %vm4471_vm14, %v4710_v48  ;;  %vm3085_vm15 = vmand %vm2764_vm9, %vm2925_vm10  ;;  %vm2718_vm9 = vcmp.ge.s32.totalorder %v2554_v15, %v5593_v16  ;;  %vm2879_vm10 = vcmp.lt.s32.totalorder %v2554_v15, %v5600_v41  ;;  %3596 = vmatmul.bf16.vlgmr.msra.gmra.mxu2 %v3554_v22  ;;  %v2450_v15 = vadd.s32 840, %v5582_v61  ;;  %v2610_v20 = vadd.s32 %v5585_v23, %v2449_v59 }
 0x304   : > { %vm3086_vm2 = vmand %vm2765_vm12, %vm2926_vm13  ;;  %vm2719_vm12 = vcmp.ge.s32.totalorder %v2555_v8, %v5593_v16  ;;  %vm2880_vm13 = vcmp.lt.s32.totalorder %v2555_v8, %v5600_v41  ;;  %v2465_v8 = vadd.s32 960, %v5582_v61  ;;  %v2414_v22 = vadd.s32 552, %v5582_v61 }
 0x305   : > { %vm4487_vm7 = vmpackc.low %vm3086_vm2, %vm3085_vm15  ;;  %v2611_v52 = vadd.s32 %v5585_v23, %v2450_v15  ;;  %v2588_v59 = vadd.s32 %v5585_v23, %v2427_v11  ;;  %v2483_v35 = vadd.s32 1104, %v5582_v61  ;;  %v2484_v11 = vadd.s32 1112, %v5582_v61 }
 0x306   : > { %4488 = vmatpush.bf16.msk.msrb.mxu1 %vm4487_vm7, %v4710_v48  ;;  %vm3101_vm8 = vmand %vm2780_vm0, %vm2941_vm1  ;;  %vm2796_vm0 = vcmp.ge.s32.totalorder %v2632_v28, %v5593_v16  ;;  %vm2957_vm1 = vcmp.lt.s32.totalorder %v2632_v28, %v5600_v41  ;;  %v2466_v28 = vadd.s32 968, %v5582_v61  ;;  %v2626_v18 = vadd.s32 %v5585_v23, %v2465_v8 }
 0x307   : > { %vm3102_vm11 = vmand %vm2781_vm4, %vm2942_vm5  ;;  %vm2797_vm4 = vcmp.ge.s32.totalorder %v2633_v32, %v5593_v16  ;;  %vm2958_vm5 = vcmp.lt.s32.totalorder %v2633_v32, %v5600_v41  ;;  %v2415_v32 = vadd.s32 560, %v5582_v61  ;;  %v2575_v19 = vadd.s32 %v5585_v23, %v2414_v22 }
 0x308   : > { %vm4503_vm14 = vmpackc.low %vm3102_vm11, %vm3101_vm8  ;;  %v2627_v6 = vadd.s32 %v5585_v23, %v2466_v28  ;;  %v3556_v22 = vpack.c.bf16 %v5560_v57, %v5560_v57 }
 0x309   : > { %4504 = vmatpush.bf16.msk.msrb.mxu2 %vm4503_vm14, %v4710_v48  ;;  %vm3039_vm15 = vmand %vm2718_vm9, %vm2879_vm10  ;;  %vm2746_vm9 = vcmp.ge.s32.totalorder %v2582_v43, %v5593_v16  ;;  %vm2907_vm10 = vcmp.lt.s32.totalorder %v2582_v43, %v5600_v41  ;;  %v2416_v43 = vadd.s32 568, %v5582_v61  ;;  %v2576_v29 = vadd.s32 %v5585_v23, %v2415_v32 }
 0x30a   : > { %vm3040_vm2 = vmand %vm2719_vm12, %vm2880_vm13  ;;  %vm2747_vm12 = vcmp.ge.s32.totalorder %v2583_v24, %v5593_v16  ;;  %vm2908_vm13 = vcmp.lt.s32.totalorder %v2583_v24, %v5600_v41  ;;  %v2431_v24 = vadd.s32 688, %v5582_v61 }
 0x30b   : > { %vm4469_vm7 = vmpackc.low %vm3040_vm2, %vm3039_vm15  ;;  %v2577_v26 = vadd.s32 %v5585_v23, %v2416_v43 }
 0x30c   : > { %4470 = vmatpush.bf16.msk.msra.mxu3 %vm4469_vm7, %v4710_v48  ;;  %vm3117_vm8 = vmand %vm2796_vm0, %vm2957_vm1  ;;  %vm2762_vm0 = vcmp.ge.s32.totalorder %v2598_v21, %v5593_v16  ;;  %vm2923_vm1 = vcmp.lt.s32.totalorder %v2598_v21, %v5600_v41  ;;  %v2432_v21 = vadd.s32 696, %v5582_v61 }
 0x30d   : > { %vm3118_vm11 = vmand %vm2797_vm4, %vm2958_vm5  ;;  %vm2763_vm4 = vcmp.ge.s32.totalorder %v2599_v38, %v5593_v16  ;;  %vm2924_vm5 = vcmp.lt.s32.totalorder %v2599_v38, %v5600_v41  ;;  %v2447_v38 = vadd.s32 816, %v5582_v61 }
 0x30e   : > { %vm4519_vm14 = vmpackc.low %vm3118_vm11, %vm3117_vm8  ;;  %vm2778_vm8 = vcmp.ge.s32.totalorder %v2614_v36, %v5593_v16  ;;  %v2593_v34 = vadd.s32 %v5585_v23, %v2432_v21 }
 0x30f   : > { %vm3067_vm15 = vmand %vm2746_vm9, %vm2907_vm10  ;;  %vm2939_vm10 = vcmp.lt.s32.totalorder %v2614_v36, %v5600_v41  ;;  %3609 = vmatmul.bf16.vlgmr.msra.gmra.mxu3 %v3555_v60  ;;  %v2592_v36 = vadd.s32 %v5585_v23, %v2431_v24  ;;  %v2608_v44 = vadd.s32 %v5585_v23, %v2447_v38  ;;  %v2607_v60 = vadd.s32 %v5585_v23, %v2446_v0 }
 0x310   : > { %4520 = vmatpush.bf16.msk.msrb.mxu3 %vm4519_vm14, %v4710_v48  ;;  %vm3068_vm2 = vmand %vm2747_vm12, %vm2908_vm13  ;;  %vm2779_vm12 = vcmp.ge.s32.totalorder %v2615_v45, %v5593_v16  ;;  %vm2940_vm13 = vcmp.lt.s32.totalorder %v2615_v45, %v5600_v41  ;;  %v2463_v45 = vadd.s32 944, %v5582_v61 }
 0x311   : > { %vm4473_vm7 = vmpackc.low %vm3068_vm2, %vm3067_vm15 }
 0x312   : > { %4474 = vmatpush.bf16.msk.msrb.mxu0 %vm4473_vm7, %v4710_v48  ;;  %vm3083_vm9 = vmand %vm2762_vm0, %vm2923_vm1  ;;  %vm2794_vm0 = vcmp.ge.s32.totalorder %v2630_v50, %v5593_v16  ;;  %vm2955_vm1 = vcmp.lt.s32.totalorder %v2630_v50, %v5600_v41  ;;  %v2464_v50 = vadd.s32 952, %v5582_v61  ;;  %v2624_v46 = vadd.s32 %v5585_v23, %v2463_v45 }
 0x313   : > { %vm3084_vm11 = vmand %vm2763_vm4, %vm2924_vm5  ;;  %vm2795_vm4 = vcmp.ge.s32.totalorder %v2631_v33, %v5593_v16  ;;  %vm2956_vm5 = vcmp.lt.s32.totalorder %v2631_v33, %v5600_v41  ;;  %v2413_v33 = vadd.s32 544, %v5582_v61 }
 0x314   : > { %vm4489_vm14 = vmpackc.low %vm3084_vm11, %vm3083_vm9  ;;  %vm2744_vm9 = vcmp.ge.s32.totalorder %v2580_v39, %v5593_v16 }
 0x315   : > { %4490 = vmatpush.bf16.msk.msrb.mxu1 %vm4489_vm14, %v4710_v48  ;;  %vm3099_vm15 = vmand %vm2778_vm8, %vm2939_vm10  ;;  %vm2905_vm10 = vcmp.lt.s32.totalorder %v2580_v39, %v5600_v41  ;;  %v2625_v39 = vadd.s32 %v5585_v23, %v2464_v50 }
 0x316   : > { %vm3100_vm2 = vmand %vm2779_vm12, %vm2940_vm13  ;;  %vm2745_vm12 = vcmp.ge.s32.totalorder %v2581_v9, %v5593_v16  ;;  %vm2906_vm13 = vcmp.lt.s32.totalorder %v2581_v9, %v5600_v41  ;;  %v2574_v9 = vadd.s32 %v5585_v23, %v2413_v33 }
 0x317   : > { %vm4505_vm7 = vmpackc.low %vm3100_vm2, %vm3099_vm15  ;;  %vm2760_vm15 = vcmp.ge.s32.totalorder %v2596_v56, %v5593_v16 }
 0x318   : > { %4506 = vmatpush.bf16.msk.msrb.mxu2 %vm4505_vm7, %v4710_v48  ;;  %vm3115_vm8 = vmand %vm2794_vm0, %vm2955_vm1  ;;  %vm2921_vm1 = vcmp.lt.s32.totalorder %v2596_v56, %v5600_v41  ;;  %v2430_v56 = vadd.s32 680, %v5582_v61 }
 0x319   : > { %vm3116_vm11 = vmand %vm2795_vm4, %vm2956_vm5  ;;  %vm2761_vm4 = vcmp.ge.s32.totalorder %v2597_v55, %v5593_v16  ;;  %vm2922_vm5 = vcmp.lt.s32.totalorder %v2597_v55, %v5600_v41  ;;  %v2590_v55 = vadd.s32 %v5585_v23, %v2429_v58  ;;  %v2457_v58 = vadd.s32 896, %v5582_v61 }
 0x31a   : > { %vm4521_vm14 = vmpackc.low %vm3116_vm11, %vm3115_vm8 }
 0x31b   : > { %4522 = vmatpush.bf16.msk.msrb.mxu3 %vm4521_vm14, %v4710_v48  ;;  %vm3065_vm0 = vmand %vm2744_vm9, %vm2905_vm10  ;;  %vm2776_vm9 = vcmp.ge.s32.totalorder %v2612_v1, %v5593_v16  ;;  %vm2937_vm10 = vcmp.lt.s32.totalorder %v2612_v1, %v5600_v41  ;;  %v2591_v1 = vadd.s32 %v5585_v23, %v2430_v56  ;;  %v2458_v56 = vadd.s32 904, %v5582_v61 }
 0x31c   : > { %vm3066_vm2 = vmand %vm2745_vm12, %vm2906_vm13  ;;  %vm2777_vm12 = vcmp.ge.s32.totalorder %v2613_v3, %v5593_v16  ;;  %vm2938_vm13 = vcmp.lt.s32.totalorder %v2613_v3, %v5600_v41  ;;  %v2606_v3 = vadd.s32 %v5585_v23, %v2445_v27  ;;  %v2618_v0 = vadd.s32 %v5585_v23, %v2457_v58 }
 0x31d   : > { %vm4475_vm7 = vmpackc.low %vm3066_vm2, %vm3065_vm0  ;;  %vm2792_vm0 = vcmp.ge.s32.totalorder %v2628_v5, %v5593_v16  ;;  %v2476_v58 = vadd.s32 1048, %v5582_v61 }
 0x31e   : > { %4476 = vmatpush.bf16.msk.msrb.mxu0 %vm4475_vm7, %v4710_v48  ;;  %vm3081_vm8 = vmand %vm2760_vm15, %vm2921_vm1  ;;  %vm2953_vm1 = vcmp.lt.s32.totalorder %v2628_v5, %v5600_v41  ;;  %v2622_v5 = vadd.s32 %v5585_v23, %v2461_v2  ;;  %v2486_v2 = vadd.s32 1128, %v5582_v61 }
 0x31f   : > { %vm3082_vm11 = vmand %vm2761_vm4, %vm2922_vm5  ;;  %vm2793_vm4 = vcmp.ge.s32.totalorder %v2629_v63, %v5593_v16  ;;  %vm2954_vm5 = vcmp.lt.s32.totalorder %v2629_v63, %v5600_v41  ;;  %v2623_v63 = vadd.s32 %v5585_v23, %v2462_v30  ;;  %v2501_v30 = vadd.s32 1248, %v5582_v61 }
 0x320   : > { %vm4491_vm14 = vmpackc.low %vm3082_vm11, %vm3081_vm8 }
 0x321   : > { %4492 = vmatpush.bf16.msk.msrb.mxu1 %vm4491_vm14, %v4710_v48  ;;  %vm3097_vm15 = vmand %vm2776_vm9, %vm2937_vm10  ;;  %vm2742_vm9 = vcmp.ge.s32.totalorder %v2578_v13, %v5593_v16  ;;  %vm2903_vm10 = vcmp.lt.s32.totalorder %v2578_v13, %v5600_v41  ;;  %v2428_v13 = vadd.s32 664, %v5582_v61 }
 0x322   : > { %vm3098_vm2 = vmand %vm2777_vm12, %vm2938_vm13  ;;  %vm2743_vm12 = vcmp.ge.s32.totalorder %v2579_v14, %v5593_v16  ;;  %vm2904_vm13 = vcmp.lt.s32.totalorder %v2579_v14, %v5600_v41  ;;  %v2443_v14 = vadd.s32 784, %v5582_v61 }
 0x323   : > { %vm4507_vm7 = vmpackc.low %vm3098_vm2, %vm3097_vm15  ;;  %v2589_v15 = vadd.s32 %v5585_v23, %v2428_v13  ;;  %v2499_v13 = vadd.s32 1232, %v5582_v61 }
 0x324   : > { %4508 = vmatpush.bf16.msk.msrb.mxu2 %vm4507_vm7, %v4710_v48  ;;  %vm3113_vm8 = vmand %vm2792_vm0, %vm2953_vm1  ;;  %vm2758_vm0 = vcmp.ge.s32.totalorder %v2594_v7, %v5593_v16  ;;  %vm2919_vm1 = vcmp.lt.s32.totalorder %v2594_v7, %v5600_v41  ;;  %v2444_v7 = vadd.s32 792, %v5582_v61  ;;  %v2604_v8 = vadd.s32 %v5585_v23, %v2443_v14 }
 0x325   : > { %vm3114_vm11 = vmand %vm2793_vm4, %vm2954_vm5  ;;  %vm2759_vm4 = vcmp.ge.s32.totalorder %v2595_v17, %v5593_v16  ;;  %vm2920_vm5 = vcmp.lt.s32.totalorder %v2595_v17, %v5600_v41  ;;  %v2459_v17 = vadd.s32 912, %v5582_v61  ;;  %v2644_v14 = vadd.s32 %v5585_v23, %v2483_v35 }
 0x326   : > { %vm4523_vm14 = vmpackc.low %vm3114_vm11, %vm3113_vm8  ;;  %v2605_v28 = vadd.s32 %v5585_v23, %v2444_v7  ;;  %v2645_v7 = vadd.s32 %v5585_v23, %v2484_v11 }
 0x327   : > { %4524 = vmatpush.bf16.msk.msrb.mxu3 %vm4523_vm14, %v4710_v48  ;;  %vm3063_vm15 = vmand %vm2742_vm9, %vm2903_vm10  ;;  %vm2774_vm9 = vcmp.ge.s32.totalorder %v2610_v20, %v5593_v16  ;;  %vm2935_vm10 = vcmp.lt.s32.totalorder %v2610_v20, %v5600_v41  ;;  %v2460_v20 = vadd.s32 920, %v5582_v61  ;;  %v2620_v32 = vadd.s32 %v5585_v23, %v2459_v17 }
 0x328   : > { %vm3064_vm2 = vmand %vm2743_vm12, %vm2904_vm13  ;;  %vm2775_vm12 = vcmp.ge.s32.totalorder %v2611_v52, %v5593_v16  ;;  %vm2936_vm13 = vcmp.lt.s32.totalorder %v2611_v52, %v5600_v41  ;;  %v2409_v52 = vadd.s32 512, %v5582_v61  ;;  %v2660_v17 = vadd.s32 %v5585_v23, %v2499_v13 }
 0x329   : > { %vm4477_vm7 = vmpackc.low %vm3064_vm2, %vm3063_vm15  ;;  %v2621_v43 = vadd.s32 %v5585_v23, %v2460_v20 }
 0x32a   : > { %4478 = vmatpush.bf16.msk.msrb.mxu0 %vm4477_vm7, %v4710_v48  ;;  %vm3079_vm8 = vmand %vm2758_vm0, %vm2919_vm1  ;;  %vm2790_vm0 = vcmp.ge.s32.totalorder %v2626_v18, %v5593_v16  ;;  %vm2951_vm1 = vcmp.lt.s32.totalorder %v2626_v18, %v5600_v41  ;;  %v2410_v18 = vadd.s32 520, %v5582_v61  ;;  %v2570_v24 = vadd.s32 %v5585_v23, %v2409_v52 }
 0x32b   : > { %vm3080_vm11 = vmand %vm2759_vm4, %vm2920_vm5  ;;  %vm2791_vm4 = vcmp.ge.s32.totalorder %v2627_v6, %v5593_v16  ;;  %vm2952_vm5 = vcmp.lt.s32.totalorder %v2627_v6, %v5600_v41  ;;  %v2425_v6 = vadd.s32 640, %v5582_v61 }
 0x32c   : > { %vm4493_vm14 = vmpackc.low %vm3080_vm11, %vm3079_vm8  ;;  %v2571_v21 = vadd.s32 %v5585_v23, %v2410_v18 }
 0x32d   : > { %4494 = vmatpush.bf16.msk.msrb.mxu1 %vm4493_vm14, %v4710_v48  ;;  %vm3095_vm15 = vmand %vm2774_vm9, %vm2935_vm10  ;;  %vm2740_vm9 = vcmp.ge.s32.totalorder %v2576_v29, %v5593_v16  ;;  %vm2901_vm10 = vcmp.lt.s32.totalorder %v2576_v29, %v5600_v41  ;;  %v2426_v29 = vadd.s32 648, %v5582_v61  ;;  %v2586_v38 = vadd.s32 %v5585_v23, %v2425_v6 }
 0x32e   : > { %vm3096_vm2 = vmand %vm2775_vm12, %vm2936_vm13  ;;  %vm2741_vm12 = vcmp.ge.s32.totalorder %v2577_v26, %v5593_v16  ;;  %vm2902_vm13 = vcmp.lt.s32.totalorder %v2577_v26, %v5600_v41  ;;  %v2441_v26 = vadd.s32 768, %v5582_v61 }
 0x32f   : > { %vm4509_vm7 = vmpackc.low %vm3096_vm2, %vm3095_vm15  ;;  %v2587_v49 = vadd.s32 %v5585_v23, %v2426_v29 }
 0x330   : > { %4510 = vmatpush.bf16.msk.msrb.mxu2 %vm4509_vm7, %v4710_v48  ;;  %vm3111_vm8 = vmand %vm2790_vm0, %vm2951_vm1  ;;  %vm2756_vm0 = vcmp.ge.s32.totalorder %v2592_v36, %v5593_v16  ;;  %vm2917_vm1 = vcmp.lt.s32.totalorder %v2592_v36, %v5600_v41  ;;  %v2442_v36 = vadd.s32 776, %v5582_v61  ;;  %v2602_v45 = vadd.s32 %v5585_v23, %v2441_v26 }
 0x331   : > { %vm3112_vm11 = vmand %vm2791_vm4, %vm2952_vm5  ;;  %vm2757_vm4 = vcmp.ge.s32.totalorder %v2593_v34, %v5593_v16  ;;  %vm2918_vm5 = vcmp.lt.s32.totalorder %v2593_v34, %v5600_v41  ;;  %v2487_v34 = vadd.s32 1136, %v5582_v61 }
 0x332   : > { %vm4525_vm14 = vmpackc.low %vm3112_vm11, %vm3111_vm8  ;;  %v2603_v50 = vadd.s32 %v5585_v23, %v2442_v36 }
 0x333   : > { %4526 = vmatpush.bf16.msk.msrb.mxu3 %vm4525_vm14, %v4710_v48  ;;  %vm3061_vm15 = vmand %vm2740_vm9, %vm2901_vm10  ;;  %vm2772_vm9 = vcmp.ge.s32.totalorder %v2608_v44, %v5593_v16  ;;  %vm2933_vm10 = vcmp.lt.s32.totalorder %v2608_v44, %v5600_v41  ;;  %v2488_v44 = vadd.s32 1144, %v5582_v61  ;;  %v2648_v33 = vadd.s32 %v5585_v23, %v2487_v34 }
 0x334   : > { %vm3062_vm2 = vmand %vm2741_vm12, %vm2902_vm13  ;;  %vm2773_vm12 = vcmp.ge.s32.totalorder %v2609_v47, %v5593_v16  ;;  %vm2934_vm13 = vcmp.lt.s32.totalorder %v2609_v47, %v5600_v41  ;;  %v2503_v47 = vadd.s32 1264, %v5582_v61 }
 0x335   : > { %vm4479_vm7 = vmpackc.low %vm3062_vm2, %vm3061_vm15 }
 0x336   : > { %4480 = vmatpush.bf16.msk.msrb.mxu0 %vm4479_vm7, %v4710_v48  ;;  %vm3077_vm8 = vmand %vm2756_vm0, %vm2917_vm1  ;;  %vm2788_vm0 = vcmp.ge.s32.totalorder %v2624_v46, %v5593_v16  ;;  %vm2949_vm1 = vcmp.lt.s32.totalorder %v2624_v46, %v5600_v41  ;;  %v2504_v46 = vadd.s32 1272, %v5582_v61 }
 0x337   : > { %vm3078_vm11 = vmand %vm2757_vm4, %vm2918_vm5  ;;  %vm2789_vm4 = vcmp.ge.s32.totalorder %v2625_v39, %v5593_v16  ;;  %vm2950_vm5 = vcmp.lt.s32.totalorder %v2625_v39, %v5600_v41  ;;  %v2649_v39 = vadd.s32 %v5585_v23, %v2488_v44 }
 0x338   : > { %vm4495_vm14 = vmpackc.low %vm3078_vm11, %vm3077_vm8  ;;  %v2665_v27 = vadd.s32 %v5585_v23, %v2504_v46 }
 0x339   : > { %4496 = vmatpush.bf16.msk.msrb.mxu1 %vm4495_vm14, %v4710_v48  ;;  %vm3093_vm15 = vmand %vm2772_vm9, %vm2933_vm10  ;;  %vm2738_vm9 = vcmp.ge.s32.totalorder %v2574_v9, %v5593_v16  ;;  %vm2899_vm10 = vcmp.lt.s32.totalorder %v2574_v9, %v5600_v41  ;;  %v2664_v9 = vadd.s32 %v5585_v23, %v2503_v47 }
 0x33a   : > { %vm3094_vm2 = vmand %vm2773_vm12, %vm2934_vm13  ;;  %vm2739_vm12 = vcmp.ge.s32.totalorder %v2575_v19, %v5593_v16  ;;  %vm2900_vm13 = vcmp.lt.s32.totalorder %v2575_v19, %v5600_v41  ;;  %v3557_v19 = vpack.c.bf16 %v5562_v53, %v5562_v53 }
 0x33b   : > { %vm4511_vm7 = vmpackc.low %vm3094_vm2, %vm3093_vm15 }
 0x33c   : > { %4512 = vmatpush.bf16.msk.msrb.mxu2 %vm4511_vm7, %v4710_v48  ;;  %vm3109_vm8 = vmand %vm2788_vm0, %vm2949_vm1  ;;  %vm2754_vm0 = vcmp.ge.s32.totalorder %v2590_v55, %v5593_v16  ;;  %vm2915_vm1 = vcmp.lt.s32.totalorder %v2590_v55, %v5600_v41  ;;  %v2485_v55 = vadd.s32 1120, %v5582_v61 }
 0x33d   : > { %vm3110_vm11 = vmand %vm2789_vm4, %vm2950_vm5  ;;  %vm2755_vm4 = vcmp.ge.s32.totalorder %v2591_v1, %v5593_v16  ;;  %vm2916_vm5 = vcmp.lt.s32.totalorder %v2591_v1, %v5600_v41  ;;  %v3558_v1 = vpack.c.bf16 %v5566_v51, %v5566_v51 }
 0x33e   : > { %vm4527_vm14 = vmpackc.low %vm3110_vm11, %vm3109_vm8 }
 0x33f   : > { %4528 = vmatpush.bf16.msk.msrb.mxu3 %vm4527_vm14, %v4710_v48  ;;  %vm3059_vm15 = vmand %vm2738_vm9, %vm2899_vm10  ;;  %vm2770_vm9 = vcmp.ge.s32.totalorder %v2606_v3, %v5593_v16  ;;  %vm2931_vm10 = vcmp.lt.s32.totalorder %v2606_v3, %v5600_v41  ;;  %v2619_v3 = vadd.s32 %v5585_v23, %v2458_v56  ;;  %v2491_v56 = vadd.s32 1168, %v5582_v61 }
 0x340   : > { %vm3060_vm2 = vmand %vm2739_vm12, %vm2900_vm13  ;;  %vm2771_vm12 = vcmp.ge.s32.totalorder %v2607_v60, %v5593_v16  ;;  %vm2932_vm13 = vcmp.lt.s32.totalorder %v2607_v60, %v5600_v41  ;;  %v2646_v60 = vadd.s32 %v5585_v23, %v2485_v55  ;;  %v2637_v55 = vadd.s32 %v5585_v23, %v2476_v58 }
 0x341   : > { %vm4481_vm7 = vmpackc.low %vm3060_vm2, %vm3059_vm15 }
 0x342   : > { %4482 = vmatpush.bf16.msk.msrb.mxu0 %vm4481_vm7, %v4710_v48  ;;  %vm3075_vm8 = vmand %vm2754_vm0, %vm2915_vm1  ;;  %vm2786_vm0 = vcmp.ge.s32.totalorder %v2622_v5, %v5593_v16  ;;  %vm2947_vm1 = vcmp.lt.s32.totalorder %v2622_v5, %v5600_v41  ;;  %v2647_v5 = vadd.s32 %v5585_v23, %v2486_v2  ;;  %v2474_v2 = vadd.s32 1032, %v5582_v61 }
 0x343   : > { %vm3076_vm11 = vmand %vm2755_vm4, %vm2916_vm5  ;;  %vm2787_vm4 = vcmp.ge.s32.totalorder %v2623_v63, %v5593_v16  ;;  %vm2948_vm5 = vcmp.lt.s32.totalorder %v2623_v63, %v5600_v41  ;;  %v2662_v63 = vadd.s32 %v5585_v23, %v2501_v30  ;;  %v2489_v30 = vadd.s32 1152, %v5582_v61 }
 0x344   : > { %vm4497_vm14 = vmpackc.low %vm3076_vm11, %vm3075_vm8 }
 0x345   : > { %4498 = vmatpush.bf16.msk.msrb.mxu1 %vm4497_vm14, %v4710_v48  ;;  %vm3091_vm15 = vmand %vm2770_vm9, %vm2931_vm10  ;;  %vm2736_vm9 = vcmp.ge.s32.totalorder %v2572_v12, %v5593_v16  ;;  %vm2897_vm10 = vcmp.lt.s32.totalorder %v2572_v12, %v5600_v41  ;;  %v2663_v12 = vadd.s32 %v5585_v23, %v2502_v62  ;;  %v2490_v62 = vadd.s32 1160, %v5582_v61 }
 0x346   : > { %vm3092_vm2 = vmand %vm2771_vm12, %vm2932_vm13  ;;  %vm2737_vm12 = vcmp.ge.s32.totalorder %v2573_v4, %v5593_v16  ;;  %vm2898_vm13 = vcmp.lt.s32.totalorder %v2573_v4, %v5600_v41  ;;  %v3559_v4 = vpack.c.bf16 %v5568_v54, %v5568_v54  ;;  %v2650_v35 = vadd.s32 %v5585_v23, %v2489_v30 }
 0x347   : > { %vm4513_vm7 = vmpackc.low %vm3092_vm2, %vm3091_vm15 }
 0x348   : > { %4514 = vmatpush.bf16.msk.msrb.mxu2 %vm4513_vm7, %v4710_v48  ;;  %vm3107_vm8 = vmand %vm2786_vm0, %vm2947_vm1  ;;  %vm2752_vm0 = vcmp.ge.s32.totalorder %v2588_v59, %v5593_v16  ;;  %vm2913_vm1 = vcmp.lt.s32.totalorder %v2588_v59, %v5600_v41  ;;  %v2500_v59 = vadd.s32 1240, %v5582_v61 }
 0x349   : > { %vm3108_vm11 = vmand %vm2787_vm4, %vm2948_vm5  ;;  %vm2753_vm4 = vcmp.ge.s32.totalorder %v2589_v15, %v5593_v16  ;;  %vm2914_vm5 = vcmp.lt.s32.totalorder %v2589_v15, %v5600_v41  ;;  %v2481_v15 = vadd.s32 1088, %v5582_v61 }
 0x34a   : > { %vm4529_vm14 = vmpackc.low %vm3108_vm11, %vm3107_vm8  ;;  %v2661_v20 = vadd.s32 %v5585_v23, %v2500_v59 }
 0x34b   : > { %4530 = vmatpush.bf16.msk.msrb.mxu3 %vm4529_vm14, %v4710_v48  ;;  %vm3057_vm15 = vmand %vm2736_vm9, %vm2897_vm10  ;;  %vm2768_vm9 = vcmp.ge.s32.totalorder %v2604_v8, %v5593_v16  ;;  %vm2929_vm10 = vcmp.lt.s32.totalorder %v2604_v8, %v5600_v41  ;;  %v2482_v8 = vadd.s32 1096, %v5582_v61  ;;  %v2642_v52 = vadd.s32 %v5585_v23, %v2481_v15 }
 0x34c   : > { %vm3058_vm2 = vmand %vm2737_vm12, %vm2898_vm13  ;;  %vm2769_vm12 = vcmp.ge.s32.totalorder %v2605_v28, %v5593_v16  ;;  %vm2930_vm13 = vcmp.lt.s32.totalorder %v2605_v28, %v5600_v41  ;;  %v2497_v28 = vadd.s32 1216, %v5582_v61 }
 0x34d   : > { %vm4483_vm7 = vmpackc.low %vm3058_vm2, %vm3057_vm15  ;;  %v2643_v18 = vadd.s32 %v5585_v23, %v2482_v8 }
 0x34e   : > { %4484 = vmatpush.bf16.msk.msrb.mxu0 %vm4483_vm7, %v4710_v48  ;;  %vm3073_vm8 = vmand %vm2752_vm0, %vm2913_vm1  ;;  %vm2784_vm0 = vcmp.ge.s32.totalorder %v2620_v32, %v5593_v16  ;;  %vm2945_vm1 = vcmp.lt.s32.totalorder %v2620_v32, %v5600_v41  ;;  %v2498_v32 = vadd.s32 1224, %v5582_v61  ;;  %v2658_v6 = vadd.s32 %v5585_v23, %v2497_v28 }
 0x34f   : > { %vm3074_vm11 = vmand %vm2753_vm4, %vm2914_vm5  ;;  %vm2785_vm4 = vcmp.ge.s32.totalorder %v2621_v43, %v5593_v16  ;;  %vm2946_vm5 = vcmp.lt.s32.totalorder %v2621_v43, %v5600_v41  ;;  %v2479_v43 = vadd.s32 1072, %v5582_v61 }
 0x350   : > { %vm4499_vm14 = vmpackc.low %vm3074_vm11, %vm3073_vm8  ;;  %v2659_v29 = vadd.s32 %v5585_v23, %v2498_v32 }
 0x351   : > { %4500 = vmatpush.bf16.msk.msrb.mxu1 %vm4499_vm14, %v4710_v48  ;;  %vm3089_vm15 = vmand %vm2768_vm9, %vm2929_vm10  ;;  %vm2734_vm9 = vcmp.ge.s32.totalorder %v2570_v24, %v5593_v16  ;;  %vm2895_vm10 = vcmp.lt.s32.totalorder %v2570_v24, %v5600_v41  ;;  %v2480_v24 = vadd.s32 1080, %v5582_v61  ;;  %v2640_v26 = vadd.s32 %v5585_v23, %v2479_v43 }
 0x352   : > { %vm3090_vm2 = vmand %vm2769_vm12, %vm2930_vm13  ;;  %vm2735_vm12 = vcmp.ge.s32.totalorder %v2571_v21, %v5593_v16  ;;  %vm2896_vm13 = vcmp.lt.s32.totalorder %v2571_v21, %v5600_v41  ;;  %v2495_v21 = vadd.s32 1200, %v5582_v61 }
 0x353   : > { %vm4515_vm7 = vmpackc.low %vm3090_vm2, %vm3089_vm15  ;;  %v2641_v36 = vadd.s32 %v5585_v23, %v2480_v24 }
 0x354   : > { %4516 = vmatpush.bf16.msk.msrb.mxu2 %vm4515_vm7, %v4710_v48  ;;  %vm3105_vm8 = vmand %vm2784_vm0, %vm2945_vm1  ;;  %vm2750_vm0 = vcmp.ge.s32.totalorder %v2586_v38, %v5593_v16  ;;  %vm2911_vm1 = vcmp.lt.s32.totalorder %v2586_v38, %v5600_v41  ;;  %v2496_v38 = vadd.s32 1208, %v5582_v61  ;;  %v2656_v34 = vadd.s32 %v5585_v23, %v2495_v21 }
 0x355   : > { %vm3106_vm11 = vmand %vm2785_vm4, %vm2946_vm5  ;;  %vm2751_vm4 = vcmp.ge.s32.totalorder %v2587_v49, %v5593_v16  ;;  %vm2912_vm5 = vcmp.lt.s32.totalorder %v2587_v49, %v5600_v41  ;;  %v2477_v49 = vadd.s32 1056, %v5582_v61 }
 0x356   : > { %vm4531_vm14 = vmpackc.low %vm3106_vm11, %vm3105_vm8  ;;  %v2657_v44 = vadd.s32 %v5585_v23, %v2496_v38 }
 0x357   : > { %4532 = vmatpush.bf16.msk.msrb.mxu3 %vm4531_vm14, %v4710_v48  ;;  %vm3055_vm15 = vmand %vm2734_vm9, %vm2895_vm10  ;;  %vm2766_vm9 = vcmp.ge.s32.totalorder %v2602_v45, %v5593_v16  ;;  %vm2927_vm10 = vcmp.lt.s32.totalorder %v2602_v45, %v5600_v41  ;;  %v2478_v45 = vadd.s32 1064, %v5582_v61  ;;  %v2638_v47 = vadd.s32 %v5585_v23, %v2477_v49 }
 0x358   : > { %vm3056_vm2 = vmand %vm2735_vm12, %vm2896_vm13  ;;  %vm2767_vm12 = vcmp.ge.s32.totalorder %v2603_v50, %v5593_v16  ;;  %vm2928_vm13 = vcmp.lt.s32.totalorder %v2603_v50, %v5600_v41  ;;  %v2493_v50 = vadd.s32 1184, %v5582_v61 }
 0x359   : > { %vm4485_vm7 = vmpackc.low %vm3056_vm2, %vm3055_vm15  ;;  %v2639_v46 = vadd.s32 %v5585_v23, %v2478_v45 }
 0x35a   : > { %4486 = vmatpush.bf16.msk.msrb.mxu0 %vm4485_vm7, %v4710_v48  ;;  %vm3071_vm8 = vmand %vm2750_vm0, %vm2911_vm1  ;;  %vm2812_vm0 = vcmp.ge.s32.totalorder %v2648_v33, %v5593_v16  ;;  %vm2973_vm1 = vcmp.lt.s32.totalorder %v2648_v33, %v5600_v41  ;;  %v2494_v33 = vadd.s32 1192, %v5582_v61 }
 0x35b   : > { %vm3072_vm11 = vmand %vm2751_vm4, %vm2912_vm5  ;;  %vm2813_vm4 = vcmp.ge.s32.totalorder %v2649_v39, %v5593_v16  ;;  %vm2974_vm5 = vcmp.lt.s32.totalorder %v2649_v39, %v5600_v41  ;;  %v2654_v39 = vadd.s32 %v5585_v23, %v2493_v50 }
 0x35c   : > { %vm4501_vm14 = vmpackc.low %vm3072_vm11, %vm3071_vm8 }
 0x35d   : > { %4502 = vmatpush.bf16.msk.msrb.mxu1 %vm4501_vm14, %v4710_v48  ;;  %vm3087_vm15 = vmand %vm2766_vm9, %vm2927_vm10  ;;  %3622 = vmatmul.bf16.vlgmr.msrb.gmra.mxu0 %v3556_v22  ;;  %vm2828_vm9 = vcmp.ge.s32.totalorder %v2664_v9, %v5593_v16  ;;  %vm2989_vm10 = vcmp.lt.s32.totalorder %v2664_v9, %v5600_v41  ;;  %v2475_v22 = vadd.s32 1040, %v5582_v61  ;;  %v2655_v9 = vadd.s32 %v5585_v23, %v2494_v33 }
 0x35e   : > { %vm3088_vm2 = vmand %vm2767_vm12, %vm2928_vm13  ;;  %vm2829_vm12 = vcmp.ge.s32.totalorder %v2665_v27, %v5593_v16  ;;  %vm2990_vm13 = vcmp.lt.s32.totalorder %v2665_v27, %v5600_v41  ;;  %v2492_v27 = vadd.s32 1176, %v5582_v61 }
 0x35f   : > { %vm4517_vm7 = vmpackc.low %vm3088_vm2, %vm3087_vm15 }
 0x360   : > { %4518 = vmatpush.bf16.msk.msrb.mxu2 %vm4517_vm7, %v4710_v48  ;;  %vm3133_vm8 = vmand %vm2812_vm0, %vm2973_vm1  ;;  %3635 = vmatmul.bf16.vlgmr.msrb.gmra.mxu1 %v3557_v19  ;;  %vm2782_vm0 = vcmp.ge.s32.totalorder %v2618_v0, %v5593_v16  ;;  %vm2943_vm1 = vcmp.lt.s32.totalorder %v2618_v0, %v5600_v41  ;;  %v2636_v19 = vadd.s32 %v5585_v23, %v2475_v22  ;;  %v2473_v0 = vadd.s32 1024, %v5582_v61 }
 0x361   : > { %vm3134_vm11 = vmand %vm2813_vm4, %vm2974_vm5  ;;  %vm2783_vm4 = vcmp.ge.s32.totalorder %v2619_v3, %v5593_v16  ;;  %vm2944_vm5 = vcmp.lt.s32.totalorder %v2619_v3, %v5600_v41  ;;  %v2653_v3 = vadd.s32 %v5585_v23, %v2492_v27  ;;  %v2651_v61 = vadd.s32 %v5585_v23, %v2490_v62 }
 0x362   : > { %vm4535_vm14 = vmpackc.low %vm3134_vm11, %vm3133_vm8 }
 0x363   : > { %4536 = vmatpush.bf16.msk.msra.mxu0 %vm4535_vm14, %v4710_v48  ;;  %vm3149_vm15 = vmand %vm2828_vm9, %vm2989_vm10  ;;  %3648 = vmatmul.bf16.vlgmr.msrb.gmra.mxu2 %v3558_v1  ;;  %vm2810_vm9 = vcmp.ge.s32.totalorder %v2646_v60, %v5593_v16  ;;  %vm2971_vm10 = vcmp.lt.s32.totalorder %v2646_v60, %v5600_v41  ;;  %v2652_v1 = vadd.s32 %v5585_v23, %v2491_v56 }
 0x364   : > { %vm3150_vm2 = vmand %vm2829_vm12, %vm2990_vm13  ;;  %vm2811_vm12 = vcmp.ge.s32.totalorder %v2647_v5, %v5593_v16  ;;  %vm2972_vm13 = vcmp.lt.s32.totalorder %v2647_v5, %v5600_v41  ;;  %v2634_v60 = vadd.s32 %v5585_v23, %v2473_v0  ;;  %v2635_v5 = vadd.s32 %v5585_v23, %v2474_v2 }
 0x365   : > { %vm4551_vm7 = vmpackc.low %vm3150_vm2, %vm3149_vm15  ;;  %vm2976_vm6 = vcmp.lt.s32.totalorder %v2651_v61, %v5600_v41  ;;  %v3560_v23 = vpack.c.bf16 %v5577_v10, %v5577_v10 }
 0x366   : > { %4552 = vmatpush.bf16.msk.msra.mxu1 %vm4551_vm7, %v4710_v48  ;;  %vm3103_vm8 = vmand %vm2782_vm0, %vm2943_vm1  ;;  %vm2826_vm0 = vcmp.ge.s32.totalorder %v2662_v63, %v5593_v16  ;;  %vm2987_vm1 = vcmp.lt.s32.totalorder %v2662_v63, %v5600_v41  ;;  %v3561_v63 = vpack.c.bf16 %v5579_v40, %v5579_v40 }
 0x367   : > { %vm3104_vm11 = vmand %vm2783_vm4, %vm2944_vm5  ;;  %vm2827_vm4 = vcmp.ge.s32.totalorder %v2663_v12, %v5593_v16  ;;  %vm2988_vm5 = vcmp.lt.s32.totalorder %v2663_v12, %v5600_v41 }
 0x368   : > { %vm4533_vm14 = vmpackc.low %vm3104_vm11, %vm3103_vm8 }
 0x369   : > { %4534 = vmatpush.bf16.msk.msrb.mxu3 %vm4533_vm14, %v4710_v48  ;;  %vm3131_vm15 = vmand %vm2810_vm9, %vm2971_vm10  ;;  %vm2808_vm9 = vcmp.ge.s32.totalorder %v2644_v14, %v5593_v16  ;;  %vm2969_vm10 = vcmp.lt.s32.totalorder %v2644_v14, %v5600_v41 }
 0x36a   : > { %vm3132_vm2 = vmand %vm2811_vm12, %vm2972_vm13  ;;  %vm2809_vm12 = vcmp.ge.s32.totalorder %v2645_v7, %v5593_v16  ;;  %vm2970_vm13 = vcmp.lt.s32.totalorder %v2645_v7, %v5600_v41 }
 0x36b   : > { %vm4537_vm7 = vmpackc.low %vm3132_vm2, %vm3131_vm15 }
 0x36c   : > { %4538 = vmatpush.bf16.msk.msra.mxu0 %vm4537_vm7, %v4710_v48  ;;  %vm3147_vm8 = vmand %vm2826_vm0, %vm2987_vm1  ;;  %3661 = vmatmul.bf16.vlgmr.msrb.gmra.mxu3 %v3559_v4  ;;  %vm2824_vm0 = vcmp.ge.s32.totalorder %v2660_v17, %v5593_v16  ;;  %vm2985_vm1 = vcmp.lt.s32.totalorder %v2660_v17, %v5600_v41 }
 0x36d   : > { %vm3148_vm11 = vmand %vm2827_vm4, %vm2988_vm5  ;;  %vm2825_vm4 = vcmp.ge.s32.totalorder %v2661_v20, %v5593_v16  ;;  %vm2986_vm5 = vcmp.lt.s32.totalorder %v2661_v20, %v5600_v41 }
 0x36e   : > { %vm4553_vm14 = vmpackc.low %vm3148_vm11, %vm3147_vm8 }
 0x36f   : > { %4554 = vmatpush.bf16.msk.msra.mxu1 %vm4553_vm14, %v4710_v48  ;;  %vm3129_vm15 = vmand %vm2808_vm9, %vm2969_vm10  ;;  %vm2806_vm9 = vcmp.ge.s32.totalorder %v2642_v52, %v5593_v16  ;;  %vm2967_vm10 = vcmp.lt.s32.totalorder %v2642_v52, %v5600_v41 }
 0x370   : > { %vm3130_vm2 = vmand %vm2809_vm12, %vm2970_vm13  ;;  %vm2807_vm12 = vcmp.ge.s32.totalorder %v2643_v18, %v5593_v16  ;;  %vm2968_vm13 = vcmp.lt.s32.totalorder %v2643_v18, %v5600_v41 }
 0x371   : > { %vm4539_vm7 = vmpackc.low %vm3130_vm2, %vm3129_vm15 }
 0x372   : > { %4540 = vmatpush.bf16.msk.msra.mxu0 %vm4539_vm7, %v4710_v48  ;;  %vm3145_vm8 = vmand %vm2824_vm0, %vm2985_vm1  ;;  %vm2822_vm0 = vcmp.ge.s32.totalorder %v2658_v6, %v5593_v16  ;;  %vm2983_vm1 = vcmp.lt.s32.totalorder %v2658_v6, %v5600_v41 }
 0x373   : > { %vm3146_vm11 = vmand %vm2825_vm4, %vm2986_vm5  ;;  %vm2823_vm4 = vcmp.ge.s32.totalorder %v2659_v29, %v5593_v16  ;;  %vm2984_vm5 = vcmp.lt.s32.totalorder %v2659_v29, %v5600_v41 }
 0x374   : > { %vm4555_vm14 = vmpackc.low %vm3146_vm11, %vm3145_vm8 }
 0x375   : > { %4556 = vmatpush.bf16.msk.msra.mxu1 %vm4555_vm14, %v4710_v48  ;;  %vm3127_vm15 = vmand %vm2806_vm9, %vm2967_vm10  ;;  %vm2804_vm9 = vcmp.ge.s32.totalorder %v2640_v26, %v5593_v16  ;;  %vm2965_vm10 = vcmp.lt.s32.totalorder %v2640_v26, %v5600_v41 }
 0x376   : > { %vm3128_vm2 = vmand %vm2807_vm12, %vm2968_vm13  ;;  %vm2805_vm12 = vcmp.ge.s32.totalorder %v2641_v36, %v5593_v16  ;;  %vm2966_vm13 = vcmp.lt.s32.totalorder %v2641_v36, %v5600_v41  ;;  %v3551_v36 = vld [vmem:[#allocation2] sm:$0xf] }
 0x377   : > { %vm4541_vm7 = vmpackc.low %vm3128_vm2, %vm3127_vm15 }
 0x378   : > { %4542 = vmatpush.bf16.msk.msra.mxu0 %vm4541_vm7, %v4710_v48  ;;  %vm3143_vm8 = vmand %vm2822_vm0, %vm2983_vm1  ;;  %vm2820_vm0 = vcmp.ge.s32.totalorder %v2656_v34, %v5593_v16  ;;  %vm2981_vm1 = vcmp.lt.s32.totalorder %v2656_v34, %v5600_v41 }
 0x379   : > { %vm3144_vm11 = vmand %vm2823_vm4, %vm2984_vm5  ;;  %vm2821_vm4 = vcmp.ge.s32.totalorder %v2657_v44, %v5593_v16  ;;  %vm2982_vm5 = vcmp.lt.s32.totalorder %v2657_v44, %v5600_v41 }
 0x37a   : > { %vm4557_vm14 = vmpackc.low %vm3144_vm11, %vm3143_vm8 }
 0x37b   : > { %4558 = vmatpush.bf16.msk.msra.mxu1 %vm4557_vm14, %v4710_v48  ;;  %vm3125_vm15 = vmand %vm2804_vm9, %vm2965_vm10  ;;  %vm2802_vm9 = vcmp.ge.s32.totalorder %v2638_v47, %v5593_v16  ;;  %vm2963_vm10 = vcmp.lt.s32.totalorder %v2638_v47, %v5600_v41 }
 0x37c   : > { %vm3126_vm2 = vmand %vm2805_vm12, %vm2966_vm13  ;;  %vm2803_vm12 = vcmp.ge.s32.totalorder %v2639_v46, %v5593_v16  ;;  %vm2964_vm13 = vcmp.lt.s32.totalorder %v2639_v46, %v5600_v41 }
 0x37d   : > { %vm4543_vm7 = vmpackc.low %vm3126_vm2, %vm3125_vm15  ;;  %v3584_v12 = vpop.f32.mrf.mxu1 }
 0x37e   : > { %4544 = vmatpush.bf16.msk.msra.mxu0 %vm4543_vm7, %v4710_v48  ;;  %vm3141_vm8 = vmand %vm2820_vm0, %vm2981_vm1  ;;  %vm2818_vm0 = vcmp.ge.s32.totalorder %v2654_v39, %v5593_v16  ;;  %vm2979_vm1 = vcmp.lt.s32.totalorder %v2654_v39, %v5600_v41 }
 0x37f   : > { %vm3142_vm11 = vmand %vm2821_vm4, %vm2982_vm5  ;;  %vm2819_vm4 = vcmp.ge.s32.totalorder %v2655_v9, %v5593_v16  ;;  %vm2980_vm5 = vcmp.lt.s32.totalorder %v2655_v9, %v5600_v41 }
 0x380   : > { %vm4559_vm14 = vmpackc.low %vm3142_vm11, %vm3141_vm8 }
 0x381   : > { %4560 = vmatpush.bf16.msk.msra.mxu1 %vm4559_vm14, %v4710_v48  ;;  %vm3123_vm15 = vmand %vm2802_vm9, %vm2963_vm10  ;;  %vm2800_vm9 = vcmp.ge.s32.totalorder %v2636_v19, %v5593_v16  ;;  %vm2961_vm10 = vcmp.lt.s32.totalorder %v2636_v19, %v5600_v41 }
 0x382   : > { %vm3124_vm2 = vmand %vm2803_vm12, %vm2964_vm13  ;;  %vm2801_vm12 = vcmp.ge.s32.totalorder %v2637_v55, %v5593_v16  ;;  %vm2962_vm13 = vcmp.lt.s32.totalorder %v2637_v55, %v5600_v41 }
 0x383   : > { %vm4545_vm7 = vmpackc.low %vm3124_vm2, %vm3123_vm15 }
 0x384   : > { %4546 = vmatpush.bf16.msk.msra.mxu0 %vm4545_vm7, %v4710_v48  ;;  %vm3139_vm8 = vmand %vm2818_vm0, %vm2979_vm1  ;;  %vm2816_vm0 = vcmp.ge.s32.totalorder %v2652_v1, %v5593_v16  ;;  %vm2977_vm1 = vcmp.lt.s32.totalorder %v2652_v1, %v5600_v41 }
 0x385   : > { %vm3140_vm11 = vmand %vm2819_vm4, %vm2980_vm5  ;;  %vm2817_vm4 = vcmp.ge.s32.totalorder %v2653_v3, %v5593_v16  ;;  %vm2978_vm5 = vcmp.lt.s32.totalorder %v2653_v3, %v5600_v41  ;;  %v3586_v15 = vpop.f32.mrf.mxu1 }
 0x386   : > { %vm4561_vm14 = vmpackc.low %vm3140_vm11, %vm3139_vm8  ;;  %vm2798_vm11 = vcmp.ge.s32.totalorder %v2634_v60, %v5593_v16  ;;  %v3597_v11 = vpop.f32.mrf.mxu2 }
 0x387   : > { %4562 = vmatpush.bf16.msk.msra.mxu1 %vm4561_vm14, %v4710_v48  ;;  %vm3121_vm15 = vmand %vm2800_vm9, %vm2961_vm10  ;;  %vm2959_vm9 = vcmp.lt.s32.totalorder %v2634_v60, %v5600_v41  ;;  %vm2799_vm14 = vcmp.ge.s32.totalorder %v2635_v5, %v5593_v16 }
 0x388   : > { %vm3122_vm2 = vmand %vm2801_vm12, %vm2962_vm13  ;;  %vm2960_vm12 = vcmp.lt.s32.totalorder %v2635_v5, %v5600_v41 }
 0x389   : > { %vm4547_vm7 = vmpackc.low %vm3122_vm2, %vm3121_vm15  ;;  %vm2814_vm2 = vcmp.ge.s32.totalorder %v2650_v35, %v5593_v16 }
 0x38a   : > { %4548 = vmatpush.bf16.msk.msra.mxu0 %vm4547_vm7, %v4710_v48  ;;  %vm3137_vm8 = vmand %vm2816_vm0, %vm2977_vm1  ;;  %vm2975_vm7 = vcmp.lt.s32.totalorder %v2650_v35, %v5600_v41  ;;  %vm2815_vm1 = vcmp.ge.s32.totalorder %v2651_v61, %v5593_v16  ;;  %v3571_v16 = vpop.f32.mrf.mxu0 }
 0x38b   : > { %vm3138_vm10 = vmand %vm2817_vm4, %vm2978_vm5  ;;  %v3585_v41 = vadd.f32 %v3584_v12, %v3571_v16 }
 0x38c   : > { %vm4563_vm13 = vmpackc.low %vm3138_vm10, %vm3137_vm8 }
 0x38d   : > { %4564 = vmatpush.bf16.msk.msra.mxu1 %vm4563_vm13, %v4710_v48  ;;  %vm3119_vm15 = vmand %vm2798_vm11, %vm2959_vm9  ;;  %v3598_v4 = vadd.f32 %v3597_v11, %v3585_v41 }
 0x38e   : > { %vm3120_vm0 = vmand %vm2799_vm14, %vm2960_vm12  ;;  %v3599_v13 = vpop.f32.mrf.mxu2 }
 0x38f   : > { %vm4549_vm3 = vmpackc.low %vm3120_vm0, %vm3119_vm15 }
 0x390   : > { %4550 = vmatpush.bf16.msk.msra.mxu0 %vm4549_vm3, %v4710_v48  ;;  %vm3135_vm4 = vmand %vm2814_vm2, %vm2975_vm7  ;;  %vm3693_vm3 = vcmask 11264  }
 0x391   : > { %vm3136_vm5 = vmand %vm2815_vm1, %vm2976_vm6 }
 0x392   : > { %vm4565_vm8 = vmpackc.low %vm3136_vm5, %vm3135_vm4  ;;  %v3610_v14 = vpop.f32.mrf.mxu3  ;;  %v3573_v7 = vpop.f32.mrf.mxu0 }
 0x393   : > { %4566 = vmatpush.bf16.msk.msra.mxu1 %vm4565_vm8, %v4710_v48  ;;  %3674 = vmatmul.bf16.vlgmr.msra.gmra.mxu0 %v3560_v23  ;;  %v3611_v59 = vadd.f32 %v3610_v14, %v3598_v4 }
 0x396   : > { %3687 = vmatmul.bf16.vlgmr.msra.gmra.mxu1 %v3561_v63 }
 0x39a   : > { %v3612_v17 = vpop.f32.mrf.mxu3 }
 0x3da   : > { %v3623_v8 = vpop.f32.mrf.mxu0 }
 0x3db   : > { %v3624_v6 = vadd.f32 %v3623_v8, %v3611_v59 }
 0x3dd   : > { %v3636_v20 = vpop.f32.mrf.mxu1 }
 0x3de   : > { %v3637_v24 = vadd.f32 %v3636_v20, %v3624_v6 }
 0x3e2   : > { %v3625_v28 = vpop.f32.mrf.mxu0 }
 0x3e5   : > { %v3638_v52 = vpop.f32.mrf.mxu1 }
 0x3e6   : > { %v3649_v32 = vpop.f32.mrf.mxu2 }
 0x3e7   : > { %v3650_v29 = vadd.f32 %v3649_v32, %v3637_v24 }
 0x3ee   : > { %v3651_v18 = vpop.f32.mrf.mxu2 }
 0x3ef   : > { %v3662_v48 = vpop.f32.mrf.mxu3 }
 0x3f0   : > { %v3663_v21 = vadd.f32 %v3662_v48, %v3650_v29 }
 0x3f7   : > { %v3664_v43 = vpop.f32.mrf.mxu3 }
 0x410   : > { %v3675_v26 = vpop.f32.mrf.mxu0 }
 0x411   : > { %v3676_v38 = vadd.f32 %v3675_v26, %v3663_v21 }
 0x413   : > { %v3688_v49 = vpop.f32.mrf.mxu1 }
 0x414   : > { %v3689_v34 = vadd.f32 %v3688_v49, %v3676_v38 }
 0x416   : > { %v3692_v45 = vadd.f32 %v3689_v34, %v3551_v36 }
 0x418   : > { %3694 = vst.msk [vmem:[#allocation2] sm:$0xf] %vm3693_vm3, %v3692_v45  ;;  %v3677_v44 = vpop.f32.mrf.mxu0 }
 0x41b   : > { %v3690_v50 = vpop.f32.mrf.mxu1 }
 0x41c PF: > { %p4567_p0 = scmp.ne.s32.totalorder %s4686_s30, 1 }
 0x41d   : > { %s3974_s24 = sshra.s32 (!%p4567_p0), %s4834_s14, 7 }
 0x41e   : > { %3698 = sbr.rel (%p4567_p0) target bundleno = 1494 (0x5d6), region = 68  ;;  %s4592_s25 = sshll.u32 (!%p4567_p0), %s3974_s24, 2 }
 0x41f   : > { %s3977_s28 = scalar_lea.vmem (!%p4567_p0), %s6553_s0, %s4592_s25 }
 0x423   : > { %v3699_v47 = vld [vmem:[#allocation2] sm:$0xf]  ;;  %vm6564_vm6 = vcmask 1043456   ;;  %v4711_v46 = vmov 0   ;;  %v3701_v22 = vld [vmem:[%s6556_s3] sm:$0x1]  ;;  %v3793_v15 = vlaneseq  ;;  %v3804_v24 = vstv %s4834_s14 }
 0x424   : > { %v3700_v33 = vmul.f32 0.0009765625, %v3699_v47  ;;  %4652 = vset.pattern.permute.xlu0 %v4711_v46  ;;  %v3702_v39 = vld [vmem:[#allocation3] sm:$0x1]  ;;  %4653 = vset.pattern.permute.xlu1 %v4711_v46  ;;  %vm6565_vm11 = vcmask 31744   ;;  %v3740_v58 = vld [vmem:[%s6559_s6] sm:$0xf] }
 0x425   : > { %3705 = vperm.xlu0 %4652, %v3702_v39   ;;  %vm3750_vm10 = vcmask 1040384   ;;  %v3739_v0 = vld [vmem:[%s6558_s5] sm:$0xf]  ;;  %vm6566_vm14 = vcmask 7168   ;;  %v4712_v60 = vmov 1   ;;  %v3979_v17 = vld [vmem:[%s3977_s28 + $0x8] sm:$0xff] }
 0x426   : > { %4568 = vmatpush.msk.msra.mxu0 %vm6564_vm6, %v3700_v33  ;;  %v3978_v7 = vld [vmem:[%s3977_s28] sm:$0xff]  ;;  %v3980_v8 = vld [vmem:[%s3977_s28 + $0x10] sm:$0xff]  ;;  %v3981_v20 = vld [vmem:[%s3977_s28 + $0x18] sm:$0xff]  ;;  %3990 = vst [vmem:[#allocation1 + $0x10] ss:$2 sm:$0xff] %v3979_v17  ;;  %v3794_v28 = vand.u32 127, %v3793_v15 }
 0x427   : > { %4569 = vmatmul.msk.f32.vlgmr.msra.gmra.mxu0 %vm6565_vm11, %v3701_v22  ;;  %3988 = vst [vmem:[#allocation1] ss:$2 sm:$0xff] %v3978_v7  ;;  %v3982_v18 = vld [vmem:[%s3977_s28 + $0x20] sm:$0xff] }
 0x428   : > { %3992 = vst [vmem:[#allocation1 + $0x20] ss:$2 sm:$0xff] %v3980_v8  ;;  %v3795_v52 = vadd.s32 128, %v3794_v28  ;;  %v3796_v32 = vadd.s32 256, %v3794_v28  ;;  %v3797_v48 = vadd.s32 384, %v3794_v28  ;;  %v3798_v43 = vadd.s32 512, %v3794_v28 }
 0x429   : > { %3994 = vst [vmem:[#allocation1 + $0x30] ss:$2 sm:$0xff] %v3981_v20  ;;  %v3799_v6 = vadd.s32 640, %v3794_v28  ;;  %v3800_v21 = vadd.s32 768, %v3794_v28  ;;  %v3801_v26 = vadd.s32 896, %v3794_v28  ;;  %v3802_v36 = vadd.s32 1024, %v3794_v28 }
 0x42a   : > { %v3803_v49 = vadd.s32 1152, %v3794_v28  ;;  %v3805_v34 = vadd.s32 %v3804_v24, %v3794_v28  ;;  %v3806_v45 = vadd.s32 %v3804_v24, %v3795_v52  ;;  %v3807_v44 = vadd.s32 %v3804_v24, %v3796_v32 }
 0x42b   : > { %v3808_v50 = vadd.s32 %v3804_v24, %v3797_v48  ;;  %v3809_v47 = vadd.s32 %v3804_v24, %v3798_v43  ;;  %v3810_v33 = vadd.s32 %v3804_v24, %v3799_v6  ;;  %v3811_v46 = vadd.s32 %v3804_v24, %v3800_v21 }
 0x42c   : > { %v6358_v22 = vadd.s32 %v3804_v24, %v3801_v26  ;;  %v6360_v39 = vadd.s32 %v3804_v24, %v3802_v36  ;;  %vm6567_vm3 = vcmp.ge.s32.totalorder %v3805_v34, 1280  ;;  %vm6570_vm11 = vcmp.ge.s32.totalorder %v3806_v45, 1280 }
 0x42d   : > { %3743 = vperm.xlu0 %4652, %v3740_v58   ;;  %v6362_v58 = vadd.s32 %v3804_v24, %v3803_v49  ;;  %vm3831_vm6 = vcmp.lt.s32.totalorder %v3811_v46, 2436 }
 0x42e   : > { %v6354_v29 = vld.sshfl [vmem:[#allocation1] sm:$0xff pattern:$0x75316420]  ;;  %v6356_v38 = vld.sshfl [vmem:[#allocation1 + $0x8] sm:$0xff pattern:$0x75316420] }
 0x42f   : > { %4003 = vst [vmem:[#allocation1] ss:$2 sm:$0xff] %v3982_v18  ;;  %vm3832_vm7 = vcmp.lt.s32.totalorder %v6358_v22, 2436  ;;  %vm3833_vm0 = vcmp.lt.s32.totalorder %v6360_v39, 2436  ;;  %vm3834_vm8 = vcmp.lt.s32.totalorder %v6362_v58, 2436 }
 0x435   : > { %4655 = vset.pattern.permute.xlu0 %v4712_v60 }
 0x497   : > { %v3706_v9 = vpop.permute.xlu0 %3705 }
 0x498   : > { %v3708_v56 = vperm.slane %v3706_v9, 0  ;;  %v6568_v9 = vmov 0 }
 0x49f   : > { %v3744_v2 = vpop.permute.xlu0 %3743 }
 0x4a4   : > { %v3733_v19 = vpop.f32.mrf.mxu0 }
 0x4a5   : > { %v3734_v27 = vadd.f32 %v3733_v19, %v3708_v56  ;;  %v6571_v56 = vmov 0  ;;  %v6574_v19 = vmov 0 }
 0x4a7   : > { %vm3736_vm9 = vcmp.ge.f32.partialorder %v3734_v27, 0.0  ;;  %v3737_v55 = vmul.f32 0.2, %v3734_v27 }
 0x4a9   : > { %v3738_v1 = vsel %vm3736_vm9, %v3734_v27, %v3737_v55  ;;  %vm3825_vm9 = vcmp.lt.s32.totalorder %v3805_v34, 2436  ;;  %v6577_v27 = vmov 0  ;;  %v6580_v55 = vmov 0 }
 0x4aa   : > { %4570 = vmatpush.msk.msra.mxu1 %vm3750_vm10, %v3738_v1  ;;  %vm3826_vm10 = vcmp.lt.s32.totalorder %v3806_v45, 2436  ;;  %vm6371_vm5 = vmand %vm6567_vm3, %vm3825_vm9  ;;  %vm6576_vm3 = vcmp.ge.s32.totalorder %v3808_v50, 1280  ;;  %v6586_v1 = vmov 0 }
 0x4ab   : > { %4571 = vmatmul.msk.f32.vlgmr.msra.gmra.mxu1 %vm6566_vm14, %v3739_v0  ;;  %vm3827_vm14 = vcmp.lt.s32.totalorder %v3807_v44, 2436  ;;  %v6569_v9 = vsel %vm6371_vm5, 4294967295, %v6568_v9  ;;  %vm6376_vm1 = vmand %vm6570_vm11, %vm3826_vm10  ;;  %vm6579_vm5 = vcmp.ge.s32.totalorder %v3809_v47, 1280  ;;  %vm6582_vm11 = vcmp.ge.s32.totalorder %v3810_v33, 1280 }
 0x4ac   : > { %v6572_v56 = vsel %vm6376_vm1, 4294967295, %v6571_v56  ;;  %v6583_v0 = vmov 0 }
 0x528   : > { %v3771_v3 = vpop.f32.mrf.mxu1 }
 0x529   : > { %v3772_v30 = vadd.f32 %v3771_v3, %v3744_v2  ;;  %v6589_v2 = vmov 0  ;;  %v6592_v3 = vmov 0 }
 0x52b   : > { %v3774_v62 = vsub.f32 0.0, %v3772_v30  ;;  %v6595_v30 = vmov 0 }
 0x52d   : > { %v3775_v5 = vmul.f32 1.442695, %v3774_v62 }
 0x52f   : > { %4656 = vpow2.f32 %v3775_v5  ;;  %v6601_v5 = vmov 0 }
 0x535   : > { %v4657_v35 = vpop.eup %4656 }
 0x536   : > { %v3777_v61 = vadd.f32 1.0, %v4657_v35  ;;  %v6603_v35 = vmov 0 }
 0x538   : > { %4658 = vrcp.f32 %v3777_v61  ;;  %v3789_v16 = vand.u32 2147483648, %v3777_v61  ;;  %v3787_v41 = vand.u32 2147483647, %v3777_v61  ;;  %vm3783_vm13 = vweird.f32 %v3777_v61 }
 0x53a   : > { %v3790_v4 = vor.u32 1.1754944e-38, %v3789_v16  ;;  %vm3788_vm2 = vcmp.eq.f32.partialorder %v3787_v41, 8.507059e+37  ;;  %v4713_v16 = vmov 0.0  }
 0x53e   : > { %v4659_v23 = vpop.eup %4658 }
 0x53f   : > { %v3779_v63 = vmul.f32 %v4659_v23, %v3777_v61  ;;  %vm3784_vm12 = vweird.f32 %v4659_v23  ;;  %v6605_v61 = vmov 0 }
 0x540   : > { %vm3785_vm15 = vmor %vm3783_vm13, %vm3784_vm12  ;;  %vm3828_vm12 = vcmp.lt.s32.totalorder %v3808_v50, 2436  ;;  %vm3829_vm13 = vcmp.lt.s32.totalorder %v3809_v47, 2436 }
 0x541   : > { %v3780_v11 = vsub.f32 1.0, %v3779_v63  ;;  %vm6386_vm9 = vmand %vm6576_vm3, %vm3828_vm12  ;;  %vm6588_vm12 = vcmp.ge.s32.totalorder %v6358_v22, 1280 }
 0x542   : > { %v6578_v27 = vsel %vm6386_vm9, 4294967295, %v6577_v27  ;;  %vm6391_vm10 = vmand %vm6579_vm5, %vm3829_vm13  ;;  %vm6591_vm5 = vcmp.ge.s32.totalorder %v6360_v39, 1280 }
 0x543   : > { %v3781_v12 = vmul.f32 %v4659_v23, %v3780_v11  ;;  %v6581_v55 = vsel %vm6391_vm10, 4294967295, %v6580_v55  ;;  %vm6407_vm9 = vmand %vm6588_vm12, %vm3832_vm7  ;;  %vm3893_vm7 = vcmp.ge.s32.totalorder %v3808_v50, 2436  ;;  %vm3903_vm12 = vcmp.lt.s32.totalorder %v3808_v50, 3592  ;;  %v3997_v11 = vld.sshfl [vmem:[#allocation1 + $0x10] sm:$0xff pattern:$0x75316420] }
 0x544   : > { %v6590_v2 = vsel %vm6407_vm9, 4294967295, %v6589_v2  ;;  %vm6413_vm13 = vmand %vm6591_vm5, %vm3833_vm0  ;;  %vm3894_vm0 = vcmp.ge.s32.totalorder %v3809_v47, 2436  ;;  %vm3904_vm5 = vcmp.lt.s32.totalorder %v3809_v47, 3592 }
 0x545   : > { %v3782_v13 = vadd.f32 %v4659_v23, %v3781_v12  ;;  %v6593_v3 = vsel %vm6413_vm13, 4294967295, %v6592_v3  ;;  %vm3895_vm13 = vcmp.ge.s32.totalorder %v3810_v33, 2436 }
 0x547   : > { %v3786_v14 = vsel %vm3785_vm15, %v4659_v23, %v3782_v13  ;;  %vm3830_vm15 = vcmp.lt.s32.totalorder %v3810_v33, 2436  ;;  %v3998_v13 = vld.sshfl [vmem:[#allocation1 + $0x18] sm:$0xff pattern:$0x75316420] }
 0x548   : > { %v3791_v59 = vsel %vm3788_vm2, %v3790_v4, %v3786_v14  ;;  %vm6573_vm2 = vcmp.ge.s32.totalorder %v3807_v44, 1280  ;;  %vm6396_vm1 = vmand %vm6582_vm11, %vm3830_vm15  ;;  %vm3891_vm15 = vcmp.ge.s32.totalorder %v3806_v45, 2436  ;;  %vm3901_vm11 = vcmp.lt.s32.totalorder %v3806_v45, 3592 }
 0x549   : > { %3867 = vperm.xlu1 %4653, %v3791_v59   ;;  %vm6381_vm4 = vmand %vm6573_vm2, %vm3827_vm14  ;;  %v6584_v0 = vsel %vm6396_vm1, 4294967295, %v6583_v0  ;;  %vm3890_vm2 = vcmp.ge.s32.totalorder %v3805_v34, 2436  ;;  %vm3900_vm14 = vcmp.lt.s32.totalorder %v3805_v34, 3592  ;;  %vm6594_vm1 = vcmp.ge.s32.totalorder %v6362_v58, 1280 }
 0x54a   : > { %v6575_v19 = vsel %vm6381_vm4, 4294967295, %v6574_v19  ;;  %vm6585_vm4 = vcmp.ge.s32.totalorder %v3811_v46, 1280  ;;  %vm6423_vm10 = vmand %vm3890_vm2, %vm3900_vm14  ;;  %vm3906_vm2 = vcmp.lt.s32.totalorder %v3811_v46, 3592 }
 0x54b   : > { %vm6401_vm3 = vmand %vm6585_vm4, %vm3831_vm6  ;;  %vm3892_vm4 = vcmp.ge.s32.totalorder %v3807_v44, 2436 }
 0x54c   : > { %v6587_v1 = vsel %vm6401_vm3, 4294967295, %v6586_v1  ;;  %vm6419_vm6 = vmand %vm6594_vm1, %vm3834_vm8  ;;  %vm3902_vm3 = vcmp.lt.s32.totalorder %v3807_v44, 3592  ;;  %vm3905_vm1 = vcmp.lt.s32.totalorder %v3810_v33, 3592 }
 0x54d   : > { %v6596_v30 = vsel %vm6419_vm6, 4294967295, %v6595_v30  ;;  %vm6427_vm9 = vmand %vm3891_vm15, %vm3901_vm11  ;;  %vm3896_vm6 = vcmp.ge.s32.totalorder %v3811_v46, 2436  ;;  %vm3907_vm11 = vcmp.lt.s32.totalorder %v6358_v22, 3592 }
 0x54e   : > { %vm6431_vm8 = vmand %vm3892_vm4, %vm3902_vm3  ;;  %vm3898_vm3 = vcmp.ge.s32.totalorder %v6360_v39, 2436  ;;  %vm3908_vm4 = vcmp.lt.s32.totalorder %v6360_v39, 3592  ;;  %v4583_v32 = vsel %vm6427_vm9, 1.0, %v4713_v16  ;;  %vm6629_vm9 = vcmask 1043456  }
 0x54f   : > { %v6602_v5 = vsel %vm6431_vm8, 4294967295, %v6601_v5  ;;  %vm6435_vm14 = vmand %vm3893_vm7, %vm3903_vm12  ;;  %vm3899_vm7 = vcmp.ge.s32.totalorder %v6362_v58, 2436  ;;  %vm3909_vm12 = vcmp.lt.s32.totalorder %v6362_v58, 3592 }
 0x550   : > { %v6604_v35 = vsel %vm6435_vm14, 4294967295, %v6603_v35  ;;  %vm6441_vm15 = vmand %vm3894_vm0, %vm3904_vm5  ;;  %vm6611_vm0 = vnez %v6569_v9  ;;  %vm6612_vm5 = vnez %v6572_v56 }
 0x551   : > { %4654 = vset.pattern.permute.xlu1 %v4712_v60  ;;  %v6597_v60 = vmov 0  ;;  %v6606_v61 = vsel %vm6441_vm15, 4294967295, %v6605_v61  ;;  %vm6447_vm8 = vmand %vm3895_vm13, %vm3905_vm1  ;;  %v4572_v12 = vsel %vm6611_vm0, 1.0, %v4713_v16  ;;  %v4573_v41 = vsel %vm6612_vm5, 1.0, %v4713_v16 }
 0x552   : > { %3941 = vperm.xlu1 %4654, %v3791_v59   ;;  %v6598_v60 = vsel %vm6423_vm10, 4294967295, %v6597_v60  ;;  %vm3897_vm10 = vcmp.ge.s32.totalorder %v6358_v22, 2436  ;;  %vm6453_vm14 = vmand %vm3896_vm6, %vm3906_vm2  ;;  %vm6615_vm13 = vnez %v6575_v19  ;;  %vm6616_vm1 = vnez %v6578_v27 }
 0x553   : > { %vm6461_vm15 = vmand %vm3897_vm10, %vm3907_vm11  ;;  %v4574_v4 = vsel %vm6615_vm13, 1.0, %v4713_v16  ;;  %v4575_v14 = vsel %vm6616_vm1, 1.0, %v4713_v16  ;;  %vm6617_vm6 = vnez %v6581_v55  ;;  %vm6618_vm2 = vnez %v6584_v0 }
 0x554   : > { %v4576_v59 = vsel %vm6617_vm6, 1.0, %v4713_v16  ;;  %v4577_v7 = vsel %vm6618_vm2, 1.0, %v4713_v16  ;;  %vm6473_vm0 = vmand %vm3898_vm3, %vm3908_vm4  ;;  %vm6621_vm10 = vnez %v6587_v1  ;;  %vm6622_vm11 = vnez %v6590_v2 }
 0x555   : > { %v4578_v17 = vsel %vm6621_vm10, 1.0, %v4713_v16  ;;  %v4579_v8 = vsel %vm6622_vm11, 1.0, %v4713_v16  ;;  %vm6623_vm5 = vnez %v6593_v3  ;;  %vm6624_vm13 = vnez %v6596_v30  ;;  %vm3919_vm3 = vmand %vm3899_vm7, %vm3909_vm12 }
 0x556   : > { %v4580_v20 = vsel %vm6623_vm5, 1.0, %v4713_v16  ;;  %v4581_v28 = vsel %vm6624_vm13, 1.0, %v4713_v16  ;;  %vm6625_vm4 = vnez %v6598_v60  ;;  %vm6626_vm1 = vnez %v6602_v5 }
 0x557   : > { %v4582_v52 = vsel %vm6625_vm4, 1.0, %v4713_v16  ;;  %v4584_v18 = vsel %vm6626_vm1, 1.0, %v4713_v16  ;;  %vm6627_vm6 = vnez %v6604_v35  ;;  %vm6628_vm2 = vnez %v6606_v61 }
 0x558   : > { %v4585_v48 = vsel %vm6627_vm6, 1.0, %v4713_v16  ;;  %v4586_v43 = vsel %vm6628_vm2, 1.0, %v4713_v16  ;;  %v4587_v6 = vsel %vm6447_vm8, 1.0, %v4713_v16  ;;  %v4588_v24 = vsel %vm6453_vm14, 1.0, %v4713_v16  ;;  %vm6630_vm8 = vmmov %vm6629_vm9 }
 0x559   : > { %v4589_v21 = vsel %vm6461_vm15, 1.0, %v4713_v16  ;;  %v4590_v49 = vsel %vm6473_vm0, 1.0, %v4713_v16  ;;  %v4591_v34 = vsel %vm3919_vm3, 1.0, %v4713_v16  ;;  %vm6631_vm14 = vmmov %vm6630_vm8 }
 0x55a   : > { %vm6632_vm15 = vmmov %vm6630_vm8 }
 0x55b   : > { %vm6633_vm7 = vmmov %vm6630_vm8 }
 0x5bb   : > { %v3868_v23 = vpop.permute.xlu1 %3867 }
 0x5bc   : > { %v3870_v26 = vmul.f32 %v4572_v12, %v3868_v23  ;;  %v3871_v36 = vmul.f32 %v4573_v41, %v3868_v23  ;;  %v3872_v45 = vmul.f32 %v4574_v4, %v3868_v23  ;;  %v3873_v44 = vmul.f32 %v4575_v14, %v3868_v23  ;;  %v4000_v4 = vld.sshfl [vmem:[#allocation1 + $0x28] sm:$0xff pattern:$0x75316420] }
 0x5bd   : > { %v3874_v50 = vmul.f32 %v4576_v59, %v3868_v23  ;;  %v3875_v47 = vmul.f32 %v4577_v7, %v3868_v23  ;;  %v3876_v33 = vmul.f32 %v4578_v17, %v3868_v23  ;;  %v3877_v46 = vmul.f32 %v4579_v8, %v3868_v23  ;;  %v4002_v17 = vld.sshfl [vmem:[#allocation1 + $0x38] sm:$0xff pattern:$0x75316420]  ;;  %v4005_v8 = vld.sshfl [vmem:[#allocation1 + $0x8] sm:$0xff pattern:$0x75316420] }
 0x5be   : > { %v3878_v22 = vmul.f32 %v4580_v20, %v3868_v23  ;;  %v3879_v39 = vmul.f32 %v4581_v28, %v3868_v23 }
 0x5c4   : > { %v3942_v58 = vpop.permute.xlu1 %3941 }
 0x5c5   : > { %v3944_v9 = vmul.f32 %v4582_v52, %v3942_v58  ;;  %v3945_v56 = vmul.f32 %v4583_v32, %v3942_v58  ;;  %v3946_v19 = vmul.f32 %v4584_v18, %v3942_v58  ;;  %v3947_v27 = vmul.f32 %v4585_v48, %v3942_v58  ;;  %v3999_v32 = vld.sshfl [vmem:[#allocation1 + $0x20] sm:$0xff pattern:$0x75316420] }
 0x5c6   : > { %v3948_v55 = vmul.f32 %v4586_v43, %v3942_v58  ;;  %v3949_v0 = vmul.f32 %v4587_v6, %v3942_v58  ;;  %v3950_v1 = vmul.f32 %v4588_v24, %v3942_v58  ;;  %v3951_v2 = vmul.f32 %v4589_v21, %v3942_v58  ;;  %v4004_v6 = vld.sshfl [vmem:[#allocation1] sm:$0xff pattern:$0x75316420] }
 0x5c7   : > { %v3952_v3 = vmul.f32 %v4590_v49, %v3942_v58  ;;  %v3953_v30 = vmul.f32 %v4591_v34, %v3942_v58  ;;  %v3954_v60 = vadd.f32 %v3944_v9, %v3870_v26  ;;  %v3955_v62 = vadd.f32 %v3945_v56, %v3871_v36 }
 0x5c8   : > { %v3956_v5 = vadd.f32 %v3946_v19, %v3872_v45  ;;  %v3957_v35 = vadd.f32 %v3947_v27, %v3873_v44  ;;  %v3958_v61 = vadd.f32 %v3948_v55, %v3874_v50  ;;  %v3959_v63 = vadd.f32 %v3949_v0, %v3875_v47 }
 0x5c9   : > { %v3960_v16 = vadd.f32 %v3950_v1, %v3876_v33  ;;  %v3961_v23 = vadd.f32 %v3951_v2, %v3877_v46  ;;  %v3962_v12 = vadd.f32 %v3952_v3, %v3878_v22  ;;  %v3963_v41 = vadd.f32 %v3953_v30, %v3879_v39 }
 0x5ca   : > { %v3964_v14 = vmul.f32 %v3954_v60, %v5545_v25  ;;  %v3965_v59 = vmul.f32 %v3955_v62, %v5547_v42  ;;  %v3966_v7 = vmul.f32 %v3956_v5, %v5550_v31  ;;  %v3967_v15 = vmul.f32 %v3957_v35, %v5552_v37  ;;  %v4001_v42 = vld.sshfl [vmem:[#allocation1 + $0x30] sm:$0xff pattern:$0x75316420] }
 0x5cb   : > { %v3968_v20 = vmul.f32 %v3958_v61, %v5560_v57  ;;  %v3969_v28 = vmul.f32 %v3959_v63, %v5562_v53  ;;  %v3971_v52 = vmul.f32 %v3961_v23, %v5568_v54  ;;  %v3970_v18 = vmul.f32 %v3960_v16, %v5566_v51 }
 0x5cc   : > { %v3973_v48 = vmul.f32 %v3963_v41, %v5579_v40  ;;  %v4017_v25 = vadd.f32 %v6356_v38, %v3965_v59  ;;  %v3972_v31 = vmul.f32 %v3962_v12, %v5577_v10  ;;  %v4019_v43 = vadd.f32 %v3998_v13, %v3967_v15 }
 0x5cd   : > { %v4021_v37 = vadd.f32 %v4000_v4, %v3969_v28  ;;  %v4016_v24 = vadd.f32 %v6354_v29, %v3964_v14  ;;  %v4018_v57 = vadd.f32 %v3997_v11, %v3966_v7  ;;  %v4023_v53 = vadd.f32 %v4002_v17, %v3971_v52 }
 0x5ce   : > { %v4025_v54 = vadd.f32 %v4005_v8, %v3973_v48  ;;  %v4020_v21 = vadd.f32 %v3999_v32, %v3968_v20  ;;  %v4036_v51 = vrot.slane %v4017_v25, 4  ;;  %v4037_v40 = vrot.slane %v4019_v43, 4 }
 0x5cf   : > { %v4038_v38 = vrot.slane %v4021_v37, 4  ;;  %v4022_v26 = vadd.f32 %v4001_v42, %v3970_v18  ;;  %v4039_v36 = vrot.slane %v4023_v53, 4  ;;  %v4024_v49 = vadd.f32 %v4004_v6, %v3972_v31 }
 0x5d0   : > { %v4040_v10 = vrot.slane %v4025_v54, 4  ;;  %v4041_v34 = vsel %vm6629_vm9, %v4016_v24, %v4036_v51  ;;  %v4042_v29 = vsel %vm6630_vm8, %v4018_v57, %v4037_v40 }
 0x5d1   : > { %v4043_v45 = vsel %vm6631_vm14, %v4020_v21, %v4038_v38  ;;  %v4044_v44 = vsel %vm6632_vm15, %v4022_v26, %v4039_v36  ;;  %4051 = vst [vmem:[%s4812_s22] sm:$0xff] %v4041_v34 }
 0x5d2   : > { %v4045_v50 = vsel %vm6633_vm7, %v4024_v49, %v4040_v10  ;;  %4052 = vst [vmem:[%s4812_s22 + $0x8] sm:$0xff] %v4042_v29 }
 0x5d3   : > { %4053 = vst [vmem:[%s4812_s22 + $0x10] sm:$0xff] %v4043_v45 }
 0x5d4   : > { %4054 = vst [vmem:[%s4812_s22 + $0x18] sm:$0xff] %v4044_v44 }
 0x5d5   : > { %4055 = vst [vmem:[%s4812_s22 + $0x20] sm:$0xff] %v4045_v50 }
 0x5d6 PF: > { %p4056_p1 = scmp.eq.s32.totalorder %s4682_s29, 3  ;;  %p4058_p2 = scmp.eq.s32.totalorder %s4686_s30, 1 }
 0x5d8   : > { %p4057_p3 = por %p4056_p1, %p327_p6 }
 0x5da   : > { %p4059_p4 = pnand %p4058_p2, %p4057_p3 }
 0x5dc   : > { %4062 = sbr.rel (%p4059_p4) target bundleno = 1511 (0x5e7), region = 72 }
 0x5e1   : > { %v4714_v47 = vmov 0.0  }
 0x5e2   : > { %4063 = vst [vmem:[%s4812_s22] sm:$0xff] %v4714_v47 }
 0x5e3   : > { %4064 = vst [vmem:[%s4812_s22 + $0x8] sm:$0xff] %v4714_v47 }
 0x5e4   : > { %4065 = vst [vmem:[%s4812_s22 + $0x10] sm:$0xff] %v4714_v47 }
 0x5e5   : > { %4066 = vst [vmem:[%s4812_s22 + $0x18] sm:$0xff] %v4714_v47 }
 0x5e6   : > { %4067 = vst [vmem:[%s4812_s22 + $0x20] sm:$0xff] %v4714_v47 }
 0x5e7 PF: > { %s20_s11 = sadd.s32 1, %s4698_s11   ;;  %s6634_s29 = smov %s4690_s9 }
 0x5e8   : > { %p17_p5 = scmp.ge.s32.totalorder %s20_s11, 10   ;;  %s6635_s30 = smov %s4694_s10 }
 0x5e9   : > { %s6636_s9 = smov %s6639_s4  ;;  %s6637_s10 = smov %s6643_s12 }
 0x5ea   :  { %19 = sbr.rel (!%p17_p5) target bundleno = 3 (0x3), region = 118 }

</bundles_post_ra>
